<compile_context>
chip_gen: v7x
topology: tpu7x:2x2x1
jax: 0.10.0
libtpu: 0.0.40
codegen_flags: <defaults>
</compile_context>

<pallas_src>
import functools

import numpy as np
import jax
import jax.numpy as jnp
from jax.experimental import pallas as pl
from jax.experimental.pallas import tpu as pltpu

MXU_DTYPE = jnp.bfloat16          # MXU input dtype
ACT_DTYPE = jnp.bfloat16          # inter-layer activation storage dtype
LANE = 128
VMEM_CAP = 64 * 1024 * 1024       # v7x per-TC VMEM (safe on v5e/v6e too)


def _round_up(x, m):
    return (x + m - 1) // m * m


def _round128(c):
    return _round_up(max(int(c), 1), LANE)


def _cpad(x, width):
    """Zero-pad the channel (last) dim to `width`."""
    c = x.shape[-1]
    if c == width:
        return x
    pad = [(0, 0)] * (x.ndim - 1) + [(0, width - c)]
    return jnp.pad(x, pad)


def _pick_th(Ho, Wo):
    """Row-tile for the 3x3 conv: divisor of Ho, (th*Wo) % 8 == 0, >= 2 tiles if possible."""
    target = max(1, min(max(Ho // 2, 1), max(1, 1024 // max(1, Wo))))
    best = None
    for d in range(1, Ho + 1):
        if Ho % d == 0 and d <= target and (d * Wo) % 8 == 0:
            best = d
    if best is None:
        best = Ho          # single full tile; block equals the full dim -> always legal
    return best


def _pick_tm(M, cap=1024):
    """M-tile for the 1x1 matmuls: multiple-of-8 divisor of M aiming for >= 4 tiles."""
    if M <= 8:
        return M
    target = min(cap, max(8, _round_up((M + 3) // 4, 8)))
    best = 0
    t = 8
    while t <= min(target, M):
        if M % t == 0:
            best = t
        t += 8
    if best:
        return best
    return min(target, _round_up(M, 8))   # rare fallback -> ragged M gets zero-padded


# ----------------------------------------------------------------------------
# Fused direct 3x3 conv kernel: 9 tap matmuls + bias + (PReLU) + (residual add)
# ----------------------------------------------------------------------------
def _conv3x3_kernel(*refs, th, wo, stride, cin, cout, has_act, has_res):
    x_ref, w_ref, b_ref = refs[0], refs[1], refs[2]
    idx = 3
    a_ref = None
    res_ref = None
    if has_act:
        a_ref = refs[idx]
        idx += 1
    if has_res:
        res_ref = refs[idx]
        idx += 1
    o_ref = refs[idx]

    i = pl.program_id(1)
    extra = 2 if stride == 1 else 1
    # Row window for this tile (contiguous rows; all tap views are static slices of it).
    win = x_ref[0, pl.ds(i * th, th + extra), :, :]          # (th+extra, WW, CC)

    acc = None
    for di in range(3):
        for dj in range(3):
            if stride == 1:
                roff, coff, choff = di, dj, 0
            else:
                roff, coff = di // 2, dj // 2
                choff = ((di % 2) * 2 + (dj % 2)) * cin
            v = win[roff:roff + th, coff:coff + wo, choff:choff + cin]   # (th, wo, cin)
            v2 = v.reshape(th * wo, cin)
            w_blk = w_ref[pl.ds((di * 3 + dj) * cin, cin), :]            # (cin, cout)
            d = jnp.dot(v2, w_blk, preferred_element_type=jnp.float32)
            acc = d if acc is None else acc + d

    acc = acc + b_ref[...]                                   # (1, cout) broadcast, f32
    if has_act:
        alpha = a_ref[0, 0]
        acc = jnp.where(acc >= 0.0, acc, alpha * acc)        # PReLU
    if has_res:
        acc = acc + res_ref[0].astype(jnp.float32)           # fused residual add
    o_ref[...] = acc[None].astype(o_ref.dtype)               # lane-dense store


def conv3x3(x, p, stride=1, alpha=None, residual=None, out_dtype=ACT_DTYPE):
    """3x3 conv (padding=1, stride 1 or 2) with fused bias + PReLU + residual add.

    x:        (N, H, W, Cin_pad) channel-padded activation (bf16/f32).
    p["w_mat"]: (9*Cin_pad, Cout_pad) bf16, p["b"]: (1, Cout_pad) f32.
    residual: optional (N, Ho, Wo, Cout_pad) tensor added after the activation.
    """
    N, H, W, cin = x.shape
    w_mat, b = p["w_mat"], p["b"]
    cout_p = int(w_mat.shape[1])
    assert int(w_mat.shape[0]) == 9 * cin, (w_mat.shape, cin)

    x = x.astype(MXU_DTYPE)
    xp = jnp.pad(x, ((0, 0), (1, 1), (1, 1), (0, 0)))        # spatial pad = 1

    if stride == 1:
        Ho, Wo = H, W
        xin = xp                                             # (N, H+2, W+2, cin)
    else:
        assert H % 2 == 0 and W % 2 == 0, "stride-2 conv requires even H/W"
        Ho, Wo = H // 2, W // 2
        Hq, Wq = (H + 2) // 2, (W + 2) // 2
        # space-to-depth of the padded input: channel group (pi*2+pj)*cin holds parity (pi,pj)
        xin = xp.reshape(N, Hq, 2, Wq, 2, cin)
        xin = jnp.transpose(xin, (0, 1, 3, 2, 4, 5)).reshape(N, Hq, Wq, 4 * cin)

    th = _pick_th(Ho, Wo)
    T = Ho // th
    grid = (N, T)
    HH, WW, CC = int(xin.shape[1]), int(xin.shape[2]), int(xin.shape[3])

    in_specs = [
        pl.BlockSpec((1, HH, WW, CC), lambda n, i: (n, 0, 0, 0)),   # whole image / item
        pl.BlockSpec((9 * cin, cout_p), lambda n, i: (0, 0)),       # weights (resident)
        pl.BlockSpec((1, cout_p), lambda n, i: (0, 0)),             # bias
    ]
    args = [xin, w_mat, b]

    has_act = alpha is not None
    if has_act:
        in_specs.append(pl.BlockSpec(memory_space=pltpu.MemorySpace.SMEM))
        args.append(jnp.reshape(alpha, (1, 1)).astype(jnp.float32))

    has_res = residual is not None
    if has_res:
        assert residual.shape == (N, Ho, Wo, cout_p), (residual.shape, (N, Ho, Wo, cout_p))
        res_flat = residual.reshape(N, Ho * Wo, cout_p)
        in_specs.append(pl.BlockSpec((1, th * Wo, cout_p), lambda n, i: (n, i, 0)))
        args.append(res_flat)

    out_specs = pl.BlockSpec((1, th * Wo, cout_p), lambda n, i: (n, i, 0))

    # VMEM budget from actual block sizes (double-buffered) + in-kernel temporaries.
    out_isz = jnp.dtype(out_dtype).itemsize
    blk_bytes = (HH * WW * CC * 2 + 9 * cin * cout_p * 2 + cout_p * 4
                 + th * Wo * cout_p * out_isz
                 + (th * Wo * cout_p * residual.dtype.itemsize if has_res else 0))
    tmp_bytes = (th + 2) * WW * CC * 2 + th * Wo * (cout_p * 8 + cin * 4)
    vmem_limit = int(min(max(2 * blk_bytes + tmp_bytes + (2 << 20), 32 << 20), VMEM_CAP))

    flops = int(2 * N * Ho * Wo * 9 * cin * cout_p)
    bytes_accessed = int(N * (HH * WW * CC * 2 + Ho * Wo * cout_p * out_isz)
                         + 9 * cin * cout_p * 2)

    kernel = functools.partial(_conv3x3_kernel, th=th, wo=Wo, stride=stride,
                               cin=cin, cout=cout_p, has_act=has_act, has_res=has_res)
    out = pl.pallas_call(
        kernel,
        out_shape=jax.ShapeDtypeStruct((N, Ho * Wo, cout_p), out_dtype),
        grid=grid,
        in_specs=in_specs,
        out_specs=out_specs,
        compiler_params=pltpu.CompilerParams(
            dimension_semantics=("parallel", "parallel"),
            vmem_limit_bytes=vmem_limit),
        cost_estimate=pl.CostEstimate(flops=flops, transcendentals=0,
                                      bytes_accessed=bytes_accessed),
    )(*args)
    return out.reshape(N, Ho, Wo, cout_p)


# ----------------------------------------------------------------------------
# Fused multi-part matmul kernel (channel-concat + 1x1 conv + bias + optional PReLU)
# ----------------------------------------------------------------------------
def _matmul_kernel(*refs, n_parts, has_act):
    xs = refs[:n_parts]
    ws = refs[n_parts:2 * n_parts]
    b_ref = refs[2 * n_parts]
    a_ref = refs[2 * n_parts + 1] if has_act else None
    o_ref = refs[-1]

    acc = jnp.dot(xs[0][...], ws[0][...], preferred_element_type=jnp.float32)
    for x_ref, w_ref in zip(xs[1:], ws[1:]):
        acc = acc + jnp.dot(x_ref[...], w_ref[...], preferred_element_type=jnp.float32)
    acc = acc + b_ref[...]
    if has_act:
        alpha = a_ref[0, 0]
        acc = jnp.where(acc >= 0.0, acc, alpha * acc)
    o_ref[...] = acc.astype(o_ref.dtype)


def _fused_matmul(x_parts, w_parts, b2, alpha, out_dtype=ACT_DTYPE):
    """sum_i x_i @ w_i + bias (+ PReLU); x_i: (M, K_i), w_i: (K_i, Cout_pad). M-tiled."""
    M = int(x_parts[0].shape[0])
    cout_p = int(w_parts[0].shape[1])
    tm = _pick_tm(M)
    M_pad = _round_up(M, tm)
    grid = (M_pad // tm,)

    xs = []
    for xp_ in x_parts:
        xp_ = xp_.astype(MXU_DTYPE)
        if M_pad != M:
            xp_ = jnp.pad(xp_, ((0, M_pad - M), (0, 0)))
        xs.append(xp_)
    ws = [w.astype(MXU_DTYPE) for w in w_parts]
    has_act = alpha is not None

    in_specs = [pl.BlockSpec((tm, int(t.shape[1])), lambda i: (i, 0)) for t in xs]
    in_specs += [pl.BlockSpec((int(w.shape[0]), cout_p), lambda i: (0, 0)) for w in ws]
    in_specs.append(pl.BlockSpec((1, cout_p), lambda i: (0, 0)))
    args = xs + ws + [b2.astype(jnp.float32).reshape(1, cout_p)]
    if has_act:
        in_specs.append(pl.BlockSpec(memory_space=pltpu.MemorySpace.SMEM))
        args.append(jnp.reshape(alpha, (1, 1)).astype(jnp.float32))

    out_isz = jnp.dtype(out_dtype).itemsize
    k_total = sum(int(t.shape[1]) for t in xs)
    blk_bytes = (sum(tm * int(t.shape[1]) * 2 for t in xs)
                 + sum(int(w.size) * 2 for w in ws)
                 + cout_p * 4 + tm * cout_p * out_isz)
    vmem_limit = int(min(max(2 * blk_bytes + tm * cout_p * 4 + (2 << 20), 32 << 20), VMEM_CAP))
    flops = int(2 * M_pad * k_total * cout_p)
    bytes_accessed = int(sum(int(t.size) * 2 for t in xs) + sum(int(w.size) * 2 for w in ws)
                         + M_pad * cout_p * out_isz)

    out = pl.pallas_call(
        functools.partial(_matmul_kernel, n_parts=len(xs), has_act=has_act),
        out_shape=jax.ShapeDtypeStruct((M_pad, cout_p), out_dtype),
        grid=grid,
        in_specs=in_specs,
        out_specs=pl.BlockSpec((tm, cout_p), lambda i: (i, 0)),
        compiler_params=pltpu.CompilerParams(
            dimension_semantics=("parallel",),
            vmem_limit_bytes=vmem_limit),
        cost_estimate=pl.CostEstimate(flops=flops, transcendentals=0,
                                      bytes_accessed=bytes_accessed),
    )(*args)
    return out if M_pad == M else out[:M]


def conv1x1(parts, p, alpha=None, out_dtype=ACT_DTYPE):
    """Fused channel-concat + 1x1 conv.  parts: list of (tensor, true_channels).

    Each tensor may be stored wider (channel-padded) than its true channel count;
    the extra weight rows are zero so padding never leaks into the result.
    """
    N, H, W = parts[0][0].shape[:3]
    M = N * H * W
    w_full, b = p["w"], p["b"]                      # (Cin_total_true, Cout_true), (Cout_true,)
    cout = int(w_full.shape[1])
    cout_p = _round128(cout)

    xs, ws = [], []
    off = 0
    for t, c_true in parts:
        width = int(t.shape[-1])
        assert width >= c_true
        w_blk = jnp.zeros((width, cout_p), jnp.float32)
        w_blk = w_blk.at[:c_true, :cout].set(w_full[off:off + c_true, :])
        xs.append(t.reshape(M, width))
        ws.append(w_blk)
        off += c_true
    assert off == int(w_full.shape[0])
    b_pad = jnp.zeros((1, cout_p), jnp.float32).at[0, :cout].set(b)

    out = _fused_matmul(xs, ws, b_pad, alpha, out_dtype=out_dtype)
    return out.reshape(N, H, W, cout_p)


# ----------------------------------------------------------------------------
# Layout plumbing (pure index permutations) kept in JAX
# ----------------------------------------------------------------------------
def pixel_shuffle(x, true_c, r=2):
    """NHWC equivalent of torch.nn.PixelShuffle(r); input may be channel-padded."""
    x = x[..., :true_c]
    N, H, W, C = x.shape
    co = C // (r * r)
    x = x.reshape(N, H, W, co, r, r)
    x = jnp.transpose(x, (0, 1, 4, 2, 5, 3))
    return x.reshape(N, H * r, W * r, co)


# ----------------------------------------------------------------------------
# Parameter init (deterministic, PyTorch-style fan_in uniform; PReLU alpha=0.25).
# 3x3 weights are stored pre-reshaped/padded to (9*Cin_pad, Cout_pad) bf16.
# ----------------------------------------------------------------------------
def _conv3x3_init(key, cin, cout):
    kw, kb = jax.random.split(key)
    k = 3
    scale = 1.0 / np.sqrt(cin * k * k)
    w = jax.random.uniform(kw, (cout, cin, k, k), jnp.float32, -scale, scale)
    b = jax.random.uniform(kb, (cout,), jnp.float32, -scale, scale)
    cin_p, cout_p = _round128(cin), _round128(cout)
    w_t = jnp.transpose(w, (2, 3, 1, 0)).reshape(k * k, cin, cout)
    w_pad = jnp.zeros((k * k, cin_p, cout_p), jnp.float32).at[:, :cin, :cout].set(w_t)
    w_mat = w_pad.reshape(k * k * cin_p, cout_p).astype(MXU_DTYPE)
    b_pad = jnp.zeros((1, cout_p), jnp.float32).at[0, :cout].set(b)
    return {"w_mat": w_mat, "b": b_pad}


def _conv1x1_init(key, cin, cout):
    kw, kb = jax.random.split(key)
    scale = 1.0 / np.sqrt(cin)
    w = jax.random.uniform(kw, (cout, cin), jnp.float32, -scale, scale)
    b = jax.random.uniform(kb, (cout,), jnp.float32, -scale, scale)
    return {"w": w.T, "b": b}            # (Cin_true, Cout_true), (Cout_true,)


def _res_block_init(key, nc):
    keys = jax.random.split(key, 14)
    p = {
        "conv1": _conv3x3_init(keys[0], nc, nc),
        "conv3": _conv3x3_init(keys[1], nc, nc),
        "conv5": _conv3x3_init(keys[2], nc, 2 * nc),
        "conv7": _conv3x3_init(keys[3], 2 * nc, 2 * nc),
        "conv9": _conv3x3_init(keys[4], 2 * nc, 4 * nc),
        "conv11": _conv3x3_init(keys[5], 4 * nc, 4 * nc),
        "conv13": _conv1x1_init(keys[6], 4 * nc, 8 * nc),
        "conv15": _conv1x1_init(keys[7], 4 * nc, 2 * nc),
        "conv16": _conv3x3_init(keys[8], 2 * nc, 2 * nc),
        "conv18": _conv1x1_init(keys[9], 2 * nc, 4 * nc),
        "conv20": _conv1x1_init(keys[10], 2 * nc, nc),
        "conv21": _conv3x3_init(keys[11], nc, nc),
        "conv23": _conv3x3_init(keys[12], nc, nc),
        "conv25": _conv3x3_init(keys[13], nc, nc),
    }
    for a in ["a2", "a4", "a6", "a8", "a10", "a12", "a17", "a22", "a24"]:
        p[a] = jnp.float32(0.25)
    return p


def didn_init(key, in_chans, out_chans, num_chans, n_res_blocks):
    keys = jax.random.split(key, 5 + n_res_blocks)
    params = {
        "conv_input": _conv3x3_init(keys[0], in_chans, num_chans),
        "conv_down": _conv3x3_init(keys[1], num_chans, num_chans),
        "conv_mid": _conv1x1_init(keys[2], num_chans * n_res_blocks, num_chans),
        "conv_mid2": _conv3x3_init(keys[3], num_chans, num_chans),
        "conv_output": _conv3x3_init(keys[4], num_chans // 4, out_chans),
        "blocks": [_res_block_init(keys[5 + i], num_chans) for i in range(n_res_blocks)],
        "a1": jnp.float32(0.25), "a2": jnp.float32(0.25),
        "a3": jnp.float32(0.25), "a4": jnp.float32(0.25),
    }
    return params


# ----------------------------------------------------------------------------
# Forward passes (mirror the PyTorch module; all torch.add's fused into conv epilogues)
# ----------------------------------------------------------------------------
def residual_block_forward(x, p, nc):
    res1 = x
    out = conv3x3(x, p["conv1"], 1, p["a2"])
    out = conv3x3(out, p["conv3"], 1, p["a4"], residual=res1)        # relu4 then +res1
    cat1 = out
    out = conv3x3(out, p["conv5"], 2, p["a6"])
    res2 = out
    out = conv3x3(out, p["conv7"], 1, p["a8"], residual=res2)        # relu8 then +res2
    cat2 = out
    out = conv3x3(out, p["conv9"], 2, p["a10"])
    res3 = out
    out = conv3x3(out, p["conv11"], 1, p["a12"], residual=res3)      # relu12 then +res3
    out = conv1x1([(out, 4 * nc)], p["conv13"])                      # 1x1, no activation
    out = pixel_shuffle(out, true_c=8 * nc, r=2)
    out = conv1x1([(out, 2 * nc), (cat2, 2 * nc)], p["conv15"])      # fused concat + 1x1
    res4 = out
    out = conv3x3(out, p["conv16"], 1, p["a17"], residual=res4)      # relu17 then +res4
    out = conv1x1([(out, 2 * nc)], p["conv18"])                      # 1x1, no activation
    out = pixel_shuffle(out, true_c=4 * nc, r=2)
    out = conv1x1([(out, nc), (cat1, nc)], p["conv20"])              # fused concat + 1x1
    res5 = out
    out = conv3x3(out, p["conv21"], 1, p["a22"])
    out = conv3x3(out, p["conv23"], 1, p["a24"], residual=res5)      # relu24 then +res5
    out = conv3x3(out, p["conv25"], 1, residual=res1)                # no act, +res1
    return out


def didn_forward(params, x_nchw, *, num_chans, out_chans,
                 pad_data=True, global_residual=True):
    nc = num_chans
    x = jnp.transpose(x_nchw, (0, 2, 3, 1)).astype(jnp.float32)      # NCHW -> NHWC
    N, H0, W0, in_ch = x.shape
    if pad_data:
        factor = 2 ** 3
        ph = (int(np.ceil(H0 / factor)) * factor - H0) // 2
        pw = (int(np.ceil(W0 / factor)) * factor - W0) // 2
        if ph or pw:
            x = jnp.pad(x, ((0, 0), (ph, ph), (pw, pw), (0, 0)))
    residual_img = x                                                 # f32 global residual

    x_in = _cpad(x, _round128(in_ch)).astype(MXU_DTYPE)
    out = conv3x3(x_in, params["conv_input"], 1, params["a1"])
    out = conv3x3(out, params["conv_down"], 2, params["a2"])
    recons = []
    for bp in params["blocks"]:
        out = residual_block_forward(out, bp, nc)
        recons.append((out, nc))
    out = conv1x1(recons, params["conv_mid"], alpha=params["a3"])    # fused concat + 1x1 + PReLU
    residual2 = out
    out = conv3x3(out, params["conv_mid2"], 1, params["a4"], residual=residual2)
    out = pixel_shuffle(out, true_c=nc, r=2)                         # (N, H, W, nc//4)
    out = _cpad(out, _round128(nc // 4)).astype(MXU_DTYPE)
    # Global residual fused into conv_output epilogue (requires out_chans == in_chans,
    # exactly as the PyTorch reference requires).
    cout_p = int(params["conv_output"]["w_mat"].shape[1])
    res = _cpad(residual_img, cout_p) if global_residual else None
    out = conv3x3(out, params["conv_output"], 1, residual=res, out_dtype=jnp.float32)
    out = out[..., :out_chans]
    if (out.shape[1], out.shape[2]) != (H0, W0):
        h0 = (out.shape[1] - H0) // 2
        w0 = (out.shape[2] - W0) // 2
        out = out[:, h0:h0 + H0, w0:w0 + W0, :]                      # center crop
    return jnp.transpose(out, (0, 3, 1, 2))                          # NHWC -> NCHW


# ----------------------------------------------------------------------------
if __name__ == "__main__":
    key = jax.random.PRNGKey(0)
    pkey, xkey = jax.random.split(key)

    in_chans, out_chans = 2, 2
    num_chans, n_res_blocks = 16, 2
    params = didn_init(pkey, in_chans, out_chans, num_chans, n_res_blocks)

    x = jax.random.normal(xkey, (2, in_chans, 16, 16), jnp.float32)

    fwd = jax.jit(functools.partial(
        didn_forward, num_chans=num_chans, out_chans=out_chans,
        pad_data=True, global_residual=True))
    out = jax.block_until_ready(fwd(params, x))   # 2nd PyTorch forward arg `_` is unused

    assert out.shape == (2, out_chans, 16, 16), out.shape
    assert bool(jnp.all(jnp.isfinite(out)))
    print("KERNEL_OK")
</pallas_src>

<mosaic_0001>
module attributes {stable_mosaic.version = 11 : i64} {
  func.func @_conv3x3_kernel(%arg0: i32, %arg1: i32, %arg2: memref<1x18x18x128xbf16, #tpu.memory_space<vmem>>, %arg3: memref<1152x128xbf16, #tpu.memory_space<vmem>>, %arg4: memref<1x128xf32, #tpu.memory_space<vmem>>, %arg5: memref<1x1xf32, #tpu.memory_space<smem>>, %arg6: memref<1x128x128xbf16, #tpu.memory_space<vmem>>) attributes {dimension_semantics = [#tpu.dimension_semantics<parallel>, #tpu.dimension_semantics<parallel>], iteration_bounds = array<i64: 2, 2>, scalar_prefetch = 0 : i64, scratch_operands = 0 : i64, tpu.core_type = #tpu.core_type<tc>, window_params = [{transform_indices = @transform_0, window_bounds = array<i64: 1, 18, 18, 128>}, {pipeline_mode = #tpu.pipeline_mode<synchronous>, transform_indices = @transform_1, window_bounds = array<i64: 1152, 128>}, {pipeline_mode = #tpu.pipeline_mode<synchronous>, transform_indices = @transform_2, window_bounds = array<i64: 1, 128>}, {transform_indices = @transform_3, window_bounds = array<i64: 1, 1>}, {transform_indices = @transform_4, window_bounds = array<i64: 1, 128, 128>}]} {
    %c8_i32 = arith.constant 8 : i32
    %0 = arith.muli %arg1, %c8_i32 : i32
    %c0 = arith.constant 0 : index
    %1 = arith.index_cast %0 : i32 to index
    %c0_0 = arith.constant 0 : index
    %c0_1 = arith.constant 0 : index
    %2 = vector.load %arg2[%c0, %1, %c0_0, %c0_1] : memref<1x18x18x128xbf16, #tpu.memory_space<vmem>>, vector<1x10x18x128xbf16>
    %3 = vector.shape_cast %2 : vector<1x10x18x128xbf16> to vector<10x18x128xbf16>
    %4 = vector.extract_strided_slice %3 {offsets = [0, 0, 0], sizes = [8, 16, 128], strides = [1, 1, 1]} : vector<10x18x128xbf16> to vector<8x16x128xbf16>
    %5 = vector.shape_cast %4 : vector<8x16x128xbf16> to vector<128x128xbf16>
    %c0_2 = arith.constant 0 : index
    %c0_3 = arith.constant 0 : index
    %6 = vector.load %arg3[%c0_2, %c0_3] : memref<1152x128xbf16, #tpu.memory_space<vmem>>, vector<128x128xbf16>
    %cst = arith.constant dense<0.000000e+00> : vector<128x128xf32>
    %7 = tpu.matmul %5, %6, %cst {dimension_numbers = #tpu.dot_dimension_numbers<[1], [0], [0], [1], [0, 0, 1, 1], [], []>} : vector<128x128xbf16>, vector<128x128xbf16>, vector<128x128xf32> -> vector<128x128xf32>
    %8 = vector.extract_strided_slice %3 {offsets = [0, 1, 0], sizes = [8, 16, 128], strides = [1, 1, 1]} : vector<10x18x128xbf16> to vector<8x16x128xbf16>
    %9 = vector.shape_cast %8 : vector<8x16x128xbf16> to vector<128x128xbf16>
    %c128 = arith.constant 128 : index
    %c0_4 = arith.constant 0 : index
    %10 = vector.load %arg3[%c128, %c0_4] : memref<1152x128xbf16, #tpu.memory_space<vmem>>, vector<128x128xbf16>
    %cst_5 = arith.constant dense<0.000000e+00> : vector<128x128xf32>
    %11 = tpu.matmul %9, %10, %cst_5 {dimension_numbers = #tpu.dot_dimension_numbers<[1], [0], [0], [1], [0, 0, 1, 1], [], []>} : vector<128x128xbf16>, vector<128x128xbf16>, vector<128x128xf32> -> vector<128x128xf32>
    %12 = arith.addf %7, %11 : vector<128x128xf32>
    %13 = vector.extract_strided_slice %3 {offsets = [0, 2, 0], sizes = [8, 16, 128], strides = [1, 1, 1]} : vector<10x18x128xbf16> to vector<8x16x128xbf16>
    %14 = vector.shape_cast %13 : vector<8x16x128xbf16> to vector<128x128xbf16>
    %c256 = arith.constant 256 : index
    %c0_6 = arith.constant 0 : index
    %15 = vector.load %arg3[%c256, %c0_6] : memref<1152x128xbf16, #tpu.memory_space<vmem>>, vector<128x128xbf16>
    %cst_7 = arith.constant dense<0.000000e+00> : vector<128x128xf32>
    %16 = tpu.matmul %14, %15, %cst_7 {dimension_numbers = #tpu.dot_dimension_numbers<[1], [0], [0], [1], [0, 0, 1, 1], [], []>} : vector<128x128xbf16>, vector<128x128xbf16>, vector<128x128xf32> -> vector<128x128xf32>
    %17 = arith.addf %12, %16 : vector<128x128xf32>
    %18 = vector.extract_strided_slice %3 {offsets = [1, 0, 0], sizes = [8, 16, 128], strides = [1, 1, 1]} : vector<10x18x128xbf16> to vector<8x16x128xbf16>
    %19 = vector.shape_cast %18 : vector<8x16x128xbf16> to vector<128x128xbf16>
    %c384 = arith.constant 384 : index
    %c0_8 = arith.constant 0 : index
    %20 = vector.load %arg3[%c384, %c0_8] : memref<1152x128xbf16, #tpu.memory_space<vmem>>, vector<128x128xbf16>
    %cst_9 = arith.constant dense<0.000000e+00> : vector<128x128xf32>
    %21 = tpu.matmul %19, %20, %cst_9 {dimension_numbers = #tpu.dot_dimension_numbers<[1], [0], [0], [1], [0, 0, 1, 1], [], []>} : vector<128x128xbf16>, vector<128x128xbf16>, vector<128x128xf32> -> vector<128x128xf32>
    %22 = arith.addf %17, %21 : vector<128x128xf32>
    %23 = vector.extract_strided_slice %3 {offsets = [1, 1, 0], sizes = [8, 16, 128], strides = [1, 1, 1]} : vector<10x18x128xbf16> to vector<8x16x128xbf16>
    %24 = vector.shape_cast %23 : vector<8x16x128xbf16> to vector<128x128xbf16>
    %c512 = arith.constant 512 : index
    %c0_10 = arith.constant 0 : index
    %25 = vector.load %arg3[%c512, %c0_10] : memref<1152x128xbf16, #tpu.memory_space<vmem>>, vector<128x128xbf16>
    %cst_11 = arith.constant dense<0.000000e+00> : vector<128x128xf32>
    %26 = tpu.matmul %24, %25, %cst_11 {dimension_numbers = #tpu.dot_dimension_numbers<[1], [0], [0], [1], [0, 0, 1, 1], [], []>} : vector<128x128xbf16>, vector<128x128xbf16>, vector<128x128xf32> -> vector<128x128xf32>
    %27 = arith.addf %22, %26 : vector<128x128xf32>
    %28 = vector.extract_strided_slice %3 {offsets = [1, 2, 0], sizes = [8, 16, 128], strides = [1, 1, 1]} : vector<10x18x128xbf16> to vector<8x16x128xbf16>
    %29 = vector.shape_cast %28 : vector<8x16x128xbf16> to vector<128x128xbf16>
    %c640 = arith.constant 640 : index
    %c0_12 = arith.constant 0 : index
    %30 = vector.load %arg3[%c640, %c0_12] : memref<1152x128xbf16, #tpu.memory_space<vmem>>, vector<128x128xbf16>
    %cst_13 = arith.constant dense<0.000000e+00> : vector<128x128xf32>
    %31 = tpu.matmul %29, %30, %cst_13 {dimension_numbers = #tpu.dot_dimension_numbers<[1], [0], [0], [1], [0, 0, 1, 1], [], []>} : vector<128x128xbf16>, vector<128x128xbf16>, vector<128x128xf32> -> vector<128x128xf32>
    %32 = arith.addf %27, %31 : vector<128x128xf32>
    %33 = vector.extract_strided_slice %3 {offsets = [2, 0, 0], sizes = [8, 16, 128], strides = [1, 1, 1]} : vector<10x18x128xbf16> to vector<8x16x128xbf16>
    %34 = vector.shape_cast %33 : vector<8x16x128xbf16> to vector<128x128xbf16>
    %c768 = arith.constant 768 : index
    %c0_14 = arith.constant 0 : index
    %35 = vector.load %arg3[%c768, %c0_14] : memref<1152x128xbf16, #tpu.memory_space<vmem>>, vector<128x128xbf16>
    %cst_15 = arith.constant dense<0.000000e+00> : vector<128x128xf32>
    %36 = tpu.matmul %34, %35, %cst_15 {dimension_numbers = #tpu.dot_dimension_numbers<[1], [0], [0], [1], [0, 0, 1, 1], [], []>} : vector<128x128xbf16>, vector<128x128xbf16>, vector<128x128xf32> -> vector<128x128xf32>
    %37 = arith.addf %32, %36 : vector<128x128xf32>
    %38 = vector.extract_strided_slice %3 {offsets = [2, 1, 0], sizes = [8, 16, 128], strides = [1, 1, 1]} : vector<10x18x128xbf16> to vector<8x16x128xbf16>
    %39 = vector.shape_cast %38 : vector<8x16x128xbf16> to vector<128x128xbf16>
    %c896 = arith.constant 896 : index
    %c0_16 = arith.constant 0 : index
    %40 = vector.load %arg3[%c896, %c0_16] : memref<1152x128xbf16, #tpu.memory_space<vmem>>, vector<128x128xbf16>
    %cst_17 = arith.constant dense<0.000000e+00> : vector<128x128xf32>
    %41 = tpu.matmul %39, %40, %cst_17 {dimension_numbers = #tpu.dot_dimension_numbers<[1], [0], [0], [1], [0, 0, 1, 1], [], []>} : vector<128x128xbf16>, vector<128x128xbf16>, vector<128x128xf32> -> vector<128x128xf32>
    %42 = arith.addf %37, %41 : vector<128x128xf32>
    %43 = vector.extract_strided_slice %3 {offsets = [2, 2, 0], sizes = [8, 16, 128], strides = [1, 1, 1]} : vector<10x18x128xbf16> to vector<8x16x128xbf16>
    %44 = vector.shape_cast %43 : vector<8x16x128xbf16> to vector<128x128xbf16>
    %c1024 = arith.constant 1024 : index
    %c0_18 = arith.constant 0 : index
    %45 = vector.load %arg3[%c1024, %c0_18] : memref<1152x128xbf16, #tpu.memory_space<vmem>>, vector<128x128xbf16>
    %cst_19 = arith.constant dense<0.000000e+00> : vector<128x128xf32>
    %46 = tpu.matmul %44, %45, %cst_19 {dimension_numbers = #tpu.dot_dimension_numbers<[1], [0], [0], [1], [0, 0, 1, 1], [], []>} : vector<128x128xbf16>, vector<128x128xbf16>, vector<128x128xf32> -> vector<128x128xf32>
    %47 = arith.addf %42, %46 : vector<128x128xf32>
    %c0_20 = arith.constant 0 : index
    %c0_21 = arith.constant 0 : index
    %48 = vector.load %arg4[%c0_20, %c0_21] : memref<1x128xf32, #tpu.memory_space<vmem>>, vector<1x128xf32>
    %49 = vector.broadcast %48 : vector<1x128xf32> to vector<128x128xf32>
    %50 = arith.addf %47, %49 : vector<128x128xf32>
    %c0_22 = arith.constant 0 : index
    %c0_23 = arith.constant 0 : index
    %51 = memref.load %arg5[%c0_22, %c0_23] : memref<1x1xf32, #tpu.memory_space<smem>>
    %cst_24 = arith.constant 0.000000e+00 : f32
    %52 = vector.broadcast %cst_24 : f32 to vector<128x128xf32>
    %53 = arith.cmpf oge, %50, %52 : vector<128x128xf32>
    %54 = vector.broadcast %51 : f32 to vector<128x128xf32>
    %55 = arith.mulf %54, %50 : vector<128x128xf32>
    %56 = arith.select %53, %50, %55 : vector<128x128xi1>, vector<128x128xf32>
    %57 = vector.shape_cast %56 : vector<128x128xf32> to vector<1x128x128xf32>
    %58 = arith.truncf %57 : vector<1x128x128xf32> to vector<1x128x128xbf16>
    %c0_25 = arith.constant 0 : index
    %c0_26 = arith.constant 0 : index
    %c0_27 = arith.constant 0 : index
    %59 = vector.load %arg6[%c0_25, %c0_26, %c0_27] : memref<1x128x128xbf16, #tpu.memory_space<vmem>>, vector<1x128x128xbf16>
    tpu.vector_store %arg6[%c0_25, %c0_26, %c0_27], %58 {strides = array<i32>} : memref<1x128x128xbf16, #tpu.memory_space<vmem>>, vector<1x128x128xbf16>,
    return
  }
  func.func @transform_0(%arg0: i32, %arg1: i32) -> (i32, i32, i32, i32) {
    %c0_i32 = arith.constant 0 : i32
    %c0_i32_0 = arith.constant 0 : i32
    %c0_i32_1 = arith.constant 0 : i32
    %c0_i32_2 = arith.constant 0 : i32
    return %arg0, %c0_i32, %c0_i32_0, %c0_i32_1 : i32, i32, i32, i32
  }
  func.func @transform_1(%arg0: i32, %arg1: i32) -> (i32, i32) {
    %c0_i32 = arith.constant 0 : i32
    %c0_i32_0 = arith.constant 0 : i32
    %c0_i32_1 = arith.constant 0 : i32
    return %c0_i32, %c0_i32_0 : i32, i32
  }
  func.func @transform_2(%arg0: i32, %arg1: i32) -> (i32, i32) {
    %c0_i32 = arith.constant 0 : i32
    %c0_i32_0 = arith.constant 0 : i32
    %c0_i32_1 = arith.constant 0 : i32
    return %c0_i32, %c0_i32_0 : i32, i32
  }
  func.func @transform_3(%arg0: i32, %arg1: i32) -> (i32, i32) {
    %c0_i32 = arith.constant 0 : i32
    %c0_i32_0 = arith.constant 0 : i32
    %c0_i32_1 = arith.constant 0 : i32
    return %c0_i32, %c0_i32_0 : i32, i32
  }
  func.func @transform_4(%arg0: i32, %arg1: i32) -> (i32, i32, i32) {
    %c0_i32 = arith.constant 0 : i32
    %c0_i32_0 = arith.constant 0 : i32
    return %arg0, %arg1, %c0_i32 : i32, i32, i32
  }
}

module attributes {stable_mosaic.version = 11 : i64} {
  func.func @_conv3x3_kernel(%arg0: i32, %arg1: i32, %arg2: memref<1x9x9x512xbf16, #tpu.memory_space<vmem>>, %arg3: memref<1152x128xbf16, #tpu.memory_space<vmem>>, %arg4: memref<1x128xf32, #tpu.memory_space<vmem>>, %arg5: memref<1x1xf32, #tpu.memory_space<smem>>, %arg6: memref<1x32x128xbf16, #tpu.memory_space<vmem>>) attributes {dimension_semantics = [#tpu.dimension_semantics<parallel>, #tpu.dimension_semantics<parallel>], iteration_bounds = array<i64: 2, 2>, scalar_prefetch = 0 : i64, scratch_operands = 0 : i64, tpu.core_type = #tpu.core_type<tc>, window_params = [{transform_indices = @transform_0, window_bounds = array<i64: 1, 9, 9, 512>}, {pipeline_mode = #tpu.pipeline_mode<synchronous>, transform_indices = @transform_1, window_bounds = array<i64: 1152, 128>}, {pipeline_mode = #tpu.pipeline_mode<synchronous>, transform_indices = @transform_2, window_bounds = array<i64: 1, 128>}, {transform_indices = @transform_3, window_bounds = array<i64: 1, 1>}, {transform_indices = @transform_4, window_bounds = array<i64: 1, 32, 128>}]} {
    %c4_i32 = arith.constant 4 : i32
    %0 = arith.muli %arg1, %c4_i32 : i32
    %c0 = arith.constant 0 : index
    %1 = arith.index_cast %0 : i32 to index
    %c0_0 = arith.constant 0 : index
    %c0_1 = arith.constant 0 : index
    %2 = vector.load %arg2[%c0, %1, %c0_0, %c0_1] : memref<1x9x9x512xbf16, #tpu.memory_space<vmem>>, vector<1x5x9x512xbf16>
    %3 = vector.shape_cast %2 : vector<1x5x9x512xbf16> to vector<5x9x512xbf16>
    %4 = vector.extract_strided_slice %3 {offsets = [0, 0, 0], sizes = [4, 8, 128], strides = [1, 1, 1]} : vector<5x9x512xbf16> to vector<4x8x128xbf16>
    %5 = vector.shape_cast %4 : vector<4x8x128xbf16> to vector<32x128xbf16>
    %c0_2 = arith.constant 0 : index
    %c0_3 = arith.constant 0 : index
    %6 = vector.load %arg3[%c0_2, %c0_3] : memref<1152x128xbf16, #tpu.memory_space<vmem>>, vector<128x128xbf16>
    %cst = arith.constant dense<0.000000e+00> : vector<32x128xf32>
    %7 = tpu.matmul %5, %6, %cst {dimension_numbers = #tpu.dot_dimension_numbers<[1], [0], [0], [1], [0, 0, 1, 1], [], []>} : vector<32x128xbf16>, vector<128x128xbf16>, vector<32x128xf32> -> vector<32x128xf32>
    %8 = vector.extract_strided_slice %3 {offsets = [0, 0, 128], sizes = [4, 8, 128], strides = [1, 1, 1]} : vector<5x9x512xbf16> to vector<4x8x128xbf16>
    %9 = vector.shape_cast %8 : vector<4x8x128xbf16> to vector<32x128xbf16>
    %c128 = arith.constant 128 : index
    %c0_4 = arith.constant 0 : index
    %10 = vector.load %arg3[%c128, %c0_4] : memref<1152x128xbf16, #tpu.memory_space<vmem>>, vector<128x128xbf16>
    %cst_5 = arith.constant dense<0.000000e+00> : vector<32x128xf32>
    %11 = tpu.matmul %9, %10, %cst_5 {dimension_numbers = #tpu.dot_dimension_numbers<[1], [0], [0], [1], [0, 0, 1, 1], [], []>} : vector<32x128xbf16>, vector<128x128xbf16>, vector<32x128xf32> -> vector<32x128xf32>
    %12 = arith.addf %7, %11 : vector<32x128xf32>
    %13 = vector.extract_strided_slice %3 {offsets = [0, 1, 0], sizes = [4, 8, 128], strides = [1, 1, 1]} : vector<5x9x512xbf16> to vector<4x8x128xbf16>
    %14 = vector.shape_cast %13 : vector<4x8x128xbf16> to vector<32x128xbf16>
    %c256 = arith.constant 256 : index
    %c0_6 = arith.constant 0 : index
    %15 = vector.load %arg3[%c256, %c0_6] : memref<1152x128xbf16, #tpu.memory_space<vmem>>, vector<128x128xbf16>
    %cst_7 = arith.constant dense<0.000000e+00> : vector<32x128xf32>
    %16 = tpu.matmul %14, %15, %cst_7 {dimension_numbers = #tpu.dot_dimension_numbers<[1], [0], [0], [1], [0, 0, 1, 1], [], []>} : vector<32x128xbf16>, vector<128x128xbf16>, vector<32x128xf32> -> vector<32x128xf32>
    %17 = arith.addf %12, %16 : vector<32x128xf32>
    %18 = vector.extract_strided_slice %3 {offsets = [0, 0, 256], sizes = [4, 8, 128], strides = [1, 1, 1]} : vector<5x9x512xbf16> to vector<4x8x128xbf16>
    %19 = vector.shape_cast %18 : vector<4x8x128xbf16> to vector<32x128xbf16>
    %c384 = arith.constant 384 : index
    %c0_8 = arith.constant 0 : index
    %20 = vector.load %arg3[%c384, %c0_8] : memref<1152x128xbf16, #tpu.memory_space<vmem>>, vector<128x128xbf16>
    %cst_9 = arith.constant dense<0.000000e+00> : vector<32x128xf32>
    %21 = tpu.matmul %19, %20, %cst_9 {dimension_numbers = #tpu.dot_dimension_numbers<[1], [0], [0], [1], [0, 0, 1, 1], [], []>} : vector<32x128xbf16>, vector<128x128xbf16>, vector<32x128xf32> -> vector<32x128xf32>
    %22 = arith.addf %17, %21 : vector<32x128xf32>
    %23 = vector.extract_strided_slice %3 {offsets = [0, 0, 384], sizes = [4, 8, 128], strides = [1, 1, 1]} : vector<5x9x512xbf16> to vector<4x8x128xbf16>
    %24 = vector.shape_cast %23 : vector<4x8x128xbf16> to vector<32x128xbf16>
    %c512 = arith.constant 512 : index
    %c0_10 = arith.constant 0 : index
    %25 = vector.load %arg3[%c512, %c0_10] : memref<1152x128xbf16, #tpu.memory_space<vmem>>, vector<128x128xbf16>
    %cst_11 = arith.constant dense<0.000000e+00> : vector<32x128xf32>
    %26 = tpu.matmul %24, %25, %cst_11 {dimension_numbers = #tpu.dot_dimension_numbers<[1], [0], [0], [1], [0, 0, 1, 1], [], []>} : vector<32x128xbf16>, vector<128x128xbf16>, vector<32x128xf32> -> vector<32x128xf32>
    %27 = arith.addf %22, %26 : vector<32x128xf32>
    %28 = vector.extract_strided_slice %3 {offsets = [0, 1, 256], sizes = [4, 8, 128], strides = [1, 1, 1]} : vector<5x9x512xbf16> to vector<4x8x128xbf16>
    %29 = vector.shape_cast %28 : vector<4x8x128xbf16> to vector<32x128xbf16>
    %c640 = arith.constant 640 : index
    %c0_12 = arith.constant 0 : index
    %30 = vector.load %arg3[%c640, %c0_12] : memref<1152x128xbf16, #tpu.memory_space<vmem>>, vector<128x128xbf16>
    %cst_13 = arith.constant dense<0.000000e+00> : vector<32x128xf32>
    %31 = tpu.matmul %29, %30, %cst_13 {dimension_numbers = #tpu.dot_dimension_numbers<[1], [0], [0], [1], [0, 0, 1, 1], [], []>} : vector<32x128xbf16>, vector<128x128xbf16>, vector<32x128xf32> -> vector<32x128xf32>
    %32 = arith.addf %27, %31 : vector<32x128xf32>
    %33 = vector.extract_strided_slice %3 {offsets = [1, 0, 0], sizes = [4, 8, 128], strides = [1, 1, 1]} : vector<5x9x512xbf16> to vector<4x8x128xbf16>
    %34 = vector.shape_cast %33 : vector<4x8x128xbf16> to vector<32x128xbf16>
    %c768 = arith.constant 768 : index
    %c0_14 = arith.constant 0 : index
    %35 = vector.load %arg3[%c768, %c0_14] : memref<1152x128xbf16, #tpu.memory_space<vmem>>, vector<128x128xbf16>
    %cst_15 = arith.constant dense<0.000000e+00> : vector<32x128xf32>
    %36 = tpu.matmul %34, %35, %cst_15 {dimension_numbers = #tpu.dot_dimension_numbers<[1], [0], [0], [1], [0, 0, 1, 1], [], []>} : vector<32x128xbf16>, vector<128x128xbf16>, vector<32x128xf32> -> vector<32x128xf32>
    %37 = arith.addf %32, %36 : vector<32x128xf32>
    %38 = vector.extract_strided_slice %3 {offsets = [1, 0, 128], sizes = [4, 8, 128], strides = [1, 1, 1]} : vector<5x9x512xbf16> to vector<4x8x128xbf16>
    %39 = vector.shape_cast %38 : vector<4x8x128xbf16> to vector<32x128xbf16>
    %c896 = arith.constant 896 : index
    %c0_16 = arith.constant 0 : index
    %40 = vector.load %arg3[%c896, %c0_16] : memref<1152x128xbf16, #tpu.memory_space<vmem>>, vector<128x128xbf16>
    %cst_17 = arith.constant dense<0.000000e+00> : vector<32x128xf32>
    %41 = tpu.matmul %39, %40, %cst_17 {dimension_numbers = #tpu.dot_dimension_numbers<[1], [0], [0], [1], [0, 0, 1, 1], [], []>} : vector<32x128xbf16>, vector<128x128xbf16>, vector<32x128xf32> -> vector<32x128xf32>
    %42 = arith.addf %37, %41 : vector<32x128xf32>
    %43 = vector.extract_strided_slice %3 {offsets = [1, 1, 0], sizes = [4, 8, 128], strides = [1, 1, 1]} : vector<5x9x512xbf16> to vector<4x8x128xbf16>
    %44 = vector.shape_cast %43 : vector<4x8x128xbf16> to vector<32x128xbf16>
    %c1024 = arith.constant 1024 : index
    %c0_18 = arith.constant 0 : index
    %45 = vector.load %arg3[%c1024, %c0_18] : memref<1152x128xbf16, #tpu.memory_space<vmem>>, vector<128x128xbf16>
    %cst_19 = arith.constant dense<0.000000e+00> : vector<32x128xf32>
    %46 = tpu.matmul %44, %45, %cst_19 {dimension_numbers = #tpu.dot_dimension_numbers<[1], [0], [0], [1], [0, 0, 1, 1], [], []>} : vector<32x128xbf16>, vector<128x128xbf16>, vector<32x128xf32> -> vector<32x128xf32>
    %47 = arith.addf %42, %46 : vector<32x128xf32>
    %c0_20 = arith.constant 0 : index
    %c0_21 = arith.constant 0 : index
    %48 = vector.load %arg4[%c0_20, %c0_21] : memref<1x128xf32, #tpu.memory_space<vmem>>, vector<1x128xf32>
    %49 = vector.broadcast %48 : vector<1x128xf32> to vector<32x128xf32>
    %50 = arith.addf %47, %49 : vector<32x128xf32>
    %c0_22 = arith.constant 0 : index
    %c0_23 = arith.constant 0 : index
    %51 = memref.load %arg5[%c0_22, %c0_23] : memref<1x1xf32, #tpu.memory_space<smem>>
    %cst_24 = arith.constant 0.000000e+00 : f32
    %52 = vector.broadcast %cst_24 : f32 to vector<32x128xf32>
    %53 = arith.cmpf oge, %50, %52 : vector<32x128xf32>
    %54 = vector.broadcast %51 : f32 to vector<32x128xf32>
    %55 = arith.mulf %54, %50 : vector<32x128xf32>
    %56 = arith.select %53, %50, %55 : vector<32x128xi1>, vector<32x128xf32>
    %57 = vector.shape_cast %56 : vector<32x128xf32> to vector<1x32x128xf32>
    %58 = arith.truncf %57 : vector<1x32x128xf32> to vector<1x32x128xbf16>
    %c0_25 = arith.constant 0 : index
    %c0_26 = arith.constant 0 : index
    %c0_27 = arith.constant 0 : index
    %59 = vector.load %arg6[%c0_25, %c0_26, %c0_27] : memref<1x32x128xbf16, #tpu.memory_space<vmem>>, vector<1x32x128xbf16>
    tpu.vector_store %arg6[%c0_25, %c0_26, %c0_27], %58 {strides = array<i32>} : memref<1x32x128xbf16, #tpu.memory_space<vmem>>, vector<1x32x128xbf16>,
    return
  }
  func.func @transform_0(%arg0: i32, %arg1: i32) -> (i32, i32, i32, i32) {
    %c0_i32 = arith.constant 0 : i32
    %c0_i32_0 = arith.constant 0 : i32
    %c0_i32_1 = arith.constant 0 : i32
    %c0_i32_2 = arith.constant 0 : i32
    return %arg0, %c0_i32, %c0_i32_0, %c0_i32_1 : i32, i32, i32, i32
  }
  func.func @transform_1(%arg0: i32, %arg1: i32) -> (i32, i32) {
    %c0_i32 = arith.constant 0 : i32
    %c0_i32_0 = arith.constant 0 : i32
    %c0_i32_1 = arith.constant 0 : i32
    return %c0_i32, %c0_i32_0 : i32, i32
  }
  func.func @transform_2(%arg0: i32, %arg1: i32) -> (i32, i32) {
    %c0_i32 = arith.constant 0 : i32
    %c0_i32_0 = arith.constant 0 : i32
    %c0_i32_1 = arith.constant 0 : i32
    return %c0_i32, %c0_i32_0 : i32, i32
  }
  func.func @transform_3(%arg0: i32, %arg1: i32) -> (i32, i32) {
    %c0_i32 = arith.constant 0 : i32
    %c0_i32_0 = arith.constant 0 : i32
    %c0_i32_1 = arith.constant 0 : i32
    return %c0_i32, %c0_i32_0 : i32, i32
  }
  func.func @transform_4(%arg0: i32, %arg1: i32) -> (i32, i32, i32) {
    %c0_i32 = arith.constant 0 : i32
    %c0_i32_0 = arith.constant 0 : i32
    return %arg0, %arg1, %c0_i32 : i32, i32, i32
  }
}

module attributes {stable_mosaic.version = 11 : i64} {
  func.func @_conv3x3_kernel(%arg0: i32, %arg1: i32, %arg2: memref<1x10x10x128xbf16, #tpu.memory_space<vmem>>, %arg3: memref<1152x128xbf16, #tpu.memory_space<vmem>>, %arg4: memref<1x128xf32, #tpu.memory_space<vmem>>, %arg5: memref<1x1xf32, #tpu.memory_space<smem>>, %arg6: memref<1x32x128xbf16, #tpu.memory_space<vmem>>) attributes {dimension_semantics = [#tpu.dimension_semantics<parallel>, #tpu.dimension_semantics<parallel>], iteration_bounds = array<i64: 2, 2>, scalar_prefetch = 0 : i64, scratch_operands = 0 : i64, tpu.core_type = #tpu.core_type<tc>, window_params = [{transform_indices = @transform_0, window_bounds = array<i64: 1, 10, 10, 128>}, {pipeline_mode = #tpu.pipeline_mode<synchronous>, transform_indices = @transform_1, window_bounds = array<i64: 1152, 128>}, {pipeline_mode = #tpu.pipeline_mode<synchronous>, transform_indices = @transform_2, window_bounds = array<i64: 1, 128>}, {transform_indices = @transform_3, window_bounds = array<i64: 1, 1>}, {transform_indices = @transform_4, window_bounds = array<i64: 1, 32, 128>}]} {
    %c4_i32 = arith.constant 4 : i32
    %0 = arith.muli %arg1, %c4_i32 : i32
    %c0 = arith.constant 0 : index
    %1 = arith.index_cast %0 : i32 to index
    %c0_0 = arith.constant 0 : index
    %c0_1 = arith.constant 0 : index
    %2 = vector.load %arg2[%c0, %1, %c0_0, %c0_1] : memref<1x10x10x128xbf16, #tpu.memory_space<vmem>>, vector<1x6x10x128xbf16>
    %3 = vector.shape_cast %2 : vector<1x6x10x128xbf16> to vector<6x10x128xbf16>
    %4 = vector.extract_strided_slice %3 {offsets = [0, 0, 0], sizes = [4, 8, 128], strides = [1, 1, 1]} : vector<6x10x128xbf16> to vector<4x8x128xbf16>
    %5 = vector.shape_cast %4 : vector<4x8x128xbf16> to vector<32x128xbf16>
    %c0_2 = arith.constant 0 : index
    %c0_3 = arith.constant 0 : index
    %6 = vector.load %arg3[%c0_2, %c0_3] : memref<1152x128xbf16, #tpu.memory_space<vmem>>, vector<128x128xbf16>
    %cst = arith.constant dense<0.000000e+00> : vector<32x128xf32>
    %7 = tpu.matmul %5, %6, %cst {dimension_numbers = #tpu.dot_dimension_numbers<[1], [0], [0], [1], [0, 0, 1, 1], [], []>} : vector<32x128xbf16>, vector<128x128xbf16>, vector<32x128xf32> -> vector<32x128xf32>
    %8 = vector.extract_strided_slice %3 {offsets = [0, 1, 0], sizes = [4, 8, 128], strides = [1, 1, 1]} : vector<6x10x128xbf16> to vector<4x8x128xbf16>
    %9 = vector.shape_cast %8 : vector<4x8x128xbf16> to vector<32x128xbf16>
    %c128 = arith.constant 128 : index
    %c0_4 = arith.constant 0 : index
    %10 = vector.load %arg3[%c128, %c0_4] : memref<1152x128xbf16, #tpu.memory_space<vmem>>, vector<128x128xbf16>
    %cst_5 = arith.constant dense<0.000000e+00> : vector<32x128xf32>
    %11 = tpu.matmul %9, %10, %cst_5 {dimension_numbers = #tpu.dot_dimension_numbers<[1], [0], [0], [1], [0, 0, 1, 1], [], []>} : vector<32x128xbf16>, vector<128x128xbf16>, vector<32x128xf32> -> vector<32x128xf32>
    %12 = arith.addf %7, %11 : vector<32x128xf32>
    %13 = vector.extract_strided_slice %3 {offsets = [0, 2, 0], sizes = [4, 8, 128], strides = [1, 1, 1]} : vector<6x10x128xbf16> to vector<4x8x128xbf16>
    %14 = vector.shape_cast %13 : vector<4x8x128xbf16> to vector<32x128xbf16>
    %c256 = arith.constant 256 : index
    %c0_6 = arith.constant 0 : index
    %15 = vector.load %arg3[%c256, %c0_6] : memref<1152x128xbf16, #tpu.memory_space<vmem>>, vector<128x128xbf16>
    %cst_7 = arith.constant dense<0.000000e+00> : vector<32x128xf32>
    %16 = tpu.matmul %14, %15, %cst_7 {dimension_numbers = #tpu.dot_dimension_numbers<[1], [0], [0], [1], [0, 0, 1, 1], [], []>} : vector<32x128xbf16>, vector<128x128xbf16>, vector<32x128xf32> -> vector<32x128xf32>
    %17 = arith.addf %12, %16 : vector<32x128xf32>
    %18 = vector.extract_strided_slice %3 {offsets = [1, 0, 0], sizes = [4, 8, 128], strides = [1, 1, 1]} : vector<6x10x128xbf16> to vector<4x8x128xbf16>
    %19 = vector.shape_cast %18 : vector<4x8x128xbf16> to vector<32x128xbf16>
    %c384 = arith.constant 384 : index
    %c0_8 = arith.constant 0 : index
    %20 = vector.load %arg3[%c384, %c0_8] : memref<1152x128xbf16, #tpu.memory_space<vmem>>, vector<128x128xbf16>
    %cst_9 = arith.constant dense<0.000000e+00> : vector<32x128xf32>
    %21 = tpu.matmul %19, %20, %cst_9 {dimension_numbers = #tpu.dot_dimension_numbers<[1], [0], [0], [1], [0, 0, 1, 1], [], []>} : vector<32x128xbf16>, vector<128x128xbf16>, vector<32x128xf32> -> vector<32x128xf32>
    %22 = arith.addf %17, %21 : vector<32x128xf32>
    %23 = vector.extract_strided_slice %3 {offsets = [1, 1, 0], sizes = [4, 8, 128], strides = [1, 1, 1]} : vector<6x10x128xbf16> to vector<4x8x128xbf16>
    %24 = vector.shape_cast %23 : vector<4x8x128xbf16> to vector<32x128xbf16>
    %c512 = arith.constant 512 : index
    %c0_10 = arith.constant 0 : index
    %25 = vector.load %arg3[%c512, %c0_10] : memref<1152x128xbf16, #tpu.memory_space<vmem>>, vector<128x128xbf16>
    %cst_11 = arith.constant dense<0.000000e+00> : vector<32x128xf32>
    %26 = tpu.matmul %24, %25, %cst_11 {dimension_numbers = #tpu.dot_dimension_numbers<[1], [0], [0], [1], [0, 0, 1, 1], [], []>} : vector<32x128xbf16>, vector<128x128xbf16>, vector<32x128xf32> -> vector<32x128xf32>
    %27 = arith.addf %22, %26 : vector<32x128xf32>
    %28 = vector.extract_strided_slice %3 {offsets = [1, 2, 0], sizes = [4, 8, 128], strides = [1, 1, 1]} : vector<6x10x128xbf16> to vector<4x8x128xbf16>
    %29 = vector.shape_cast %28 : vector<4x8x128xbf16> to vector<32x128xbf16>
    %c640 = arith.constant 640 : index
    %c0_12 = arith.constant 0 : index
    %30 = vector.load %arg3[%c640, %c0_12] : memref<1152x128xbf16, #tpu.memory_space<vmem>>, vector<128x128xbf16>
    %cst_13 = arith.constant dense<0.000000e+00> : vector<32x128xf32>
    %31 = tpu.matmul %29, %30, %cst_13 {dimension_numbers = #tpu.dot_dimension_numbers<[1], [0], [0], [1], [0, 0, 1, 1], [], []>} : vector<32x128xbf16>, vector<128x128xbf16>, vector<32x128xf32> -> vector<32x128xf32>
    %32 = arith.addf %27, %31 : vector<32x128xf32>
    %33 = vector.extract_strided_slice %3 {offsets = [2, 0, 0], sizes = [4, 8, 128], strides = [1, 1, 1]} : vector<6x10x128xbf16> to vector<4x8x128xbf16>
    %34 = vector.shape_cast %33 : vector<4x8x128xbf16> to vector<32x128xbf16>
    %c768 = arith.constant 768 : index
    %c0_14 = arith.constant 0 : index
    %35 = vector.load %arg3[%c768, %c0_14] : memref<1152x128xbf16, #tpu.memory_space<vmem>>, vector<128x128xbf16>
    %cst_15 = arith.constant dense<0.000000e+00> : vector<32x128xf32>
    %36 = tpu.matmul %34, %35, %cst_15 {dimension_numbers = #tpu.dot_dimension_numbers<[1], [0], [0], [1], [0, 0, 1, 1], [], []>} : vector<32x128xbf16>, vector<128x128xbf16>, vector<32x128xf32> -> vector<32x128xf32>
    %37 = arith.addf %32, %36 : vector<32x128xf32>
    %38 = vector.extract_strided_slice %3 {offsets = [2, 1, 0], sizes = [4, 8, 128], strides = [1, 1, 1]} : vector<6x10x128xbf16> to vector<4x8x128xbf16>
    %39 = vector.shape_cast %38 : vector<4x8x128xbf16> to vector<32x128xbf16>
    %c896 = arith.constant 896 : index
    %c0_16 = arith.constant 0 : index
    %40 = vector.load %arg3[%c896, %c0_16] : memref<1152x128xbf16, #tpu.memory_space<vmem>>, vector<128x128xbf16>
    %cst_17 = arith.constant dense<0.000000e+00> : vector<32x128xf32>
    %41 = tpu.matmul %39, %40, %cst_17 {dimension_numbers = #tpu.dot_dimension_numbers<[1], [0], [0], [1], [0, 0, 1, 1], [], []>} : vector<32x128xbf16>, vector<128x128xbf16>, vector<32x128xf32> -> vector<32x128xf32>
    %42 = arith.addf %37, %41 : vector<32x128xf32>
    %43 = vector.extract_strided_slice %3 {offsets = [2, 2, 0], sizes = [4, 8, 128], strides = [1, 1, 1]} : vector<6x10x128xbf16> to vector<4x8x128xbf16>
    %44 = vector.shape_cast %43 : vector<4x8x128xbf16> to vector<32x128xbf16>
    %c1024 = arith.constant 1024 : index
    %c0_18 = arith.constant 0 : index
    %45 = vector.load %arg3[%c1024, %c0_18] : memref<1152x128xbf16, #tpu.memory_space<vmem>>, vector<128x128xbf16>
    %cst_19 = arith.constant dense<0.000000e+00> : vector<32x128xf32>
    %46 = tpu.matmul %44, %45, %cst_19 {dimension_numbers = #tpu.dot_dimension_numbers<[1], [0], [0], [1], [0, 0, 1, 1], [], []>} : vector<32x128xbf16>, vector<128x128xbf16>, vector<32x128xf32> -> vector<32x128xf32>
    %47 = arith.addf %42, %46 : vector<32x128xf32>
    %c0_20 = arith.constant 0 : index
    %c0_21 = arith.constant 0 : index
    %48 = vector.load %arg4[%c0_20, %c0_21] : memref<1x128xf32, #tpu.memory_space<vmem>>, vector<1x128xf32>
    %49 = vector.broadcast %48 : vector<1x128xf32> to vector<32x128xf32>
    %50 = arith.addf %47, %49 : vector<32x128xf32>
    %c0_22 = arith.constant 0 : index
    %c0_23 = arith.constant 0 : index
    %51 = memref.load %arg5[%c0_22, %c0_23] : memref<1x1xf32, #tpu.memory_space<smem>>
    %cst_24 = arith.constant 0.000000e+00 : f32
    %52 = vector.broadcast %cst_24 : f32 to vector<32x128xf32>
    %53 = arith.cmpf oge, %50, %52 : vector<32x128xf32>
    %54 = vector.broadcast %51 : f32 to vector<32x128xf32>
    %55 = arith.mulf %54, %50 : vector<32x128xf32>
    %56 = arith.select %53, %50, %55 : vector<32x128xi1>, vector<32x128xf32>
    %57 = vector.shape_cast %56 : vector<32x128xf32> to vector<1x32x128xf32>
    %58 = arith.truncf %57 : vector<1x32x128xf32> to vector<1x32x128xbf16>
    %c0_25 = arith.constant 0 : index
    %c0_26 = arith.constant 0 : index
    %c0_27 = arith.constant 0 : index
    %59 = vector.load %arg6[%c0_25, %c0_26, %c0_27] : memref<1x32x128xbf16, #tpu.memory_space<vmem>>, vector<1x32x128xbf16>
    tpu.vector_store %arg6[%c0_25, %c0_26, %c0_27], %58 {strides = array<i32>} : memref<1x32x128xbf16, #tpu.memory_space<vmem>>, vector<1x32x128xbf16>,
    return
  }
  func.func @transform_0(%arg0: i32, %arg1: i32) -> (i32, i32, i32, i32) {
    %c0_i32 = arith.constant 0 : i32
    %c0_i32_0 = arith.constant 0 : i32
    %c0_i32_1 = arith.constant 0 : i32
    %c0_i32_2 = arith.constant 0 : i32
    return %arg0, %c0_i32, %c0_i32_0, %c0_i32_1 : i32, i32, i32, i32
  }
  func.func @transform_1(%arg0: i32, %arg1: i32) -> (i32, i32) {
    %c0_i32 = arith.constant 0 : i32
    %c0_i32_0 = arith.constant 0 : i32
    %c0_i32_1 = arith.constant 0 : i32
    return %c0_i32, %c0_i32_0 : i32, i32
  }
  func.func @transform_2(%arg0: i32, %arg1: i32) -> (i32, i32) {
    %c0_i32 = arith.constant 0 : i32
    %c0_i32_0 = arith.constant 0 : i32
    %c0_i32_1 = arith.constant 0 : i32
    return %c0_i32, %c0_i32_0 : i32, i32
  }
  func.func @transform_3(%arg0: i32, %arg1: i32) -> (i32, i32) {
    %c0_i32 = arith.constant 0 : i32
    %c0_i32_0 = arith.constant 0 : i32
    %c0_i32_1 = arith.constant 0 : i32
    return %c0_i32, %c0_i32_0 : i32, i32
  }
  func.func @transform_4(%arg0: i32, %arg1: i32) -> (i32, i32, i32) {
    %c0_i32 = arith.constant 0 : i32
    %c0_i32_0 = arith.constant 0 : i32
    return %arg0, %arg1, %c0_i32 : i32, i32, i32
  }
}

module attributes {stable_mosaic.version = 11 : i64} {
  func.func @_conv3x3_kernel(%arg0: i32, %arg1: i32, %arg2: memref<1x10x10x128xbf16, #tpu.memory_space<vmem>>, %arg3: memref<1152x128xbf16, #tpu.memory_space<vmem>>, %arg4: memref<1x128xf32, #tpu.memory_space<vmem>>, %arg5: memref<1x1xf32, #tpu.memory_space<smem>>, %arg6: memref<1x32x128xbf16, #tpu.memory_space<vmem>>, %arg7: memref<1x32x128xbf16, #tpu.memory_space<vmem>>) attributes {dimension_semantics = [#tpu.dimension_semantics<parallel>, #tpu.dimension_semantics<parallel>], iteration_bounds = array<i64: 2, 2>, scalar_prefetch = 0 : i64, scratch_operands = 0 : i64, tpu.core_type = #tpu.core_type<tc>, window_params = [{transform_indices = @transform_0, window_bounds = array<i64: 1, 10, 10, 128>}, {pipeline_mode = #tpu.pipeline_mode<synchronous>, transform_indices = @transform_1, window_bounds = array<i64: 1152, 128>}, {pipeline_mode = #tpu.pipeline_mode<synchronous>, transform_indices = @transform_2, window_bounds = array<i64: 1, 128>}, {transform_indices = @transform_3, window_bounds = array<i64: 1, 1>}, {transform_indices = @transform_4, window_bounds = array<i64: 1, 32, 128>}, {transform_indices = @transform_5, window_bounds = array<i64: 1, 32, 128>}]} {
    %c4_i32 = arith.constant 4 : i32
    %0 = arith.muli %arg1, %c4_i32 : i32
    %c0 = arith.constant 0 : index
    %1 = arith.index_cast %0 : i32 to index
    %c0_0 = arith.constant 0 : index
    %c0_1 = arith.constant 0 : index
    %2 = vector.load %arg2[%c0, %1, %c0_0, %c0_1] : memref<1x10x10x128xbf16, #tpu.memory_space<vmem>>, vector<1x6x10x128xbf16>
    %3 = vector.shape_cast %2 : vector<1x6x10x128xbf16> to vector<6x10x128xbf16>
    %4 = vector.extract_strided_slice %3 {offsets = [0, 0, 0], sizes = [4, 8, 128], strides = [1, 1, 1]} : vector<6x10x128xbf16> to vector<4x8x128xbf16>
    %5 = vector.shape_cast %4 : vector<4x8x128xbf16> to vector<32x128xbf16>
    %c0_2 = arith.constant 0 : index
    %c0_3 = arith.constant 0 : index
    %6 = vector.load %arg3[%c0_2, %c0_3] : memref<1152x128xbf16, #tpu.memory_space<vmem>>, vector<128x128xbf16>
    %cst = arith.constant dense<0.000000e+00> : vector<32x128xf32>
    %7 = tpu.matmul %5, %6, %cst {dimension_numbers = #tpu.dot_dimension_numbers<[1], [0], [0], [1], [0, 0, 1, 1], [], []>} : vector<32x128xbf16>, vector<128x128xbf16>, vector<32x128xf32> -> vector<32x128xf32>
    %8 = vector.extract_strided_slice %3 {offsets = [0, 1, 0], sizes = [4, 8, 128], strides = [1, 1, 1]} : vector<6x10x128xbf16> to vector<4x8x128xbf16>
    %9 = vector.shape_cast %8 : vector<4x8x128xbf16> to vector<32x128xbf16>
    %c128 = arith.constant 128 : index
    %c0_4 = arith.constant 0 : index
    %10 = vector.load %arg3[%c128, %c0_4] : memref<1152x128xbf16, #tpu.memory_space<vmem>>, vector<128x128xbf16>
    %cst_5 = arith.constant dense<0.000000e+00> : vector<32x128xf32>
    %11 = tpu.matmul %9, %10, %cst_5 {dimension_numbers = #tpu.dot_dimension_numbers<[1], [0], [0], [1], [0, 0, 1, 1], [], []>} : vector<32x128xbf16>, vector<128x128xbf16>, vector<32x128xf32> -> vector<32x128xf32>
    %12 = arith.addf %7, %11 : vector<32x128xf32>
    %13 = vector.extract_strided_slice %3 {offsets = [0, 2, 0], sizes = [4, 8, 128], strides = [1, 1, 1]} : vector<6x10x128xbf16> to vector<4x8x128xbf16>
    %14 = vector.shape_cast %13 : vector<4x8x128xbf16> to vector<32x128xbf16>
    %c256 = arith.constant 256 : index
    %c0_6 = arith.constant 0 : index
    %15 = vector.load %arg3[%c256, %c0_6] : memref<1152x128xbf16, #tpu.memory_space<vmem>>, vector<128x128xbf16>
    %cst_7 = arith.constant dense<0.000000e+00> : vector<32x128xf32>
    %16 = tpu.matmul %14, %15, %cst_7 {dimension_numbers = #tpu.dot_dimension_numbers<[1], [0], [0], [1], [0, 0, 1, 1], [], []>} : vector<32x128xbf16>, vector<128x128xbf16>, vector<32x128xf32> -> vector<32x128xf32>
    %17 = arith.addf %12, %16 : vector<32x128xf32>
    %18 = vector.extract_strided_slice %3 {offsets = [1, 0, 0], sizes = [4, 8, 128], strides = [1, 1, 1]} : vector<6x10x128xbf16> to vector<4x8x128xbf16>
    %19 = vector.shape_cast %18 : vector<4x8x128xbf16> to vector<32x128xbf16>
    %c384 = arith.constant 384 : index
    %c0_8 = arith.constant 0 : index
    %20 = vector.load %arg3[%c384, %c0_8] : memref<1152x128xbf16, #tpu.memory_space<vmem>>, vector<128x128xbf16>
    %cst_9 = arith.constant dense<0.000000e+00> : vector<32x128xf32>
    %21 = tpu.matmul %19, %20, %cst_9 {dimension_numbers = #tpu.dot_dimension_numbers<[1], [0], [0], [1], [0, 0, 1, 1], [], []>} : vector<32x128xbf16>, vector<128x128xbf16>, vector<32x128xf32> -> vector<32x128xf32>
    %22 = arith.addf %17, %21 : vector<32x128xf32>
    %23 = vector.extract_strided_slice %3 {offsets = [1, 1, 0], sizes = [4, 8, 128], strides = [1, 1, 1]} : vector<6x10x128xbf16> to vector<4x8x128xbf16>
    %24 = vector.shape_cast %23 : vector<4x8x128xbf16> to vector<32x128xbf16>
    %c512 = arith.constant 512 : index
    %c0_10 = arith.constant 0 : index
    %25 = vector.load %arg3[%c512, %c0_10] : memref<1152x128xbf16, #tpu.memory_space<vmem>>, vector<128x128xbf16>
    %cst_11 = arith.constant dense<0.000000e+00> : vector<32x128xf32>
    %26 = tpu.matmul %24, %25, %cst_11 {dimension_numbers = #tpu.dot_dimension_numbers<[1], [0], [0], [1], [0, 0, 1, 1], [], []>} : vector<32x128xbf16>, vector<128x128xbf16>, vector<32x128xf32> -> vector<32x128xf32>
    %27 = arith.addf %22, %26 : vector<32x128xf32>
    %28 = vector.extract_strided_slice %3 {offsets = [1, 2, 0], sizes = [4, 8, 128], strides = [1, 1, 1]} : vector<6x10x128xbf16> to vector<4x8x128xbf16>
    %29 = vector.shape_cast %28 : vector<4x8x128xbf16> to vector<32x128xbf16>
    %c640 = arith.constant 640 : index
    %c0_12 = arith.constant 0 : index
    %30 = vector.load %arg3[%c640, %c0_12] : memref<1152x128xbf16, #tpu.memory_space<vmem>>, vector<128x128xbf16>
    %cst_13 = arith.constant dense<0.000000e+00> : vector<32x128xf32>
    %31 = tpu.matmul %29, %30, %cst_13 {dimension_numbers = #tpu.dot_dimension_numbers<[1], [0], [0], [1], [0, 0, 1, 1], [], []>} : vector<32x128xbf16>, vector<128x128xbf16>, vector<32x128xf32> -> vector<32x128xf32>
    %32 = arith.addf %27, %31 : vector<32x128xf32>
    %33 = vector.extract_strided_slice %3 {offsets = [2, 0, 0], sizes = [4, 8, 128], strides = [1, 1, 1]} : vector<6x10x128xbf16> to vector<4x8x128xbf16>
    %34 = vector.shape_cast %33 : vector<4x8x128xbf16> to vector<32x128xbf16>
    %c768 = arith.constant 768 : index
    %c0_14 = arith.constant 0 : index
    %35 = vector.load %arg3[%c768, %c0_14] : memref<1152x128xbf16, #tpu.memory_space<vmem>>, vector<128x128xbf16>
    %cst_15 = arith.constant dense<0.000000e+00> : vector<32x128xf32>
    %36 = tpu.matmul %34, %35, %cst_15 {dimension_numbers = #tpu.dot_dimension_numbers<[1], [0], [0], [1], [0, 0, 1, 1], [], []>} : vector<32x128xbf16>, vector<128x128xbf16>, vector<32x128xf32> -> vector<32x128xf32>
    %37 = arith.addf %32, %36 : vector<32x128xf32>
    %38 = vector.extract_strided_slice %3 {offsets = [2, 1, 0], sizes = [4, 8, 128], strides = [1, 1, 1]} : vector<6x10x128xbf16> to vector<4x8x128xbf16>
    %39 = vector.shape_cast %38 : vector<4x8x128xbf16> to vector<32x128xbf16>
    %c896 = arith.constant 896 : index
    %c0_16 = arith.constant 0 : index
    %40 = vector.load %arg3[%c896, %c0_16] : memref<1152x128xbf16, #tpu.memory_space<vmem>>, vector<128x128xbf16>
    %cst_17 = arith.constant dense<0.000000e+00> : vector<32x128xf32>
    %41 = tpu.matmul %39, %40, %cst_17 {dimension_numbers = #tpu.dot_dimension_numbers<[1], [0], [0], [1], [0, 0, 1, 1], [], []>} : vector<32x128xbf16>, vector<128x128xbf16>, vector<32x128xf32> -> vector<32x128xf32>
    %42 = arith.addf %37, %41 : vector<32x128xf32>
    %43 = vector.extract_strided_slice %3 {offsets = [2, 2, 0], sizes = [4, 8, 128], strides = [1, 1, 1]} : vector<6x10x128xbf16> to vector<4x8x128xbf16>
    %44 = vector.shape_cast %43 : vector<4x8x128xbf16> to vector<32x128xbf16>
    %c1024 = arith.constant 1024 : index
    %c0_18 = arith.constant 0 : index
    %45 = vector.load %arg3[%c1024, %c0_18] : memref<1152x128xbf16, #tpu.memory_space<vmem>>, vector<128x128xbf16>
    %cst_19 = arith.constant dense<0.000000e+00> : vector<32x128xf32>
    %46 = tpu.matmul %44, %45, %cst_19 {dimension_numbers = #tpu.dot_dimension_numbers<[1], [0], [0], [1], [0, 0, 1, 1], [], []>} : vector<32x128xbf16>, vector<128x128xbf16>, vector<32x128xf32> -> vector<32x128xf32>
    %47 = arith.addf %42, %46 : vector<32x128xf32>
    %c0_20 = arith.constant 0 : index
    %c0_21 = arith.constant 0 : index
    %48 = vector.load %arg4[%c0_20, %c0_21] : memref<1x128xf32, #tpu.memory_space<vmem>>, vector<1x128xf32>
    %49 = vector.broadcast %48 : vector<1x128xf32> to vector<32x128xf32>
    %50 = arith.addf %47, %49 : vector<32x128xf32>
    %c0_22 = arith.constant 0 : index
    %c0_23 = arith.constant 0 : index
    %51 = memref.load %arg5[%c0_22, %c0_23] : memref<1x1xf32, #tpu.memory_space<smem>>
    %cst_24 = arith.constant 0.000000e+00 : f32
    %52 = vector.broadcast %cst_24 : f32 to vector<32x128xf32>
    %53 = arith.cmpf oge, %50, %52 : vector<32x128xf32>
    %54 = vector.broadcast %51 : f32 to vector<32x128xf32>
    %55 = arith.mulf %54, %50 : vector<32x128xf32>
    %56 = arith.select %53, %50, %55 : vector<32x128xi1>, vector<32x128xf32>
    %c0_25 = arith.constant 0 : index
    %c0_26 = arith.constant 0 : index
    %c0_27 = arith.constant 0 : index
    %57 = vector.load %arg6[%c0_25, %c0_26, %c0_27] : memref<1x32x128xbf16, #tpu.memory_space<vmem>>, vector<1x32x128xbf16>
    %58 = vector.shape_cast %57 : vector<1x32x128xbf16> to vector<32x128xbf16>
    %59 = arith.extf %58 : vector<32x128xbf16> to vector<32x128xf32>
    %60 = arith.addf %56, %59 : vector<32x128xf32>
    %61 = vector.shape_cast %60 : vector<32x128xf32> to vector<1x32x128xf32>
    %62 = arith.truncf %61 : vector<1x32x128xf32> to vector<1x32x128xbf16>
    %c0_28 = arith.constant 0 : index
    %c0_29 = arith.constant 0 : index
    %c0_30 = arith.constant 0 : index
    %63 = vector.load %arg7[%c0_28, %c0_29, %c0_30] : memref<1x32x128xbf16, #tpu.memory_space<vmem>>, vector<1x32x128xbf16>
    tpu.vector_store %arg7[%c0_28, %c0_29, %c0_30], %62 {strides = array<i32>} : memref<1x32x128xbf16, #tpu.memory_space<vmem>>, vector<1x32x128xbf16>,
    return
  }
  func.func @transform_0(%arg0: i32, %arg1: i32) -> (i32, i32, i32, i32) {
    %c0_i32 = arith.constant 0 : i32
    %c0_i32_0 = arith.constant 0 : i32
    %c0_i32_1 = arith.constant 0 : i32
    %c0_i32_2 = arith.constant 0 : i32
    return %arg0, %c0_i32, %c0_i32_0, %c0_i32_1 : i32, i32, i32, i32
  }
  func.func @transform_1(%arg0: i32, %arg1: i32) -> (i32, i32) {
    %c0_i32 = arith.constant 0 : i32
    %c0_i32_0 = arith.constant 0 : i32
    %c0_i32_1 = arith.constant 0 : i32
    return %c0_i32, %c0_i32_0 : i32, i32
  }
  func.func @transform_2(%arg0: i32, %arg1: i32) -> (i32, i32) {
    %c0_i32 = arith.constant 0 : i32
    %c0_i32_0 = arith.constant 0 : i32
    %c0_i32_1 = arith.constant 0 : i32
    return %c0_i32, %c0_i32_0 : i32, i32
  }
  func.func @transform_3(%arg0: i32, %arg1: i32) -> (i32, i32) {
    %c0_i32 = arith.constant 0 : i32
    %c0_i32_0 = arith.constant 0 : i32
    %c0_i32_1 = arith.constant 0 : i32
    return %c0_i32, %c0_i32_0 : i32, i32
  }
  func.func @transform_4(%arg0: i32, %arg1: i32) -> (i32, i32, i32) {
    %c0_i32 = arith.constant 0 : i32
    %c0_i32_0 = arith.constant 0 : i32
    return %arg0, %arg1, %c0_i32 : i32, i32, i32
  }
  func.func @transform_5(%arg0: i32, %arg1: i32) -> (i32, i32, i32) {
    %c0_i32 = arith.constant 0 : i32
    %c0_i32_0 = arith.constant 0 : i32
    return %arg0, %arg1, %c0_i32 : i32, i32, i32
  }
}

module attributes {stable_mosaic.version = 11 : i64} {
  func.func @_conv3x3_kernel(%arg0: i32, %arg1: i32, %arg2: memref<1x5x5x512xbf16, #tpu.memory_space<vmem>>, %arg3: memref<1152x128xbf16, #tpu.memory_space<vmem>>, %arg4: memref<1x128xf32, #tpu.memory_space<vmem>>, %arg5: memref<1x1xf32, #tpu.memory_space<smem>>, %arg6: memref<1x8x128xbf16, #tpu.memory_space<vmem>>) attributes {dimension_semantics = [#tpu.dimension_semantics<parallel>, #tpu.dimension_semantics<parallel>], iteration_bounds = array<i64: 2, 2>, scalar_prefetch = 0 : i64, scratch_operands = 0 : i64, tpu.core_type = #tpu.core_type<tc>, window_params = [{transform_indices = @transform_0, window_bounds = array<i64: 1, 5, 5, 512>}, {pipeline_mode = #tpu.pipeline_mode<synchronous>, transform_indices = @transform_1, window_bounds = array<i64: 1152, 128>}, {pipeline_mode = #tpu.pipeline_mode<synchronous>, transform_indices = @transform_2, window_bounds = array<i64: 1, 128>}, {transform_indices = @transform_3, window_bounds = array<i64: 1, 1>}, {transform_indices = @transform_4, window_bounds = array<i64: 1, 8, 128>}]} {
    %c2_i32 = arith.constant 2 : i32
    %0 = arith.muli %arg1, %c2_i32 : i32
    %c0 = arith.constant 0 : index
    %1 = arith.index_cast %0 : i32 to index
    %c0_0 = arith.constant 0 : index
    %c0_1 = arith.constant 0 : index
    %2 = vector.load %arg2[%c0, %1, %c0_0, %c0_1] : memref<1x5x5x512xbf16, #tpu.memory_space<vmem>>, vector<1x3x5x512xbf16>
    %3 = vector.shape_cast %2 : vector<1x3x5x512xbf16> to vector<3x5x512xbf16>
    %4 = vector.extract_strided_slice %3 {offsets = [0, 0, 0], sizes = [2, 4, 128], strides = [1, 1, 1]} : vector<3x5x512xbf16> to vector<2x4x128xbf16>
    %5 = vector.shape_cast %4 : vector<2x4x128xbf16> to vector<8x128xbf16>
    %c0_2 = arith.constant 0 : index
    %c0_3 = arith.constant 0 : index
    %6 = vector.load %arg3[%c0_2, %c0_3] : memref<1152x128xbf16, #tpu.memory_space<vmem>>, vector<128x128xbf16>
    %cst = arith.constant dense<0.000000e+00> : vector<8x128xf32>
    %7 = tpu.matmul %5, %6, %cst {dimension_numbers = #tpu.dot_dimension_numbers<[1], [0], [0], [1], [0, 0, 1, 1], [], []>} : vector<8x128xbf16>, vector<128x128xbf16>, vector<8x128xf32> -> vector<8x128xf32>
    %8 = vector.extract_strided_slice %3 {offsets = [0, 0, 128], sizes = [2, 4, 128], strides = [1, 1, 1]} : vector<3x5x512xbf16> to vector<2x4x128xbf16>
    %9 = vector.shape_cast %8 : vector<2x4x128xbf16> to vector<8x128xbf16>
    %c128 = arith.constant 128 : index
    %c0_4 = arith.constant 0 : index
    %10 = vector.load %arg3[%c128, %c0_4] : memref<1152x128xbf16, #tpu.memory_space<vmem>>, vector<128x128xbf16>
    %cst_5 = arith.constant dense<0.000000e+00> : vector<8x128xf32>
    %11 = tpu.matmul %9, %10, %cst_5 {dimension_numbers = #tpu.dot_dimension_numbers<[1], [0], [0], [1], [0, 0, 1, 1], [], []>} : vector<8x128xbf16>, vector<128x128xbf16>, vector<8x128xf32> -> vector<8x128xf32>
    %12 = arith.addf %7, %11 : vector<8x128xf32>
    %13 = vector.extract_strided_slice %3 {offsets = [0, 1, 0], sizes = [2, 4, 128], strides = [1, 1, 1]} : vector<3x5x512xbf16> to vector<2x4x128xbf16>
    %14 = vector.shape_cast %13 : vector<2x4x128xbf16> to vector<8x128xbf16>
    %c256 = arith.constant 256 : index
    %c0_6 = arith.constant 0 : index
    %15 = vector.load %arg3[%c256, %c0_6] : memref<1152x128xbf16, #tpu.memory_space<vmem>>, vector<128x128xbf16>
    %cst_7 = arith.constant dense<0.000000e+00> : vector<8x128xf32>
    %16 = tpu.matmul %14, %15, %cst_7 {dimension_numbers = #tpu.dot_dimension_numbers<[1], [0], [0], [1], [0, 0, 1, 1], [], []>} : vector<8x128xbf16>, vector<128x128xbf16>, vector<8x128xf32> -> vector<8x128xf32>
    %17 = arith.addf %12, %16 : vector<8x128xf32>
    %18 = vector.extract_strided_slice %3 {offsets = [0, 0, 256], sizes = [2, 4, 128], strides = [1, 1, 1]} : vector<3x5x512xbf16> to vector<2x4x128xbf16>
    %19 = vector.shape_cast %18 : vector<2x4x128xbf16> to vector<8x128xbf16>
    %c384 = arith.constant 384 : index
    %c0_8 = arith.constant 0 : index
    %20 = vector.load %arg3[%c384, %c0_8] : memref<1152x128xbf16, #tpu.memory_space<vmem>>, vector<128x128xbf16>
    %cst_9 = arith.constant dense<0.000000e+00> : vector<8x128xf32>
    %21 = tpu.matmul %19, %20, %cst_9 {dimension_numbers = #tpu.dot_dimension_numbers<[1], [0], [0], [1], [0, 0, 1, 1], [], []>} : vector<8x128xbf16>, vector<128x128xbf16>, vector<8x128xf32> -> vector<8x128xf32>
    %22 = arith.addf %17, %21 : vector<8x128xf32>
    %23 = vector.extract_strided_slice %3 {offsets = [0, 0, 384], sizes = [2, 4, 128], strides = [1, 1, 1]} : vector<3x5x512xbf16> to vector<2x4x128xbf16>
    %24 = vector.shape_cast %23 : vector<2x4x128xbf16> to vector<8x128xbf16>
    %c512 = arith.constant 512 : index
    %c0_10 = arith.constant 0 : index
    %25 = vector.load %arg3[%c512, %c0_10] : memref<1152x128xbf16, #tpu.memory_space<vmem>>, vector<128x128xbf16>
    %cst_11 = arith.constant dense<0.000000e+00> : vector<8x128xf32>
    %26 = tpu.matmul %24, %25, %cst_11 {dimension_numbers = #tpu.dot_dimension_numbers<[1], [0], [0], [1], [0, 0, 1, 1], [], []>} : vector<8x128xbf16>, vector<128x128xbf16>, vector<8x128xf32> -> vector<8x128xf32>
    %27 = arith.addf %22, %26 : vector<8x128xf32>
    %28 = vector.extract_strided_slice %3 {offsets = [0, 1, 256], sizes = [2, 4, 128], strides = [1, 1, 1]} : vector<3x5x512xbf16> to vector<2x4x128xbf16>
    %29 = vector.shape_cast %28 : vector<2x4x128xbf16> to vector<8x128xbf16>
    %c640 = arith.constant 640 : index
    %c0_12 = arith.constant 0 : index
    %30 = vector.load %arg3[%c640, %c0_12] : memref<1152x128xbf16, #tpu.memory_space<vmem>>, vector<128x128xbf16>
    %cst_13 = arith.constant dense<0.000000e+00> : vector<8x128xf32>
    %31 = tpu.matmul %29, %30, %cst_13 {dimension_numbers = #tpu.dot_dimension_numbers<[1], [0], [0], [1], [0, 0, 1, 1], [], []>} : vector<8x128xbf16>, vector<128x128xbf16>, vector<8x128xf32> -> vector<8x128xf32>
    %32 = arith.addf %27, %31 : vector<8x128xf32>
    %33 = vector.extract_strided_slice %3 {offsets = [1, 0, 0], sizes = [2, 4, 128], strides = [1, 1, 1]} : vector<3x5x512xbf16> to vector<2x4x128xbf16>
    %34 = vector.shape_cast %33 : vector<2x4x128xbf16> to vector<8x128xbf16>
    %c768 = arith.constant 768 : index
    %c0_14 = arith.constant 0 : index
    %35 = vector.load %arg3[%c768, %c0_14] : memref<1152x128xbf16, #tpu.memory_space<vmem>>, vector<128x128xbf16>
    %cst_15 = arith.constant dense<0.000000e+00> : vector<8x128xf32>
    %36 = tpu.matmul %34, %35, %cst_15 {dimension_numbers = #tpu.dot_dimension_numbers<[1], [0], [0], [1], [0, 0, 1, 1], [], []>} : vector<8x128xbf16>, vector<128x128xbf16>, vector<8x128xf32> -> vector<8x128xf32>
    %37 = arith.addf %32, %36 : vector<8x128xf32>
    %38 = vector.extract_strided_slice %3 {offsets = [1, 0, 128], sizes = [2, 4, 128], strides = [1, 1, 1]} : vector<3x5x512xbf16> to vector<2x4x128xbf16>
    %39 = vector.shape_cast %38 : vector<2x4x128xbf16> to vector<8x128xbf16>
    %c896 = arith.constant 896 : index
    %c0_16 = arith.constant 0 : index
    %40 = vector.load %arg3[%c896, %c0_16] : memref<1152x128xbf16, #tpu.memory_space<vmem>>, vector<128x128xbf16>
    %cst_17 = arith.constant dense<0.000000e+00> : vector<8x128xf32>
    %41 = tpu.matmul %39, %40, %cst_17 {dimension_numbers = #tpu.dot_dimension_numbers<[1], [0], [0], [1], [0, 0, 1, 1], [], []>} : vector<8x128xbf16>, vector<128x128xbf16>, vector<8x128xf32> -> vector<8x128xf32>
    %42 = arith.addf %37, %41 : vector<8x128xf32>
    %43 = vector.extract_strided_slice %3 {offsets = [1, 1, 0], sizes = [2, 4, 128], strides = [1, 1, 1]} : vector<3x5x512xbf16> to vector<2x4x128xbf16>
    %44 = vector.shape_cast %43 : vector<2x4x128xbf16> to vector<8x128xbf16>
    %c1024 = arith.constant 1024 : index
    %c0_18 = arith.constant 0 : index
    %45 = vector.load %arg3[%c1024, %c0_18] : memref<1152x128xbf16, #tpu.memory_space<vmem>>, vector<128x128xbf16>
    %cst_19 = arith.constant dense<0.000000e+00> : vector<8x128xf32>
    %46 = tpu.matmul %44, %45, %cst_19 {dimension_numbers = #tpu.dot_dimension_numbers<[1], [0], [0], [1], [0, 0, 1, 1], [], []>} : vector<8x128xbf16>, vector<128x128xbf16>, vector<8x128xf32> -> vector<8x128xf32>
    %47 = arith.addf %42, %46 : vector<8x128xf32>
    %c0_20 = arith.constant 0 : index
    %c0_21 = arith.constant 0 : index
    %48 = vector.load %arg4[%c0_20, %c0_21] : memref<1x128xf32, #tpu.memory_space<vmem>>, vector<1x128xf32>
    %49 = vector.broadcast %48 : vector<1x128xf32> to vector<8x128xf32>
    %50 = arith.addf %47, %49 : vector<8x128xf32>
    %c0_22 = arith.constant 0 : index
    %c0_23 = arith.constant 0 : index
    %51 = memref.load %arg5[%c0_22, %c0_23] : memref<1x1xf32, #tpu.memory_space<smem>>
    %cst_24 = arith.constant 0.000000e+00 : f32
    %52 = vector.broadcast %cst_24 : f32 to vector<8x128xf32>
    %53 = arith.cmpf oge, %50, %52 : vector<8x128xf32>
    %54 = vector.broadcast %51 : f32 to vector<8x128xf32>
    %55 = arith.mulf %54, %50 : vector<8x128xf32>
    %56 = arith.select %53, %50, %55 : vector<8x128xi1>, vector<8x128xf32>
    %57 = vector.shape_cast %56 : vector<8x128xf32> to vector<1x8x128xf32>
    %58 = arith.truncf %57 : vector<1x8x128xf32> to vector<1x8x128xbf16>
    %c0_25 = arith.constant 0 : index
    %c0_26 = arith.constant 0 : index
    %c0_27 = arith.constant 0 : index
    %59 = vector.load %arg6[%c0_25, %c0_26, %c0_27] : memref<1x8x128xbf16, #tpu.memory_space<vmem>>, vector<1x8x128xbf16>
    tpu.vector_store %arg6[%c0_25, %c0_26, %c0_27], %58 {strides = array<i32>} : memref<1x8x128xbf16, #tpu.memory_space<vmem>>, vector<1x8x128xbf16>,
    return
  }
  func.func @transform_0(%arg0: i32, %arg1: i32) -> (i32, i32, i32, i32) {
    %c0_i32 = arith.constant 0 : i32
    %c0_i32_0 = arith.constant 0 : i32
    %c0_i32_1 = arith.constant 0 : i32
    %c0_i32_2 = arith.constant 0 : i32
    return %arg0, %c0_i32, %c0_i32_0, %c0_i32_1 : i32, i32, i32, i32
  }
  func.func @transform_1(%arg0: i32, %arg1: i32) -> (i32, i32) {
    %c0_i32 = arith.constant 0 : i32
    %c0_i32_0 = arith.constant 0 : i32
    %c0_i32_1 = arith.constant 0 : i32
    return %c0_i32, %c0_i32_0 : i32, i32
  }
  func.func @transform_2(%arg0: i32, %arg1: i32) -> (i32, i32) {
    %c0_i32 = arith.constant 0 : i32
    %c0_i32_0 = arith.constant 0 : i32
    %c0_i32_1 = arith.constant 0 : i32
    return %c0_i32, %c0_i32_0 : i32, i32
  }
  func.func @transform_3(%arg0: i32, %arg1: i32) -> (i32, i32) {
    %c0_i32 = arith.constant 0 : i32
    %c0_i32_0 = arith.constant 0 : i32
    %c0_i32_1 = arith.constant 0 : i32
    return %c0_i32, %c0_i32_0 : i32, i32
  }
  func.func @transform_4(%arg0: i32, %arg1: i32) -> (i32, i32, i32) {
    %c0_i32 = arith.constant 0 : i32
    %c0_i32_0 = arith.constant 0 : i32
    return %arg0, %arg1, %c0_i32 : i32, i32, i32
  }
}

module attributes {stable_mosaic.version = 11 : i64} {
  func.func @_conv3x3_kernel(%arg0: i32, %arg1: i32, %arg2: memref<1x6x6x128xbf16, #tpu.memory_space<vmem>>, %arg3: memref<1152x128xbf16, #tpu.memory_space<vmem>>, %arg4: memref<1x128xf32, #tpu.memory_space<vmem>>, %arg5: memref<1x1xf32, #tpu.memory_space<smem>>, %arg6: memref<1x8x128xbf16, #tpu.memory_space<vmem>>, %arg7: memref<1x8x128xbf16, #tpu.memory_space<vmem>>) attributes {dimension_semantics = [#tpu.dimension_semantics<parallel>, #tpu.dimension_semantics<parallel>], iteration_bounds = array<i64: 2, 2>, scalar_prefetch = 0 : i64, scratch_operands = 0 : i64, tpu.core_type = #tpu.core_type<tc>, window_params = [{transform_indices = @transform_0, window_bounds = array<i64: 1, 6, 6, 128>}, {pipeline_mode = #tpu.pipeline_mode<synchronous>, transform_indices = @transform_1, window_bounds = array<i64: 1152, 128>}, {pipeline_mode = #tpu.pipeline_mode<synchronous>, transform_indices = @transform_2, window_bounds = array<i64: 1, 128>}, {transform_indices = @transform_3, window_bounds = array<i64: 1, 1>}, {transform_indices = @transform_4, window_bounds = array<i64: 1, 8, 128>}, {transform_indices = @transform_5, window_bounds = array<i64: 1, 8, 128>}]} {
    %c2_i32 = arith.constant 2 : i32
    %0 = arith.muli %arg1, %c2_i32 : i32
    %c0 = arith.constant 0 : index
    %1 = arith.index_cast %0 : i32 to index
    %c0_0 = arith.constant 0 : index
    %c0_1 = arith.constant 0 : index
    %2 = vector.load %arg2[%c0, %1, %c0_0, %c0_1] : memref<1x6x6x128xbf16, #tpu.memory_space<vmem>>, vector<1x4x6x128xbf16>
    %3 = vector.shape_cast %2 : vector<1x4x6x128xbf16> to vector<4x6x128xbf16>
    %4 = vector.extract_strided_slice %3 {offsets = [0, 0, 0], sizes = [2, 4, 128], strides = [1, 1, 1]} : vector<4x6x128xbf16> to vector<2x4x128xbf16>
    %5 = vector.shape_cast %4 : vector<2x4x128xbf16> to vector<8x128xbf16>
    %c0_2 = arith.constant 0 : index
    %c0_3 = arith.constant 0 : index
    %6 = vector.load %arg3[%c0_2, %c0_3] : memref<1152x128xbf16, #tpu.memory_space<vmem>>, vector<128x128xbf16>
    %cst = arith.constant dense<0.000000e+00> : vector<8x128xf32>
    %7 = tpu.matmul %5, %6, %cst {dimension_numbers = #tpu.dot_dimension_numbers<[1], [0], [0], [1], [0, 0, 1, 1], [], []>} : vector<8x128xbf16>, vector<128x128xbf16>, vector<8x128xf32> -> vector<8x128xf32>
    %8 = vector.extract_strided_slice %3 {offsets = [0, 1, 0], sizes = [2, 4, 128], strides = [1, 1, 1]} : vector<4x6x128xbf16> to vector<2x4x128xbf16>
    %9 = vector.shape_cast %8 : vector<2x4x128xbf16> to vector<8x128xbf16>
    %c128 = arith.constant 128 : index
    %c0_4 = arith.constant 0 : index
    %10 = vector.load %arg3[%c128, %c0_4] : memref<1152x128xbf16, #tpu.memory_space<vmem>>, vector<128x128xbf16>
    %cst_5 = arith.constant dense<0.000000e+00> : vector<8x128xf32>
    %11 = tpu.matmul %9, %10, %cst_5 {dimension_numbers = #tpu.dot_dimension_numbers<[1], [0], [0], [1], [0, 0, 1, 1], [], []>} : vector<8x128xbf16>, vector<128x128xbf16>, vector<8x128xf32> -> vector<8x128xf32>
    %12 = arith.addf %7, %11 : vector<8x128xf32>
    %13 = vector.extract_strided_slice %3 {offsets = [0, 2, 0], sizes = [2, 4, 128], strides = [1, 1, 1]} : vector<4x6x128xbf16> to vector<2x4x128xbf16>
    %14 = vector.shape_cast %13 : vector<2x4x128xbf16> to vector<8x128xbf16>
    %c256 = arith.constant 256 : index
    %c0_6 = arith.constant 0 : index
    %15 = vector.load %arg3[%c256, %c0_6] : memref<1152x128xbf16, #tpu.memory_space<vmem>>, vector<128x128xbf16>
    %cst_7 = arith.constant dense<0.000000e+00> : vector<8x128xf32>
    %16 = tpu.matmul %14, %15, %cst_7 {dimension_numbers = #tpu.dot_dimension_numbers<[1], [0], [0], [1], [0, 0, 1, 1], [], []>} : vector<8x128xbf16>, vector<128x128xbf16>, vector<8x128xf32> -> vector<8x128xf32>
    %17 = arith.addf %12, %16 : vector<8x128xf32>
    %18 = vector.extract_strided_slice %3 {offsets = [1, 0, 0], sizes = [2, 4, 128], strides = [1, 1, 1]} : vector<4x6x128xbf16> to vector<2x4x128xbf16>
    %19 = vector.shape_cast %18 : vector<2x4x128xbf16> to vector<8x128xbf16>
    %c384 = arith.constant 384 : index
    %c0_8 = arith.constant 0 : index
    %20 = vector.load %arg3[%c384, %c0_8] : memref<1152x128xbf16, #tpu.memory_space<vmem>>, vector<128x128xbf16>
    %cst_9 = arith.constant dense<0.000000e+00> : vector<8x128xf32>
    %21 = tpu.matmul %19, %20, %cst_9 {dimension_numbers = #tpu.dot_dimension_numbers<[1], [0], [0], [1], [0, 0, 1, 1], [], []>} : vector<8x128xbf16>, vector<128x128xbf16>, vector<8x128xf32> -> vector<8x128xf32>
    %22 = arith.addf %17, %21 : vector<8x128xf32>
    %23 = vector.extract_strided_slice %3 {offsets = [1, 1, 0], sizes = [2, 4, 128], strides = [1, 1, 1]} : vector<4x6x128xbf16> to vector<2x4x128xbf16>
    %24 = vector.shape_cast %23 : vector<2x4x128xbf16> to vector<8x128xbf16>
    %c512 = arith.constant 512 : index
    %c0_10 = arith.constant 0 : index
    %25 = vector.load %arg3[%c512, %c0_10] : memref<1152x128xbf16, #tpu.memory_space<vmem>>, vector<128x128xbf16>
    %cst_11 = arith.constant dense<0.000000e+00> : vector<8x128xf32>
    %26 = tpu.matmul %24, %25, %cst_11 {dimension_numbers = #tpu.dot_dimension_numbers<[1], [0], [0], [1], [0, 0, 1, 1], [], []>} : vector<8x128xbf16>, vector<128x128xbf16>, vector<8x128xf32> -> vector<8x128xf32>
    %27 = arith.addf %22, %26 : vector<8x128xf32>
    %28 = vector.extract_strided_slice %3 {offsets = [1, 2, 0], sizes = [2, 4, 128], strides = [1, 1, 1]} : vector<4x6x128xbf16> to vector<2x4x128xbf16>
    %29 = vector.shape_cast %28 : vector<2x4x128xbf16> to vector<8x128xbf16>
    %c640 = arith.constant 640 : index
    %c0_12 = arith.constant 0 : index
    %30 = vector.load %arg3[%c640, %c0_12] : memref<1152x128xbf16, #tpu.memory_space<vmem>>, vector<128x128xbf16>
    %cst_13 = arith.constant dense<0.000000e+00> : vector<8x128xf32>
    %31 = tpu.matmul %29, %30, %cst_13 {dimension_numbers = #tpu.dot_dimension_numbers<[1], [0], [0], [1], [0, 0, 1, 1], [], []>} : vector<8x128xbf16>, vector<128x128xbf16>, vector<8x128xf32> -> vector<8x128xf32>
    %32 = arith.addf %27, %31 : vector<8x128xf32>
    %33 = vector.extract_strided_slice %3 {offsets = [2, 0, 0], sizes = [2, 4, 128], strides = [1, 1, 1]} : vector<4x6x128xbf16> to vector<2x4x128xbf16>
    %34 = vector.shape_cast %33 : vector<2x4x128xbf16> to vector<8x128xbf16>
    %c768 = arith.constant 768 : index
    %c0_14 = arith.constant 0 : index
    %35 = vector.load %arg3[%c768, %c0_14] : memref<1152x128xbf16, #tpu.memory_space<vmem>>, vector<128x128xbf16>
    %cst_15 = arith.constant dense<0.000000e+00> : vector<8x128xf32>
    %36 = tpu.matmul %34, %35, %cst_15 {dimension_numbers = #tpu.dot_dimension_numbers<[1], [0], [0], [1], [0, 0, 1, 1], [], []>} : vector<8x128xbf16>, vector<128x128xbf16>, vector<8x128xf32> -> vector<8x128xf32>
    %37 = arith.addf %32, %36 : vector<8x128xf32>
    %38 = vector.extract_strided_slice %3 {offsets = [2, 1, 0], sizes = [2, 4, 128], strides = [1, 1, 1]} : vector<4x6x128xbf16> to vector<2x4x128xbf16>
    %39 = vector.shape_cast %38 : vector<2x4x128xbf16> to vector<8x128xbf16>
    %c896 = arith.constant 896 : index
    %c0_16 = arith.constant 0 : index
    %40 = vector.load %arg3[%c896, %c0_16] : memref<1152x128xbf16, #tpu.memory_space<vmem>>, vector<128x128xbf16>
    %cst_17 = arith.constant dense<0.000000e+00> : vector<8x128xf32>
    %41 = tpu.matmul %39, %40, %cst_17 {dimension_numbers = #tpu.dot_dimension_numbers<[1], [0], [0], [1], [0, 0, 1, 1], [], []>} : vector<8x128xbf16>, vector<128x128xbf16>, vector<8x128xf32> -> vector<8x128xf32>
    %42 = arith.addf %37, %41 : vector<8x128xf32>
    %43 = vector.extract_strided_slice %3 {offsets = [2, 2, 0], sizes = [2, 4, 128], strides = [1, 1, 1]} : vector<4x6x128xbf16> to vector<2x4x128xbf16>
    %44 = vector.shape_cast %43 : vector<2x4x128xbf16> to vector<8x128xbf16>
    %c1024 = arith.constant 1024 : index
    %c0_18 = arith.constant 0 : index
    %45 = vector.load %arg3[%c1024, %c0_18] : memref<1152x128xbf16, #tpu.memory_space<vmem>>, vector<128x128xbf16>
    %cst_19 = arith.constant dense<0.000000e+00> : vector<8x128xf32>
    %46 = tpu.matmul %44, %45, %cst_19 {dimension_numbers = #tpu.dot_dimension_numbers<[1], [0], [0], [1], [0, 0, 1, 1], [], []>} : vector<8x128xbf16>, vector<128x128xbf16>, vector<8x128xf32> -> vector<8x128xf32>
    %47 = arith.addf %42, %46 : vector<8x128xf32>
    %c0_20 = arith.constant 0 : index
    %c0_21 = arith.constant 0 : index
    %48 = vector.load %arg4[%c0_20, %c0_21] : memref<1x128xf32, #tpu.memory_space<vmem>>, vector<1x128xf32>
    %49 = vector.broadcast %48 : vector<1x128xf32> to vector<8x128xf32>
    %50 = arith.addf %47, %49 : vector<8x128xf32>
    %c0_22 = arith.constant 0 : index
    %c0_23 = arith.constant 0 : index
    %51 = memref.load %arg5[%c0_22, %c0_23] : memref<1x1xf32, #tpu.memory_space<smem>>
    %cst_24 = arith.constant 0.000000e+00 : f32
    %52 = vector.broadcast %cst_24 : f32 to vector<8x128xf32>
    %53 = arith.cmpf oge, %50, %52 : vector<8x128xf32>
    %54 = vector.broadcast %51 : f32 to vector<8x128xf32>
    %55 = arith.mulf %54, %50 : vector<8x128xf32>
    %56 = arith.select %53, %50, %55 : vector<8x128xi1>, vector<8x128xf32>
    %c0_25 = arith.constant 0 : index
    %c0_26 = arith.constant 0 : index
    %c0_27 = arith.constant 0 : index
    %57 = vector.load %arg6[%c0_25, %c0_26, %c0_27] : memref<1x8x128xbf16, #tpu.memory_space<vmem>>, vector<1x8x128xbf16>
    %58 = vector.shape_cast %57 : vector<1x8x128xbf16> to vector<8x128xbf16>
    %59 = arith.extf %58 : vector<8x128xbf16> to vector<8x128xf32>
    %60 = arith.addf %56, %59 : vector<8x128xf32>
    %61 = vector.shape_cast %60 : vector<8x128xf32> to vector<1x8x128xf32>
    %62 = arith.truncf %61 : vector<1x8x128xf32> to vector<1x8x128xbf16>
    %c0_28 = arith.constant 0 : index
    %c0_29 = arith.constant 0 : index
    %c0_30 = arith.constant 0 : index
    %63 = vector.load %arg7[%c0_28, %c0_29, %c0_30] : memref<1x8x128xbf16, #tpu.memory_space<vmem>>, vector<1x8x128xbf16>
    tpu.vector_store %arg7[%c0_28, %c0_29, %c0_30], %62 {strides = array<i32>} : memref<1x8x128xbf16, #tpu.memory_space<vmem>>, vector<1x8x128xbf16>,
    return
  }
  func.func @transform_0(%arg0: i32, %arg1: i32) -> (i32, i32, i32, i32) {
    %c0_i32 = arith.constant 0 : i32
    %c0_i32_0 = arith.constant 0 : i32
    %c0_i32_1 = arith.constant 0 : i32
    %c0_i32_2 = arith.constant 0 : i32
    return %arg0, %c0_i32, %c0_i32_0, %c0_i32_1 : i32, i32, i32, i32
  }
  func.func @transform_1(%arg0: i32, %arg1: i32) -> (i32, i32) {
    %c0_i32 = arith.constant 0 : i32
    %c0_i32_0 = arith.constant 0 : i32
    %c0_i32_1 = arith.constant 0 : i32
    return %c0_i32, %c0_i32_0 : i32, i32
  }
  func.func @transform_2(%arg0: i32, %arg1: i32) -> (i32, i32) {
    %c0_i32 = arith.constant 0 : i32
    %c0_i32_0 = arith.constant 0 : i32
    %c0_i32_1 = arith.constant 0 : i32
    return %c0_i32, %c0_i32_0 : i32, i32
  }
  func.func @transform_3(%arg0: i32, %arg1: i32) -> (i32, i32) {
    %c0_i32 = arith.constant 0 : i32
    %c0_i32_0 = arith.constant 0 : i32
    %c0_i32_1 = arith.constant 0 : i32
    return %c0_i32, %c0_i32_0 : i32, i32
  }
  func.func @transform_4(%arg0: i32, %arg1: i32) -> (i32, i32, i32) {
    %c0_i32 = arith.constant 0 : i32
    %c0_i32_0 = arith.constant 0 : i32
    return %arg0, %arg1, %c0_i32 : i32, i32, i32
  }
  func.func @transform_5(%arg0: i32, %arg1: i32) -> (i32, i32, i32) {
    %c0_i32 = arith.constant 0 : i32
    %c0_i32_0 = arith.constant 0 : i32
    return %arg0, %arg1, %c0_i32 : i32, i32, i32
  }
}

module attributes {stable_mosaic.version = 11 : i64} {
  func.func @_conv3x3_kernel(%arg0: i32, %arg1: i32, %arg2: memref<1x3x3x512xbf16, #tpu.memory_space<vmem>>, %arg3: memref<1152x128xbf16, #tpu.memory_space<vmem>>, %arg4: memref<1x128xf32, #tpu.memory_space<vmem>>, %arg5: memref<1x1xf32, #tpu.memory_space<smem>>, %arg6: memref<1x4x128xbf16, #tpu.memory_space<vmem>>) attributes {dimension_semantics = [#tpu.dimension_semantics<parallel>, #tpu.dimension_semantics<parallel>], iteration_bounds = array<i64: 2, 1>, scalar_prefetch = 0 : i64, scratch_operands = 0 : i64, tpu.core_type = #tpu.core_type<tc>, window_params = [{transform_indices = @transform_0, window_bounds = array<i64: 1, 3, 3, 512>}, {pipeline_mode = #tpu.pipeline_mode<synchronous>, transform_indices = @transform_1, window_bounds = array<i64: 1152, 128>}, {pipeline_mode = #tpu.pipeline_mode<synchronous>, transform_indices = @transform_2, window_bounds = array<i64: 1, 128>}, {transform_indices = @transform_3, window_bounds = array<i64: 1, 1>}, {transform_indices = @transform_4, window_bounds = array<i64: 1, 4, 128>}]} {
    %c2_i32 = arith.constant 2 : i32
    %0 = arith.muli %arg1, %c2_i32 : i32
    %c0 = arith.constant 0 : index
    %1 = arith.index_cast %0 : i32 to index
    %c0_0 = arith.constant 0 : index
    %c0_1 = arith.constant 0 : index
    %2 = vector.load %arg2[%c0, %1, %c0_0, %c0_1] : memref<1x3x3x512xbf16, #tpu.memory_space<vmem>>, vector<1x3x3x512xbf16>
    %3 = vector.shape_cast %2 : vector<1x3x3x512xbf16> to vector<3x3x512xbf16>
    %4 = vector.extract_strided_slice %3 {offsets = [0, 0, 0], sizes = [2, 2, 128], strides = [1, 1, 1]} : vector<3x3x512xbf16> to vector<2x2x128xbf16>
    %5 = vector.shape_cast %4 : vector<2x2x128xbf16> to vector<4x128xbf16>
    %c0_2 = arith.constant 0 : index
    %c0_3 = arith.constant 0 : index
    %6 = vector.load %arg3[%c0_2, %c0_3] : memref<1152x128xbf16, #tpu.memory_space<vmem>>, vector<128x128xbf16>
    %cst = arith.constant dense<0.000000e+00> : vector<4x128xf32>
    %7 = tpu.matmul %5, %6, %cst {dimension_numbers = #tpu.dot_dimension_numbers<[1], [0], [0], [1], [0, 0, 1, 1], [], []>} : vector<4x128xbf16>, vector<128x128xbf16>, vector<4x128xf32> -> vector<4x128xf32>
    %8 = vector.extract_strided_slice %3 {offsets = [0, 0, 128], sizes = [2, 2, 128], strides = [1, 1, 1]} : vector<3x3x512xbf16> to vector<2x2x128xbf16>
    %9 = vector.shape_cast %8 : vector<2x2x128xbf16> to vector<4x128xbf16>
    %c128 = arith.constant 128 : index
    %c0_4 = arith.constant 0 : index
    %10 = vector.load %arg3[%c128, %c0_4] : memref<1152x128xbf16, #tpu.memory_space<vmem>>, vector<128x128xbf16>
    %cst_5 = arith.constant dense<0.000000e+00> : vector<4x128xf32>
    %11 = tpu.matmul %9, %10, %cst_5 {dimension_numbers = #tpu.dot_dimension_numbers<[1], [0], [0], [1], [0, 0, 1, 1], [], []>} : vector<4x128xbf16>, vector<128x128xbf16>, vector<4x128xf32> -> vector<4x128xf32>
    %12 = arith.addf %7, %11 : vector<4x128xf32>
    %13 = vector.extract_strided_slice %3 {offsets = [0, 1, 0], sizes = [2, 2, 128], strides = [1, 1, 1]} : vector<3x3x512xbf16> to vector<2x2x128xbf16>
    %14 = vector.shape_cast %13 : vector<2x2x128xbf16> to vector<4x128xbf16>
    %c256 = arith.constant 256 : index
    %c0_6 = arith.constant 0 : index
    %15 = vector.load %arg3[%c256, %c0_6] : memref<1152x128xbf16, #tpu.memory_space<vmem>>, vector<128x128xbf16>
    %cst_7 = arith.constant dense<0.000000e+00> : vector<4x128xf32>
    %16 = tpu.matmul %14, %15, %cst_7 {dimension_numbers = #tpu.dot_dimension_numbers<[1], [0], [0], [1], [0, 0, 1, 1], [], []>} : vector<4x128xbf16>, vector<128x128xbf16>, vector<4x128xf32> -> vector<4x128xf32>
    %17 = arith.addf %12, %16 : vector<4x128xf32>
    %18 = vector.extract_strided_slice %3 {offsets = [0, 0, 256], sizes = [2, 2, 128], strides = [1, 1, 1]} : vector<3x3x512xbf16> to vector<2x2x128xbf16>
    %19 = vector.shape_cast %18 : vector<2x2x128xbf16> to vector<4x128xbf16>
    %c384 = arith.constant 384 : index
    %c0_8 = arith.constant 0 : index
    %20 = vector.load %arg3[%c384, %c0_8] : memref<1152x128xbf16, #tpu.memory_space<vmem>>, vector<128x128xbf16>
    %cst_9 = arith.constant dense<0.000000e+00> : vector<4x128xf32>
    %21 = tpu.matmul %19, %20, %cst_9 {dimension_numbers = #tpu.dot_dimension_numbers<[1], [0], [0], [1], [0, 0, 1, 1], [], []>} : vector<4x128xbf16>, vector<128x128xbf16>, vector<4x128xf32> -> vector<4x128xf32>
    %22 = arith.addf %17, %21 : vector<4x128xf32>
    %23 = vector.extract_strided_slice %3 {offsets = [0, 0, 384], sizes = [2, 2, 128], strides = [1, 1, 1]} : vector<3x3x512xbf16> to vector<2x2x128xbf16>
    %24 = vector.shape_cast %23 : vector<2x2x128xbf16> to vector<4x128xbf16>
    %c512 = arith.constant 512 : index
    %c0_10 = arith.constant 0 : index
    %25 = vector.load %arg3[%c512, %c0_10] : memref<1152x128xbf16, #tpu.memory_space<vmem>>, vector<128x128xbf16>
    %cst_11 = arith.constant dense<0.000000e+00> : vector<4x128xf32>
    %26 = tpu.matmul %24, %25, %cst_11 {dimension_numbers = #tpu.dot_dimension_numbers<[1], [0], [0], [1], [0, 0, 1, 1], [], []>} : vector<4x128xbf16>, vector<128x128xbf16>, vector<4x128xf32> -> vector<4x128xf32>
    %27 = arith.addf %22, %26 : vector<4x128xf32>
    %28 = vector.extract_strided_slice %3 {offsets = [0, 1, 256], sizes = [2, 2, 128], strides = [1, 1, 1]} : vector<3x3x512xbf16> to vector<2x2x128xbf16>
    %29 = vector.shape_cast %28 : vector<2x2x128xbf16> to vector<4x128xbf16>
    %c640 = arith.constant 640 : index
    %c0_12 = arith.constant 0 : index
    %30 = vector.load %arg3[%c640, %c0_12] : memref<1152x128xbf16, #tpu.memory_space<vmem>>, vector<128x128xbf16>
    %cst_13 = arith.constant dense<0.000000e+00> : vector<4x128xf32>
    %31 = tpu.matmul %29, %30, %cst_13 {dimension_numbers = #tpu.dot_dimension_numbers<[1], [0], [0], [1], [0, 0, 1, 1], [], []>} : vector<4x128xbf16>, vector<128x128xbf16>, vector<4x128xf32> -> vector<4x128xf32>
    %32 = arith.addf %27, %31 : vector<4x128xf32>
    %33 = vector.extract_strided_slice %3 {offsets = [1, 0, 0], sizes = [2, 2, 128], strides = [1, 1, 1]} : vector<3x3x512xbf16> to vector<2x2x128xbf16>
    %34 = vector.shape_cast %33 : vector<2x2x128xbf16> to vector<4x128xbf16>
    %c768 = arith.constant 768 : index
    %c0_14 = arith.constant 0 : index
    %35 = vector.load %arg3[%c768, %c0_14] : memref<1152x128xbf16, #tpu.memory_space<vmem>>, vector<128x128xbf16>
    %cst_15 = arith.constant dense<0.000000e+00> : vector<4x128xf32>
    %36 = tpu.matmul %34, %35, %cst_15 {dimension_numbers = #tpu.dot_dimension_numbers<[1], [0], [0], [1], [0, 0, 1, 1], [], []>} : vector<4x128xbf16>, vector<128x128xbf16>, vector<4x128xf32> -> vector<4x128xf32>
    %37 = arith.addf %32, %36 : vector<4x128xf32>
    %38 = vector.extract_strided_slice %3 {offsets = [1, 0, 128], sizes = [2, 2, 128], strides = [1, 1, 1]} : vector<3x3x512xbf16> to vector<2x2x128xbf16>
    %39 = vector.shape_cast %38 : vector<2x2x128xbf16> to vector<4x128xbf16>
    %c896 = arith.constant 896 : index
    %c0_16 = arith.constant 0 : index
    %40 = vector.load %arg3[%c896, %c0_16] : memref<1152x128xbf16, #tpu.memory_space<vmem>>, vector<128x128xbf16>
    %cst_17 = arith.constant dense<0.000000e+00> : vector<4x128xf32>
    %41 = tpu.matmul %39, %40, %cst_17 {dimension_numbers = #tpu.dot_dimension_numbers<[1], [0], [0], [1], [0, 0, 1, 1], [], []>} : vector<4x128xbf16>, vector<128x128xbf16>, vector<4x128xf32> -> vector<4x128xf32>
    %42 = arith.addf %37, %41 : vector<4x128xf32>
    %43 = vector.extract_strided_slice %3 {offsets = [1, 1, 0], sizes = [2, 2, 128], strides = [1, 1, 1]} : vector<3x3x512xbf16> to vector<2x2x128xbf16>
    %44 = vector.shape_cast %43 : vector<2x2x128xbf16> to vector<4x128xbf16>
    %c1024 = arith.constant 1024 : index
    %c0_18 = arith.constant 0 : index
    %45 = vector.load %arg3[%c1024, %c0_18] : memref<1152x128xbf16, #tpu.memory_space<vmem>>, vector<128x128xbf16>
    %cst_19 = arith.constant dense<0.000000e+00> : vector<4x128xf32>
    %46 = tpu.matmul %44, %45, %cst_19 {dimension_numbers = #tpu.dot_dimension_numbers<[1], [0], [0], [1], [0, 0, 1, 1], [], []>} : vector<4x128xbf16>, vector<128x128xbf16>, vector<4x128xf32> -> vector<4x128xf32>
    %47 = arith.addf %42, %46 : vector<4x128xf32>
    %c0_20 = arith.constant 0 : index
    %c0_21 = arith.constant 0 : index
    %48 = vector.load %arg4[%c0_20, %c0_21] : memref<1x128xf32, #tpu.memory_space<vmem>>, vector<1x128xf32>
    %49 = vector.broadcast %48 : vector<1x128xf32> to vector<4x128xf32>
    %50 = arith.addf %47, %49 : vector<4x128xf32>
    %c0_22 = arith.constant 0 : index
    %c0_23 = arith.constant 0 : index
    %51 = memref.load %arg5[%c0_22, %c0_23] : memref<1x1xf32, #tpu.memory_space<smem>>
    %cst_24 = arith.constant 0.000000e+00 : f32
    %52 = vector.broadcast %cst_24 : f32 to vector<4x128xf32>
    %53 = arith.cmpf oge, %50, %52 : vector<4x128xf32>
    %54 = vector.broadcast %51 : f32 to vector<4x128xf32>
    %55 = arith.mulf %54, %50 : vector<4x128xf32>
    %56 = arith.select %53, %50, %55 : vector<4x128xi1>, vector<4x128xf32>
    %57 = vector.shape_cast %56 : vector<4x128xf32> to vector<1x4x128xf32>
    %58 = arith.truncf %57 : vector<1x4x128xf32> to vector<1x4x128xbf16>
    %c0_25 = arith.constant 0 : index
    %c0_26 = arith.constant 0 : index
    %c0_27 = arith.constant 0 : index
    %59 = vector.load %arg6[%c0_25, %c0_26, %c0_27] : memref<1x4x128xbf16, #tpu.memory_space<vmem>>, vector<1x4x128xbf16>
    tpu.vector_store %arg6[%c0_25, %c0_26, %c0_27], %58 {strides = array<i32>} : memref<1x4x128xbf16, #tpu.memory_space<vmem>>, vector<1x4x128xbf16>,
    return
  }
  func.func @transform_0(%arg0: i32, %arg1: i32) -> (i32, i32, i32, i32) {
    %c0_i32 = arith.constant 0 : i32
    %c0_i32_0 = arith.constant 0 : i32
    %c0_i32_1 = arith.constant 0 : i32
    %c0_i32_2 = arith.constant 0 : i32
    return %arg0, %c0_i32, %c0_i32_0, %c0_i32_1 : i32, i32, i32, i32
  }
  func.func @transform_1(%arg0: i32, %arg1: i32) -> (i32, i32) {
    %c0_i32 = arith.constant 0 : i32
    %c0_i32_0 = arith.constant 0 : i32
    %c0_i32_1 = arith.constant 0 : i32
    return %c0_i32, %c0_i32_0 : i32, i32
  }
  func.func @transform_2(%arg0: i32, %arg1: i32) -> (i32, i32) {
    %c0_i32 = arith.constant 0 : i32
    %c0_i32_0 = arith.constant 0 : i32
    %c0_i32_1 = arith.constant 0 : i32
    return %c0_i32, %c0_i32_0 : i32, i32
  }
  func.func @transform_3(%arg0: i32, %arg1: i32) -> (i32, i32) {
    %c0_i32 = arith.constant 0 : i32
    %c0_i32_0 = arith.constant 0 : i32
    %c0_i32_1 = arith.constant 0 : i32
    return %c0_i32, %c0_i32_0 : i32, i32
  }
  func.func @transform_4(%arg0: i32, %arg1: i32) -> (i32, i32, i32) {
    %c0_i32 = arith.constant 0 : i32
    %c0_i32_0 = arith.constant 0 : i32
    return %arg0, %arg1, %c0_i32 : i32, i32, i32
  }
}

module attributes {stable_mosaic.version = 11 : i64} {
  func.func @_conv3x3_kernel(%arg0: i32, %arg1: i32, %arg2: memref<1x4x4x128xbf16, #tpu.memory_space<vmem>>, %arg3: memref<1152x128xbf16, #tpu.memory_space<vmem>>, %arg4: memref<1x128xf32, #tpu.memory_space<vmem>>, %arg5: memref<1x1xf32, #tpu.memory_space<smem>>, %arg6: memref<1x4x128xbf16, #tpu.memory_space<vmem>>, %arg7: memref<1x4x128xbf16, #tpu.memory_space<vmem>>) attributes {dimension_semantics = [#tpu.dimension_semantics<parallel>, #tpu.dimension_semantics<parallel>], iteration_bounds = array<i64: 2, 1>, scalar_prefetch = 0 : i64, scratch_operands = 0 : i64, tpu.core_type = #tpu.core_type<tc>, window_params = [{transform_indices = @transform_0, window_bounds = array<i64: 1, 4, 4, 128>}, {pipeline_mode = #tpu.pipeline_mode<synchronous>, transform_indices = @transform_1, window_bounds = array<i64: 1152, 128>}, {pipeline_mode = #tpu.pipeline_mode<synchronous>, transform_indices = @transform_2, window_bounds = array<i64: 1, 128>}, {transform_indices = @transform_3, window_bounds = array<i64: 1, 1>}, {transform_indices = @transform_4, window_bounds = array<i64: 1, 4, 128>}, {transform_indices = @transform_5, window_bounds = array<i64: 1, 4, 128>}]} {
    %c2_i32 = arith.constant 2 : i32
    %0 = arith.muli %arg1, %c2_i32 : i32
    %c0 = arith.constant 0 : index
    %1 = arith.index_cast %0 : i32 to index
    %c0_0 = arith.constant 0 : index
    %c0_1 = arith.constant 0 : index
    %2 = vector.load %arg2[%c0, %1, %c0_0, %c0_1] : memref<1x4x4x128xbf16, #tpu.memory_space<vmem>>, vector<1x4x4x128xbf16>
    %3 = vector.shape_cast %2 : vector<1x4x4x128xbf16> to vector<4x4x128xbf16>
    %4 = vector.extract_strided_slice %3 {offsets = [0, 0, 0], sizes = [2, 2, 128], strides = [1, 1, 1]} : vector<4x4x128xbf16> to vector<2x2x128xbf16>
    %5 = vector.shape_cast %4 : vector<2x2x128xbf16> to vector<4x128xbf16>
    %c0_2 = arith.constant 0 : index
    %c0_3 = arith.constant 0 : index
    %6 = vector.load %arg3[%c0_2, %c0_3] : memref<1152x128xbf16, #tpu.memory_space<vmem>>, vector<128x128xbf16>
    %cst = arith.constant dense<0.000000e+00> : vector<4x128xf32>
    %7 = tpu.matmul %5, %6, %cst {dimension_numbers = #tpu.dot_dimension_numbers<[1], [0], [0], [1], [0, 0, 1, 1], [], []>} : vector<4x128xbf16>, vector<128x128xbf16>, vector<4x128xf32> -> vector<4x128xf32>
    %8 = vector.extract_strided_slice %3 {offsets = [0, 1, 0], sizes = [2, 2, 128], strides = [1, 1, 1]} : vector<4x4x128xbf16> to vector<2x2x128xbf16>
    %9 = vector.shape_cast %8 : vector<2x2x128xbf16> to vector<4x128xbf16>
    %c128 = arith.constant 128 : index
    %c0_4 = arith.constant 0 : index
    %10 = vector.load %arg3[%c128, %c0_4] : memref<1152x128xbf16, #tpu.memory_space<vmem>>, vector<128x128xbf16>
    %cst_5 = arith.constant dense<0.000000e+00> : vector<4x128xf32>
    %11 = tpu.matmul %9, %10, %cst_5 {dimension_numbers = #tpu.dot_dimension_numbers<[1], [0], [0], [1], [0, 0, 1, 1], [], []>} : vector<4x128xbf16>, vector<128x128xbf16>, vector<4x128xf32> -> vector<4x128xf32>
    %12 = arith.addf %7, %11 : vector<4x128xf32>
    %13 = vector.extract_strided_slice %3 {offsets = [0, 2, 0], sizes = [2, 2, 128], strides = [1, 1, 1]} : vector<4x4x128xbf16> to vector<2x2x128xbf16>
    %14 = vector.shape_cast %13 : vector<2x2x128xbf16> to vector<4x128xbf16>
    %c256 = arith.constant 256 : index
    %c0_6 = arith.constant 0 : index
    %15 = vector.load %arg3[%c256, %c0_6] : memref<1152x128xbf16, #tpu.memory_space<vmem>>, vector<128x128xbf16>
    %cst_7 = arith.constant dense<0.000000e+00> : vector<4x128xf32>
    %16 = tpu.matmul %14, %15, %cst_7 {dimension_numbers = #tpu.dot_dimension_numbers<[1], [0], [0], [1], [0, 0, 1, 1], [], []>} : vector<4x128xbf16>, vector<128x128xbf16>, vector<4x128xf32> -> vector<4x128xf32>
    %17 = arith.addf %12, %16 : vector<4x128xf32>
    %18 = vector.extract_strided_slice %3 {offsets = [1, 0, 0], sizes = [2, 2, 128], strides = [1, 1, 1]} : vector<4x4x128xbf16> to vector<2x2x128xbf16>
    %19 = vector.shape_cast %18 : vector<2x2x128xbf16> to vector<4x128xbf16>
    %c384 = arith.constant 384 : index
    %c0_8 = arith.constant 0 : index
    %20 = vector.load %arg3[%c384, %c0_8] : memref<1152x128xbf16, #tpu.memory_space<vmem>>, vector<128x128xbf16>
    %cst_9 = arith.constant dense<0.000000e+00> : vector<4x128xf32>
    %21 = tpu.matmul %19, %20, %cst_9 {dimension_numbers = #tpu.dot_dimension_numbers<[1], [0], [0], [1], [0, 0, 1, 1], [], []>} : vector<4x128xbf16>, vector<128x128xbf16>, vector<4x128xf32> -> vector<4x128xf32>
    %22 = arith.addf %17, %21 : vector<4x128xf32>
    %23 = vector.extract_strided_slice %3 {offsets = [1, 1, 0], sizes = [2, 2, 128], strides = [1, 1, 1]} : vector<4x4x128xbf16> to vector<2x2x128xbf16>
    %24 = vector.shape_cast %23 : vector<2x2x128xbf16> to vector<4x128xbf16>
    %c512 = arith.constant 512 : index
    %c0_10 = arith.constant 0 : index
    %25 = vector.load %arg3[%c512, %c0_10] : memref<1152x128xbf16, #tpu.memory_space<vmem>>, vector<128x128xbf16>
    %cst_11 = arith.constant dense<0.000000e+00> : vector<4x128xf32>
    %26 = tpu.matmul %24, %25, %cst_11 {dimension_numbers = #tpu.dot_dimension_numbers<[1], [0], [0], [1], [0, 0, 1, 1], [], []>} : vector<4x128xbf16>, vector<128x128xbf16>, vector<4x128xf32> -> vector<4x128xf32>
    %27 = arith.addf %22, %26 : vector<4x128xf32>
    %28 = vector.extract_strided_slice %3 {offsets = [1, 2, 0], sizes = [2, 2, 128], strides = [1, 1, 1]} : vector<4x4x128xbf16> to vector<2x2x128xbf16>
    %29 = vector.shape_cast %28 : vector<2x2x128xbf16> to vector<4x128xbf16>
    %c640 = arith.constant 640 : index
    %c0_12 = arith.constant 0 : index
    %30 = vector.load %arg3[%c640, %c0_12] : memref<1152x128xbf16, #tpu.memory_space<vmem>>, vector<128x128xbf16>
    %cst_13 = arith.constant dense<0.000000e+00> : vector<4x128xf32>
    %31 = tpu.matmul %29, %30, %cst_13 {dimension_numbers = #tpu.dot_dimension_numbers<[1], [0], [0], [1], [0, 0, 1, 1], [], []>} : vector<4x128xbf16>, vector<128x128xbf16>, vector<4x128xf32> -> vector<4x128xf32>
    %32 = arith.addf %27, %31 : vector<4x128xf32>
    %33 = vector.extract_strided_slice %3 {offsets = [2, 0, 0], sizes = [2, 2, 128], strides = [1, 1, 1]} : vector<4x4x128xbf16> to vector<2x2x128xbf16>
    %34 = vector.shape_cast %33 : vector<2x2x128xbf16> to vector<4x128xbf16>
    %c768 = arith.constant 768 : index
    %c0_14 = arith.constant 0 : index
    %35 = vector.load %arg3[%c768, %c0_14] : memref<1152x128xbf16, #tpu.memory_space<vmem>>, vector<128x128xbf16>
    %cst_15 = arith.constant dense<0.000000e+00> : vector<4x128xf32>
    %36 = tpu.matmul %34, %35, %cst_15 {dimension_numbers = #tpu.dot_dimension_numbers<[1], [0], [0], [1], [0, 0, 1, 1], [], []>} : vector<4x128xbf16>, vector<128x128xbf16>, vector<4x128xf32> -> vector<4x128xf32>
    %37 = arith.addf %32, %36 : vector<4x128xf32>
    %38 = vector.extract_strided_slice %3 {offsets = [2, 1, 0], sizes = [2, 2, 128], strides = [1, 1, 1]} : vector<4x4x128xbf16> to vector<2x2x128xbf16>
    %39 = vector.shape_cast %38 : vector<2x2x128xbf16> to vector<4x128xbf16>
    %c896 = arith.constant 896 : index
    %c0_16 = arith.constant 0 : index
    %40 = vector.load %arg3[%c896, %c0_16] : memref<1152x128xbf16, #tpu.memory_space<vmem>>, vector<128x128xbf16>
    %cst_17 = arith.constant dense<0.000000e+00> : vector<4x128xf32>
    %41 = tpu.matmul %39, %40, %cst_17 {dimension_numbers = #tpu.dot_dimension_numbers<[1], [0], [0], [1], [0, 0, 1, 1], [], []>} : vector<4x128xbf16>, vector<128x128xbf16>, vector<4x128xf32> -> vector<4x128xf32>
    %42 = arith.addf %37, %41 : vector<4x128xf32>
    %43 = vector.extract_strided_slice %3 {offsets = [2, 2, 0], sizes = [2, 2, 128], strides = [1, 1, 1]} : vector<4x4x128xbf16> to vector<2x2x128xbf16>
    %44 = vector.shape_cast %43 : vector<2x2x128xbf16> to vector<4x128xbf16>
    %c1024 = arith.constant 1024 : index
    %c0_18 = arith.constant 0 : index
    %45 = vector.load %arg3[%c1024, %c0_18] : memref<1152x128xbf16, #tpu.memory_space<vmem>>, vector<128x128xbf16>
    %cst_19 = arith.constant dense<0.000000e+00> : vector<4x128xf32>
    %46 = tpu.matmul %44, %45, %cst_19 {dimension_numbers = #tpu.dot_dimension_numbers<[1], [0], [0], [1], [0, 0, 1, 1], [], []>} : vector<4x128xbf16>, vector<128x128xbf16>, vector<4x128xf32> -> vector<4x128xf32>
    %47 = arith.addf %42, %46 : vector<4x128xf32>
    %c0_20 = arith.constant 0 : index
    %c0_21 = arith.constant 0 : index
    %48 = vector.load %arg4[%c0_20, %c0_21] : memref<1x128xf32, #tpu.memory_space<vmem>>, vector<1x128xf32>
    %49 = vector.broadcast %48 : vector<1x128xf32> to vector<4x128xf32>
    %50 = arith.addf %47, %49 : vector<4x128xf32>
    %c0_22 = arith.constant 0 : index
    %c0_23 = arith.constant 0 : index
    %51 = memref.load %arg5[%c0_22, %c0_23] : memref<1x1xf32, #tpu.memory_space<smem>>
    %cst_24 = arith.constant 0.000000e+00 : f32
    %52 = vector.broadcast %cst_24 : f32 to vector<4x128xf32>
    %53 = arith.cmpf oge, %50, %52 : vector<4x128xf32>
    %54 = vector.broadcast %51 : f32 to vector<4x128xf32>
    %55 = arith.mulf %54, %50 : vector<4x128xf32>
    %56 = arith.select %53, %50, %55 : vector<4x128xi1>, vector<4x128xf32>
    %c0_25 = arith.constant 0 : index
    %c0_26 = arith.constant 0 : index
    %c0_27 = arith.constant 0 : index
    %57 = vector.load %arg6[%c0_25, %c0_26, %c0_27] : memref<1x4x128xbf16, #tpu.memory_space<vmem>>, vector<1x4x128xbf16>
    %58 = vector.shape_cast %57 : vector<1x4x128xbf16> to vector<4x128xbf16>
    %59 = arith.extf %58 : vector<4x128xbf16> to vector<4x128xf32>
    %60 = arith.addf %56, %59 : vector<4x128xf32>
    %61 = vector.shape_cast %60 : vector<4x128xf32> to vector<1x4x128xf32>
    %62 = arith.truncf %61 : vector<1x4x128xf32> to vector<1x4x128xbf16>
    %c0_28 = arith.constant 0 : index
    %c0_29 = arith.constant 0 : index
    %c0_30 = arith.constant 0 : index
    %63 = vector.load %arg7[%c0_28, %c0_29, %c0_30] : memref<1x4x128xbf16, #tpu.memory_space<vmem>>, vector<1x4x128xbf16>
    tpu.vector_store %arg7[%c0_28, %c0_29, %c0_30], %62 {strides = array<i32>} : memref<1x4x128xbf16, #tpu.memory_space<vmem>>, vector<1x4x128xbf16>,
    return
  }
  func.func @transform_0(%arg0: i32, %arg1: i32) -> (i32, i32, i32, i32) {
    %c0_i32 = arith.constant 0 : i32
    %c0_i32_0 = arith.constant 0 : i32
    %c0_i32_1 = arith.constant 0 : i32
    %c0_i32_2 = arith.constant 0 : i32
    return %arg0, %c0_i32, %c0_i32_0, %c0_i32_1 : i32, i32, i32, i32
  }
  func.func @transform_1(%arg0: i32, %arg1: i32) -> (i32, i32) {
    %c0_i32 = arith.constant 0 : i32
    %c0_i32_0 = arith.constant 0 : i32
    %c0_i32_1 = arith.constant 0 : i32
    return %c0_i32, %c0_i32_0 : i32, i32
  }
  func.func @transform_2(%arg0: i32, %arg1: i32) -> (i32, i32) {
    %c0_i32 = arith.constant 0 : i32
    %c0_i32_0 = arith.constant 0 : i32
    %c0_i32_1 = arith.constant 0 : i32
    return %c0_i32, %c0_i32_0 : i32, i32
  }
  func.func @transform_3(%arg0: i32, %arg1: i32) -> (i32, i32) {
    %c0_i32 = arith.constant 0 : i32
    %c0_i32_0 = arith.constant 0 : i32
    %c0_i32_1 = arith.constant 0 : i32
    return %c0_i32, %c0_i32_0 : i32, i32
  }
  func.func @transform_4(%arg0: i32, %arg1: i32) -> (i32, i32, i32) {
    %c0_i32 = arith.constant 0 : i32
    %c0_i32_0 = arith.constant 0 : i32
    return %arg0, %arg1, %c0_i32 : i32, i32, i32
  }
  func.func @transform_5(%arg0: i32, %arg1: i32) -> (i32, i32, i32) {
    %c0_i32 = arith.constant 0 : i32
    %c0_i32_0 = arith.constant 0 : i32
    return %arg0, %arg1, %c0_i32 : i32, i32, i32
  }
}

module attributes {stable_mosaic.version = 11 : i64} {
  func.func @_matmul_kernel(%arg0: i32, %arg1: memref<8x128xbf16, #tpu.memory_space<vmem>>, %arg2: memref<128x128xbf16, #tpu.memory_space<vmem>>, %arg3: memref<1x128xf32, #tpu.memory_space<vmem>>, %arg4: memref<8x128xbf16, #tpu.memory_space<vmem>>) attributes {dimension_semantics = [#tpu.dimension_semantics<parallel>], iteration_bounds = array<i64: 1>, scalar_prefetch = 0 : i64, scratch_operands = 0 : i64, tpu.core_type = #tpu.core_type<tc>, window_params = [{transform_indices = @transform_0, window_bounds = array<i64: 8, 128>}, {pipeline_mode = #tpu.pipeline_mode<synchronous>, transform_indices = @transform_1, window_bounds = array<i64: 128, 128>}, {pipeline_mode = #tpu.pipeline_mode<synchronous>, transform_indices = @transform_2, window_bounds = array<i64: 1, 128>}, {transform_indices = @transform_3, window_bounds = array<i64: 8, 128>}]} {
    %c0 = arith.constant 0 : index
    %c0_0 = arith.constant 0 : index
    %0 = vector.load %arg1[%c0, %c0_0] : memref<8x128xbf16, #tpu.memory_space<vmem>>, vector<8x128xbf16>
    %c0_1 = arith.constant 0 : index
    %c0_2 = arith.constant 0 : index
    %1 = vector.load %arg2[%c0_1, %c0_2] : memref<128x128xbf16, #tpu.memory_space<vmem>>, vector<128x128xbf16>
    %cst = arith.constant dense<0.000000e+00> : vector<8x128xf32>
    %2 = tpu.matmul %0, %1, %cst {dimension_numbers = #tpu.dot_dimension_numbers<[1], [0], [0], [1], [0, 0, 1, 1], [], []>} : vector<8x128xbf16>, vector<128x128xbf16>, vector<8x128xf32> -> vector<8x128xf32>
    %c0_3 = arith.constant 0 : index
    %c0_4 = arith.constant 0 : index
    %3 = vector.load %arg3[%c0_3, %c0_4] : memref<1x128xf32, #tpu.memory_space<vmem>>, vector<1x128xf32>
    %4 = vector.broadcast %3 : vector<1x128xf32> to vector<8x128xf32>
    %5 = arith.addf %2, %4 : vector<8x128xf32>
    %6 = arith.truncf %5 : vector<8x128xf32> to vector<8x128xbf16>
    %c0_5 = arith.constant 0 : index
    %c0_6 = arith.constant 0 : index
    %7 = vector.load %arg4[%c0_5, %c0_6] : memref<8x128xbf16, #tpu.memory_space<vmem>>, vector<8x128xbf16>
    tpu.vector_store %arg4[%c0_5, %c0_6], %6 {strides = array<i32>} : memref<8x128xbf16, #tpu.memory_space<vmem>>, vector<8x128xbf16>,
    return
  }
  func.func @transform_0(%arg0: i32) -> (i32, i32) {
    %c0_i32 = arith.constant 0 : i32
    %c0_i32_0 = arith.constant 0 : i32
    return %arg0, %c0_i32 : i32, i32
  }
  func.func @transform_1(%arg0: i32) -> (i32, i32) {
    %c0_i32 = arith.constant 0 : i32
    %c0_i32_0 = arith.constant 0 : i32
    %c0_i32_1 = arith.constant 0 : i32
    return %c0_i32, %c0_i32_0 : i32, i32
  }
  func.func @transform_2(%arg0: i32) -> (i32, i32) {
    %c0_i32 = arith.constant 0 : i32
    %c0_i32_0 = arith.constant 0 : i32
    %c0_i32_1 = arith.constant 0 : i32
    return %c0_i32, %c0_i32_0 : i32, i32
  }
  func.func @transform_3(%arg0: i32) -> (i32, i32) {
    %c0_i32 = arith.constant 0 : i32
    %c0_i32_0 = arith.constant 0 : i32
    return %arg0, %c0_i32 : i32, i32
  }
}

module attributes {stable_mosaic.version = 11 : i64} {
  func.func @_matmul_kernel(%arg0: i32, %arg1: memref<8x128xbf16, #tpu.memory_space<vmem>>, %arg2: memref<128x128xbf16, #tpu.memory_space<vmem>>, %arg3: memref<1x128xf32, #tpu.memory_space<vmem>>, %arg4: memref<8x128xbf16, #tpu.memory_space<vmem>>) attributes {dimension_semantics = [#tpu.dimension_semantics<parallel>], iteration_bounds = array<i64: 4>, scalar_prefetch = 0 : i64, scratch_operands = 0 : i64, tpu.core_type = #tpu.core_type<tc>, window_params = [{transform_indices = @transform_0, window_bounds = array<i64: 8, 128>}, {pipeline_mode = #tpu.pipeline_mode<synchronous>, transform_indices = @transform_1, window_bounds = array<i64: 128, 128>}, {pipeline_mode = #tpu.pipeline_mode<synchronous>, transform_indices = @transform_2, window_bounds = array<i64: 1, 128>}, {transform_indices = @transform_3, window_bounds = array<i64: 8, 128>}]} {
    %c0 = arith.constant 0 : index
    %c0_0 = arith.constant 0 : index
    %0 = vector.load %arg1[%c0, %c0_0] : memref<8x128xbf16, #tpu.memory_space<vmem>>, vector<8x128xbf16>
    %c0_1 = arith.constant 0 : index
    %c0_2 = arith.constant 0 : index
    %1 = vector.load %arg2[%c0_1, %c0_2] : memref<128x128xbf16, #tpu.memory_space<vmem>>, vector<128x128xbf16>
    %cst = arith.constant dense<0.000000e+00> : vector<8x128xf32>
    %2 = tpu.matmul %0, %1, %cst {dimension_numbers = #tpu.dot_dimension_numbers<[1], [0], [0], [1], [0, 0, 1, 1], [], []>} : vector<8x128xbf16>, vector<128x128xbf16>, vector<8x128xf32> -> vector<8x128xf32>
    %c0_3 = arith.constant 0 : index
    %c0_4 = arith.constant 0 : index
    %3 = vector.load %arg3[%c0_3, %c0_4] : memref<1x128xf32, #tpu.memory_space<vmem>>, vector<1x128xf32>
    %4 = vector.broadcast %3 : vector<1x128xf32> to vector<8x128xf32>
    %5 = arith.addf %2, %4 : vector<8x128xf32>
    %6 = arith.truncf %5 : vector<8x128xf32> to vector<8x128xbf16>
    %c0_5 = arith.constant 0 : index
    %c0_6 = arith.constant 0 : index
    %7 = vector.load %arg4[%c0_5, %c0_6] : memref<8x128xbf16, #tpu.memory_space<vmem>>, vector<8x128xbf16>
    tpu.vector_store %arg4[%c0_5, %c0_6], %6 {strides = array<i32>} : memref<8x128xbf16, #tpu.memory_space<vmem>>, vector<8x128xbf16>,
    return
  }
  func.func @transform_0(%arg0: i32) -> (i32, i32) {
    %c0_i32 = arith.constant 0 : i32
    %c0_i32_0 = arith.constant 0 : i32
    return %arg0, %c0_i32 : i32, i32
  }
  func.func @transform_1(%arg0: i32) -> (i32, i32) {
    %c0_i32 = arith.constant 0 : i32
    %c0_i32_0 = arith.constant 0 : i32
    %c0_i32_1 = arith.constant 0 : i32
    return %c0_i32, %c0_i32_0 : i32, i32
  }
  func.func @transform_2(%arg0: i32) -> (i32, i32) {
    %c0_i32 = arith.constant 0 : i32
    %c0_i32_0 = arith.constant 0 : i32
    %c0_i32_1 = arith.constant 0 : i32
    return %c0_i32, %c0_i32_0 : i32, i32
  }
  func.func @transform_3(%arg0: i32) -> (i32, i32) {
    %c0_i32 = arith.constant 0 : i32
    %c0_i32_0 = arith.constant 0 : i32
    return %arg0, %c0_i32 : i32, i32
  }
}

module attributes {stable_mosaic.version = 11 : i64} {
  func.func @_matmul_kernel(%arg0: i32, %arg1: memref<8x32xbf16, #tpu.memory_space<vmem>>, %arg2: memref<8x128xbf16, #tpu.memory_space<vmem>>, %arg3: memref<32x128xbf16, #tpu.memory_space<vmem>>, %arg4: memref<128x128xbf16, #tpu.memory_space<vmem>>, %arg5: memref<1x128xf32, #tpu.memory_space<vmem>>, %arg6: memref<8x128xbf16, #tpu.memory_space<vmem>>) attributes {dimension_semantics = [#tpu.dimension_semantics<parallel>], iteration_bounds = array<i64: 4>, scalar_prefetch = 0 : i64, scratch_operands = 0 : i64, tpu.core_type = #tpu.core_type<tc>, window_params = [{transform_indices = @transform_0, window_bounds = array<i64: 8, 32>}, {transform_indices = @transform_1, window_bounds = array<i64: 8, 128>}, {pipeline_mode = #tpu.pipeline_mode<synchronous>, transform_indices = @transform_2, window_bounds = array<i64: 32, 128>}, {pipeline_mode = #tpu.pipeline_mode<synchronous>, transform_indices = @transform_3, window_bounds = array<i64: 128, 128>}, {pipeline_mode = #tpu.pipeline_mode<synchronous>, transform_indices = @transform_4, window_bounds = array<i64: 1, 128>}, {transform_indices = @transform_5, window_bounds = array<i64: 8, 128>}]} {
    %c0 = arith.constant 0 : index
    %c0_0 = arith.constant 0 : index
    %0 = vector.load %arg1[%c0, %c0_0] : memref<8x32xbf16, #tpu.memory_space<vmem>>, vector<8x32xbf16>
    %c0_1 = arith.constant 0 : index
    %c0_2 = arith.constant 0 : index
    %1 = vector.load %arg3[%c0_1, %c0_2] : memref<32x128xbf16, #tpu.memory_space<vmem>>, vector<32x128xbf16>
    %cst = arith.constant dense<0.000000e+00> : vector<8x128xf32>
    %2 = tpu.matmul %0, %1, %cst {dimension_numbers = #tpu.dot_dimension_numbers<[1], [0], [0], [1], [0, 0, 1, 1], [], []>} : vector<8x32xbf16>, vector<32x128xbf16>, vector<8x128xf32> -> vector<8x128xf32>
    %c0_3 = arith.constant 0 : index
    %c0_4 = arith.constant 0 : index
    %3 = vector.load %arg2[%c0_3, %c0_4] : memref<8x128xbf16, #tpu.memory_space<vmem>>, vector<8x128xbf16>
    %c0_5 = arith.constant 0 : index
    %c0_6 = arith.constant 0 : index
    %4 = vector.load %arg4[%c0_5, %c0_6] : memref<128x128xbf16, #tpu.memory_space<vmem>>, vector<128x128xbf16>
    %cst_7 = arith.constant dense<0.000000e+00> : vector<8x128xf32>
    %5 = tpu.matmul %3, %4, %cst_7 {dimension_numbers = #tpu.dot_dimension_numbers<[1], [0], [0], [1], [0, 0, 1, 1], [], []>} : vector<8x128xbf16>, vector<128x128xbf16>, vector<8x128xf32> -> vector<8x128xf32>
    %6 = arith.addf %2, %5 : vector<8x128xf32>
    %c0_8 = arith.constant 0 : index
    %c0_9 = arith.constant 0 : index
    %7 = vector.load %arg5[%c0_8, %c0_9] : memref<1x128xf32, #tpu.memory_space<vmem>>, vector<1x128xf32>
    %8 = vector.broadcast %7 : vector<1x128xf32> to vector<8x128xf32>
    %9 = arith.addf %6, %8 : vector<8x128xf32>
    %10 = arith.truncf %9 : vector<8x128xf32> to vector<8x128xbf16>
    %c0_10 = arith.constant 0 : index
    %c0_11 = arith.constant 0 : index
    %11 = vector.load %arg6[%c0_10, %c0_11] : memref<8x128xbf16, #tpu.memory_space<vmem>>, vector<8x128xbf16>
    tpu.vector_store %arg6[%c0_10, %c0_11], %10 {strides = array<i32>} : memref<8x128xbf16, #tpu.memory_space<vmem>>, vector<8x128xbf16>,
    return
  }
  func.func @transform_0(%arg0: i32) -> (i32, i32) {
    %c0_i32 = arith.constant 0 : i32
    %c0_i32_0 = arith.constant 0 : i32
    return %arg0, %c0_i32 : i32, i32
  }
  func.func @transform_1(%arg0: i32) -> (i32, i32) {
    %c0_i32 = arith.constant 0 : i32
    %c0_i32_0 = arith.constant 0 : i32
    return %arg0, %c0_i32 : i32, i32
  }
  func.func @transform_2(%arg0: i32) -> (i32, i32) {
    %c0_i32 = arith.constant 0 : i32
    %c0_i32_0 = arith.constant 0 : i32
    %c0_i32_1 = arith.constant 0 : i32
    return %c0_i32, %c0_i32_0 : i32, i32
  }
  func.func @transform_3(%arg0: i32) -> (i32, i32) {
    %c0_i32 = arith.constant 0 : i32
    %c0_i32_0 = arith.constant 0 : i32
    %c0_i32_1 = arith.constant 0 : i32
    return %c0_i32, %c0_i32_0 : i32, i32
  }
  func.func @transform_4(%arg0: i32) -> (i32, i32) {
    %c0_i32 = arith.constant 0 : i32
    %c0_i32_0 = arith.constant 0 : i32
    %c0_i32_1 = arith.constant 0 : i32
    return %c0_i32, %c0_i32_0 : i32, i32
  }
  func.func @transform_5(%arg0: i32) -> (i32, i32) {
    %c0_i32 = arith.constant 0 : i32
    %c0_i32_0 = arith.constant 0 : i32
    return %arg0, %c0_i32 : i32, i32
  }
}

module attributes {stable_mosaic.version = 11 : i64} {
  func.func @_matmul_kernel(%arg0: i32, %arg1: memref<32x128xbf16, #tpu.memory_space<vmem>>, %arg2: memref<32x128xbf16, #tpu.memory_space<vmem>>, %arg3: memref<128x128xbf16, #tpu.memory_space<vmem>>, %arg4: memref<128x128xbf16, #tpu.memory_space<vmem>>, %arg5: memref<1x128xf32, #tpu.memory_space<vmem>>, %arg6: memref<1x1xf32, #tpu.memory_space<smem>>, %arg7: memref<32x128xbf16, #tpu.memory_space<vmem>>) attributes {dimension_semantics = [#tpu.dimension_semantics<parallel>], iteration_bounds = array<i64: 4>, scalar_prefetch = 0 : i64, scratch_operands = 0 : i64, tpu.core_type = #tpu.core_type<tc>, window_params = [{transform_indices = @transform_0, window_bounds = array<i64: 32, 128>}, {transform_indices = @transform_1, window_bounds = array<i64: 32, 128>}, {pipeline_mode = #tpu.pipeline_mode<synchronous>, transform_indices = @transform_2, window_bounds = array<i64: 128, 128>}, {pipeline_mode = #tpu.pipeline_mode<synchronous>, transform_indices = @transform_3, window_bounds = array<i64: 128, 128>}, {pipeline_mode = #tpu.pipeline_mode<synchronous>, transform_indices = @transform_4, window_bounds = array<i64: 1, 128>}, {transform_indices = @transform_5, window_bounds = array<i64: 1, 1>}, {transform_indices = @transform_6, window_bounds = array<i64: 32, 128>}]} {
    %c0 = arith.constant 0 : index
    %c0_0 = arith.constant 0 : index
    %0 = vector.load %arg1[%c0, %c0_0] : memref<32x128xbf16, #tpu.memory_space<vmem>>, vector<32x128xbf16>
    %c0_1 = arith.constant 0 : index
    %c0_2 = arith.constant 0 : index
    %1 = vector.load %arg3[%c0_1, %c0_2] : memref<128x128xbf16, #tpu.memory_space<vmem>>, vector<128x128xbf16>
    %cst = arith.constant dense<0.000000e+00> : vector<32x128xf32>
    %2 = tpu.matmul %0, %1, %cst {dimension_numbers = #tpu.dot_dimension_numbers<[1], [0], [0], [1], [0, 0, 1, 1], [], []>} : vector<32x128xbf16>, vector<128x128xbf16>, vector<32x128xf32> -> vector<32x128xf32>
    %c0_3 = arith.constant 0 : index
    %c0_4 = arith.constant 0 : index
    %3 = vector.load %arg2[%c0_3, %c0_4] : memref<32x128xbf16, #tpu.memory_space<vmem>>, vector<32x128xbf16>
    %c0_5 = arith.constant 0 : index
    %c0_6 = arith.constant 0 : index
    %4 = vector.load %arg4[%c0_5, %c0_6] : memref<128x128xbf16, #tpu.memory_space<vmem>>, vector<128x128xbf16>
    %cst_7 = arith.constant dense<0.000000e+00> : vector<32x128xf32>
    %5 = tpu.matmul %3, %4, %cst_7 {dimension_numbers = #tpu.dot_dimension_numbers<[1], [0], [0], [1], [0, 0, 1, 1], [], []>} : vector<32x128xbf16>, vector<128x128xbf16>, vector<32x128xf32> -> vector<32x128xf32>
    %6 = arith.addf %2, %5 : vector<32x128xf32>
    %c0_8 = arith.constant 0 : index
    %c0_9 = arith.constant 0 : index
    %7 = vector.load %arg5[%c0_8, %c0_9] : memref<1x128xf32, #tpu.memory_space<vmem>>, vector<1x128xf32>
    %8 = vector.broadcast %7 : vector<1x128xf32> to vector<32x128xf32>
    %9 = arith.addf %6, %8 : vector<32x128xf32>
    %c0_10 = arith.constant 0 : index
    %c0_11 = arith.constant 0 : index
    %10 = memref.load %arg6[%c0_10, %c0_11] : memref<1x1xf32, #tpu.memory_space<smem>>
    %cst_12 = arith.constant 0.000000e+00 : f32
    %11 = vector.broadcast %cst_12 : f32 to vector<32x128xf32>
    %12 = arith.cmpf oge, %9, %11 : vector<32x128xf32>
    %13 = vector.broadcast %10 : f32 to vector<32x128xf32>
    %14 = arith.mulf %13, %9 : vector<32x128xf32>
    %15 = arith.select %12, %9, %14 : vector<32x128xi1>, vector<32x128xf32>
    %16 = arith.truncf %15 : vector<32x128xf32> to vector<32x128xbf16>
    %c0_13 = arith.constant 0 : index
    %c0_14 = arith.constant 0 : index
    %17 = vector.load %arg7[%c0_13, %c0_14] : memref<32x128xbf16, #tpu.memory_space<vmem>>, vector<32x128xbf16>
    tpu.vector_store %arg7[%c0_13, %c0_14], %16 {strides = array<i32>} : memref<32x128xbf16, #tpu.memory_space<vmem>>, vector<32x128xbf16>,
    return
  }
  func.func @transform_0(%arg0: i32) -> (i32, i32) {
    %c0_i32 = arith.constant 0 : i32
    %c0_i32_0 = arith.constant 0 : i32
    return %arg0, %c0_i32 : i32, i32
  }
  func.func @transform_1(%arg0: i32) -> (i32, i32) {
    %c0_i32 = arith.constant 0 : i32
    %c0_i32_0 = arith.constant 0 : i32
    return %arg0, %c0_i32 : i32, i32
  }
  func.func @transform_2(%arg0: i32) -> (i32, i32) {
    %c0_i32 = arith.constant 0 : i32
    %c0_i32_0 = arith.constant 0 : i32
    %c0_i32_1 = arith.constant 0 : i32
    return %c0_i32, %c0_i32_0 : i32, i32
  }
  func.func @transform_3(%arg0: i32) -> (i32, i32) {
    %c0_i32 = arith.constant 0 : i32
    %c0_i32_0 = arith.constant 0 : i32
    %c0_i32_1 = arith.constant 0 : i32
    return %c0_i32, %c0_i32_0 : i32, i32
  }
  func.func @transform_4(%arg0: i32) -> (i32, i32) {
    %c0_i32 = arith.constant 0 : i32
    %c0_i32_0 = arith.constant 0 : i32
    %c0_i32_1 = arith.constant 0 : i32
    return %c0_i32, %c0_i32_0 : i32, i32
  }
  func.func @transform_5(%arg0: i32) -> (i32, i32) {
    %c0_i32 = arith.constant 0 : i32
    %c0_i32_0 = arith.constant 0 : i32
    %c0_i32_1 = arith.constant 0 : i32
    return %c0_i32, %c0_i32_0 : i32, i32
  }
  func.func @transform_6(%arg0: i32) -> (i32, i32) {
    %c0_i32 = arith.constant 0 : i32
    %c0_i32_0 = arith.constant 0 : i32
    return %arg0, %c0_i32 : i32, i32
  }
}

module attributes {stable_mosaic.version = 11 : i64} {
  func.func @_matmul_kernel(%arg0: i32, %arg1: memref<32x16xbf16, #tpu.memory_space<vmem>>, %arg2: memref<32x128xbf16, #tpu.memory_space<vmem>>, %arg3: memref<16x128xbf16, #tpu.memory_space<vmem>>, %arg4: memref<128x128xbf16, #tpu.memory_space<vmem>>, %arg5: memref<1x128xf32, #tpu.memory_space<vmem>>, %arg6: memref<32x128xbf16, #tpu.memory_space<vmem>>) attributes {dimension_semantics = [#tpu.dimension_semantics<parallel>], iteration_bounds = array<i64: 4>, scalar_prefetch = 0 : i64, scratch_operands = 0 : i64, tpu.core_type = #tpu.core_type<tc>, window_params = [{transform_indices = @transform_0, window_bounds = array<i64: 32, 16>}, {transform_indices = @transform_1, window_bounds = array<i64: 32, 128>}, {pipeline_mode = #tpu.pipeline_mode<synchronous>, transform_indices = @transform_2, window_bounds = array<i64: 16, 128>}, {pipeline_mode = #tpu.pipeline_mode<synchronous>, transform_indices = @transform_3, window_bounds = array<i64: 128, 128>}, {pipeline_mode = #tpu.pipeline_mode<synchronous>, transform_indices = @transform_4, window_bounds = array<i64: 1, 128>}, {transform_indices = @transform_5, window_bounds = array<i64: 32, 128>}]} {
    %c0 = arith.constant 0 : index
    %c0_0 = arith.constant 0 : index
    %0 = vector.load %arg1[%c0, %c0_0] : memref<32x16xbf16, #tpu.memory_space<vmem>>, vector<32x16xbf16>
    %c0_1 = arith.constant 0 : index
    %c0_2 = arith.constant 0 : index
    %1 = vector.load %arg3[%c0_1, %c0_2] : memref<16x128xbf16, #tpu.memory_space<vmem>>, vector<16x128xbf16>
    %cst = arith.constant dense<0.000000e+00> : vector<32x128xf32>
    %2 = tpu.matmul %0, %1, %cst {dimension_numbers = #tpu.dot_dimension_numbers<[1], [0], [0], [1], [0, 0, 1, 1], [], []>} : vector<32x16xbf16>, vector<16x128xbf16>, vector<32x128xf32> -> vector<32x128xf32>
    %c0_3 = arith.constant 0 : index
    %c0_4 = arith.constant 0 : index
    %3 = vector.load %arg2[%c0_3, %c0_4] : memref<32x128xbf16, #tpu.memory_space<vmem>>, vector<32x128xbf16>
    %c0_5 = arith.constant 0 : index
    %c0_6 = arith.constant 0 : index
    %4 = vector.load %arg4[%c0_5, %c0_6] : memref<128x128xbf16, #tpu.memory_space<vmem>>, vector<128x128xbf16>
    %cst_7 = arith.constant dense<0.000000e+00> : vector<32x128xf32>
    %5 = tpu.matmul %3, %4, %cst_7 {dimension_numbers = #tpu.dot_dimension_numbers<[1], [0], [0], [1], [0, 0, 1, 1], [], []>} : vector<32x128xbf16>, vector<128x128xbf16>, vector<32x128xf32> -> vector<32x128xf32>
    %6 = arith.addf %2, %5 : vector<32x128xf32>
    %c0_8 = arith.constant 0 : index
    %c0_9 = arith.constant 0 : index
    %7 = vector.load %arg5[%c0_8, %c0_9] : memref<1x128xf32, #tpu.memory_space<vmem>>, vector<1x128xf32>
    %8 = vector.broadcast %7 : vector<1x128xf32> to vector<32x128xf32>
    %9 = arith.addf %6, %8 : vector<32x128xf32>
    %10 = arith.truncf %9 : vector<32x128xf32> to vector<32x128xbf16>
    %c0_10 = arith.constant 0 : index
    %c0_11 = arith.constant 0 : index
    %11 = vector.load %arg6[%c0_10, %c0_11] : memref<32x128xbf16, #tpu.memory_space<vmem>>, vector<32x128xbf16>
    tpu.vector_store %arg6[%c0_10, %c0_11], %10 {strides = array<i32>} : memref<32x128xbf16, #tpu.memory_space<vmem>>, vector<32x128xbf16>,
    return
  }
  func.func @transform_0(%arg0: i32) -> (i32, i32) {
    %c0_i32 = arith.constant 0 : i32
    %c0_i32_0 = arith.constant 0 : i32
    return %arg0, %c0_i32 : i32, i32
  }
  func.func @transform_1(%arg0: i32) -> (i32, i32) {
    %c0_i32 = arith.constant 0 : i32
    %c0_i32_0 = arith.constant 0 : i32
    return %arg0, %c0_i32 : i32, i32
  }
  func.func @transform_2(%arg0: i32) -> (i32, i32) {
    %c0_i32 = arith.constant 0 : i32
    %c0_i32_0 = arith.constant 0 : i32
    %c0_i32_1 = arith.constant 0 : i32
    return %c0_i32, %c0_i32_0 : i32, i32
  }
  func.func @transform_3(%arg0: i32) -> (i32, i32) {
    %c0_i32 = arith.constant 0 : i32
    %c0_i32_0 = arith.constant 0 : i32
    %c0_i32_1 = arith.constant 0 : i32
    return %c0_i32, %c0_i32_0 : i32, i32
  }
  func.func @transform_4(%arg0: i32) -> (i32, i32) {
    %c0_i32 = arith.constant 0 : i32
    %c0_i32_0 = arith.constant 0 : i32
    %c0_i32_1 = arith.constant 0 : i32
    return %c0_i32, %c0_i32_0 : i32, i32
  }
  func.func @transform_5(%arg0: i32) -> (i32, i32) {
    %c0_i32 = arith.constant 0 : i32
    %c0_i32_0 = arith.constant 0 : i32
    return %arg0, %c0_i32 : i32, i32
  }
}

module attributes {stable_mosaic.version = 11 : i64} {
  func.func @_conv3x3_kernel(%arg0: i32, %arg1: i32, %arg2: memref<1x10x10x128xbf16, #tpu.memory_space<vmem>>, %arg3: memref<1152x128xbf16, #tpu.memory_space<vmem>>, %arg4: memref<1x128xf32, #tpu.memory_space<vmem>>, %arg5: memref<1x32x128xbf16, #tpu.memory_space<vmem>>, %arg6: memref<1x32x128xbf16, #tpu.memory_space<vmem>>) attributes {dimension_semantics = [#tpu.dimension_semantics<parallel>, #tpu.dimension_semantics<parallel>], iteration_bounds = array<i64: 2, 2>, scalar_prefetch = 0 : i64, scratch_operands = 0 : i64, tpu.core_type = #tpu.core_type<tc>, window_params = [{transform_indices = @transform_0, window_bounds = array<i64: 1, 10, 10, 128>}, {pipeline_mode = #tpu.pipeline_mode<synchronous>, transform_indices = @transform_1, window_bounds = array<i64: 1152, 128>}, {pipeline_mode = #tpu.pipeline_mode<synchronous>, transform_indices = @transform_2, window_bounds = array<i64: 1, 128>}, {transform_indices = @transform_3, window_bounds = array<i64: 1, 32, 128>}, {transform_indices = @transform_4, window_bounds = array<i64: 1, 32, 128>}]} {
    %c4_i32 = arith.constant 4 : i32
    %0 = arith.muli %arg1, %c4_i32 : i32
    %c0 = arith.constant 0 : index
    %1 = arith.index_cast %0 : i32 to index
    %c0_0 = arith.constant 0 : index
    %c0_1 = arith.constant 0 : index
    %2 = vector.load %arg2[%c0, %1, %c0_0, %c0_1] : memref<1x10x10x128xbf16, #tpu.memory_space<vmem>>, vector<1x6x10x128xbf16>
    %3 = vector.shape_cast %2 : vector<1x6x10x128xbf16> to vector<6x10x128xbf16>
    %4 = vector.extract_strided_slice %3 {offsets = [0, 0, 0], sizes = [4, 8, 128], strides = [1, 1, 1]} : vector<6x10x128xbf16> to vector<4x8x128xbf16>
    %5 = vector.shape_cast %4 : vector<4x8x128xbf16> to vector<32x128xbf16>
    %c0_2 = arith.constant 0 : index
    %c0_3 = arith.constant 0 : index
    %6 = vector.load %arg3[%c0_2, %c0_3] : memref<1152x128xbf16, #tpu.memory_space<vmem>>, vector<128x128xbf16>
    %cst = arith.constant dense<0.000000e+00> : vector<32x128xf32>
    %7 = tpu.matmul %5, %6, %cst {dimension_numbers = #tpu.dot_dimension_numbers<[1], [0], [0], [1], [0, 0, 1, 1], [], []>} : vector<32x128xbf16>, vector<128x128xbf16>, vector<32x128xf32> -> vector<32x128xf32>
    %8 = vector.extract_strided_slice %3 {offsets = [0, 1, 0], sizes = [4, 8, 128], strides = [1, 1, 1]} : vector<6x10x128xbf16> to vector<4x8x128xbf16>
    %9 = vector.shape_cast %8 : vector<4x8x128xbf16> to vector<32x128xbf16>
    %c128 = arith.constant 128 : index
    %c0_4 = arith.constant 0 : index
    %10 = vector.load %arg3[%c128, %c0_4] : memref<1152x128xbf16, #tpu.memory_space<vmem>>, vector<128x128xbf16>
    %cst_5 = arith.constant dense<0.000000e+00> : vector<32x128xf32>
    %11 = tpu.matmul %9, %10, %cst_5 {dimension_numbers = #tpu.dot_dimension_numbers<[1], [0], [0], [1], [0, 0, 1, 1], [], []>} : vector<32x128xbf16>, vector<128x128xbf16>, vector<32x128xf32> -> vector<32x128xf32>
    %12 = arith.addf %7, %11 : vector<32x128xf32>
    %13 = vector.extract_strided_slice %3 {offsets = [0, 2, 0], sizes = [4, 8, 128], strides = [1, 1, 1]} : vector<6x10x128xbf16> to vector<4x8x128xbf16>
    %14 = vector.shape_cast %13 : vector<4x8x128xbf16> to vector<32x128xbf16>
    %c256 = arith.constant 256 : index
    %c0_6 = arith.constant 0 : index
    %15 = vector.load %arg3[%c256, %c0_6] : memref<1152x128xbf16, #tpu.memory_space<vmem>>, vector<128x128xbf16>
    %cst_7 = arith.constant dense<0.000000e+00> : vector<32x128xf32>
    %16 = tpu.matmul %14, %15, %cst_7 {dimension_numbers = #tpu.dot_dimension_numbers<[1], [0], [0], [1], [0, 0, 1, 1], [], []>} : vector<32x128xbf16>, vector<128x128xbf16>, vector<32x128xf32> -> vector<32x128xf32>
    %17 = arith.addf %12, %16 : vector<32x128xf32>
    %18 = vector.extract_strided_slice %3 {offsets = [1, 0, 0], sizes = [4, 8, 128], strides = [1, 1, 1]} : vector<6x10x128xbf16> to vector<4x8x128xbf16>
    %19 = vector.shape_cast %18 : vector<4x8x128xbf16> to vector<32x128xbf16>
    %c384 = arith.constant 384 : index
    %c0_8 = arith.constant 0 : index
    %20 = vector.load %arg3[%c384, %c0_8] : memref<1152x128xbf16, #tpu.memory_space<vmem>>, vector<128x128xbf16>
    %cst_9 = arith.constant dense<0.000000e+00> : vector<32x128xf32>
    %21 = tpu.matmul %19, %20, %cst_9 {dimension_numbers = #tpu.dot_dimension_numbers<[1], [0], [0], [1], [0, 0, 1, 1], [], []>} : vector<32x128xbf16>, vector<128x128xbf16>, vector<32x128xf32> -> vector<32x128xf32>
    %22 = arith.addf %17, %21 : vector<32x128xf32>
    %23 = vector.extract_strided_slice %3 {offsets = [1, 1, 0], sizes = [4, 8, 128], strides = [1, 1, 1]} : vector<6x10x128xbf16> to vector<4x8x128xbf16>
    %24 = vector.shape_cast %23 : vector<4x8x128xbf16> to vector<32x128xbf16>
    %c512 = arith.constant 512 : index
    %c0_10 = arith.constant 0 : index
    %25 = vector.load %arg3[%c512, %c0_10] : memref<1152x128xbf16, #tpu.memory_space<vmem>>, vector<128x128xbf16>
    %cst_11 = arith.constant dense<0.000000e+00> : vector<32x128xf32>
    %26 = tpu.matmul %24, %25, %cst_11 {dimension_numbers = #tpu.dot_dimension_numbers<[1], [0], [0], [1], [0, 0, 1, 1], [], []>} : vector<32x128xbf16>, vector<128x128xbf16>, vector<32x128xf32> -> vector<32x128xf32>
    %27 = arith.addf %22, %26 : vector<32x128xf32>
    %28 = vector.extract_strided_slice %3 {offsets = [1, 2, 0], sizes = [4, 8, 128], strides = [1, 1, 1]} : vector<6x10x128xbf16> to vector<4x8x128xbf16>
    %29 = vector.shape_cast %28 : vector<4x8x128xbf16> to vector<32x128xbf16>
    %c640 = arith.constant 640 : index
    %c0_12 = arith.constant 0 : index
    %30 = vector.load %arg3[%c640, %c0_12] : memref<1152x128xbf16, #tpu.memory_space<vmem>>, vector<128x128xbf16>
    %cst_13 = arith.constant dense<0.000000e+00> : vector<32x128xf32>
    %31 = tpu.matmul %29, %30, %cst_13 {dimension_numbers = #tpu.dot_dimension_numbers<[1], [0], [0], [1], [0, 0, 1, 1], [], []>} : vector<32x128xbf16>, vector<128x128xbf16>, vector<32x128xf32> -> vector<32x128xf32>
    %32 = arith.addf %27, %31 : vector<32x128xf32>
    %33 = vector.extract_strided_slice %3 {offsets = [2, 0, 0], sizes = [4, 8, 128], strides = [1, 1, 1]} : vector<6x10x128xbf16> to vector<4x8x128xbf16>
    %34 = vector.shape_cast %33 : vector<4x8x128xbf16> to vector<32x128xbf16>
    %c768 = arith.constant 768 : index
    %c0_14 = arith.constant 0 : index
    %35 = vector.load %arg3[%c768, %c0_14] : memref<1152x128xbf16, #tpu.memory_space<vmem>>, vector<128x128xbf16>
    %cst_15 = arith.constant dense<0.000000e+00> : vector<32x128xf32>
    %36 = tpu.matmul %34, %35, %cst_15 {dimension_numbers = #tpu.dot_dimension_numbers<[1], [0], [0], [1], [0, 0, 1, 1], [], []>} : vector<32x128xbf16>, vector<128x128xbf16>, vector<32x128xf32> -> vector<32x128xf32>
    %37 = arith.addf %32, %36 : vector<32x128xf32>
    %38 = vector.extract_strided_slice %3 {offsets = [2, 1, 0], sizes = [4, 8, 128], strides = [1, 1, 1]} : vector<6x10x128xbf16> to vector<4x8x128xbf16>
    %39 = vector.shape_cast %38 : vector<4x8x128xbf16> to vector<32x128xbf16>
    %c896 = arith.constant 896 : index
    %c0_16 = arith.constant 0 : index
    %40 = vector.load %arg3[%c896, %c0_16] : memref<1152x128xbf16, #tpu.memory_space<vmem>>, vector<128x128xbf16>
    %cst_17 = arith.constant dense<0.000000e+00> : vector<32x128xf32>
    %41 = tpu.matmul %39, %40, %cst_17 {dimension_numbers = #tpu.dot_dimension_numbers<[1], [0], [0], [1], [0, 0, 1, 1], [], []>} : vector<32x128xbf16>, vector<128x128xbf16>, vector<32x128xf32> -> vector<32x128xf32>
    %42 = arith.addf %37, %41 : vector<32x128xf32>
    %43 = vector.extract_strided_slice %3 {offsets = [2, 2, 0], sizes = [4, 8, 128], strides = [1, 1, 1]} : vector<6x10x128xbf16> to vector<4x8x128xbf16>
    %44 = vector.shape_cast %43 : vector<4x8x128xbf16> to vector<32x128xbf16>
    %c1024 = arith.constant 1024 : index
    %c0_18 = arith.constant 0 : index
    %45 = vector.load %arg3[%c1024, %c0_18] : memref<1152x128xbf16, #tpu.memory_space<vmem>>, vector<128x128xbf16>
    %cst_19 = arith.constant dense<0.000000e+00> : vector<32x128xf32>
    %46 = tpu.matmul %44, %45, %cst_19 {dimension_numbers = #tpu.dot_dimension_numbers<[1], [0], [0], [1], [0, 0, 1, 1], [], []>} : vector<32x128xbf16>, vector<128x128xbf16>, vector<32x128xf32> -> vector<32x128xf32>
    %47 = arith.addf %42, %46 : vector<32x128xf32>
    %c0_20 = arith.constant 0 : index
    %c0_21 = arith.constant 0 : index
    %48 = vector.load %arg4[%c0_20, %c0_21] : memref<1x128xf32, #tpu.memory_space<vmem>>, vector<1x128xf32>
    %49 = vector.broadcast %48 : vector<1x128xf32> to vector<32x128xf32>
    %50 = arith.addf %47, %49 : vector<32x128xf32>
    %c0_22 = arith.constant 0 : index
    %c0_23 = arith.constant 0 : index
    %c0_24 = arith.constant 0 : index
    %51 = vector.load %arg5[%c0_22, %c0_23, %c0_24] : memref<1x32x128xbf16, #tpu.memory_space<vmem>>, vector<1x32x128xbf16>
    %52 = vector.shape_cast %51 : vector<1x32x128xbf16> to vector<32x128xbf16>
    %53 = arith.extf %52 : vector<32x128xbf16> to vector<32x128xf32>
    %54 = arith.addf %50, %53 : vector<32x128xf32>
    %55 = vector.shape_cast %54 : vector<32x128xf32> to vector<1x32x128xf32>
    %56 = arith.truncf %55 : vector<1x32x128xf32> to vector<1x32x128xbf16>
    %c0_25 = arith.constant 0 : index
    %c0_26 = arith.constant 0 : index
    %c0_27 = arith.constant 0 : index
    %57 = vector.load %arg6[%c0_25, %c0_26, %c0_27] : memref<1x32x128xbf16, #tpu.memory_space<vmem>>, vector<1x32x128xbf16>
    tpu.vector_store %arg6[%c0_25, %c0_26, %c0_27], %56 {strides = array<i32>} : memref<1x32x128xbf16, #tpu.memory_space<vmem>>, vector<1x32x128xbf16>,
    return
  }
  func.func @transform_0(%arg0: i32, %arg1: i32) -> (i32, i32, i32, i32) {
    %c0_i32 = arith.constant 0 : i32
    %c0_i32_0 = arith.constant 0 : i32
    %c0_i32_1 = arith.constant 0 : i32
    %c0_i32_2 = arith.constant 0 : i32
    return %arg0, %c0_i32, %c0_i32_0, %c0_i32_1 : i32, i32, i32, i32
  }
  func.func @transform_1(%arg0: i32, %arg1: i32) -> (i32, i32) {
    %c0_i32 = arith.constant 0 : i32
    %c0_i32_0 = arith.constant 0 : i32
    %c0_i32_1 = arith.constant 0 : i32
    return %c0_i32, %c0_i32_0 : i32, i32
  }
  func.func @transform_2(%arg0: i32, %arg1: i32) -> (i32, i32) {
    %c0_i32 = arith.constant 0 : i32
    %c0_i32_0 = arith.constant 0 : i32
    %c0_i32_1 = arith.constant 0 : i32
    return %c0_i32, %c0_i32_0 : i32, i32
  }
  func.func @transform_3(%arg0: i32, %arg1: i32) -> (i32, i32, i32) {
    %c0_i32 = arith.constant 0 : i32
    %c0_i32_0 = arith.constant 0 : i32
    return %arg0, %arg1, %c0_i32 : i32, i32, i32
  }
  func.func @transform_4(%arg0: i32, %arg1: i32) -> (i32, i32, i32) {
    %c0_i32 = arith.constant 0 : i32
    %c0_i32_0 = arith.constant 0 : i32
    return %arg0, %arg1, %c0_i32 : i32, i32, i32
  }
}

module attributes {stable_mosaic.version = 11 : i64} {
  func.func @_conv3x3_kernel(%arg0: i32, %arg1: i32, %arg2: memref<1x18x18x128xbf16, #tpu.memory_space<vmem>>, %arg3: memref<1152x128xbf16, #tpu.memory_space<vmem>>, %arg4: memref<1x128xf32, #tpu.memory_space<vmem>>, %arg5: memref<1x128x128xf32, #tpu.memory_space<vmem>>, %arg6: memref<1x128x128xf32, #tpu.memory_space<vmem>>) attributes {dimension_semantics = [#tpu.dimension_semantics<parallel>, #tpu.dimension_semantics<parallel>], iteration_bounds = array<i64: 2, 2>, scalar_prefetch = 0 : i64, scratch_operands = 0 : i64, tpu.core_type = #tpu.core_type<tc>, window_params = [{transform_indices = @transform_0, window_bounds = array<i64: 1, 18, 18, 128>}, {pipeline_mode = #tpu.pipeline_mode<synchronous>, transform_indices = @transform_1, window_bounds = array<i64: 1152, 128>}, {pipeline_mode = #tpu.pipeline_mode<synchronous>, transform_indices = @transform_2, window_bounds = array<i64: 1, 128>}, {transform_indices = @transform_3, window_bounds = array<i64: 1, 128, 128>}, {transform_indices = @transform_4, window_bounds = array<i64: 1, 128, 128>}]} {
    %c8_i32 = arith.constant 8 : i32
    %0 = arith.muli %arg1, %c8_i32 : i32
    %c0 = arith.constant 0 : index
    %1 = arith.index_cast %0 : i32 to index
    %c0_0 = arith.constant 0 : index
    %c0_1 = arith.constant 0 : index
    %2 = vector.load %arg2[%c0, %1, %c0_0, %c0_1] : memref<1x18x18x128xbf16, #tpu.memory_space<vmem>>, vector<1x10x18x128xbf16>
    %3 = vector.shape_cast %2 : vector<1x10x18x128xbf16> to vector<10x18x128xbf16>
    %4 = vector.extract_strided_slice %3 {offsets = [0, 0, 0], sizes = [8, 16, 128], strides = [1, 1, 1]} : vector<10x18x128xbf16> to vector<8x16x128xbf16>
    %5 = vector.shape_cast %4 : vector<8x16x128xbf16> to vector<128x128xbf16>
    %c0_2 = arith.constant 0 : index
    %c0_3 = arith.constant 0 : index
    %6 = vector.load %arg3[%c0_2, %c0_3] : memref<1152x128xbf16, #tpu.memory_space<vmem>>, vector<128x128xbf16>
    %cst = arith.constant dense<0.000000e+00> : vector<128x128xf32>
    %7 = tpu.matmul %5, %6, %cst {dimension_numbers = #tpu.dot_dimension_numbers<[1], [0], [0], [1], [0, 0, 1, 1], [], []>} : vector<128x128xbf16>, vector<128x128xbf16>, vector<128x128xf32> -> vector<128x128xf32>
    %8 = vector.extract_strided_slice %3 {offsets = [0, 1, 0], sizes = [8, 16, 128], strides = [1, 1, 1]} : vector<10x18x128xbf16> to vector<8x16x128xbf16>
    %9 = vector.shape_cast %8 : vector<8x16x128xbf16> to vector<128x128xbf16>
    %c128 = arith.constant 128 : index
    %c0_4 = arith.constant 0 : index
    %10 = vector.load %arg3[%c128, %c0_4] : memref<1152x128xbf16, #tpu.memory_space<vmem>>, vector<128x128xbf16>
    %cst_5 = arith.constant dense<0.000000e+00> : vector<128x128xf32>
    %11 = tpu.matmul %9, %10, %cst_5 {dimension_numbers = #tpu.dot_dimension_numbers<[1], [0], [0], [1], [0, 0, 1, 1], [], []>} : vector<128x128xbf16>, vector<128x128xbf16>, vector<128x128xf32> -> vector<128x128xf32>
    %12 = arith.addf %7, %11 : vector<128x128xf32>
    %13 = vector.extract_strided_slice %3 {offsets = [0, 2, 0], sizes = [8, 16, 128], strides = [1, 1, 1]} : vector<10x18x128xbf16> to vector<8x16x128xbf16>
    %14 = vector.shape_cast %13 : vector<8x16x128xbf16> to vector<128x128xbf16>
    %c256 = arith.constant 256 : index
    %c0_6 = arith.constant 0 : index
    %15 = vector.load %arg3[%c256, %c0_6] : memref<1152x128xbf16, #tpu.memory_space<vmem>>, vector<128x128xbf16>
    %cst_7 = arith.constant dense<0.000000e+00> : vector<128x128xf32>
    %16 = tpu.matmul %14, %15, %cst_7 {dimension_numbers = #tpu.dot_dimension_numbers<[1], [0], [0], [1], [0, 0, 1, 1], [], []>} : vector<128x128xbf16>, vector<128x128xbf16>, vector<128x128xf32> -> vector<128x128xf32>
    %17 = arith.addf %12, %16 : vector<128x128xf32>
    %18 = vector.extract_strided_slice %3 {offsets = [1, 0, 0], sizes = [8, 16, 128], strides = [1, 1, 1]} : vector<10x18x128xbf16> to vector<8x16x128xbf16>
    %19 = vector.shape_cast %18 : vector<8x16x128xbf16> to vector<128x128xbf16>
    %c384 = arith.constant 384 : index
    %c0_8 = arith.constant 0 : index
    %20 = vector.load %arg3[%c384, %c0_8] : memref<1152x128xbf16, #tpu.memory_space<vmem>>, vector<128x128xbf16>
    %cst_9 = arith.constant dense<0.000000e+00> : vector<128x128xf32>
    %21 = tpu.matmul %19, %20, %cst_9 {dimension_numbers = #tpu.dot_dimension_numbers<[1], [0], [0], [1], [0, 0, 1, 1], [], []>} : vector<128x128xbf16>, vector<128x128xbf16>, vector<128x128xf32> -> vector<128x128xf32>
    %22 = arith.addf %17, %21 : vector<128x128xf32>
    %23 = vector.extract_strided_slice %3 {offsets = [1, 1, 0], sizes = [8, 16, 128], strides = [1, 1, 1]} : vector<10x18x128xbf16> to vector<8x16x128xbf16>
    %24 = vector.shape_cast %23 : vector<8x16x128xbf16> to vector<128x128xbf16>
    %c512 = arith.constant 512 : index
    %c0_10 = arith.constant 0 : index
    %25 = vector.load %arg3[%c512, %c0_10] : memref<1152x128xbf16, #tpu.memory_space<vmem>>, vector<128x128xbf16>
    %cst_11 = arith.constant dense<0.000000e+00> : vector<128x128xf32>
    %26 = tpu.matmul %24, %25, %cst_11 {dimension_numbers = #tpu.dot_dimension_numbers<[1], [0], [0], [1], [0, 0, 1, 1], [], []>} : vector<128x128xbf16>, vector<128x128xbf16>, vector<128x128xf32> -> vector<128x128xf32>
    %27 = arith.addf %22, %26 : vector<128x128xf32>
    %28 = vector.extract_strided_slice %3 {offsets = [1, 2, 0], sizes = [8, 16, 128], strides = [1, 1, 1]} : vector<10x18x128xbf16> to vector<8x16x128xbf16>
    %29 = vector.shape_cast %28 : vector<8x16x128xbf16> to vector<128x128xbf16>
    %c640 = arith.constant 640 : index
    %c0_12 = arith.constant 0 : index
    %30 = vector.load %arg3[%c640, %c0_12] : memref<1152x128xbf16, #tpu.memory_space<vmem>>, vector<128x128xbf16>
    %cst_13 = arith.constant dense<0.000000e+00> : vector<128x128xf32>
    %31 = tpu.matmul %29, %30, %cst_13 {dimension_numbers = #tpu.dot_dimension_numbers<[1], [0], [0], [1], [0, 0, 1, 1], [], []>} : vector<128x128xbf16>, vector<128x128xbf16>, vector<128x128xf32> -> vector<128x128xf32>
    %32 = arith.addf %27, %31 : vector<128x128xf32>
    %33 = vector.extract_strided_slice %3 {offsets = [2, 0, 0], sizes = [8, 16, 128], strides = [1, 1, 1]} : vector<10x18x128xbf16> to vector<8x16x128xbf16>
    %34 = vector.shape_cast %33 : vector<8x16x128xbf16> to vector<128x128xbf16>
    %c768 = arith.constant 768 : index
    %c0_14 = arith.constant 0 : index
    %35 = vector.load %arg3[%c768, %c0_14] : memref<1152x128xbf16, #tpu.memory_space<vmem>>, vector<128x128xbf16>
    %cst_15 = arith.constant dense<0.000000e+00> : vector<128x128xf32>
    %36 = tpu.matmul %34, %35, %cst_15 {dimension_numbers = #tpu.dot_dimension_numbers<[1], [0], [0], [1], [0, 0, 1, 1], [], []>} : vector<128x128xbf16>, vector<128x128xbf16>, vector<128x128xf32> -> vector<128x128xf32>
    %37 = arith.addf %32, %36 : vector<128x128xf32>
    %38 = vector.extract_strided_slice %3 {offsets = [2, 1, 0], sizes = [8, 16, 128], strides = [1, 1, 1]} : vector<10x18x128xbf16> to vector<8x16x128xbf16>
    %39 = vector.shape_cast %38 : vector<8x16x128xbf16> to vector<128x128xbf16>
    %c896 = arith.constant 896 : index
    %c0_16 = arith.constant 0 : index
    %40 = vector.load %arg3[%c896, %c0_16] : memref<1152x128xbf16, #tpu.memory_space<vmem>>, vector<128x128xbf16>
    %cst_17 = arith.constant dense<0.000000e+00> : vector<128x128xf32>
    %41 = tpu.matmul %39, %40, %cst_17 {dimension_numbers = #tpu.dot_dimension_numbers<[1], [0], [0], [1], [0, 0, 1, 1], [], []>} : vector<128x128xbf16>, vector<128x128xbf16>, vector<128x128xf32> -> vector<128x128xf32>
    %42 = arith.addf %37, %41 : vector<128x128xf32>
    %43 = vector.extract_strided_slice %3 {offsets = [2, 2, 0], sizes = [8, 16, 128], strides = [1, 1, 1]} : vector<10x18x128xbf16> to vector<8x16x128xbf16>
    %44 = vector.shape_cast %43 : vector<8x16x128xbf16> to vector<128x128xbf16>
    %c1024 = arith.constant 1024 : index
    %c0_18 = arith.constant 0 : index
    %45 = vector.load %arg3[%c1024, %c0_18] : memref<1152x128xbf16, #tpu.memory_space<vmem>>, vector<128x128xbf16>
    %cst_19 = arith.constant dense<0.000000e+00> : vector<128x128xf32>
    %46 = tpu.matmul %44, %45, %cst_19 {dimension_numbers = #tpu.dot_dimension_numbers<[1], [0], [0], [1], [0, 0, 1, 1], [], []>} : vector<128x128xbf16>, vector<128x128xbf16>, vector<128x128xf32> -> vector<128x128xf32>
    %47 = arith.addf %42, %46 : vector<128x128xf32>
    %c0_20 = arith.constant 0 : index
    %c0_21 = arith.constant 0 : index
    %48 = vector.load %arg4[%c0_20, %c0_21] : memref<1x128xf32, #tpu.memory_space<vmem>>, vector<1x128xf32>
    %49 = vector.broadcast %48 : vector<1x128xf32> to vector<128x128xf32>
    %50 = arith.addf %47, %49 : vector<128x128xf32>
    %c0_22 = arith.constant 0 : index
    %c0_23 = arith.constant 0 : index
    %c0_24 = arith.constant 0 : index
    %51 = vector.load %arg5[%c0_22, %c0_23, %c0_24] : memref<1x128x128xf32, #tpu.memory_space<vmem>>, vector<1x128x128xf32>
    %52 = vector.shape_cast %51 : vector<1x128x128xf32> to vector<128x128xf32>
    %53 = arith.addf %50, %52 : vector<128x128xf32>
    %54 = vector.shape_cast %53 : vector<128x128xf32> to vector<1x128x128xf32>
    %c0_25 = arith.constant 0 : index
    %c0_26 = arith.constant 0 : index
    %c0_27 = arith.constant 0 : index
    %55 = vector.load %arg6[%c0_25, %c0_26, %c0_27] : memref<1x128x128xf32, #tpu.memory_space<vmem>>, vector<1x128x128xf32>
    tpu.vector_store %arg6[%c0_25, %c0_26, %c0_27], %54 {strides = array<i32>} : memref<1x128x128xf32, #tpu.memory_space<vmem>>, vector<1x128x128xf32>,
    return
  }
  func.func @transform_0(%arg0: i32, %arg1: i32) -> (i32, i32, i32, i32) {
    %c0_i32 = arith.constant 0 : i32
    %c0_i32_0 = arith.constant 0 : i32
    %c0_i32_1 = arith.constant 0 : i32
    %c0_i32_2 = arith.constant 0 : i32
    return %arg0, %c0_i32, %c0_i32_0, %c0_i32_1 : i32, i32, i32, i32
  }
  func.func @transform_1(%arg0: i32, %arg1: i32) -> (i32, i32) {
    %c0_i32 = arith.constant 0 : i32
    %c0_i32_0 = arith.constant 0 : i32
    %c0_i32_1 = arith.constant 0 : i32
    return %c0_i32, %c0_i32_0 : i32, i32
  }
  func.func @transform_2(%arg0: i32, %arg1: i32) -> (i32, i32) {
    %c0_i32 = arith.constant 0 : i32
    %c0_i32_0 = arith.constant 0 : i32
    %c0_i32_1 = arith.constant 0 : i32
    return %c0_i32, %c0_i32_0 : i32, i32
  }
  func.func @transform_3(%arg0: i32, %arg1: i32) -> (i32, i32, i32) {
    %c0_i32 = arith.constant 0 : i32
    %c0_i32_0 = arith.constant 0 : i32
    return %arg0, %arg1, %c0_i32 : i32, i32, i32
  }
  func.func @transform_4(%arg0: i32, %arg1: i32) -> (i32, i32, i32) {
    %c0_i32 = arith.constant 0 : i32
    %c0_i32_0 = arith.constant 0 : i32
    return %arg0, %arg1, %c0_i32 : i32, i32, i32
  }
}

</mosaic_0001>

<bundles_post_ra>
// kernel: didn_forward.33
= control target key start
LH: loop header
LB: loop body
LE: loop exit
PB: predicated region body
PF: predicated region fallthrough
CT: control target
= control target key end

     0   :  { %s3497_s17 = smov 0   ;;  %s3499_s18 = smov 0   ;;  %s4242_s0 = inlined_call_operand.vmem [shape: bf16[2,18,18,128], index: 0, kind: input, shape index: {}]   ;;  %s4243_s1 = inlined_call_operand.vmem [shape: bf16[1152,128], index: 1, kind: input, shape index: {}]   ;;  %s4244_s2 = inlined_call_operand.vmem [shape: f32[1,128], index: 2, kind: input, shape index: {}]   ;;  %s4245_s3 = inlined_call_operand.<no memory space> [shape: f32[1,1], index: 3, kind: input, shape index: {}]   ;;  %s4246_s4 = inlined_call_operand.vmem [shape: bf16[2,256,128], index: 4, kind: output, shape index: {}]  }
   0x1   :  { %9 = sst [smem:[#allocation2]] %s4245_s3  ;;  %s3501_s19 = smov 0  }
   0x2   :  { %s3503_s20 = smov 0   ;;  %s3505_s21 = smov 0  }
   0x3 LB: > { %s24_s3 = sadd.s32 1, %s3459_s19  ;;  %s27_s22 = sadd.s32 1, %s3463_s20  ;;  %s3467_s21 = sphi %s3505_s21, %s15_s21   ;;  %s3463_s20 = sphi %s3503_s20, %s4254_s20   ;;  %s3459_s19 = sphi %s3501_s19, %s4253_s19   ;;  %s3455_s18 = sphi %s3499_s18, %s4252_s18   ;;  %s3451_s17 = sphi %s3497_s17, %s4251_s17  }
   0x4   : > { %p25_p0 = scmp.ge.s32.totalorder %s24_s3, 2  ;;  %p2527_p1 = scmp.ge.s32.totalorder %s3467_s21, 1 }
   0x5   : > { %p177_p2 = scmp.lt.s32.totalorder %s3467_s21, 5 }
   0x6   : > { %s4256_s3 = smov (%p25_p0, %s24_s3), 0  ;;  %s4258_s22 = smov (!%p25_p0, %s27_s22), %s3463_s20 }
   0x7   : > { %p178_p3 = pnand %p2527_p1, %p177_p2  ;;  %p29_p4 = scmp.ge.s32.totalorder %s4258_s22, 2 }
   0x8   : > { %v3347_v0 = vld [vmem:[%s4243_s1 + $0x40] sm:$0xff] (!%p178_p3)   ;;  %p207_p5 = scmp.lt.s32.totalorder (!%p178_p3), %s3455_s18, 1  ;;  %v3349_v2 = vld [vmem:[%s4243_s1 + $0x48] sm:$0xff] (!%p178_p3)   ;;  %v3351_v4 = vld [vmem:[%s4243_s1 + $0x50] sm:$0xff] (!%p178_p3)   ;;  %s2666_s14 = smul.u32 (!%p178_p3), 96, %s3451_s17  ;;  %vm862_vm3 = vcmask (!%p178_p3), 1042432  }
   0x9   : > { %s4260_s22 = smov (%p29_p4, %s4258_s22), 0  ;;  %181 = sbr.rel (%p178_p3) target bundleno = 412 (0x19c), region = 36 }
   0xa   : > { %v3348_v1 = vld [vmem:[%s4243_s1 + $0x100] sm:$0xff] (!%p178_p3)   ;;  %2874 = vmatprep.subr.bf16.mxu1 (!%p178_p3), %v3347_v0  ;;  %v3350_v3 = vld [vmem:[%s4243_s1 + $0x108] sm:$0xff] (!%p178_p3)   ;;  %v3352_v5 = vld [vmem:[%s4243_s1 + $0x110] sm:$0xff] (!%p178_p3)   ;;  %vm273_vm0 = vsmask.f32 (!%p178_p3), 3328  ;;  %vm863_vm4 = vcmask (!%p178_p3), 1046532  }
   0xb   : > { %3002 = vmatprep.subr.bf16.mxu0 (!%p178_p3), %v3348_v1  ;;  %2875 = vmatpush3.bf16.msra.mxu1 (!%p178_p3), %v3347_v0  ;;  %v3353_v6 = vld [vmem:[%s4243_s1 + $0x58] sm:$0xff] (!%p178_p3)   ;;  %v3355_v8 = vld [vmem:[%s4243_s1 + $0x60] sm:$0xff] (!%p178_p3)   ;;  %v3357_v10 = vld [vmem:[%s4243_s1 + $0x68] sm:$0xff] (!%p178_p3)   ;;  %vm274_vm1 = vsmask.f32 (!%p178_p3), 7440  ;;  %s2529_s12 = sshll.u32 (!%p178_p3), %s3451_s17, 4 }
   0xc   : > { %3003 = vmatpush3.bf16.msra.mxu0 (!%p178_p3), %v3348_v1  ;;  %2876 = vmatprep.subr.bf16.mxu1 (!%p178_p3), %v3349_v2  ;;  %v3354_v7 = vld [vmem:[%s4243_s1 + $0x118] sm:$0xff] (!%p178_p3)   ;;  %v3356_v9 = vld [vmem:[%s4243_s1 + $0x120] sm:$0xff] (!%p178_p3)   ;;  %v3358_v11 = vld [vmem:[%s4243_s1 + $0x128] sm:$0xff] (!%p178_p3)   ;;  %s2307_s13 = sld [smem:[#allocation2]] (!%p178_p3)  ;;  %p215_p6 = scmp.lt.s32.totalorder (!%p178_p3), %s2529_s12, 31 }
   0xd   : > { %3004 = vmatprep.subr.bf16.mxu0 (!%p178_p3), %v3350_v3  ;;  %v3359_v17 = vld [vmem:[%s4243_s1 + $0x70] sm:$0xff] (!%p178_p3)   ;;  %v3361_v35 = vld [vmem:[%s4243_s1 + $0x78] sm:$0xff] (!%p178_p3)   ;;  %vm3612_vm2 = vmor (!%p178_p3), %vm273_vm0, %vm274_vm1 }
   0xe   : > { %v3360_v30 = vld [vmem:[%s4243_s1 + $0x130] sm:$0xff] (!%p178_p3)   ;;  %v3362_v51 = vld [vmem:[%s4243_s1 + $0x138] sm:$0xff] (!%p178_p3)   ;;  %v3363_v0 = vld [vmem:[%s4243_s1] sm:$0xff] (!%p178_p3)  }
   0xf   : > { %2877 = vmatpush3.bf16.msra.mxu1 (!%p178_p3), %v3349_v2  ;;  %vm3813_vm5 = vmor (!%p178_p3), %vm862_vm3, %vm863_vm4 }
  0x10   : > { %s4262_s18 = smov (!%p207_p5, %s3455_s18), 1  ;;  %3005 = vmatpush3.bf16.msra.mxu0 %v3350_v3  ;;  %2878 = vmatprep.subr.bf16.mxu1 %v3351_v4  ;;  %s4264_s12 = smov (!%p215_p6, %s2529_s12), 31 }
  0x11   : > { %s3306_s9 = smul.u32 216, %s4262_s18  ;;  %3006 = vmatprep.subr.bf16.mxu0 %v3352_v5  ;;  %s2530_s15 = sshll.u32 %s4262_s18, 5 }
  0x12   : > { %s218_s16 = sadd.s32 %s2530_s15, %s4264_s12 }
  0x13   : > { %s211_s23 = scalar_lea.vmem %s4242_s0, %s3306_s9  ;;  %2879 = vmatpush3.bf16.msra.mxu1 %v3351_v4  ;;  %v3364_v4 = vld [vmem:[%s4243_s1 + $0x140] sm:$0xff]   ;;  %s2531_s18 = sshll.u32 %s218_s16, 2 }
  0x14   : > { %3007 = vmatpush3.bf16.msra.mxu0 %v3352_v5  ;;  %2880 = vmatprep.subr.bf16.mxu1 %v3353_v6  ;;  %s3566_s28 = scalar_lea.vmem %s211_s23, %s2666_s14  ;;  %s4184_s25 = scalar_lea.vmem %s4246_s4, %s2531_s18 }
  0x15   : > { %3008 = vmatprep.subr.bf16.mxu0 %v3354_v7  ;;  %v3575_v12 = vld [vmem:[%s3566_s28] sm:$0xf]  ;;  %v3578_v13 = vld [vmem:[%s3566_s28 + $0x4] sm:$0xf]  ;;  %v3581_v14 = vld [vmem:[%s3566_s28 + $0x8] sm:$0x1] }
  0x16   : > { %v277_v15 = vshrl.u32 %v3575_v12, 16  ;;  %v280_v16 = vshll.u32 %v3575_v12, 16  ;;  %v286_v18 = vshll.u32 %v3578_v13, 16  ;;  %v290_v19 = vshrl.u32 %v3578_v13, 16  ;;  %v3592_v21 = vld [vmem:[%s3566_s28 + $0xc] sm:$0xf] }
  0x17   : > { %2881 = vmatpush3.bf16.msra.mxu1 %v3353_v6  ;;  %v296_v20 = vshll.u32 %v3581_v14, 16  ;;  %v3595_v24 = vld [vmem:[%s3566_s28 + $0x10] sm:$0xf]  ;;  %v3598_v25 = vld [vmem:[%s3566_s28 + $0x14] sm:$0x1]  ;;  %v301_v29 = vshrl.u32 %v3592_v21, 16 }
  0x18   : > { %3009 = vmatpush3.bf16.msra.mxu0 %v3354_v7  ;;  %2882 = vmatprep.subr.bf16.mxu1 %v3355_v8  ;;  %v279_v22 = vrot.slane %v277_v15, 4  ;;  %v282_v23 = vrot.slane %v280_v16, 5  ;;  %v288_v26 = vrot.slane %v286_v18, 5  ;;  %v292_v27 = vrot.slane %v290_v19, 4  ;;  %v3618_v40 = vld [vmem:[%s3566_s28 + $0x18] sm:$0xf] }
  0x19   : > { %3010 = vmatprep.subr.bf16.mxu0 %v3356_v9  ;;  %v298_v28 = vrot.slane %v296_v20, 5  ;;  %v304_v32 = vshll.u32 %v3592_v21, 16  ;;  %v310_v33 = vshll.u32 %v3595_v24, 16  ;;  %v314_v34 = vshrl.u32 %v3595_v24, 16  ;;  %v3621_v41 = vld [vmem:[%s3566_s28 + $0x1c] sm:$0xf] }
  0x1a   : > { %v283_v31 = vor.u32 %v282_v23, %v279_v22  ;;  %v293_v37 = vor.u32 %v292_v27, %v288_v26  ;;  %v303_v38 = vrot.slane %v301_v29, 4  ;;  %v320_v39 = vshll.u32 %v3598_v25, 16  ;;  %v3624_v46 = vld [vmem:[%s3566_s28 + $0x20] sm:$0x1]  ;;  %v3649_v7 = vld [vmem:[%s3566_s28 + $0x24] sm:$0xf] }
  0x1b   : > { %2883 = vmatpush3.bf16.msra.mxu1 %v3355_v8  ;;  %v306_v43 = vrot.slane %v304_v32, 5  ;;  %v312_v44 = vrot.slane %v310_v33, 5  ;;  %v316_v45 = vrot.slane %v314_v34, 4  ;;  %v325_v49 = vshrl.u32 %v3618_v40, 16  ;;  %v3652_v8 = vld [vmem:[%s3566_s28 + $0x28] sm:$0xf] }
  0x1c   : > { %3011 = vmatpush3.bf16.msra.mxu0 %v3356_v9  ;;  %2884 = vmatprep.subr.bf16.mxu1 %v3357_v10  ;;  %v284_v42 = vrot.slane %v283_v31, 4  ;;  %v294_v47 = vrot.slane %v293_v37, 4  ;;  %v322_v48 = vrot.slane %v320_v39, 5  ;;  %v328_v50 = vshll.u32 %v3618_v40, 16  ;;  %v3655_v9 = vld [vmem:[%s3566_s28 + $0x2c] sm:$0x1] }
  0x1d   : > { %3012 = vmatprep.subr.bf16.mxu0 %v3358_v11  ;;  %v307_v53 = vor.u32 %v306_v43, %v303_v38  ;;  %v317_v54 = vor.u32 %v316_v45, %v312_v44  ;;  %v334_v55 = vshll.u32 %v3621_v41, 16  ;;  %v327_v57 = vrot.slane %v325_v49, 4  ;;  %v3665_v23 = vld [vmem:[%s3566_s28 + $0x30] sm:$0xf]  ;;  %v3671_v29 = vld [vmem:[%s3566_s28 + $0x34] sm:$0xf] }
  0x1e   : > { %v289_v52 = vsel %vm3612_vm2, %v284_v42, %v288_v26  ;;  %v299_v56 = vsel %vm3612_vm2, %v294_v47, %v298_v28  ;;  %v330_v58 = vrot.slane %v328_v50, 5  ;;  %v338_v59 = vshrl.u32 %v3621_v41, 16  ;;  %v3366_v37 = vld [vmem:[%s4243_s1 + $0x148] sm:$0xff]   ;;  %v3367_v47 = vld [vmem:[%s4243_s1 + $0x10] sm:$0xff]  }
  0x1f   : > { %2885 = vmatpush3.bf16.msra.mxu1 %v3357_v10  ;;  %v2535_v60 = vcombine.low %v289_v52, %v299_v56  ;;  %v308_v61 = vrot.slane %v307_v53, 4  ;;  %v318_v62 = vrot.slane %v317_v54, 4  ;;  %v336_v63 = vrot.slane %v334_v55, 5  ;;  %v3368_v56 = vld [vmem:[%s4243_s1 + $0x150] sm:$0xff]  }
  0x20   : > { %3013 = vmatpush3.bf16.msra.mxu0 %v3358_v11  ;;  %2886 = vmatprep.subr.bf16.mxu1 %v3359_v17  ;;  %v331_v1 = vor.u32 %v330_v58, %v327_v57  ;;  %v340_v2 = vrot.slane %v338_v59, 4  ;;  %v344_v3 = vshll.u32 %v3624_v46, 16  ;;  %v349_v18 = vshrl.u32 %v3649_v7, 16 }
  0x21   : > { %3014 = vmatprep.subr.bf16.mxu0 %v3360_v30  ;;  %2890 = vmatprep.mubr.bf16.mxu1 %v2535_v60  ;;  %v313_v5 = vsel %vm3612_vm2, %v308_v61, %v312_v44  ;;  %v323_v6 = vsel %vm3612_vm2, %v318_v62, %v322_v48  ;;  %v352_v19 = vshll.u32 %v3649_v7, 16  ;;  %v358_v20 = vshll.u32 %v3652_v8, 16  ;;  %v3697_v60 = vld [vmem:[%s3566_s28 + $0x3c] sm:$0xf]  ;;  %v3700_v61 = vld [vmem:[%s3566_s28 + $0x40] sm:$0xf] }
  0x22   : > { %v2536_v10 = vcombine.low %v313_v5, %v323_v6  ;;  %v332_v11 = vrot.slane %v331_v1, 4  ;;  %v341_v15 = vor.u32 %v340_v2, %v336_v63  ;;  %v346_v16 = vrot.slane %v344_v3, 5  ;;  %v3369_v6 = vld [vmem:[%s4243_s1 + $0x18] sm:$0xff]  }
  0x23   : > { %2887 = vmatpush3.bf16.msra.mxu1 %v3359_v17  ;;  %v3365_v17 = vld [vmem:[%s4243_s1 + $0x8] sm:$0xff]   ;;  %v362_v22 = vshrl.u32 %v3652_v8, 16  ;;  %v368_v28 = vshll.u32 %v3655_v9, 16  ;;  %v351_v31 = vrot.slane %v349_v18, 4  ;;  %v354_v32 = vrot.slane %v352_v19, 5 }
  0x24   : > { %3015 = vmatpush3.bf16.msra.mxu0 %v3360_v30  ;;  %2888 = vmatprep.subr.bf16.mxu1 %v3361_v35  ;;  %v337_v26 = vsel %vm3612_vm2, %v332_v11, %v336_v63  ;;  %v342_v27 = vrot.slane %v341_v15, 4  ;;  %v3674_v30 = vld [vmem:[%s3566_s28 + $0x38] sm:$0x1]  ;;  %v360_v33 = vrot.slane %v358_v20, 5  ;;  %v373_v39 = vshrl.u32 %v3665_v23, 16 }
  0x25   : > { %3016 = vmatprep.subr.bf16.mxu0 %v3362_v51  ;;  %3018 = vmatprep.mubr.bf16.mxu0 %v2536_v10  ;;  %v364_v34 = vrot.slane %v362_v22, 4  ;;  %v370_v38 = vrot.slane %v368_v28, 5  ;;  %v376_v42 = vshll.u32 %v3665_v23, 16  ;;  %v355_v44 = vor.u32 %v354_v32, %v351_v31  ;;  %v3720_v18 = vld [vmem:[%s3566_s28 + $0x48] sm:$0xf]  ;;  %v3370_v28 = vld [vmem:[%s4243_s1 + $0x158] sm:$0xff]  }
  0x26   : > { %v382_v48 = vshll.u32 %v3671_v29, 16  ;;  %v375_v49 = vrot.slane %v373_v39, 4  ;;  %v392_v52 = vshll.u32 %v3674_v30, 16  ;;  %v397_v1 = vshrl.u32 %v3697_v60, 16 }
  0x27   : > { %2889 = vmatpush3.bf16.msra.mxu1 %v3361_v35  ;;  %v347_v35 = vsel %vm3612_vm2, %v342_v27, %v346_v16  ;;  %v365_v45 = vor.u32 %v364_v34, %v360_v33  ;;  %v378_v50 = vrot.slane %v376_v42, 5  ;;  %v356_v53 = vrot.slane %v355_v44, 4  ;;  %v3729_v27 = vld [vmem:[%s3566_s28 + $0x50] sm:$0x1] }
  0x28   : > { %3017 = vmatpush3.bf16.msra.mxu0 %v3362_v51  ;;  %2906 = vmatprep.subr.bf16.mxu1 %v3363_v0  ;;  %v3683_v43 = vcombine.low %v337_v26, %v347_v35  ;;  %v386_v51 = vshrl.u32 %v3671_v29, 16  ;;  %v384_v55 = vrot.slane %v382_v48, 5  ;;  %v394_v59 = vrot.slane %v392_v52, 5  ;;  %v3726_v26 = vld [vmem:[%s3566_s28 + $0x4c] sm:$0xf] }
  0x29   : > { %3034 = vmatprep.subr.bf16.mxu0 %v3364_v4  ;;  %v366_v54 = vrot.slane %v365_v45, 4  ;;  %v379_v57 = vor.u32 %v378_v50, %v375_v49  ;;  %v361_v62 = vsel %vm3612_vm2, %v356_v53, %v360_v33  ;;  %v400_v2 = vshll.u32 %v3697_v60, 16 }
  0x2a   : > { %2891 = vmatmul.mubr.bf16.vlgmr.msra.gmra.mrb[0].mxu1 %v2536_v10  ;;  %v388_v58 = vrot.slane %v386_v51, 4  ;;  %v406_v10 = vshll.u32 %v3700_v61, 16  ;;  %v399_v11 = vrot.slane %v397_v1, 4  ;;  %v410_v16 = vshrl.u32 %v3700_v61, 16 }
  0x2b   : > { %2907 = vmatpush3.bf16.msra.mxu1 %v3363_v0  ;;  %3019 = vmatmul.mubr.bf16.vlgmr.msra.gmra.mrb[0].mxu0 %v3683_v43  ;;  %v371_v63 = vsel %vm3612_vm2, %v366_v54, %v370_v38  ;;  %v3707_v0 = vld [vmem:[%s3566_s28 + $0x44] sm:$0x1]  ;;  %v402_v15 = vrot.slane %v400_v2, 5  ;;  %v421_v34 = vshrl.u32 %v3720_v18, 16  ;;  %v424_v38 = vshll.u32 %v3720_v18, 16 }
  0x2c   : > { %2908 = vmatprep.subr.bf16.mxu1 %v3365_v17  ;;  %2894 = vmatprep.mubr.bf16.mxu1 %v3683_v43  ;;  %v3711_v3 = vcombine.low %v361_v62, %v371_v63  ;;  %v389_v5 = vor.u32 %v388_v58, %v384_v55  ;;  %v408_v22 = vrot.slane %v406_v10, 5  ;;  %v412_v32 = vrot.slane %v410_v16, 4  ;;  %v3758_v62 = vld [vmem:[%s3566_s28 + $0x58] sm:$0xf]  ;;  %v3761_v63 = vld [vmem:[%s3566_s28 + $0x5c] sm:$0x1] }
  0x2d   : > { %3035 = vmatpush3.bf16.msra.mxu0 %v3364_v4  ;;  %v380_v4 = vrot.slane %v379_v57, 4  ;;  %v403_v31 = vor.u32 %v402_v15, %v399_v11  ;;  %v430_v39 = vshll.u32 %v3726_v26, 16  ;;  %v434_v42 = vshrl.u32 %v3726_v26, 16  ;;  %v3754_v57 = vld [vmem:[%s3566_s28 + $0x54] sm:$0xf] }
  0x2e   : > { %3036 = vmatprep.subr.bf16.mxu0 %v3366_v37  ;;  %3022 = vmatprep.mubr.bf16.mxu0 %v3711_v3  ;;  %v390_v20 = vrot.slane %v389_v5, 4  ;;  %v413_v48 = vor.u32 %v412_v32, %v408_v22  ;;  %v423_v49 = vrot.slane %v421_v34, 4  ;;  %v440_v52 = vshll.u32 %v3729_v27, 16 }
  0x2f   : > { %2909 = vmatpush3.bf16.msra.mxu1 %v3365_v17  ;;  %v416_v17 = vshll.u32 %v3707_v0, 16  ;;  %v385_v19 = vsel %vm3612_vm2, %v380_v4, %v384_v55  ;;  %v404_v45 = vrot.slane %v403_v31, 4  ;;  %v432_v50 = vrot.slane %v430_v39, 5  ;;  %v3372_v55 = vld [vmem:[%s4243_s1 + $0x160] sm:$0xff]   ;;  %v3373_v4 = vld [vmem:[%s4243_s1 + $0x28] sm:$0xff]  }
  0x30   : > { %2910 = vmatprep.subr.bf16.mxu1 %v3367_v47  ;;  %v395_v35 = vsel %vm3612_vm2, %v390_v20, %v394_v59  ;;  %v436_v51 = vrot.slane %v434_v42, 4  ;;  %v414_v54 = vrot.slane %v413_v48, 4  ;;  %v442_v59 = vrot.slane %v440_v52, 5  ;;  %v3794_v39 = vld [vmem:[%s3566_s28 + $0x68] sm:$0x1] }
  0x31   : > { %3037 = vmatpush3.bf16.msra.mxu0 %v3366_v37  ;;  %v418_v33 = vrot.slane %v416_v17, 5  ;;  %v3371_v37 = vld [vmem:[%s4243_s1 + $0x20] sm:$0xff]   ;;  %v3744_v44 = vcombine.low %v385_v19, %v395_v35  ;;  %v409_v53 = vsel %vm3612_vm2, %v404_v45, %v408_v22  ;;  %v445_v1 = vshrl.u32 %v3754_v57, 16  ;;  %v3374_v17 = vld [vmem:[%s4243_s1 + $0x168] sm:$0xff]   ;;  %v3375_v35 = vld [vmem:[%s4243_s1 + $0x30] sm:$0xff]  }
  0x32   : > { %2895 = vmatmul.mubr.bf16.gmra.mrb[4].mxu1 %v3711_v3  ;;  %3038 = vmatprep.subr.bf16.mxu0 %v3368_v56  ;;  %v437_v58 = vor.u32 %v436_v51, %v432_v50  ;;  %v448_v5 = vshll.u32 %v3754_v57, 16  ;;  %v458_v10 = vshrl.u32 %v3758_v62, 16  ;;  %v464_v32 = vshll.u32 %v3761_v63, 16  ;;  %v3376_v51 = vld [vmem:[%s4243_s1 + $0x170] sm:$0xff]  }
  0x33   : > { %2911 = vmatpush3.bf16.msra.mxu1 %v3367_v47  ;;  %v426_v47 = vrot.slane %v424_v38, 5  ;;  %3023 = vmatmul.mubr.bf16.gmra.mrb[4].mxu0 %v3744_v44  ;;  %v419_v2 = vsel %vm3612_vm2, %v414_v54, %v418_v33  ;;  %v447_v19 = vrot.slane %v445_v1, 4  ;;  %v3779_v33 = vld [vmem:[%s3566_s28 + $0x60] sm:$0xf]  ;;  %v3791_v38 = vld [vmem:[%s3566_s28 + $0x64] sm:$0xf] }
  0x34   : > { %2912 = vmatprep.subr.bf16.mxu1 %v3369_v6  ;;  %2898 = vmatprep.mubr.bf16.mxu1 %v3744_v44  ;;  %v3772_v11 = vcombine.low %v409_v53, %v419_v2  ;;  %v438_v16 = vrot.slane %v437_v58, 4  ;;  %v450_v20 = vrot.slane %v448_v5, 5  ;;  %v460_v31 = vrot.slane %v458_v10, 4 }
  0x35   : > { %3039 = vmatpush3.bf16.msra.mxu0 %v3368_v56  ;;  %v427_v56 = vor.u32 %v426_v47, %v423_v49  ;;  %v1314_v42 = vshrl.u32 %v3779_v33, 16  ;;  %v1317_v45 = vshll.u32 %v3779_v33, 16  ;;  %v1323_v54 = vshll.u32 %v3791_v38, 16 }
  0x36   : > { %3040 = vmatprep.subr.bf16.mxu0 %v3370_v28  ;;  %3026 = vmatprep.mubr.bf16.mxu0 %v3772_v11  ;;  %v443_v34 = vsel %vm3612_vm2, %v438_v16, %v442_v59  ;;  %v451_v49 = vor.u32 %v450_v20, %v447_v19  ;;  %v1333_v59 = vshll.u32 %v3794_v39, 16  ;;  %v2568_v1 = vrot.slane %v3592_v21, 9 }
  0x37   : > { %2913 = vmatpush3.bf16.msra.mxu1 %v3369_v6  ;;  %v454_v6 = vshll.u32 %v3758_v62, 16  ;;  %v428_v15 = vrot.slane %v427_v56, 4  ;;  %v1316_v52 = vrot.slane %v1314_v42, 4  ;;  %v1319_v53 = vrot.slane %v1317_v45, 5 }
  0x38   : > { %2914 = vmatprep.subr.bf16.mxu1 %v3371_v37  ;;  %v1327_v56 = vshrl.u32 %v3791_v38, 16  ;;  %v452_v58 = vrot.slane %v451_v49, 4  ;;  %v1335_v19 = vrot.slane %v1333_v59, 5  ;;  %v874_v20 = vrot.slane %v3595_v24, 5 }
  0x39   : > { %3041 = vmatpush3.bf16.msra.mxu0 %v3370_v28  ;;  %v456_v22 = vrot.slane %v454_v6, 5  ;;  %v433_v28 = vsel %vm3612_vm2, %v428_v15, %v432_v50  ;;  %v466_v50 = vrot.slane %v464_v32, 5  ;;  %v1320_v2 = vor.u32 %v1319_v53, %v1316_v52 }
  0x3a   : > { %3042 = vmatprep.subr.bf16.mxu0 %v3372_v55  ;;  %2899 = vmatmul.mubr.bf16.gmra.mrb[8].mxu1 %v3772_v11  ;;  %v3798_v48 = vcombine.low %v433_v28, %v443_v34  ;;  %v1329_v5 = vrot.slane %v1327_v56, 4  ;;  %v2551_v6 = vcombine.low %v3575_v12, %v3578_v13  ;;  %v3377_v34 = vld [vmem:[%s4243_s1 + $0x38] sm:$0xff]   ;;  %v875_v42 = vsel %vm3813_vm5, %v2568_v1, %v874_v20 }
  0x3b   : > { %2915 = vmatpush3.bf16.msra.mxu1 %v3371_v37  ;;  %v461_v47 = vor.u32 %v460_v31, %v456_v22  ;;  %v457_v15 = vsel %vm3612_vm2, %v452_v58, %v456_v22  ;;  %v1321_v32 = vrot.slane %v1320_v2, 4  ;;  %v3378_v22 = vld [vmem:[%s4243_s1 + $0x178] sm:$0xff]   ;;  %v881_v45 = vrot.slane %v3621_v41, 5 }
  0x3c   : > { %2916 = vmatprep.subr.bf16.mxu1 %v3373_v4  ;;  %3027 = vmatmul.mubr.bf16.gmra.mrb[8].mxu0 %v3798_v48  ;;  %v2569_v53 = vrot.slane %v3618_v40, 9  ;;  %v2570_v1 = vrot.slane %v3649_v7, 9  ;;  %v3863_v2 = vcombine.low %v3592_v21, %v3595_v24  ;;  %v3383_v21 = vld [vmem:[%s4243_s1 + $0x88] sm:$0xff]   ;;  %v895_v24 = vrot.slane %v3671_v29, 5 }
  0x3d   : > { %3043 = vmatpush3.bf16.msra.mxu0 %v3372_v55  ;;  %v462_v37 = vrot.slane %v461_v47, 4  ;;  %2902 = vmatprep.mubr.bf16.mxu1 %v3798_v48  ;;  %v1325_v55 = vrot.slane %v1323_v54, 5  ;;  %v883_v58 = vrot.slane %v881_v45, 4 }
  0x3e   : > { %3044 = vmatprep.subr.bf16.mxu0 %v3374_v17 }
  0x3f   : > { %2917 = vmatpush3.bf16.msra.mxu1 %v3373_v4  ;;  %v467_v16 = vsel %vm3612_vm2, %v462_v37, %v466_v50  ;;  %v1330_v28 = vor.u32 %v1329_v5, %v1325_v55  ;;  %v877_v4 = vrot.slane %v3598_v25, 5  ;;  %v1326_v49 = vsel %vm3612_vm2, %v1321_v32, %v1325_v55 }
  0x40   : > { %v3822_v31 = vcombine.low %v457_v15, %v467_v16  ;;  %2918 = vmatprep.subr.bf16.mxu1 %v3375_v35  ;;  %v3840_v25 = vcombine.low %v3779_v33, %v3791_v38  ;;  %v884_v50 = vrot.slane %v3624_v46, 5  ;;  %v888_v37 = vrot.slane %v3652_v8, 5  ;;  %v3381_v46 = vld [vmem:[%s4243_s1 + $0x80] sm:$0xff]  }
  0x41   : > { %3045 = vmatpush3.bf16.msra.mxu0 %v3374_v17  ;;  %v876_v17 = vrot.slane %v874_v20, 4  ;;  %v1331_v47 = vrot.slane %v1330_v28, 4  ;;  %v3868_v5 = vcombine.low %v3618_v40, %v3621_v41  ;;  %v902_v15 = vrot.slane %v3700_v61, 5 }
  0x42   : > { %3046 = vmatprep.subr.bf16.mxu0 %v3376_v51  ;;  %3030 = vmatprep.mubr.bf16.mxu0 %v3822_v31  ;;  %v890_v55 = vrot.slane %v888_v37, 4  ;;  %v889_v40 = vsel %vm3813_vm5, %v2570_v1, %v888_v37  ;;  %v2571_v20 = vrot.slane %v3665_v23, 9  ;;  %v897_v28 = vrot.slane %v895_v24, 4  ;;  %v3390_v37 = vld [vmem:[%s4243_s1 + $0x198] sm:$0xff]  }
  0x43   : > { %2903 = vmatmul.mubr.bf16.gmra.mrb[12].mxu1 %v3822_v31  ;;  %v878_v52 = vsel %vm3813_vm5, %v876_v17, %v877_v4  ;;  %v1336_v54 = vsel %vm3612_vm2, %v1331_v47, %v1335_v19  ;;  %v3384_v19 = vld [vmem:[%s4243_s1 + $0x188] sm:$0xff]   ;;  %v3387_v4 = vld [vmem:[%s4243_s1 + $0x90] sm:$0xff]   ;;  %v905_v17 = vrot.slane %v3707_v0, 5  ;;  %v909_v47 = vrot.slane %v3726_v26, 5  ;;  %v3389_v0 = vld [vmem:[%s4243_s1 + $0x98] sm:$0xff]  }
  0x44   : > { %2919 = vmatpush3.bf16.msra.mxu1 %v3375_v35  ;;  %2922 = vmatprep.mubr.bf16.mxu1 %v2551_v6  ;;  %v3848_v56 = vcombine.low %v875_v42, %v878_v52  ;;  %v3851_v59 = vcombine.low %v1326_v49, %v1336_v54  ;;  %v3382_v35 = vld [vmem:[%s4243_s1 + $0x180] sm:$0xff]   ;;  %v882_v6 = vsel %vm3813_vm5, %v2569_v53, %v881_v45  ;;  %v904_v42 = vrot.slane %v902_v15, 4 }
  0x45   : > { %3047 = vmatpush3.bf16.msra.mxu0 %v3376_v51  ;;  %2920 = vmatprep.subr.bf16.mxu1 %v3377_v34  ;;  %v891_v51 = vrot.slane %v3655_v9, 5  ;;  %v885_v9 = vsel %vm3813_vm5, %v883_v58, %v884_v50  ;;  %v3902_v45 = vcombine.low %v3649_v7, %v3652_v8  ;;  %v3910_v49 = vcombine.low %v3665_v23, %v3671_v29 }
  0x46   : > { %3048 = vmatprep.subr.bf16.mxu0 %v3378_v22  ;;  %3031 = vmatmul.mubr.bf16.gmra.mrb[12].mxu0 %v3851_v59  ;;  %v3885_v16 = vcombine.low %v882_v6, %v885_v9  ;;  %v870_v50 = vrot.slane %v3581_v14, 5  ;;  %v896_v7 = vsel %vm3813_vm5, %v2571_v20, %v895_v24  ;;  %v906_v14 = vsel %vm3813_vm5, %v904_v42, %v905_v17  ;;  %v3401_v17 = vld [vmem:[%s4243_s1 + $0xb8] sm:$0xff]  }
  0x47   : > { %3050 = vmatprep.mubr.bf16.mxu0 %v3848_v56  ;;  %v892_v41 = vsel %vm3813_vm5, %v890_v55, %v891_v51  ;;  %v916_v29 = vrot.slane %v3758_v62, 5  ;;  %v2567_v52 = vrot.slane %v3575_v12, 9  ;;  %v2573_v53 = vrot.slane %v3720_v18, 9 }
  0x48   : > { %2921 = vmatpush3.bf16.msra.mxu1 %v3377_v34  ;;  %v3892_v32 = vcombine.low %v889_v40, %v892_v41  ;;  %v898_v34 = vrot.slane %v3674_v30, 5  ;;  %v3388_v30 = vld [vmem:[%s4243_s1 + $0x190] sm:$0xff]   ;;  %v867_v54 = vrot.slane %v3578_v13, 5  ;;  %v911_v12 = vrot.slane %v909_v47, 4 }
  0x49   : > { %3049 = vmatpush3.bf16.msra.mxu0 %v3378_v22  ;;  %2938 = vmatprep.subr.bf16.mxu1 %v3381_v46  ;;  %v2572_v22 = vrot.slane %v3697_v60, 9  ;;  %v2574_v13 = vrot.slane %v3754_v57, 9  ;;  %v918_v6 = vrot.slane %v916_v29, 4  ;;  %v919_v9 = vrot.slane %v3761_v63, 5 }
  0x4a   : > { %3066 = vmatprep.subr.bf16.mxu0 %v3382_v35  ;;  %v899_v8 = vsel %vm3813_vm5, %v897_v28, %v898_v34  ;;  %v868_v51 = vsel %vm3813_vm5, %v2567_v52, %v867_v54  ;;  %v869_v55 = vrot.slane %v867_v54, 4  ;;  %v3956_v24 = vcombine.low %v3720_v18, %v3726_v26  ;;  %v3394_v18 = vld [vmem:[%s4243_s1 + $0x1a0] sm:$0xff]   ;;  %v3413_v52 = vld [vmem:[%s4243_s1 + $0xe8] sm:$0xff]  }
  0x4b   : > { %2923 = vmatmul.mubr.bf16.vlgmr.msra.gmra.mrb[0].mxu1 %v3863_v2  ;;  %v903_v23 = vsel %vm3813_vm5, %v2572_v22, %v902_v15  ;;  %v3931_v58 = vcombine.low %v896_v7, %v899_v8  ;;  %v910_v63 = vsel %vm3813_vm5, %v2573_v53, %v909_v47  ;;  %v1521_v41 = vrot.slane %v3791_v38, 5  ;;  %v3396_v38 = vld [vmem:[%s4243_s1 + $0x1a8] sm:$0xff]   ;;  %v3399_v22 = vld [vmem:[%s4243_s1 + $0xb0] sm:$0xff]   ;;  %v3403_v47 = vld [vmem:[%s4243_s1 + $0xc0] sm:$0xff]  }
  0x4c   : > { %2939 = vmatpush3.bf16.msra.mxu1 %v3381_v46  ;;  %2926 = vmatprep.mubr.bf16.mxu1 %v3868_v5  ;;  %v3393_v46 = vld [vmem:[%s4243_s1 + $0xa0] sm:$0xff]   ;;  %v3941_v1 = vcombine.low %v903_v23, %v906_v14  ;;  %v917_v26 = vsel %vm3813_vm5, %v2574_v13, %v916_v29  ;;  %v920_v15 = vsel %vm3813_vm5, %v918_v6, %v919_v9  ;;  %v2609_v20 = vrot.slane %v3779_v33, 9  ;;  %v3406_v8 = vld [vmem:[%s4243_s1 + $0x1c8] sm:$0xff]   ;;  %v3408_v23 = vld [vmem:[%s4243_s1 + $0x1d0] sm:$0xff]  }
  0x4d   : > { %2940 = vmatprep.subr.bf16.mxu1 %v3383_v21  ;;  %v3982_v28 = vcombine.low %v917_v26, %v920_v15  ;;  %v1523_v34 = vrot.slane %v1521_v41, 4  ;;  %v3990_v42 = vcombine.low %v3754_v57, %v3758_v62  ;;  %v3400_v57 = vld [vmem:[%s4243_s1 + $0x1b0] sm:$0xff]   ;;  %v3404_v7 = vld [vmem:[%s4243_s1 + $0x1c0] sm:$0xff]   ;;  %v3410_v14 = vld [vmem:[%s4243_s1 + $0x1d8] sm:$0xff]  }
  0x4e   : > { %3051 = vmatmul.mubr.bf16.vlgmr.msra.gmra.mrb[0].mxu0 %v3885_v16  ;;  %v1522_v33 = vsel %vm3813_vm5, %v2609_v20, %v1521_v41  ;;  %v3411_v29 = vld [vmem:[%s4243_s1 + $0xe0] sm:$0xff]   ;;  %v3414_v54 = vld [vmem:[%s4243_s1 + $0x1e8] sm:$0xff]   ;;  %v3418_v13 = vld [vmem:[%s4243_s1 + $0x1f0] sm:$0xff]  }
  0x4f   : > { %3067 = vmatpush3.bf16.msra.mxu0 %v3382_v35  ;;  %3054 = vmatprep.mubr.bf16.mxu0 %v3892_v32  ;;  %v912_v35 = vrot.slane %v3729_v27, 5  ;;  %v871_v27 = vsel %vm3813_vm5, %v869_v55, %v870_v50  ;;  %v3405_v50 = vld [vmem:[%s4243_s1 + $0xc8] sm:$0xff]   ;;  %v3412_v53 = vld [vmem:[%s4243_s1 + $0x1e0] sm:$0xff]   ;;  %v3420_v55 = vld [vmem:[%s4243_s1 + $0x1f8] sm:$0xff]  }
  0x50   : > { %2941 = vmatpush3.bf16.msra.mxu1 %v3383_v21  ;;  %3068 = vmatprep.subr.bf16.mxu0 %v3384_v19  ;;  %v3949_v21 = vcombine.low %v3697_v60, %v3700_v61  ;;  %v2575_v40 = vcombine.low %v868_v51, %v871_v27  ;;  %v3395_v61 = vld [vmem:[%s4243_s1 + $0xa8] sm:$0xff]   ;;  %v3421_v6 = vld [vmem:[%s4243_s1 + $0x200] sm:$0xff]   ;;  %v3423_v9 = vld [vmem:[%s4243_s1 + $0x210] sm:$0xff]  }
  0x51   : > { %2942 = vmatprep.subr.bf16.mxu1 %v3387_v4  ;;  %v913_v60 = vsel %vm3813_vm5, %v911_v12, %v912_v35  ;;  %v4067_v12 = vld [vmem:[%s3566_s28 + $0x70] sm:$0xf]  ;;  %v3419_v35 = vld [vmem:[%s4243_s1 + $0xf8] sm:$0xff]   ;;  %v256_v41 = vld [vmem:[%s3566_s28 + $0x74] sm:$0x1] }
  0x52   : > { %v1910_v26 = vshll.u32 %v256_v41, 16 }
  0x53   : > { %2927 = vmatmul.mubr.bf16.gmra.mrb[4].mxu1 %v3902_v45  ;;  %3069 = vmatpush3.bf16.msra.mxu0 %v3384_v19  ;;  %v3975_v19 = vcombine.low %v910_v63, %v913_v60 }
  0x54   : > { %2943 = vmatpush3.bf16.msra.mxu1 %v3387_v4  ;;  %2930 = vmatprep.mubr.bf16.mxu1 %v3910_v49  ;;  %v1524_v4 = vrot.slane %v3794_v39, 5 }
  0x55   : > { %2944 = vmatprep.subr.bf16.mxu1 %v3389_v0  ;;  %3070 = vmatprep.subr.bf16.mxu0 %v3388_v30 }
  0x56   : > { %3055 = vmatmul.mubr.bf16.gmra.mrb[4].mxu0 %v3931_v58  ;;  %v1525_v39 = vsel %vm3813_vm5, %v1523_v34, %v1524_v4  ;;  %v3428_v34 = vld [vmem:[%s4243_s1 + $0x238] sm:$0xff]  }
  0x57   : > { %3071 = vmatpush3.bf16.msra.mxu0 %v3388_v30  ;;  %3058 = vmatprep.mubr.bf16.mxu0 %v3941_v1  ;;  %v4005_v62 = vcombine.low %v1522_v33, %v1525_v39  ;;  %v3402_v30 = vld [vmem:[%s4243_s1 + $0x1b8] sm:$0xff]  }
  0x58   : > { %2945 = vmatpush3.bf16.msra.mxu1 %v3389_v0  ;;  %3072 = vmatprep.subr.bf16.mxu0 %v3390_v37  ;;  %v3407_v0 = vld [vmem:[%s4243_s1 + $0xd0] sm:$0xff]  }
  0x59   : > { %2946 = vmatprep.subr.bf16.mxu1 %v3393_v46 }
  0x5b   : > { %2931 = vmatmul.mubr.bf16.gmra.mrb[8].mxu1 %v3949_v21  ;;  %3073 = vmatpush3.bf16.msra.mxu0 %v3390_v37  ;;  %v3416_v37 = vld [vmem:[%s4243_s1 + $0xf0] sm:$0xff]  }
  0x5c   : > { %2947 = vmatpush3.bf16.msra.mxu1 %v3393_v46  ;;  %2934 = vmatprep.mubr.bf16.mxu1 %v3956_v24  ;;  %v4064_v46 = vld [vmem:[%s3566_s28 + $0x6c] sm:$0xf] }
  0x5d   : > { %2948 = vmatprep.subr.bf16.mxu1 %v3395_v61  ;;  %3074 = vmatprep.subr.bf16.mxu0 %v3394_v18  ;;  %v2619_v51 = vcombine.low %v4064_v46, %v4067_v12  ;;  %v1894_v27 = vshll.u32 %v4064_v46, 16  ;;  %v2637_v36 = vrot.slane %v4064_v46, 9 }
  0x5e   : > { %3059 = vmatmul.mubr.bf16.gmra.mrb[8].mxu0 %v3975_v19 }
  0x5f   : > { %3075 = vmatpush3.bf16.msra.mxu0 %v3394_v18  ;;  %3062 = vmatprep.mubr.bf16.mxu0 %v3982_v28  ;;  %v1896_v63 = vrot.slane %v1894_v27, 5 }
  0x60   : > { %2949 = vmatpush3.bf16.msra.mxu1 %v3395_v61  ;;  %3076 = vmatprep.subr.bf16.mxu0 %v3396_v38  ;;  %v3425_v61 = vld [vmem:[%s4243_s1 + $0x220] sm:$0xff]  }
  0x61   : > { %2950 = vmatprep.subr.bf16.mxu1 %v3399_v22 }
  0x63   : > { %2935 = vmatmul.mubr.bf16.gmra.mrb[12].mxu1 %v3990_v42  ;;  %3077 = vmatpush3.bf16.msra.mxu0 %v3396_v38  ;;  %v1912_v38 = vrot.slane %v1910_v26, 5 }
  0x64   : > { %2951 = vmatpush3.bf16.msra.mxu1 %v3399_v22  ;;  %2954 = vmatprep.mubr.bf16.mxu1 %v2575_v40  ;;  %v1904_v40 = vshrl.u32 %v4067_v12, 16  ;;  %v2101_v22 = vrot.slane %v256_v41, 5 }
  0x65   : > { %2952 = vmatprep.subr.bf16.mxu1 %v3401_v17  ;;  %3078 = vmatprep.subr.bf16.mxu0 %v3400_v57 }
  0x66   : > { %3063 = vmatmul.mubr.bf16.gmra.mrb[12].mxu0 %v4005_v62 }
  0x67   : > { %3079 = vmatpush3.bf16.msra.mxu0 %v3400_v57  ;;  %3082 = vmatprep.mubr.bf16.mxu0 %v3868_v5 }
  0x68   : > { %2953 = vmatpush3.bf16.msra.mxu1 %v3401_v17  ;;  %3080 = vmatprep.subr.bf16.mxu0 %v3402_v30 }
  0x69   : > { %2970 = vmatprep.subr.bf16.mxu1 %v3403_v47 }
  0x6b   : > { %2955 = vmatmul.mubr.bf16.vlgmr.msra.gmra.mrb[0].mxu1 %v3848_v56  ;;  %3081 = vmatpush3.bf16.msra.mxu0 %v3402_v30  ;;  %v3409_v56 = vld [vmem:[%s4243_s1 + $0xd8] sm:$0xff]  }
  0x6c   : > { %2971 = vmatpush3.bf16.msra.mxu1 %v3403_v47  ;;  %2958 = vmatprep.mubr.bf16.mxu1 %v3885_v16 }
  0x6d   : > { %2972 = vmatprep.subr.bf16.mxu1 %v3405_v50  ;;  %3098 = vmatprep.subr.bf16.mxu0 %v3404_v7 }
  0x6e   : > { %3083 = vmatmul.mubr.bf16.vlgmr.msra.gmra.mrb[0].mxu0 %v3902_v45 }
  0x6f   : > { %3099 = vmatpush3.bf16.msra.mxu0 %v3404_v7  ;;  %3086 = vmatprep.mubr.bf16.mxu0 %v3910_v49 }
  0x70   : > { %2973 = vmatpush3.bf16.msra.mxu1 %v3405_v50  ;;  %3100 = vmatprep.subr.bf16.mxu0 %v3406_v8 }
  0x71   : > { %2974 = vmatprep.subr.bf16.mxu1 %v3407_v0 }
  0x73   : > { %2959 = vmatmul.mubr.bf16.gmra.mrb[4].mxu1 %v3892_v32  ;;  %3101 = vmatpush3.bf16.msra.mxu0 %v3406_v8 }
  0x74   : > { %2975 = vmatpush3.bf16.msra.mxu1 %v3407_v0  ;;  %2962 = vmatprep.mubr.bf16.mxu1 %v3931_v58 }
  0x75   : > { %2976 = vmatprep.subr.bf16.mxu1 %v3409_v56  ;;  %3102 = vmatprep.subr.bf16.mxu0 %v3408_v23 }
  0x76   : > { %3087 = vmatmul.mubr.bf16.gmra.mrb[4].mxu0 %v3949_v21 }
  0x77   : > { %3103 = vmatpush3.bf16.msra.mxu0 %v3408_v23  ;;  %3090 = vmatprep.mubr.bf16.mxu0 %v3956_v24 }
  0x78   : > { %2977 = vmatpush3.bf16.msra.mxu1 %v3409_v56  ;;  %3104 = vmatprep.subr.bf16.mxu0 %v3410_v14 }
  0x79   : > { %2978 = vmatprep.subr.bf16.mxu1 %v3411_v29 }
  0x7b   : > { %2963 = vmatmul.mubr.bf16.gmra.mrb[8].mxu1 %v3941_v1  ;;  %3105 = vmatpush3.bf16.msra.mxu0 %v3410_v14 }
  0x7c   : > { %2979 = vmatpush3.bf16.msra.mxu1 %v3411_v29  ;;  %2966 = vmatprep.mubr.bf16.mxu1 %v3975_v19 }
  0x7d   : > { %2980 = vmatprep.subr.bf16.mxu1 %v3413_v52  ;;  %3106 = vmatprep.subr.bf16.mxu0 %v3412_v53 }
  0x7e   : > { %3091 = vmatmul.mubr.bf16.gmra.mrb[8].mxu0 %v3990_v42 }
  0x7f   : > { %3107 = vmatpush3.bf16.msra.mxu0 %v3412_v53  ;;  %3094 = vmatprep.mubr.bf16.mxu0 %v3840_v25 }
  0x80   : > { %2981 = vmatpush3.bf16.msra.mxu1 %v3413_v52  ;;  %3108 = vmatprep.subr.bf16.mxu0 %v3414_v54 }
  0x81   : > { %2982 = vmatprep.subr.bf16.mxu1 %v3416_v37 }
  0x83   : > { %2967 = vmatmul.mubr.bf16.gmra.mrb[12].mxu1 %v3982_v28  ;;  %3109 = vmatpush3.bf16.msra.mxu0 %v3414_v54 }
  0x84   : > { %2983 = vmatpush3.bf16.msra.mxu1 %v3416_v37  ;;  %2986 = vmatprep.mubr.bf16.mxu1 %v3863_v2  ;;  %v3422_v2 = vld [vmem:[%s4243_s1 + $0x208] sm:$0xff]  }
  0x85   : > { %2984 = vmatprep.subr.bf16.mxu1 %v3419_v35  ;;  %3110 = vmatprep.subr.bf16.mxu0 %v3418_v13 }
  0x86   : > { %3095 = vmatmul.mubr.bf16.gmra.mrb[12].mxu0 %v2619_v51 }
  0x87   : > { %3111 = vmatpush3.bf16.msra.mxu0 %v3418_v13  ;;  %3114 = vmatprep.mubr.bf16.mxu0 %v3683_v43  ;;  %v1891_v43 = vshrl.u32 %v4064_v46, 16 }
  0x88   : > { %2985 = vmatpush3.bf16.msra.mxu1 %v3419_v35  ;;  %3112 = vmatprep.subr.bf16.mxu0 %v3420_v55 }
  0x89   : > { %3162 = vmatprep.subr.bf16.mxu1 %v3421_v6 }
  0x8b   : > { %2987 = vmatmul.mubr.bf16.vlgmr.msra.gmra.mrb[0].mxu1 %v3868_v5  ;;  %3113 = vmatpush3.bf16.msra.mxu0 %v3420_v55  ;;  %v3424_v5 = vld [vmem:[%s4243_s1 + $0x218] sm:$0xff]  }
  0x8c   : > { %3170 = vmatpush3.bf16.msra.mxu1 %v3421_v6  ;;  %2990 = vmatprep.mubr.bf16.mxu1 %v3902_v45  ;;  %v1900_v45 = vshll.u32 %v4067_v12, 16 }
  0x8d   : > { %3163 = vmatprep.subr.bf16.mxu1 %v3422_v2  ;;  %3130 = vmatprep.subr.bf16.mxu0 %v3421_v6 }
  0x8e   : > { %3115 = vmatmul.mubr.bf16.vlgmr.msra.gmra.mrb[0].mxu0 %v3711_v3  ;;  %v1893_v3 = vrot.slane %v1891_v43, 4  ;;  %v1902_v60 = vrot.slane %v1900_v45, 5 }
  0x8f   : > { %3131 = vmatpush3.bf16.msra.mxu0 %v3421_v6  ;;  %3118 = vmatprep.mubr.bf16.mxu0 %v3744_v44  ;;  %v1906_v44 = vrot.slane %v1904_v40, 4  ;;  %v4164_v6 = vld [vmem:[%s4244_s2] ss:$0 sm:$0xff]  ;;  %v4169_v40 = vstv %s2307_s13 }
  0x90   : > { %3171 = vmatpush3.bf16.msra.mxu1 %v3422_v2  ;;  %3132 = vmatprep.subr.bf16.mxu0 %v3422_v2 }
  0x91   : > { %3164 = vmatprep.subr.bf16.mxu1 %v3423_v9  ;;  %v1907_v18 = vor.u32 %v1906_v44, %v1902_v60 }
  0x93   : > { %2991 = vmatmul.mubr.bf16.gmra.mrb[4].mxu1 %v3910_v49  ;;  %3133 = vmatpush3.bf16.msra.mxu0 %v3422_v2  ;;  %v3426_v49 = vld [vmem:[%s4243_s1 + $0x228] sm:$0xff]   ;;  %v1908_v15 = vrot.slane %v1907_v18, 4 }
  0x94   : > { %3172 = vmatpush3.bf16.msra.mxu1 %v3423_v9  ;;  %2994 = vmatprep.mubr.bf16.mxu1 %v3949_v21  ;;  %v1897_v21 = vor.u32 %v1896_v63, %v1893_v3 }
  0x95   : > { %3165 = vmatprep.subr.bf16.mxu1 %v3424_v5  ;;  %3134 = vmatprep.subr.bf16.mxu0 %v3423_v9  ;;  %v1913_v20 = vsel %vm3612_vm2, %v1908_v15, %v1912_v38 }
  0x96   : > { %3119 = vmatmul.mubr.bf16.gmra.mrb[4].mxu0 %v3772_v11  ;;  %v1898_v11 = vrot.slane %v1897_v21, 4 }
  0x97   : > { %3135 = vmatpush3.bf16.msra.mxu0 %v3423_v9  ;;  %3122 = vmatprep.mubr.bf16.mxu0 %v3798_v48  ;;  %v3427_v48 = vld [vmem:[%s4243_s1 + $0x230] sm:$0xff]  }
  0x98   : > { %3173 = vmatpush3.bf16.msra.mxu1 %v3424_v5  ;;  %3136 = vmatprep.subr.bf16.mxu0 %v3424_v5 }
  0x99   : > { %3166 = vmatprep.subr.bf16.mxu1 %v3425_v61 }
  0x9b   : > { %2995 = vmatmul.mubr.bf16.gmra.mrb[8].mxu1 %v3956_v24  ;;  %3137 = vmatpush3.bf16.msra.mxu0 %v3424_v5  ;;  %v1903_v24 = vsel %vm3612_vm2, %v1898_v11, %v1902_v60 }
  0x9c   : > { %3174 = vmatpush3.bf16.msra.mxu1 %v3425_v61  ;;  %2998 = vmatprep.mubr.bf16.mxu1 %v3990_v42  ;;  %v2628_v4 = vcombine.low %v1903_v24, %v1913_v20 }
  0x9d   : > { %3167 = vmatprep.subr.bf16.mxu1 %v3426_v49  ;;  %3138 = vmatprep.subr.bf16.mxu0 %v3425_v61 }
  0x9e   : > { %3123 = vmatmul.mubr.bf16.gmra.mrb[8].mxu0 %v3822_v31  ;;  %v2098_v31 = vrot.slane %v4067_v12, 5 }
  0x9f   : > { %3139 = vmatpush3.bf16.msra.mxu0 %v3425_v61  ;;  %3126 = vmatprep.mubr.bf16.mxu0 %v3851_v59 }
  0xa0   : > { %3175 = vmatpush3.bf16.msra.mxu1 %v3426_v49  ;;  %3140 = vmatprep.subr.bf16.mxu0 %v3426_v49  ;;  %v2100_v59 = vrot.slane %v2098_v31, 4 }
  0xa1   : > { %3168 = vmatprep.subr.bf16.mxu1 %v3427_v48 }
  0xa3   : > { %2999 = vmatmul.mubr.bf16.gmra.mrb[12].mxu1 %v3840_v25  ;;  %3141 = vmatpush3.bf16.msra.mxu0 %v3426_v49  ;;  %v2099_v25 = vsel %vm3813_vm5, %v2637_v36, %v2098_v31 }
  0xa4   : > { %3176 = vmatpush3.bf16.msra.mxu1 %v3427_v48  ;;  %3154 = vmatprep.mubr.bf16.mxu1 %v3975_v19  ;;  %v2102_v19 = vsel %vm3813_vm5, %v2100_v59, %v2101_v22 }
  0xa5   : > { %3169 = vmatprep.subr.bf16.mxu1 %v3428_v34  ;;  %3142 = vmatprep.subr.bf16.mxu0 %v3427_v48  ;;  %v2638_v42 = vcombine.low %v2099_v25, %v2102_v19 }
  0xa6   : > { %3127 = vmatmul.mubr.bf16.gmra.mrb[12].mxu0 %v2628_v4 }
  0xa7   : > { %3143 = vmatpush3.bf16.msra.mxu0 %v3427_v48  ;;  %3146 = vmatprep.mubr.bf16.mxu0 %v3885_v16 }
  0xa8   : > { %3177 = vmatpush3.bf16.msra.mxu1 %v3428_v34  ;;  %3144 = vmatprep.subr.bf16.mxu0 %v3428_v34 }
  0xab   : > { %3155 = vmatmul.mubr.bf16.vlgmr.msra.gmra.mrb[16].mxu1 %v3982_v28  ;;  %3145 = vmatpush3.bf16.msra.mxu0 %v3428_v34 }
  0xac   : > { %3158 = vmatprep.mubr.bf16.mxu1 %v4005_v62 }
  0xae   : > { %3147 = vmatmul.mubr.bf16.vlgmr.msra.gmra.mrb[0].mxu0 %v3892_v32 }
  0xaf   : > { %3150 = vmatprep.mubr.bf16.mxu0 %v3931_v58 }
  0xb3   : > { %3159 = vmatmul.mubr.bf16.gmra.mrb[20].mxu1 %v2638_v42 }
  0xb6   : > { %3151 = vmatmul.mubr.bf16.gmra.mrb[4].mxu0 %v3941_v1 }
 0x15e   : > { %v2988_v16 = vpop.f32.mrb[0].mxu1 }
 0x15f   : > { %v1234_v33 = vpop.f32.mrb[1].mxu1 }
 0x160   : > { %v4142_v28 = vpop.f32.mrb[2].mxu1 }
 0x161   : > { %v4144_v39 = vpop.f32.mrb[3].mxu1 }
 0x166   : > { %v4146_v17 = vpop.f32.mrb[4].mxu1 }
 0x167   : > { %v4148_v10 = vpop.f32.mrb[5].mxu1 }
 0x168   : > { %v4150_v57 = vpop.f32.mrb[6].mxu1 }
 0x169   : > { %v4152_v62 = vpop.f32.mrb[7].mxu1 }
 0x16e   : > { %v2996_v32 = vpop.f32.mrb[8].mxu1 }
 0x16f   : > { %v1266_v58 = vpop.f32.mrb[9].mxu1 }
 0x170   : > { %v2997_v30 = vpop.f32.mrb[10].mxu1 }
 0x171   : > { %v1269_v47 = vpop.f32.mrb[11].mxu1  ;;  %v3124_v1 = vpop.f32.mrb[8].mxu0 }
 0x172   : > { %v3186_v50 = vadd.f32 %v3124_v1, %v2996_v32  ;;  %v2048_v7 = vpop.f32.mrb[9].mxu0 }
 0x173   : > { %v3188_v8 = vadd.f32 %v2048_v7, %v1266_v58  ;;  %v3125_v0 = vpop.f32.mrb[10].mxu0 }
 0x174   : > { %v3190_v56 = vadd.f32 %v3125_v0, %v2997_v30  ;;  %v2051_v23 = vpop.f32.mrb[11].mxu0 }
 0x175   : > { %v3192_v29 = vadd.f32 %v2051_v23, %v1269_v47 }
 0x176   : > { %v3000_v14 = vpop.f32.mrb[12].mxu1 }
 0x177   : > { %v1282_v52 = vpop.f32.mrb[13].mxu1 }
 0x178   : > { %v3001_v53 = vpop.f32.mrb[14].mxu1 }
 0x179   : > { %v1285_v54 = vpop.f32.mrb[15].mxu1  ;;  %v3128_v37 = vpop.f32.mrb[12].mxu0 }
 0x17a   : > { %v4155_v46 = vadd.f32 %v3128_v37, %v3000_v14  ;;  %v2064_v12 = vpop.f32.mrb[13].mxu0 }
 0x17b   : > { %v4157_v35 = vadd.f32 %v2064_v12, %v1282_v52  ;;  %v3129_v13 = vpop.f32.mrb[14].mxu0 }
 0x17c   : > { %v4159_v51 = vadd.f32 %v3129_v13, %v3001_v53  ;;  %v2067_v55 = vpop.f32.mrb[15].mxu0 }
 0x17d   : > { %v4167_v9 = vadd.f32 %v2067_v55, %v1285_v54 }
 0x17e   : > { %v3156_v2 = vpop.f32.mrb[16].mxu1 }
 0x17f   : > { %v3187_v43 = vadd.f32 %v3186_v50, %v3156_v2  ;;  %v2237_v27 = vpop.f32.mrb[17].mxu1 }
 0x180   : > { %v3189_v5 = vadd.f32 %v3188_v8, %v2237_v27  ;;  %v3157_v45 = vpop.f32.mrb[18].mxu1 }
 0x181   : > { %v2301_v3 = vadd.f32 %v3187_v43, %v4164_v6  ;;  %v3191_v63 = vadd.f32 %v3190_v56, %v3157_v45  ;;  %v2240_v60 = vpop.f32.mrb[19].mxu1  ;;  %v3148_v41 = vpop.f32.mrb[0].mxu0 }
 0x182   : > { %v2299_v44 = vadd.f32 %v3189_v5, %v4164_v6  ;;  %v3193_v61 = vadd.f32 %v3192_v29, %v2240_v60  ;;  %v3178_v18 = vadd.f32 %v3148_v41, %v2988_v16  ;;  %v2205_v26 = vpop.f32.mrb[1].mxu0 }
 0x183   : > { %vm2318_vm6 = vcmp.ge.f32.partialorder %v2301_v3, 0.0  ;;  %v2335_v49 = vmul.f32 %v4169_v40, %v2301_v3  ;;  %v2302_v21 = vadd.f32 %v3191_v63, %v4164_v6  ;;  %v3179_v48 = vadd.f32 %v2205_v26, %v1234_v33  ;;  %v3149_v24 = vpop.f32.mrb[2].mxu0 }
 0x184   : > { %vm2316_vm7 = vcmp.ge.f32.partialorder %v2299_v44, 0.0  ;;  %v2333_v11 = vmul.f32 %v4169_v40, %v2299_v44  ;;  %v2300_v15 = vadd.f32 %v3193_v61, %v4164_v6  ;;  %v2293_v34 = vadd.f32 %v3178_v18, %v4164_v6  ;;  %v2208_v36 = vpop.f32.mrb[3].mxu0 }
 0x185   : > { %v2351_v38 = vsel %vm2318_vm6, %v2301_v3, %v2335_v49  ;;  %vm2319_vm8 = vcmp.ge.f32.partialorder %v2302_v21, 0.0  ;;  %v2336_v20 = vmul.f32 %v4169_v40, %v2302_v21  ;;  %v3180_v31 = vadd.f32 %v3149_v24, %v4142_v28 }
 0x186   : > { %v2349_v4 = vsel %vm2316_vm7, %v2299_v44, %v2333_v11  ;;  %vm2317_vm9 = vcmp.ge.f32.partialorder %v2300_v15, 0.0  ;;  %v3160_v59 = vpop.f32.mrb[20].mxu1  ;;  %v2291_v22 = vadd.f32 %v3179_v48, %v4164_v6  ;;  %v3181_v19 = vadd.f32 %v2208_v36, %v4144_v39 }
 0x187   : > { %v2352_v25 = vsel %vm2319_vm8, %v2302_v21, %v2336_v20  ;;  %v2334_v42 = vmul.f32 %v4169_v40, %v2300_v15  ;;  %v2253_v16 = vpop.f32.mrb[21].mxu1  ;;  %vm2310_vm10 = vcmp.ge.f32.partialorder %v2293_v34, 0.0  ;;  %v2327_v33 = vmul.f32 %v4169_v40, %v2293_v34 }
 0x188   : > { %v2294_v28 = vadd.f32 %v3180_v31, %v4164_v6  ;;  %v2711_v32 = vpack.c.bf16 %v2352_v25, %v2351_v38  ;;  %v3161_v58 = vpop.f32.mrb[22].mxu1  ;;  %vm2308_vm11 = vcmp.ge.f32.partialorder %v2291_v22, 0.0  ;;  %v2325_v30 = vmul.f32 %v4169_v40, %v2291_v22 }
 0x189   : > { %v2292_v47 = vadd.f32 %v3181_v19, %v4164_v6  ;;  %v2350_v1 = vsel %vm2317_vm9, %v2300_v15, %v2334_v42  ;;  %v2256_v39 = vpop.f32.mrb[23].mxu1  ;;  %v2343_v50 = vsel %vm2310_vm10, %v2293_v34, %v2327_v33  ;;  %v3152_v23 = vpop.f32.mrb[4].mxu0  ;;  %v3195_v14 = vadd.f32 %v4155_v46, %v3160_v59 }
 0x18a   : > { %vm2311_vm12 = vcmp.ge.f32.partialorder %v2294_v28, 0.0  ;;  %v2328_v7 = vmul.f32 %v4169_v40, %v2294_v28  ;;  %2727 = vst [vmem:[%s4184_s25 + $0x28] sm:$0xff] %v2711_v32   ;;  %v2706_v8 = vpack.c.bf16 %v2350_v1, %v2349_v4  ;;  %v2341_v0 = vsel %vm2308_vm11, %v2291_v22, %v2325_v30  ;;  %v2221_v53 = vpop.f32.mrb[5].mxu0 }
 0x18b   : > { %vm2309_vm13 = vcmp.ge.f32.partialorder %v2292_v47, 0.0  ;;  %v2326_v56 = vmul.f32 %v4169_v40, %v2292_v47  ;;  %v3182_v52 = vadd.f32 %v3152_v23, %v4146_v17  ;;  %v3197_v54 = vadd.f32 %v4157_v35, %v2253_v16  ;;  %v3153_v43 = vpop.f32.mrb[6].mxu0 }
 0x18c   : > { %v2344_v29 = vsel %vm2311_vm12, %v2294_v28, %v2328_v7  ;;  %2726 = vst [vmem:[%s4184_s25 + $0x20] sm:$0xff] %v2706_v8   ;;  %v3199_v37 = vadd.f32 %v4159_v51, %v3161_v58  ;;  %v2305_v55 = vadd.f32 %v3195_v14, %v4164_v6  ;;  %v3183_v2 = vadd.f32 %v2221_v53, %v4148_v10  ;;  %v2224_v45 = vpop.f32.mrb[7].mxu0 }
 0x18d   : > { %v2691_v12 = vpack.c.bf16 %v2344_v29, %v2343_v50  ;;  %v2342_v13 = vsel %vm2309_vm13, %v2292_v47, %v2326_v56  ;;  %v2297_v46 = vadd.f32 %v3182_v52, %v4164_v6  ;;  %v3184_v5 = vadd.f32 %v3153_v43, %v4150_v57 }
 0x18e   : > { %v2686_v27 = vpack.c.bf16 %v2342_v13, %v2341_v0  ;;  %v2306_v17 = vadd.f32 %v3199_v37, %v4164_v6  ;;  %v2339_v35 = vmul.f32 %v4169_v40, %v2305_v55  ;;  %v2295_v51 = vadd.f32 %v3183_v2, %v4164_v6 }
 0x18f   : > { %2723 = vst [vmem:[%s4184_s25 + $0x8] sm:$0xff] %v2691_v12   ;;  %v2331_v3 = vmul.f32 %v4169_v40, %v2297_v46  ;;  %vm2322_vm14 = vcmp.ge.f32.partialorder %v2305_v55, 0.0  ;;  %v2298_v10 = vadd.f32 %v3184_v5, %v4164_v6  ;;  %vm2314_vm15 = vcmp.ge.f32.partialorder %v2297_v46, 0.0 }
 0x190   : > { %2687 = vst [vmem:[%s4184_s25] sm:$0xff] %v2686_v27   ;;  %v2303_v63 = vadd.f32 %v3197_v54, %v4164_v6  ;;  %vm2323_vm0 = vcmp.ge.f32.partialorder %v2306_v17, 0.0  ;;  %v2340_v57 = vmul.f32 %v4169_v40, %v2306_v17  ;;  %v3185_v44 = vadd.f32 %v2224_v45, %v4152_v62 }
 0x191   : > { %vm2315_vm1 = vcmp.ge.f32.partialorder %v2298_v10, 0.0  ;;  %v2332_v60 = vmul.f32 %v4169_v40, %v2298_v10  ;;  %v2355_v61 = vsel %vm2322_vm14, %v2305_v55, %v2339_v35  ;;  %v2329_v41 = vmul.f32 %v4169_v40, %v2295_v51 }
 0x192   : > { %v2356_v49 = vsel %vm2323_vm0, %v2306_v17, %v2340_v57  ;;  %v3201_v21 = vadd.f32 %v4167_v9, %v2256_v39  ;;  %v2347_v18 = vsel %vm2314_vm15, %v2297_v46, %v2331_v3  ;;  %v2296_v15 = vadd.f32 %v3185_v44, %v4164_v6 }
 0x193   : > { %v2348_v26 = vsel %vm2315_vm1, %v2298_v10, %v2332_v60  ;;  %v2721_v11 = vpack.c.bf16 %v2356_v49, %v2355_v61  ;;  %vm2312_vm2 = vcmp.ge.f32.partialorder %v2295_v51, 0.0  ;;  %v2337_v38 = vmul.f32 %v4169_v40, %v2303_v63 }
 0x194   : > { %v2701_v48 = vpack.c.bf16 %v2348_v26, %v2347_v18  ;;  %v2304_v62 = vadd.f32 %v3201_v21, %v4164_v6  ;;  %vm2320_vm3 = vcmp.ge.f32.partialorder %v2303_v63, 0.0  ;;  %vm2313_vm4 = vcmp.ge.f32.partialorder %v2296_v15, 0.0 }
 0x195   : > { %2729 = vst [vmem:[%s4184_s25 + $0x38] sm:$0xff] %v2721_v11   ;;  %v2330_v24 = vmul.f32 %v4169_v40, %v2296_v15  ;;  %v2345_v20 = vsel %vm2312_vm2, %v2295_v51, %v2329_v41  ;;  %v2353_v4 = vsel %vm2320_vm3, %v2303_v63, %v2337_v38 }
 0x196   : > { %2725 = vst [vmem:[%s4184_s25 + $0x18] sm:$0xff] %v2701_v48   ;;  %vm2321_vm5 = vcmp.ge.f32.partialorder %v2304_v62, 0.0  ;;  %v2338_v9 = vmul.f32 %v4169_v40, %v2304_v62 }
 0x197   : > { %v2346_v34 = vsel %vm2313_vm4, %v2296_v15, %v2330_v24 }
 0x198   : > { %v2696_v31 = vpack.c.bf16 %v2346_v34, %v2345_v20  ;;  %v2354_v36 = vsel %vm2321_vm5, %v2304_v62, %v2338_v9 }
 0x199   : > { %v2716_v59 = vpack.c.bf16 %v2354_v36, %v2353_v4 }
 0x19a   : > { %2724 = vst [vmem:[%s4184_s25 + $0x10] sm:$0xff] %v2696_v31  }
 0x19b   : > { %2728 = vst [vmem:[%s4184_s25 + $0x30] sm:$0xff] %v2716_v59  }
 0x19c PF: > { %s15_s21 = sadd.s32 1, %s3467_s21   ;;  %s4251_s17 = smov %s3459_s19 }
 0x19d   : > { %p12_p7 = scmp.ge.s32.totalorder %s15_s21, 6   ;;  %s4252_s18 = smov %s3463_s20 }
 0x19e   : > { %s4253_s19 = smov %s4256_s3  ;;  %s4254_s20 = smov %s4260_s22 }
 0x19f   :  { %14 = sbr.rel (!%p12_p7) target bundleno = 3 (0x3), region = 67 }

// kernel: didn_forward.34
= control target key start
LH: loop header
LB: loop body
LE: loop exit
PB: predicated region body
PF: predicated region fallthrough
CT: control target
= control target key end

     0   :  { %s2240_s17 = smov 0   ;;  %s2242_s18 = smov 0   ;;  %s2643_s0 = inlined_call_operand.vmem [shape: bf16[2,9,9,512], index: 0, kind: input, shape index: {}]   ;;  %s2644_s1 = inlined_call_operand.vmem [shape: bf16[1152,128], index: 1, kind: input, shape index: {}]   ;;  %s2645_s2 = inlined_call_operand.vmem [shape: f32[1,128], index: 2, kind: input, shape index: {}]   ;;  %s2646_s3 = inlined_call_operand.<no memory space> [shape: f32[1,1], index: 3, kind: input, shape index: {}]   ;;  %s2647_s4 = inlined_call_operand.vmem [shape: bf16[2,64,128], index: 4, kind: output, shape index: {}]  }
   0x1   :  { %9 = sst [smem:[#allocation2]] %s2646_s3  ;;  %s2244_s19 = smov 0  }
   0x2   :  { %s2246_s20 = smov 0   ;;  %s2248_s21 = smov 0  }
   0x3 LB: > { %s24_s3 = sadd.s32 1, %s2202_s19  ;;  %s27_s22 = sadd.s32 1, %s2206_s20  ;;  %s2210_s21 = sphi %s2248_s21, %s15_s21   ;;  %s2206_s20 = sphi %s2246_s20, %s2653_s20   ;;  %s2202_s19 = sphi %s2244_s19, %s2652_s19   ;;  %s2198_s18 = sphi %s2242_s18, %s2651_s18   ;;  %s2194_s17 = sphi %s2240_s17, %s2650_s17  }
   0x4   : > { %p25_p0 = scmp.ge.s32.totalorder %s24_s3, 2  ;;  %p1635_p1 = scmp.ge.s32.totalorder %s2210_s21, 1 }
   0x5   : > { %p177_p2 = scmp.lt.s32.totalorder %s2210_s21, 5 }
   0x6   : > { %s2655_s3 = smov (%p25_p0, %s24_s3), 0  ;;  %s2657_s22 = smov (!%p25_p0, %s27_s22), %s2206_s20 }
   0x7   : > { %p178_p3 = pnand %p1635_p1, %p177_p2  ;;  %p29_p4 = scmp.ge.s32.totalorder %s2657_s22, 2 }
   0x8   : > { %v2100_v0 = vld [vmem:[%s2644_s1 + $0x40] sm:$0xff] (!%p178_p3)   ;;  %p207_p5 = scmp.lt.s32.totalorder (!%p178_p3), %s2198_s18, 1  ;;  %v2102_v2 = vld [vmem:[%s2644_s1 + $0x48] sm:$0xff] (!%p178_p3)   ;;  %v2104_v4 = vld [vmem:[%s2644_s1 + $0x50] sm:$0xff] (!%p178_p3)   ;;  %s1741_s23 = sshll.u32 (!%p178_p3), %s2194_s17, 7 }
   0x9   : > { %s2659_s22 = smov (%p29_p4, %s2657_s22), 0  ;;  %181 = sbr.rel (%p178_p3) target bundleno = 396 (0x18c), region = 36 }
   0xa   : > { %v2101_v1 = vld [vmem:[%s2644_s1 + $0x100] sm:$0xff] (!%p178_p3)   ;;  %1847 = vmatprep.subr.bf16.mxu1 (!%p178_p3), %v2100_v0  ;;  %v2103_v3 = vld [vmem:[%s2644_s1 + $0x108] sm:$0xff] (!%p178_p3)   ;;  %v2105_v5 = vld [vmem:[%s2644_s1 + $0x110] sm:$0xff] (!%p178_p3)   ;;  %vm495_vm0 = vsmask.f32 (!%p178_p3), 3328  ;;  %s1637_s10 = sshll.u32 (!%p178_p3), %s2194_s17, 2 }
   0xb   : > { %1927 = vmatprep.subr.bf16.mxu0 (!%p178_p3), %v2101_v1  ;;  %1848 = vmatpush3.bf16.msra.mxu1 (!%p178_p3), %v2100_v0  ;;  %v2106_v6 = vld [vmem:[%s2644_s1 + $0x58] sm:$0xff] (!%p178_p3)   ;;  %v2108_v8 = vld [vmem:[%s2644_s1 + $0x60] sm:$0xff] (!%p178_p3)   ;;  %v2110_v10 = vld [vmem:[%s2644_s1 + $0x68] sm:$0xff] (!%p178_p3)   ;;  %vm496_vm1 = vsmask.f32 (!%p178_p3), 7440  ;;  %s1511_s11 = sld [smem:[#allocation2]] (!%p178_p3) }
   0xc   : > { %1928 = vmatpush3.bf16.msra.mxu0 (!%p178_p3), %v2101_v1  ;;  %1849 = vmatprep.subr.bf16.mxu1 (!%p178_p3), %v2102_v2  ;;  %v2107_v7 = vld [vmem:[%s2644_s1 + $0x118] sm:$0xff] (!%p178_p3)   ;;  %v2109_v9 = vld [vmem:[%s2644_s1 + $0x120] sm:$0xff] (!%p178_p3)   ;;  %v2111_v13 = vld [vmem:[%s2644_s1 + $0x128] sm:$0xff] (!%p178_p3)   ;;  %p215_p6 = scmp.lt.s32.totalorder (!%p178_p3), %s1637_s10, 7 }
   0xd   : > { %1929 = vmatprep.subr.bf16.mxu0 (!%p178_p3), %v2103_v3  ;;  %v2112_v20 = vld [vmem:[%s2644_s1 + $0x70] sm:$0xff] (!%p178_p3)   ;;  %v2114_v23 = vld [vmem:[%s2644_s1 + $0x78] sm:$0xff] (!%p178_p3)   ;;  %v2116_v32 = vld [vmem:[%s2644_s1] sm:$0xff] (!%p178_p3)  }
   0xe   : > { %v2113_v22 = vld [vmem:[%s2644_s1 + $0x130] sm:$0xff] (!%p178_p3)   ;;  %v2115_v27 = vld [vmem:[%s2644_s1 + $0x138] sm:$0xff] (!%p178_p3)   ;;  %v2117_v42 = vld [vmem:[%s2644_s1 + $0x140] sm:$0xff] (!%p178_p3)  }
   0xf   : > { %1850 = vmatpush3.bf16.msra.mxu1 (!%p178_p3), %v2102_v2  ;;  %v2118_v49 = vld [vmem:[%s2644_s1 + $0x8] sm:$0xff] (!%p178_p3)   ;;  %v2120_v53 = vld [vmem:[%s2644_s1 + $0x10] sm:$0xff] (!%p178_p3)   ;;  %v2122_v59 = vld [vmem:[%s2644_s1 + $0x18] sm:$0xff] (!%p178_p3)  }
  0x10   : > { %s2661_s18 = smov (!%p207_p5, %s2198_s18), 1  ;;  %1930 = vmatpush3.bf16.msra.mxu0 %v2103_v3  ;;  %1851 = vmatprep.subr.bf16.mxu1 %v2104_v4  ;;  %v2119_v50 = vld [vmem:[%s2644_s1 + $0x148] sm:$0xff]   ;;  %v2121_v57 = vld [vmem:[%s2644_s1 + $0x150] sm:$0xff]   ;;  %vm2407_vm2 = vmor %vm495_vm0, %vm496_vm1  ;;  %s2663_s10 = smov (!%p215_p6, %s1637_s10), 7 }
  0x11   : > { %s2059_s9 = smul.u32 288, %s2661_s18  ;;  %1931 = vmatprep.subr.bf16.mxu0 %v2105_v5  ;;  %s1638_s14 = sshll.u32 %s2661_s18, 3 }
  0x12   : > { %s218_s15 = sadd.s32 %s1638_s14, %s2663_s10 }
  0x13   : > { %s211_s16 = scalar_lea.vmem %s2643_s0, %s2059_s9  ;;  %1852 = vmatpush3.bf16.msra.mxu1 %v2104_v4  ;;  %v2123_v4 = vld [vmem:[%s2644_s1 + $0x158] sm:$0xff]   ;;  %s1639_s17 = sshll.u32 %s218_s15, 2 }
  0x14   : > { %1932 = vmatpush3.bf16.msra.mxu0 %v2105_v5  ;;  %1853 = vmatprep.subr.bf16.mxu1 %v2106_v6  ;;  %s2309_s28 = scalar_lea.vmem %s211_s16, %s1741_s23  ;;  %v2150_v5 = vld [vmem:[%s2644_s1 + $0xc8] sm:$0xff]   ;;  %s220_s23 = scalar_lea.vmem %s2647_s4, %s1639_s17 }
  0x15   : > { %1933 = vmatprep.subr.bf16.mxu0 %v2107_v7  ;;  %v2315_v11 = vld [vmem:[%s2309_s28] sm:$0xff]  ;;  %v2326_v16 = vld [vmem:[%s2309_s28 + $0x8] sm:$0xff]  ;;  %v230_v60 = vld [vmem:[%s2309_s28 + $0x18] sm:$0x11] }
  0x16   : > { %v2318_v12 = vld [vmem:[%s2309_s28 + $0x20] sm:$0xff]  ;;  %v265_v14 = vrot.slane %v2315_v11, 4  ;;  %v2329_v17 = vld [vmem:[%s2309_s28 + $0x28] sm:$0xff]  ;;  %v808_v19 = vrot.slane %v2326_v16, 4  ;;  %v938_v30 = vshrl.u32 %v2326_v16, 16  ;;  %v941_v31 = vshll.u32 %v2326_v16, 16 }
  0x17   : > { %1854 = vmatpush3.bf16.msra.mxu1 %v2106_v6  ;;  %v266_v15 = vrot.slane %v2318_v12, 4  ;;  %v809_v21 = vrot.slane %v2329_v17, 4  ;;  %v2343_v25 = vld [vmem:[%s2309_s28 + $0x40] sm:$0xff]  ;;  %v2352_v28 = vld [vmem:[%s2309_s28 + $0x48] sm:$0xff]  ;;  %v952_v33 = vshrl.u32 %v2329_v17, 16  ;;  %v955_v34 = vshll.u32 %v2329_v17, 16 }
  0x18   : > { %1934 = vmatpush3.bf16.msra.mxu0 %v2107_v7  ;;  %1855 = vmatprep.subr.bf16.mxu1 %v2108_v8  ;;  %v2346_v26 = vld [vmem:[%s2309_s28 + $0x60] sm:$0xff]  ;;  %v2355_v29 = vld [vmem:[%s2309_s28 + $0x68] sm:$0xff]  ;;  %v267_v35 = vrot.slane %v2343_v25, 4  ;;  %v810_v37 = vrot.slane %v2352_v28, 4  ;;  %v1673_v39 = vcombine.low %v2326_v16, %v2329_v17  ;;  %v940_v43 = vrot.slane %v938_v30, 4 }
  0x19   : > { %1935 = vmatprep.subr.bf16.mxu0 %v2109_v9  ;;  %v1643_v18 = vcombine.low %v265_v14, %v266_v15  ;;  %v1683_v24 = vcombine.low %v808_v19, %v809_v21  ;;  %v268_v36 = vrot.slane %v2346_v26, 4  ;;  %v811_v38 = vrot.slane %v2355_v29, 4  ;;  %v234_v61 = vld [vmem:[%s2309_s28 + $0x38] sm:$0x11]  ;;  %v2125_v21 = vld [vmem:[%s2644_s1 + $0x160] sm:$0xff]   ;;  %v2127_v30 = vld [vmem:[%s2644_s1 + $0x168] sm:$0xff]  }
  0x1a   : > { %v1674_v40 = vcombine.low %v2352_v28, %v2355_v29  ;;  %v2372_v41 = vcombine.low %v266_v15, %v267_v35  ;;  %v943_v45 = vrot.slane %v941_v31, 5  ;;  %v954_v46 = vrot.slane %v952_v33, 4  ;;  %v2124_v15 = vld [vmem:[%s2644_s1 + $0x20] sm:$0xff]   ;;  %v238_v31 = vld [vmem:[%s2309_s28 + $0x58] sm:$0x11] }
  0x1b   : > { %1856 = vmatpush3.bf16.msra.mxu1 %v2108_v8  ;;  %1863 = vmatprep.mubr.bf16.mxu1 %v1643_v18  ;;  %v1644_v44 = vcombine.low %v267_v35, %v268_v36  ;;  %v1684_v47 = vcombine.low %v810_v37, %v811_v38  ;;  %v957_v48 = vrot.slane %v955_v34, 5  ;;  %v1653_v51 = vcombine.low %v2315_v11, %v2318_v12  ;;  %v2128_v37 = vld [vmem:[%s2644_s1 + $0x30] sm:$0xff]   ;;  %v2156_v16 = vld [vmem:[%s2644_s1 + $0xe0] sm:$0xff]  }
  0x1c   : > { %1936 = vmatpush3.bf16.msra.mxu0 %v2109_v9  ;;  %1857 = vmatprep.subr.bf16.mxu1 %v2110_v10  ;;  %v499_v52 = vshrl.u32 %v2315_v11, 16  ;;  %v944_v54 = vor.u32 %v943_v45, %v940_v43  ;;  %v502_v56 = vshll.u32 %v2315_v11, 16  ;;  %v966_v58 = vshrl.u32 %v2352_v28, 16  ;;  %v2130_v45 = vld [vmem:[%s2644_s1 + $0x38] sm:$0xff]   ;;  %v2157_v17 = vld [vmem:[%s2644_s1 + $0x1e0] sm:$0xff]  }
  0x1d   : > { %1937 = vmatprep.subr.bf16.mxu0 %v2111_v13  ;;  %1943 = vmatprep.mubr.bf16.mxu0 %v1683_v24  ;;  %v958_v55 = vor.u32 %v957_v48, %v954_v46  ;;  %v947_v63 = vshll.u32 %v230_v60, 16  ;;  %v961_v1 = vshll.u32 %v234_v61, 16  ;;  %v969_v3 = vshll.u32 %v2352_v28, 16  ;;  %v2126_v24 = vld [vmem:[%s2644_s1 + $0x28] sm:$0xff]   ;;  %v2132_v61 = vld [vmem:[%s2644_s1 + $0x80] sm:$0xff]  }
  0x1e   : > { %v945_v62 = vrot.slane %v944_v54, 4  ;;  %v501_v2 = vrot.slane %v499_v52, 4  ;;  %v513_v6 = vshrl.u32 %v2318_v12, 16  ;;  %v504_v7 = vrot.slane %v502_v56, 5  ;;  %v233_v54 = vld [vmem:[%s2309_s28 + $0x30] sm:$0x11] }
  0x1f   : > { %1858 = vmatpush3.bf16.msra.mxu1 %v2110_v10  ;;  %v959_v0 = vrot.slane %v958_v55, 4  ;;  %v980_v8 = vshrl.u32 %v2355_v29, 16  ;;  %v949_v9 = vrot.slane %v947_v63, 5  ;;  %v963_v10 = vrot.slane %v961_v1, 5  ;;  %v2168_v28 = vld [vmem:[%s2644_s1 + $0x220] sm:$0xff]  }
  0x20   : > { %1938 = vmatpush3.bf16.msra.mxu0 %v2111_v13  ;;  %1859 = vmatprep.subr.bf16.mxu1 %v2112_v20  ;;  %v983_v11 = vshll.u32 %v2355_v29, 16  ;;  %v516_v13 = vshll.u32 %v2318_v12, 16  ;;  %v968_v14 = vrot.slane %v966_v58, 4  ;;  %v515_v34 = vrot.slane %v513_v6, 4  ;;  %v2134_v6 = vld [vmem:[%s2644_s1 + $0x88] sm:$0xff]  }
  0x21   : > { %1939 = vmatprep.subr.bf16.mxu0 %v2113_v22  ;;  %v950_v18 = vsel %vm2407_vm2, %v945_v62, %v949_v9  ;;  %v964_v19 = vsel %vm2407_vm2, %v959_v0, %v963_v10  ;;  %v522_v56 = vshll.u32 %v233_v54, 16  ;;  %v2133_v0 = vld [vmem:[%s2644_s1 + $0x180] sm:$0xff]   ;;  %v1654_v1 = vcombine.low %v2343_v25, %v2346_v26  ;;  %v2136_v10 = vld [vmem:[%s2644_s1 + $0x90] sm:$0xff]   ;;  %v2169_v29 = vld [vmem:[%s2644_s1 + $0x228] sm:$0xff]  }
  0x22   : > { %v518_v35 = vrot.slane %v516_v13, 5  ;;  %v1703_v9 = vcombine.low %v2318_v12, %v2343_v25  ;;  %v2137_v13 = vld [vmem:[%s2644_s1 + $0x190] sm:$0xff]   ;;  %v544_v12 = vshll.u32 %v2346_v26, 16 }
  0x23   : > { %1860 = vmatpush3.bf16.msra.mxu1 %v2112_v20  ;;  %v971_v20 = vrot.slane %v969_v3, 5  ;;  %v524_v60 = vrot.slane %v522_v56, 5 }
  0x24   : > { %1940 = vmatpush3.bf16.msra.mxu0 %v2113_v22  ;;  %1861 = vmatprep.subr.bf16.mxu1 %v2114_v23  ;;  %v1693_v22 = vcombine.low %v950_v18, %v964_v19  ;;  %v519_v48 = vor.u32 %v518_v35, %v515_v34 }
  0x25   : > { %1941 = vmatprep.subr.bf16.mxu0 %v2115_v27  ;;  %v972_v33 = vor.u32 %v971_v20, %v968_v14  ;;  %v541_v14 = vshrl.u32 %v2346_v26, 16  ;;  %v2138_v20 = vld [vmem:[%s2644_s1 + $0x98] sm:$0xff]  }
  0x26   : > { %v520_v58 = vrot.slane %v519_v48, 4 }
  0x27   : > { %1862 = vmatpush3.bf16.msra.mxu1 %v2114_v23  ;;  %v982_v23 = vrot.slane %v980_v8, 4  ;;  %v973_v46 = vrot.slane %v972_v33, 4 }
  0x28   : > { %1942 = vmatpush3.bf16.msra.mxu0 %v2115_v27  ;;  %1867 = vmatprep.subr.bf16.mxu1 %v2116_v32  ;;  %v985_v27 = vrot.slane %v983_v11, 5  ;;  %v2463_v3 = vsel %vm2407_vm2, %v520_v58, %v524_v60  ;;  %v527_v11 = vshrl.u32 %v2343_v25, 16 }
  0x29   : > { %1947 = vmatprep.subr.bf16.mxu0 %v2117_v42 }
  0x2a   : > { %1864 = vmatmul.mubr.bf16.vlgmr.msra.gmra.mrb[0].mxu1 %v1644_v44  ;;  %v986_v38 = vor.u32 %v985_v27, %v982_v23  ;;  %v2129_v44 = vld [vmem:[%s2644_s1 + $0x170] sm:$0xff]   ;;  %v543_v23 = vrot.slane %v541_v14, 4  ;;  %v546_v27 = vrot.slane %v544_v12, 5  ;;  %v529_v33 = vrot.slane %v527_v11, 4  ;;  %v2163_v14 = vld [vmem:[%s2644_s1 + $0x1f8] sm:$0xff]  }
  0x2b   : > { %1868 = vmatpush3.bf16.msra.mxu1 %v2116_v32  ;;  %1944 = vmatmul.mubr.bf16.vlgmr.msra.gmra.mrb[0].mxu0 %v1684_v47  ;;  %v242_v32 = vld [vmem:[%s2309_s28 + $0x78] sm:$0x11]  ;;  %v505_v47 = vor.u32 %v504_v7, %v501_v2  ;;  %v2135_v7 = vld [vmem:[%s2644_s1 + $0x188] sm:$0xff]   ;;  %v2161_v11 = vld [vmem:[%s2644_s1 + $0x1f0] sm:$0xff]  }
  0x2c   : > { %1948 = vmatpush3.bf16.msra.mxu0 %v2117_v42  ;;  %1869 = vmatprep.subr.bf16.mxu1 %v2118_v49  ;;  %v975_v42 = vshll.u32 %v238_v31, 16  ;;  %v989_v43 = vshll.u32 %v242_v32, 16  ;;  %v241_v32 = vld [vmem:[%s2309_s28 + $0x70] sm:$0x11]  ;;  %v547_v35 = vor.u32 %v546_v27, %v543_v23 }
  0x2d   : > { %1949 = vmatprep.subr.bf16.mxu0 %v2119_v50  ;;  %1883 = vmatprep.mubr.bf16.mxu1 %v1653_v51 }
  0x2e   : > { %1963 = vmatprep.mubr.bf16.mxu0 %v1693_v22  ;;  %v977_v51 = vrot.slane %v975_v42, 5  ;;  %v991_v52 = vrot.slane %v989_v43, 5  ;;  %v2139_v22 = vld [vmem:[%s2644_s1 + $0x198] sm:$0xff]   ;;  %v237_v43 = vld [vmem:[%s2309_s28 + $0x50] sm:$0x11] }
  0x2f   : > { %1870 = vmatpush3.bf16.msra.mxu1 %v2118_v49  ;;  %v2131_v49 = vld [vmem:[%s2644_s1 + $0x178] sm:$0xff]   ;;  %v536_v48 = vshll.u32 %v237_v43, 16 }
  0x30   : > { %1950 = vmatpush3.bf16.msra.mxu0 %v2119_v50  ;;  %1871 = vmatprep.subr.bf16.mxu1 %v2120_v53  ;;  %v987_v50 = vrot.slane %v986_v38, 4  ;;  %v978_v62 = vsel %vm2407_vm2, %v973_v46, %v977_v51  ;;  %v550_v38 = vshll.u32 %v241_v32, 16  ;;  %v548_v46 = vrot.slane %v547_v35, 4 }
  0x31   : > { %1951 = vmatprep.subr.bf16.mxu0 %v2121_v57  ;;  %v538_v56 = vrot.slane %v536_v48, 5 }
  0x32   : > { %v992_v63 = vsel %vm2407_vm2, %v987_v50, %v991_v52  ;;  %v2144_v52 = vld [vmem:[%s2644_s1 + $0xb0] sm:$0xff]  }
  0x33   : > { %1872 = vmatpush3.bf16.msra.mxu1 %v2120_v53  ;;  %v229_v53 = vld [vmem:[%s2309_s28 + $0x10] sm:$0x11] }
  0x34   : > { %1952 = vmatpush3.bf16.msra.mxu0 %v2121_v57  ;;  %1873 = vmatprep.subr.bf16.mxu1 %v2122_v59  ;;  %v508_v55 = vshll.u32 %v229_v53, 16  ;;  %v506_v57 = vrot.slane %v505_v47, 4  ;;  %v244_v47 = vld [vmem:[%s2309_s28 + $0x90] sm:$0x11] }
  0x35   : > { %1953 = vmatprep.subr.bf16.mxu0 %v2123_v4  ;;  %v1374_v51 = vshll.u32 %v244_v47, 16  ;;  %v2145_v53 = vld [vmem:[%s2644_s1 + $0x1b0] sm:$0xff]  }
  0x37   : > { %1874 = vmatpush3.bf16.msra.mxu1 %v2122_v59  ;;  %v510_v59 = vrot.slane %v508_v55, 5  ;;  %v1376_v54 = vrot.slane %v1374_v51, 5 }
  0x38   : > { %1954 = vmatpush3.bf16.msra.mxu0 %v2123_v4  ;;  %1875 = vmatprep.subr.bf16.mxu1 %v2124_v15  ;;  %v1694_v4 = vcombine.low %v978_v62, %v992_v63  ;;  %v2148_v63 = vld [vmem:[%s2644_s1 + $0xc0] sm:$0xff]  }
  0x39   : > { %1955 = vmatprep.subr.bf16.mxu0 %v2125_v21  ;;  %v511_v2 = vsel %vm2407_vm2, %v506_v57, %v510_v59  ;;  %v2146_v59 = vld [vmem:[%s2644_s1 + $0xb8] sm:$0xff]  }
  0x3a   : > { %v1663_v8 = vcombine.low %v511_v2, %v2463_v3 }
  0x3b   : > { %1876 = vmatpush3.bf16.msra.mxu1 %v2124_v15  ;;  %v2484_v15 = vld [vmem:[%s2309_s28 + $0x80] sm:$0xff] }
  0x3c   : > { %1956 = vmatpush3.bf16.msra.mxu0 %v2125_v21  ;;  %1877 = vmatprep.subr.bf16.mxu1 %v2126_v24  ;;  %v1365_v18 = vshrl.u32 %v2484_v15, 16  ;;  %v1368_v19 = vshll.u32 %v2484_v15, 16  ;;  %v530_v21 = vshll.u32 %v2343_v25, 16  ;;  %v2141_v25 = vld [vmem:[%s2644_s1 + $0x1a0] sm:$0xff]   ;;  %v1704_v2 = vcombine.low %v2346_v26, %v2484_v15  ;;  %v2166_v26 = vld [vmem:[%s2644_s1 + $0x210] sm:$0xff]  }
  0x3d   : > { %1957 = vmatprep.subr.bf16.mxu0 %v2127_v30  ;;  %v1241_v12 = vrot.slane %v2484_v15, 4  ;;  %v2165_v15 = vld [vmem:[%s2644_s1 + $0x208] sm:$0xff]  }
  0x3e   : > { %v1370_v31 = vrot.slane %v1368_v19, 5  ;;  %v532_v34 = vrot.slane %v530_v21, 5 }
  0x3f   : > { %1878 = vmatpush3.bf16.msra.mxu1 %v2126_v24  ;;  %v2140_v24 = vld [vmem:[%s2644_s1 + $0xa0] sm:$0xff]   ;;  %v1714_v19 = vcombine.low %v268_v36, %v1241_v12  ;;  %v2167_v36 = vld [vmem:[%s2644_s1 + $0x218] sm:$0xff]  }
  0x40   : > { %1958 = vmatpush3.bf16.msra.mxu0 %v2127_v30  ;;  %1879 = vmatprep.subr.bf16.mxu1 %v2128_v37  ;;  %v1367_v30 = vrot.slane %v1365_v18, 4  ;;  %v2164_v18 = vld [vmem:[%s2644_s1 + $0x200] sm:$0xff]  }
  0x41   : > { %1959 = vmatprep.subr.bf16.mxu0 %v2129_v44 }
  0x42   : > { %v1371_v42 = vor.u32 %v1370_v31, %v1367_v30  ;;  %v1733_v30 = vld [vmem:[%s2645_s2] ss:$0 sm:$0xff] }
  0x43   : > { %1880 = vmatpush3.bf16.msra.mxu1 %v2128_v37  ;;  %v2142_v37 = vld [vmem:[%s2644_s1 + $0xa8] sm:$0xff]  }
  0x44   : > { %1960 = vmatpush3.bf16.msra.mxu0 %v2129_v44  ;;  %1881 = vmatprep.subr.bf16.mxu1 %v2130_v45  ;;  %v2143_v44 = vld [vmem:[%s2644_s1 + $0x1a8] sm:$0xff]   ;;  %v1372_v50 = vrot.slane %v1371_v42, 4 }
  0x45   : > { %1961 = vmatprep.subr.bf16.mxu0 %v2131_v49 }
  0x46   : > { %v1377_v58 = vsel %vm2407_vm2, %v1372_v50, %v1376_v54 }
  0x47   : > { %1882 = vmatpush3.bf16.msra.mxu1 %v2130_v45  ;;  %v533_v45 = vor.u32 %v532_v34, %v529_v33 }
  0x48   : > { %1962 = vmatpush3.bf16.msra.mxu0 %v2131_v49  ;;  %1887 = vmatprep.subr.bf16.mxu1 %v2132_v61  ;;  %v552_v49 = vrot.slane %v550_v38, 5 }
  0x49   : > { %1967 = vmatprep.subr.bf16.mxu0 %v2133_v0  ;;  %v534_v55 = vrot.slane %v533_v45, 4 }
  0x4a   : > { %1884 = vmatmul.mubr.bf16.vlgmr.msra.gmra.mrb[0].mxu1 %v1654_v1  ;;  %v553_v57 = vsel %vm2407_vm2, %v548_v46, %v552_v49 }
  0x4b   : > { %1888 = vmatpush3.bf16.msra.mxu1 %v2132_v61  ;;  %1964 = vmatmul.mubr.bf16.vlgmr.msra.gmra.mrb[0].mxu0 %v1694_v4  ;;  %v2523_v60 = vcombine.low %v553_v57, %v1377_v58  ;;  %v2147_v61 = vld [vmem:[%s2644_s1 + $0x1b8] sm:$0xff]   ;;  %v2530_v62 = vsel %vm2407_vm2, %v534_v55, %v538_v56  ;;  %v2151_v4 = vld [vmem:[%s2644_s1 + $0x1c8] sm:$0xff]  }
  0x4c   : > { %1968 = vmatpush3.bf16.msra.mxu0 %v2133_v0  ;;  %1889 = vmatprep.subr.bf16.mxu1 %v2134_v6  ;;  %v2149_v0 = vld [vmem:[%s2644_s1 + $0x1c0] sm:$0xff]   ;;  %v1664_v1 = vcombine.low %v2530_v62, %v553_v57 }
  0x4d   : > { %1969 = vmatprep.subr.bf16.mxu0 %v2135_v7  ;;  %1903 = vmatprep.mubr.bf16.mxu1 %v1663_v8  ;;  %v2154_v8 = vld [vmem:[%s2644_s1 + $0xd8] sm:$0xff]  }
  0x4e   : > { %1983 = vmatprep.mubr.bf16.mxu0 %v1703_v9  ;;  %v2155_v9 = vld [vmem:[%s2644_s1 + $0x1d8] sm:$0xff]  }
  0x4f   : > { %1890 = vmatpush3.bf16.msra.mxu1 %v2134_v6  ;;  %v2152_v6 = vld [vmem:[%s2644_s1 + $0xd0] sm:$0xff]  }
  0x50   : > { %1970 = vmatpush3.bf16.msra.mxu0 %v2135_v7  ;;  %1891 = vmatprep.subr.bf16.mxu1 %v2136_v10  ;;  %v2153_v7 = vld [vmem:[%s2644_s1 + $0x1d0] sm:$0xff]  }
  0x51   : > { %1971 = vmatprep.subr.bf16.mxu0 %v2137_v13 }
  0x53   : > { %1892 = vmatpush3.bf16.msra.mxu1 %v2136_v10  ;;  %v2160_v10 = vld [vmem:[%s2644_s1 + $0xf0] sm:$0xff]  }
  0x54   : > { %1972 = vmatpush3.bf16.msra.mxu0 %v2137_v13  ;;  %1893 = vmatprep.subr.bf16.mxu1 %v2138_v20  ;;  %v2162_v13 = vld [vmem:[%s2644_s1 + $0xf8] sm:$0xff]  }
  0x55   : > { %1973 = vmatprep.subr.bf16.mxu0 %v2139_v22 }
  0x57   : > { %1894 = vmatpush3.bf16.msra.mxu1 %v2138_v20  ;;  %v1723_v20 = vcombine.low %v2463_v3, %v2530_v62  ;;  %v2171_v3 = vld [vmem:[%s2644_s1 + $0x238] sm:$0xff]  }
  0x58   : > { %1974 = vmatpush3.bf16.msra.mxu0 %v2139_v22  ;;  %1895 = vmatprep.subr.bf16.mxu1 %v2140_v24 }
  0x59   : > { %1975 = vmatprep.subr.bf16.mxu0 %v2141_v25 }
  0x5b   : > { %1896 = vmatpush3.bf16.msra.mxu1 %v2140_v24 }
  0x5c   : > { %1976 = vmatpush3.bf16.msra.mxu0 %v2141_v25  ;;  %1897 = vmatprep.subr.bf16.mxu1 %v2142_v37  ;;  %v1516_v25 = vstv %s1511_s11 }
  0x5d   : > { %1977 = vmatprep.subr.bf16.mxu0 %v2143_v44 }
  0x5f   : > { %1898 = vmatpush3.bf16.msra.mxu1 %v2142_v37 }
  0x60   : > { %1978 = vmatpush3.bf16.msra.mxu0 %v2143_v44  ;;  %1899 = vmatprep.subr.bf16.mxu1 %v2144_v52 }
  0x61   : > { %1979 = vmatprep.subr.bf16.mxu0 %v2145_v53 }
  0x63   : > { %1900 = vmatpush3.bf16.msra.mxu1 %v2144_v52 }
  0x64   : > { %1980 = vmatpush3.bf16.msra.mxu0 %v2145_v53  ;;  %1901 = vmatprep.subr.bf16.mxu1 %v2146_v59 }
  0x65   : > { %1981 = vmatprep.subr.bf16.mxu0 %v2147_v61 }
  0x67   : > { %1902 = vmatpush3.bf16.msra.mxu1 %v2146_v59 }
  0x68   : > { %1982 = vmatpush3.bf16.msra.mxu0 %v2147_v61  ;;  %1907 = vmatprep.subr.bf16.mxu1 %v2148_v63 }
  0x69   : > { %1987 = vmatprep.subr.bf16.mxu0 %v2149_v0 }
  0x6a   : > { %1904 = vmatmul.mubr.bf16.vlgmr.msra.gmra.mrb[0].mxu1 %v1664_v1 }
  0x6b   : > { %1908 = vmatpush3.bf16.msra.mxu1 %v2148_v63  ;;  %1984 = vmatmul.mubr.bf16.vlgmr.msra.gmra.mrb[0].mxu0 %v1704_v2 }
  0x6c   : > { %1988 = vmatpush3.bf16.msra.mxu0 %v2149_v0  ;;  %1909 = vmatprep.subr.bf16.mxu1 %v2150_v5 }
  0x6d   : > { %1989 = vmatprep.subr.bf16.mxu0 %v2151_v4  ;;  %1923 = vmatprep.mubr.bf16.mxu1 %v1673_v39  ;;  %v2158_v39 = vld [vmem:[%s2644_s1 + $0xe8] sm:$0xff]  }
  0x6e   : > { %2003 = vmatprep.mubr.bf16.mxu0 %v2372_v41  ;;  %v2159_v41 = vld [vmem:[%s2644_s1 + $0x1e8] sm:$0xff]  }
  0x6f   : > { %1910 = vmatpush3.bf16.msra.mxu1 %v2150_v5 }
  0x70   : > { %1990 = vmatpush3.bf16.msra.mxu0 %v2151_v4  ;;  %1911 = vmatprep.subr.bf16.mxu1 %v2152_v6 }
  0x71   : > { %1991 = vmatprep.subr.bf16.mxu0 %v2153_v7 }
  0x73   : > { %1912 = vmatpush3.bf16.msra.mxu1 %v2152_v6 }
  0x74   : > { %1992 = vmatpush3.bf16.msra.mxu0 %v2153_v7  ;;  %1913 = vmatprep.subr.bf16.mxu1 %v2154_v8 }
  0x75   : > { %1993 = vmatprep.subr.bf16.mxu0 %v2155_v9 }
  0x77   : > { %1914 = vmatpush3.bf16.msra.mxu1 %v2154_v8 }
  0x78   : > { %1994 = vmatpush3.bf16.msra.mxu0 %v2155_v9  ;;  %1915 = vmatprep.subr.bf16.mxu1 %v2156_v16 }
  0x79   : > { %1995 = vmatprep.subr.bf16.mxu0 %v2157_v17 }
  0x7b   : > { %1916 = vmatpush3.bf16.msra.mxu1 %v2156_v16 }
  0x7c   : > { %1996 = vmatpush3.bf16.msra.mxu0 %v2157_v17  ;;  %1917 = vmatprep.subr.bf16.mxu1 %v2158_v39 }
  0x7d   : > { %1997 = vmatprep.subr.bf16.mxu0 %v2159_v41 }
  0x7f   : > { %1918 = vmatpush3.bf16.msra.mxu1 %v2158_v39 }
  0x80   : > { %1998 = vmatpush3.bf16.msra.mxu0 %v2159_v41  ;;  %1919 = vmatprep.subr.bf16.mxu1 %v2160_v10 }
  0x81   : > { %1999 = vmatprep.subr.bf16.mxu0 %v2161_v11 }
  0x83   : > { %1920 = vmatpush3.bf16.msra.mxu1 %v2160_v10 }
  0x84   : > { %2000 = vmatpush3.bf16.msra.mxu0 %v2161_v11  ;;  %1921 = vmatprep.subr.bf16.mxu1 %v2162_v13 }
  0x85   : > { %2001 = vmatprep.subr.bf16.mxu0 %v2163_v14 }
  0x87   : > { %1922 = vmatpush3.bf16.msra.mxu1 %v2162_v13 }
  0x88   : > { %2002 = vmatpush3.bf16.msra.mxu0 %v2163_v14 }
  0x89   : > { %2007 = vmatprep.subr.bf16.mxu0 %v2164_v18 }
  0x8a   : > { %1924 = vmatmul.mubr.bf16.vlgmr.msra.gmra.mrb[0].mxu1 %v1674_v40  ;;  %v2170_v40 = vld [vmem:[%s2644_s1 + $0x230] sm:$0xff]  }
  0x8b   : > { %2004 = vmatmul.mubr.bf16.vlgmr.msra.gmra.mrb[0].mxu0 %v1714_v19 }
  0x8c   : > { %2008 = vmatpush3.bf16.msra.mxu0 %v2164_v18  ;;  %2023 = vmatprep.mubr.bf16.mxu0 %v1723_v20 }
  0x8d   : > { %2009 = vmatprep.subr.bf16.mxu0 %v2165_v15 }
  0x90   : > { %2010 = vmatpush3.bf16.msra.mxu0 %v2165_v15 }
  0x91   : > { %2011 = vmatprep.subr.bf16.mxu0 %v2166_v26 }
  0x94   : > { %2012 = vmatpush3.bf16.msra.mxu0 %v2166_v26 }
  0x95   : > { %2013 = vmatprep.subr.bf16.mxu0 %v2167_v36 }
  0x98   : > { %2014 = vmatpush3.bf16.msra.mxu0 %v2167_v36 }
  0x99   : > { %2015 = vmatprep.subr.bf16.mxu0 %v2168_v28 }
  0x9c   : > { %2016 = vmatpush3.bf16.msra.mxu0 %v2168_v28 }
  0x9d   : > { %2017 = vmatprep.subr.bf16.mxu0 %v2169_v29 }
  0xa0   : > { %2018 = vmatpush3.bf16.msra.mxu0 %v2169_v29 }
  0xa1   : > { %2019 = vmatprep.subr.bf16.mxu0 %v2170_v40 }
  0xa4   : > { %2020 = vmatpush3.bf16.msra.mxu0 %v2170_v40 }
  0xa5   : > { %2021 = vmatprep.subr.bf16.mxu0 %v2171_v3 }
  0xa8   : > { %2022 = vmatpush3.bf16.msra.mxu0 %v2171_v3 }
  0xab   : > { %2024 = vmatmul.mubr.bf16.vlgmr.msra.gmra.mrb[0].mxu0 %v2523_v60 }
 0x15d   : > { %v1925_v21 = vpop.f32.mrb[0].mxu1 }
 0x15e   : > { %v789_v22 = vpop.f32.mrb[1].mxu1 }
 0x15f   : > { %v1926_v23 = vpop.f32.mrb[2].mxu1 }
 0x160   : > { %v792_v24 = vpop.f32.mrb[3].mxu1 }
 0x17e   : > { %v2025_v27 = vpop.f32.mrb[0].mxu0 }
 0x17f   : > { %v2027_v31 = vadd.f32 %v2025_v27, %v1925_v21  ;;  %v1481_v32 = vpop.f32.mrb[1].mxu0 }
 0x180   : > { %v2028_v33 = vadd.f32 %v1481_v32, %v789_v22  ;;  %v2026_v34 = vpop.f32.mrb[2].mxu0 }
 0x181   : > { %v1509_v35 = vadd.f32 %v2027_v31, %v1733_v30  ;;  %v2029_v37 = vadd.f32 %v2026_v34, %v1926_v23  ;;  %v1484_v38 = vpop.f32.mrb[3].mxu0 }
 0x182   : > { %v1507_v42 = vadd.f32 %v2028_v33, %v1733_v30  ;;  %v2030_v43 = vadd.f32 %v1484_v38, %v792_v24 }
 0x183   : > { %v1519_v44 = vmul.f32 %v1516_v25, %v1509_v35  ;;  %v1510_v45 = vadd.f32 %v2029_v37, %v1733_v30  ;;  %vm1514_vm3 = vcmp.ge.f32.partialorder %v1509_v35, 0.0 }
 0x184   : > { %v1517_v46 = vmul.f32 %v1516_v25, %v1507_v42  ;;  %v1508_v47 = vadd.f32 %v2030_v43, %v1733_v30  ;;  %vm1512_vm4 = vcmp.ge.f32.partialorder %v1507_v42, 0.0 }
 0x185   : > { %vm1515_vm5 = vcmp.ge.f32.partialorder %v1510_v45, 0.0  ;;  %v1520_v48 = vmul.f32 %v1516_v25, %v1510_v45  ;;  %v1523_v50 = vsel %vm1514_vm3, %v1509_v35, %v1519_v44 }
 0x186   : > { %vm1513_vm6 = vcmp.ge.f32.partialorder %v1508_v47, 0.0  ;;  %v1518_v49 = vmul.f32 %v1516_v25, %v1508_v47  ;;  %v1521_v52 = vsel %vm1512_vm4, %v1507_v42, %v1517_v46 }
 0x187   : > { %v1524_v51 = vsel %vm1515_vm5, %v1510_v45, %v1520_v48 }
 0x188   : > { %v1754_v53 = vpack.c.bf16 %v1524_v51, %v1523_v50  ;;  %v1522_v54 = vsel %vm1513_vm6, %v1508_v47, %v1518_v49 }
 0x189   : > { %v1749_v55 = vpack.c.bf16 %v1522_v54, %v1521_v52 }
 0x18a   : > { %1756 = vst [vmem:[%s220_s23 + $0x8] sm:$0xff] %v1754_v53  }
 0x18b   : > { %1750 = vst [vmem:[%s220_s23] sm:$0xff] %v1749_v55  }
 0x18c PF: > { %s15_s21 = sadd.s32 1, %s2210_s21   ;;  %s2650_s17 = smov %s2202_s19 }
 0x18d   : > { %p12_p7 = scmp.ge.s32.totalorder %s15_s21, 6   ;;  %s2651_s18 = smov %s2206_s20 }
 0x18e   : > { %s2652_s19 = smov %s2655_s3  ;;  %s2653_s20 = smov %s2659_s22 }
 0x18f   :  { %14 = sbr.rel (!%p12_p7) target bundleno = 3 (0x3), region = 67 }

// kernel: didn_forward.35
= control target key start
LH: loop header
LB: loop body
LE: loop exit
PB: predicated region body
PF: predicated region fallthrough
CT: control target
= control target key end

     0   :  { %s2206_s17 = smov 0   ;;  %s2208_s18 = smov 0   ;;  %s2632_s0 = inlined_call_operand.vmem [shape: bf16[2,10,10,128], index: 0, kind: input, shape index: {}]   ;;  %s2633_s1 = inlined_call_operand.vmem [shape: bf16[1152,128], index: 1, kind: input, shape index: {}]   ;;  %s2634_s2 = inlined_call_operand.vmem [shape: f32[1,128], index: 2, kind: input, shape index: {}]   ;;  %s2635_s3 = inlined_call_operand.<no memory space> [shape: f32[1,1], index: 3, kind: input, shape index: {}]   ;;  %s2636_s4 = inlined_call_operand.vmem [shape: bf16[2,64,128], index: 4, kind: output, shape index: {}]  }
   0x1   :  { %9 = sst [smem:[#allocation2]] %s2635_s3  ;;  %s2210_s19 = smov 0  }
   0x2   :  { %s2212_s20 = smov 0   ;;  %s2214_s21 = smov 0  }
   0x3 LB: > { %s24_s3 = sadd.s32 1, %s2168_s19  ;;  %s27_s22 = sadd.s32 1, %s2172_s20  ;;  %s2176_s21 = sphi %s2214_s21, %s15_s21   ;;  %s2172_s20 = sphi %s2212_s20, %s2644_s20   ;;  %s2168_s19 = sphi %s2210_s19, %s2643_s19   ;;  %s2164_s18 = sphi %s2208_s18, %s2642_s18   ;;  %s2160_s17 = sphi %s2206_s17, %s2641_s17  }
   0x4   : > { %p25_p0 = scmp.ge.s32.totalorder %s24_s3, 2  ;;  %p1593_p1 = scmp.ge.s32.totalorder %s2176_s21, 1 }
   0x5   : > { %p177_p2 = scmp.lt.s32.totalorder %s2176_s21, 5 }
   0x6   : > { %s2646_s3 = smov (%p25_p0, %s24_s3), 0  ;;  %s2648_s22 = smov (!%p25_p0, %s27_s22), %s2172_s20 }
   0x7   : > { %p178_p3 = pnand %p1593_p1, %p177_p2  ;;  %p29_p4 = scmp.ge.s32.totalorder %s2648_s22, 2 }
   0x8   : > { %v2061_v0 = vld [vmem:[%s2633_s1 + $0x40] sm:$0xff] (!%p178_p3)   ;;  %p207_p5 = scmp.lt.s32.totalorder (!%p178_p3), %s2164_s18, 1  ;;  %v2063_v2 = vld [vmem:[%s2633_s1 + $0x48] sm:$0xff] (!%p178_p3)   ;;  %v2065_v4 = vld [vmem:[%s2633_s1 + $0x50] sm:$0xff] (!%p178_p3)   ;;  %s1702_s23 = sshll.u32 (!%p178_p3), %s2160_s17, 5  ;;  %vm548_vm3 = vcmask (!%p178_p3), 1042432  }
   0x9   : > { %s2650_s22 = smov (%p29_p4, %s2648_s22), 0  ;;  %181 = sbr.rel (%p178_p3) target bundleno = 397 (0x18d), region = 36 }
   0xa   : > { %v2062_v1 = vld [vmem:[%s2633_s1 + $0x100] sm:$0xff] (!%p178_p3)   ;;  %1808 = vmatprep.subr.bf16.mxu1 (!%p178_p3), %v2061_v0  ;;  %v2064_v3 = vld [vmem:[%s2633_s1 + $0x108] sm:$0xff] (!%p178_p3)   ;;  %v2066_v5 = vld [vmem:[%s2633_s1 + $0x110] sm:$0xff] (!%p178_p3)   ;;  %vm255_vm0 = vsmask.f32 (!%p178_p3), 3328  ;;  %vm549_vm4 = vcmask (!%p178_p3), 1046532  }
   0xb   : > { %1888 = vmatprep.subr.bf16.mxu0 (!%p178_p3), %v2062_v1  ;;  %1809 = vmatpush3.bf16.msra.mxu1 (!%p178_p3), %v2061_v0  ;;  %v2067_v6 = vld [vmem:[%s2633_s1 + $0x58] sm:$0xff] (!%p178_p3)   ;;  %v2069_v8 = vld [vmem:[%s2633_s1 + $0x60] sm:$0xff] (!%p178_p3)   ;;  %v2071_v10 = vld [vmem:[%s2633_s1 + $0x68] sm:$0xff] (!%p178_p3)   ;;  %vm256_vm1 = vsmask.f32 (!%p178_p3), 7440  ;;  %s1595_s7 = sshll.u32 (!%p178_p3), %s2160_s17, 2 }
   0xc   : > { %1889 = vmatpush3.bf16.msra.mxu0 (!%p178_p3), %v2062_v1  ;;  %1810 = vmatprep.subr.bf16.mxu1 (!%p178_p3), %v2063_v2  ;;  %v2068_v7 = vld [vmem:[%s2633_s1 + $0x118] sm:$0xff] (!%p178_p3)   ;;  %v2070_v9 = vld [vmem:[%s2633_s1 + $0x120] sm:$0xff] (!%p178_p3)   ;;  %v2072_v14 = vld [vmem:[%s2633_s1 + $0x128] sm:$0xff] (!%p178_p3)   ;;  %s1469_s8 = sld [smem:[#allocation2]] (!%p178_p3)  ;;  %p215_p6 = scmp.lt.s32.totalorder (!%p178_p3), %s1595_s7, 7 }
   0xd   : > { %1890 = vmatprep.subr.bf16.mxu0 (!%p178_p3), %v2064_v3  ;;  %v2073_v22 = vld [vmem:[%s2633_s1 + $0x70] sm:$0xff] (!%p178_p3)   ;;  %v2075_v38 = vld [vmem:[%s2633_s1 + $0x78] sm:$0xff] (!%p178_p3)   ;;  %vm2328_vm2 = vmor (!%p178_p3), %vm255_vm0, %vm256_vm1 }
   0xe   : > { %v2074_v23 = vld [vmem:[%s2633_s1 + $0x130] sm:$0xff] (!%p178_p3)   ;;  %v2076_v48 = vld [vmem:[%s2633_s1 + $0x138] sm:$0xff] (!%p178_p3)   ;;  %v2077_v0 = vld [vmem:[%s2633_s1] sm:$0xff] (!%p178_p3)  }
   0xf   : > { %1811 = vmatpush3.bf16.msra.mxu1 (!%p178_p3), %v2063_v2  ;;  %vm2386_vm5 = vmor (!%p178_p3), %vm548_vm3, %vm549_vm4 }
  0x10   : > { %s2652_s18 = smov (!%p207_p5, %s2164_s18), 1  ;;  %1891 = vmatpush3.bf16.msra.mxu0 %v2064_v3  ;;  %1812 = vmatprep.subr.bf16.mxu1 %v2065_v4  ;;  %s2654_s7 = smov (!%p215_p6, %s1595_s7), 7 }
  0x11   : > { %s2020_s9 = smul.u32 80, %s2652_s18  ;;  %1892 = vmatprep.subr.bf16.mxu0 %v2066_v5  ;;  %s1596_s11 = sshll.u32 %s2652_s18, 3 }
  0x12   : > { %s218_s12 = sadd.s32 %s1596_s11, %s2654_s7 }
  0x13   : > { %s211_s16 = scalar_lea.vmem %s2632_s0, %s2020_s9  ;;  %1813 = vmatpush3.bf16.msra.mxu1 %v2065_v4  ;;  %s1597_s17 = sshll.u32 %s218_s12, 2 }
  0x14   : > { %1893 = vmatpush3.bf16.msra.mxu0 %v2066_v5  ;;  %1814 = vmatprep.subr.bf16.mxu1 %v2067_v6  ;;  %s2275_s28 = scalar_lea.vmem %s211_s16, %s1702_s23  ;;  %v2078_v5 = vld [vmem:[%s2633_s1 + $0x140] sm:$0xff]   ;;  %s220_s14 = scalar_lea.vmem %s2636_s4, %s1597_s17 }
  0x15   : > { %1894 = vmatprep.subr.bf16.mxu0 %v2068_v7  ;;  %v2281_v11 = vld [vmem:[%s2275_s28] sm:$0xf]  ;;  %v2284_v12 = vld [vmem:[%s2275_s28 + $0x4] sm:$0x1]  ;;  %v2287_v13 = vld [vmem:[%s2275_s28 + $0x8] sm:$0xf] }
  0x16   : > { %v2293_v15 = vld [vmem:[%s2275_s28 + $0xc] sm:$0x1]  ;;  %v259_v16 = vshrl.u32 %v2281_v11, 16  ;;  %v262_v17 = vshll.u32 %v2281_v11, 16  ;;  %v268_v18 = vshll.u32 %v2284_v12, 16  ;;  %v273_v19 = vshrl.u32 %v2287_v13, 16 }
  0x17   : > { %1815 = vmatpush3.bf16.msra.mxu1 %v2067_v6  ;;  %v276_v20 = vshll.u32 %v2287_v13, 16  ;;  %v282_v21 = vshll.u32 %v2293_v15, 16  ;;  %v2308_v30 = vld [vmem:[%s2275_s28 + $0x10] sm:$0xf]  ;;  %v2311_v31 = vld [vmem:[%s2275_s28 + $0x14] sm:$0x1] }
  0x18   : > { %1895 = vmatpush3.bf16.msra.mxu0 %v2068_v7  ;;  %1816 = vmatprep.subr.bf16.mxu1 %v2069_v8  ;;  %v261_v24 = vrot.slane %v259_v16, 4  ;;  %v264_v25 = vrot.slane %v262_v17, 5  ;;  %v270_v26 = vrot.slane %v268_v18, 5  ;;  %v275_v27 = vrot.slane %v273_v19, 4  ;;  %v2314_v33 = vld [vmem:[%s2275_s28 + $0x18] sm:$0xf] }
  0x19   : > { %1896 = vmatprep.subr.bf16.mxu0 %v2070_v9  ;;  %v278_v28 = vrot.slane %v276_v20, 5  ;;  %v284_v29 = vrot.slane %v282_v21, 5  ;;  %v2317_v34 = vld [vmem:[%s2275_s28 + $0x1c] sm:$0x1]  ;;  %v287_v35 = vshrl.u32 %v2308_v30, 16  ;;  %v290_v36 = vshll.u32 %v2308_v30, 16 }
  0x1a   : > { %v265_v32 = vor.u32 %v264_v25, %v261_v24  ;;  %v1635_v37 = vcombine.low %v2287_v13, %v2308_v30  ;;  %v296_v41 = vshll.u32 %v2311_v31, 16  ;;  %v301_v42 = vshrl.u32 %v2314_v33, 16  ;;  %v2340_v52 = vld [vmem:[%s2275_s28 + $0x20] sm:$0xf]  ;;  %v2345_v56 = vld [vmem:[%s2275_s28 + $0x24] sm:$0x1] }
  0x1b   : > { %1817 = vmatpush3.bf16.msra.mxu1 %v2069_v8  ;;  %v279_v40 = vor.u32 %v278_v28, %v275_v27  ;;  %v304_v43 = vshll.u32 %v2314_v33, 16  ;;  %v289_v45 = vrot.slane %v287_v35, 4  ;;  %v292_v46 = vrot.slane %v290_v36, 5  ;;  %v2348_v57 = vld [vmem:[%s2275_s28 + $0x28] sm:$0xf]  ;;  %v2108_v35 = vld [vmem:[%s2633_s1 + $0x1b0] sm:$0xff]  }
  0x1c   : > { %1897 = vmatpush3.bf16.msra.mxu0 %v2070_v9  ;;  %1818 = vmatprep.subr.bf16.mxu1 %v2071_v10  ;;  %v266_v44 = vrot.slane %v265_v32, 4  ;;  %v310_v47 = vshll.u32 %v2317_v34, 16  ;;  %v303_v50 = vrot.slane %v301_v42, 4  ;;  %v298_v55 = vrot.slane %v296_v41, 5  ;;  %v2353_v61 = vld [vmem:[%s2275_s28 + $0x2c] sm:$0x1] }
  0x1d   : > { %1898 = vmatprep.subr.bf16.mxu0 %v2072_v14  ;;  %v280_v49 = vrot.slane %v279_v40, 4  ;;  %v306_v51 = vrot.slane %v304_v43, 5  ;;  %v293_v54 = vor.u32 %v292_v46, %v289_v45  ;;  %v816_v62 = vshrl.u32 %v2340_v52, 16  ;;  %v2081_v41 = vld [vmem:[%s2633_s1 + $0x10] sm:$0xff]   ;;  %v2080_v43 = vld [vmem:[%s2633_s1 + $0x148] sm:$0xff]  }
  0x1e   : > { %v271_v53 = vsel %vm2328_vm2, %v266_v44, %v270_v26  ;;  %v312_v60 = vrot.slane %v310_v47, 5  ;;  %v819_v2 = vshll.u32 %v2340_v52, 16  ;;  %v825_v3 = vshll.u32 %v2345_v56, 16 }
  0x1f   : > { %1819 = vmatpush3.bf16.msra.mxu1 %v2071_v10  ;;  %v285_v58 = vsel %vm2328_vm2, %v280_v49, %v284_v29  ;;  %v307_v59 = vor.u32 %v306_v51, %v303_v50  ;;  %v294_v1 = vrot.slane %v293_v54, 4  ;;  %v818_v6 = vrot.slane %v816_v62, 4  ;;  %v2083_v49 = vld [vmem:[%s2633_s1 + $0x18] sm:$0xff]   ;;  %v2082_v51 = vld [vmem:[%s2633_s1 + $0x150] sm:$0xff]   ;;  %v2086_v62 = vld [vmem:[%s2633_s1 + $0x160] sm:$0xff]  }
  0x20   : > { %1899 = vmatpush3.bf16.msra.mxu0 %v2072_v14  ;;  %1820 = vmatprep.subr.bf16.mxu1 %v2073_v22  ;;  %v1601_v63 = vcombine.low %v271_v53, %v285_v58  ;;  %v1200_v7 = vshrl.u32 %v2348_v57, 16  ;;  %v821_v9 = vrot.slane %v819_v2, 5  ;;  %v1203_v10 = vshll.u32 %v2348_v57, 16  ;;  %v2079_v14 = vld [vmem:[%s2633_s1 + $0x8] sm:$0xff]   ;;  %v2091_v2 = vld [vmem:[%s2633_s1 + $0x38] sm:$0xff]  }
  0x21   : > { %1900 = vmatprep.subr.bf16.mxu0 %v2074_v23  ;;  %v308_v4 = vrot.slane %v307_v59, 4  ;;  %v299_v8 = vsel %vm2328_vm2, %v294_v1, %v298_v55  ;;  %v1611_v16 = vcombine.low %v2281_v11, %v2287_v13  ;;  %v1209_v20 = vshll.u32 %v2353_v61, 16  ;;  %v2085_v55 = vld [vmem:[%s2633_s1 + $0x20] sm:$0xff]   ;;  %v2084_v59 = vld [vmem:[%s2633_s1 + $0x158] sm:$0xff]  }
  0x22   : > { %1824 = vmatprep.mubr.bf16.mxu1 %v1601_v63  ;;  %v1645_v18 = vcombine.low %v285_v58, %v299_v8  ;;  %v1202_v19 = vrot.slane %v1200_v7, 4  ;;  %v1205_v24 = vrot.slane %v1203_v10, 5  ;;  %v557_v25 = vrot.slane %v2293_v15, 5  ;;  %v2089_v63 = vld [vmem:[%s2633_s1 + $0x30] sm:$0xff]   ;;  %v2097_v10 = vld [vmem:[%s2633_s1 + $0x88] sm:$0xff]  }
  0x23   : > { %1821 = vmatpush3.bf16.msra.mxu1 %v2073_v22  ;;  %v313_v17 = vsel %vm2328_vm2, %v308_v4, %v312_v60  ;;  %v822_v22 = vor.u32 %v821_v9, %v818_v6  ;;  %v1666_v26 = vcombine.low %v2340_v52, %v2348_v57  ;;  %v1636_v27 = vcombine.low %v2314_v33, %v2340_v52  ;;  %v2090_v4 = vld [vmem:[%s2633_s1 + $0x170] sm:$0xff]  }
  0x24   : > { %1901 = vmatpush3.bf16.msra.mxu0 %v2074_v23  ;;  %1822 = vmatprep.subr.bf16.mxu1 %v2075_v38  ;;  %v2376_v21 = vcombine.low %v299_v8, %v313_v17  ;;  %v827_v23 = vrot.slane %v825_v3, 5  ;;  %v1206_v29 = vor.u32 %v1205_v24, %v1202_v19  ;;  %v1211_v32 = vrot.slane %v1209_v20, 5  ;;  %v2101_v19 = vld [vmem:[%s2633_s1 + $0x98] sm:$0xff]   ;;  %v2100_v20 = vld [vmem:[%s2633_s1 + $0x190] sm:$0xff]   ;;  %v2105_v24 = vld [vmem:[%s2633_s1 + $0xa8] sm:$0xff]  }
  0x25   : > { %1902 = vmatprep.subr.bf16.mxu0 %v2076_v48  ;;  %1904 = vmatprep.mubr.bf16.mxu0 %v1645_v18  ;;  %v823_v28 = vrot.slane %v822_v22, 4  ;;  %v561_v15 = vrot.slane %v2311_v31, 5  ;;  %v1622_v36 = vrot.slane %v2287_v13, 9  ;;  %v1623_v44 = vrot.slane %v2308_v30, 9  ;;  %v2098_v18 = vld [vmem:[%s2633_s1 + $0x188] sm:$0xff]   ;;  %v2103_v22 = vld [vmem:[%s2633_s1 + $0xa0] sm:$0xff]  }
  0x26   : > { %v1207_v40 = vrot.slane %v1206_v29, 4  ;;  %v954_v46 = vrot.slane %v2345_v56, 5  ;;  %v1655_v50 = vrot.slane %v2340_v52, 9  ;;  %v1684_v53 = vrot.slane %v2348_v57, 9  ;;  %v2106_v29 = vld [vmem:[%s2633_s1 + $0x1a8] sm:$0xff]   ;;  %v2118_v13 = vld [vmem:[%s2633_s1 + $0xd8] sm:$0xff]  }
  0x27   : > { %1823 = vmatpush3.bf16.msra.mxu1 %v2075_v38  ;;  %v828_v38 = vsel %vm2328_vm2, %v823_v28, %v827_v23  ;;  %v2402_v31 = vsel %vm2386_vm5, %v1622_v36, %v557_v25  ;;  %v1336_v54 = vrot.slane %v2353_v61, 5  ;;  %v2087_v61 = vld [vmem:[%s2633_s1 + $0x28] sm:$0xff]   ;;  %v553_v1 = vrot.slane %v2284_v12, 5  ;;  %v2094_v12 = vld [vmem:[%s2633_s1 + $0x80] sm:$0xff]   ;;  %v2102_v23 = vld [vmem:[%s2633_s1 + $0x198] sm:$0xff]  }
  0x28   : > { %1903 = vmatpush3.bf16.msra.mxu0 %v2076_v48  ;;  %1828 = vmatprep.subr.bf16.mxu1 %v2077_v0  ;;  %v1646_v42 = vcombine.low %v313_v17, %v828_v38  ;;  %v1212_v45 = vsel %vm2328_vm2, %v1207_v40, %v1211_v32  ;;  %v2412_v48 = vsel %vm2386_vm5, %v1623_v44, %v561_v15  ;;  %v1621_v3 = vrot.slane %v2281_v11, 9  ;;  %v2092_v11 = vld [vmem:[%s2633_s1 + $0x178] sm:$0xff]   ;;  %v2099_v17 = vld [vmem:[%s2633_s1 + $0x90] sm:$0xff]   ;;  %v2104_v25 = vld [vmem:[%s2633_s1 + $0x1a0] sm:$0xff]  }
  0x29   : > { %1908 = vmatprep.subr.bf16.mxu0 %v2078_v5  ;;  %v2408_v47 = vcombine.low %v828_v38, %v1212_v45  ;;  %v1656_v39 = vcombine.low %v2402_v31, %v2412_v48  ;;  %v2430_v56 = vsel %vm2386_vm5, %v1655_v50, %v954_v46  ;;  %v2434_v58 = vsel %vm2386_vm5, %v1684_v53, %v1336_v54  ;;  %v2107_v28 = vld [vmem:[%s2633_s1 + $0xb0] sm:$0xff]   ;;  %v2109_v32 = vld [vmem:[%s2633_s1 + $0xb8] sm:$0xff]   ;;  %v2111_v15 = vld [vmem:[%s2633_s1 + $0xc0] sm:$0xff]  }
  0x2a   : > { %1825 = vmatmul.mubr.bf16.vlgmr.msra.gmra.mrb[0].mxu1 %v2376_v21  ;;  %v1685_v60 = vcombine.low %v2430_v56, %v2434_v58  ;;  %v1624_v6 = vrot.slane %v2314_v33, 9  ;;  %v554_v7 = vsel %vm2386_vm5, %v1621_v3, %v553_v1  ;;  %v2110_v36 = vld [vmem:[%s2633_s1 + $0x1b8] sm:$0xff]   ;;  %v2114_v40 = vld [vmem:[%s2633_s1 + $0xc8] sm:$0xff]   ;;  %v2125_v46 = vld [vmem:[%s2633_s1 + $0x1f0] sm:$0xff]   ;;  %v1474_v1 = vstv %s1469_s8 }
  0x2b   : > { %1829 = vmatpush3.bf16.msra.mxu1 %v2077_v0  ;;  %1844 = vmatprep.mubr.bf16.mxu1 %v1611_v16  ;;  %v2088_v0 = vld [vmem:[%s2633_s1 + $0x168] sm:$0xff]   ;;  %v1625_v8 = vcombine.low %v554_v7, %v2402_v31  ;;  %v2119_v57 = vld [vmem:[%s2633_s1 + $0x1d8] sm:$0xff]   ;;  %v2124_v31 = vld [vmem:[%s2633_s1 + $0xf0] sm:$0xff]  }
  0x2c   : > { %1830 = vmatprep.subr.bf16.mxu1 %v2079_v14  ;;  %1905 = vmatmul.mubr.bf16.vlgmr.msra.gmra.mrb[0].mxu0 %v1646_v42  ;;  %v2116_v42 = vld [vmem:[%s2633_s1 + $0xd0] sm:$0xff]   ;;  %v2123_v44 = vld [vmem:[%s2633_s1 + $0x1e8] sm:$0xff]   ;;  %v2126_v45 = vld [vmem:[%s2633_s1 + $0xf8] sm:$0xff]  }
  0x2d   : > { %1909 = vmatpush3.bf16.msra.mxu0 %v2078_v5  ;;  %1924 = vmatprep.mubr.bf16.mxu0 %v1656_v39  ;;  %v565_v5 = vrot.slane %v2317_v34, 5  ;;  %v1612_v34 = vcombine.low %v2308_v30, %v2314_v33  ;;  %v2117_v30 = vld [vmem:[%s2633_s1 + $0x1d0] sm:$0xff]   ;;  %v2131_v39 = vld [vmem:[%s2633_s1 + $0x208] sm:$0xff]   ;;  %v2133_v33 = vld [vmem:[%s2633_s1 + $0x218] sm:$0xff]  }
  0x2e   : > { %1910 = vmatprep.subr.bf16.mxu0 %v2080_v43  ;;  %v2132_v50 = vld [vmem:[%s2633_s1 + $0x210] sm:$0xff]   ;;  %v2134_v52 = vld [vmem:[%s2633_s1 + $0x220] sm:$0xff]  }
  0x2f   : > { %1831 = vmatpush3.bf16.msra.mxu1 %v2079_v14  ;;  %v566_v9 = vsel %vm2386_vm5, %v1624_v6, %v565_v5  ;;  %v2095_v14 = vld [vmem:[%s2633_s1 + $0x180] sm:$0xff]  }
  0x30   : > { %1832 = vmatprep.subr.bf16.mxu1 %v2081_v41  ;;  %v1657_v16 = vcombine.low %v566_v9, %v2430_v56  ;;  %v1626_v38 = vcombine.low %v2412_v48, %v566_v9  ;;  %v2127_v48 = vld [vmem:[%s2633_s1 + $0x1f8] sm:$0xff]  }
  0x31   : > { %1911 = vmatpush3.bf16.msra.mxu0 %v2080_v43  ;;  %v2115_v43 = vld [vmem:[%s2633_s1 + $0x1c8] sm:$0xff]  }
  0x32   : > { %1912 = vmatprep.subr.bf16.mxu0 %v2082_v51 }
  0x33   : > { %1833 = vmatpush3.bf16.msra.mxu1 %v2081_v41  ;;  %v2112_v41 = vld [vmem:[%s2633_s1 + $0x1c0] sm:$0xff]  }
  0x34   : > { %1834 = vmatprep.subr.bf16.mxu1 %v2083_v49 }
  0x35   : > { %1913 = vmatpush3.bf16.msra.mxu0 %v2082_v51  ;;  %v2137_v51 = vld [vmem:[%s2633_s1 + $0x238] sm:$0xff]  }
  0x36   : > { %1914 = vmatprep.subr.bf16.mxu0 %v2084_v59 }
  0x37   : > { %1835 = vmatpush3.bf16.msra.mxu1 %v2083_v49  ;;  %v2130_v49 = vld [vmem:[%s2633_s1 + $0x200] sm:$0xff]  }
  0x38   : > { %1836 = vmatprep.subr.bf16.mxu1 %v2085_v55 }
  0x39   : > { %1915 = vmatpush3.bf16.msra.mxu0 %v2084_v59 }
  0x3a   : > { %1916 = vmatprep.subr.bf16.mxu0 %v2086_v62 }
  0x3b   : > { %1837 = vmatpush3.bf16.msra.mxu1 %v2085_v55 }
  0x3c   : > { %1838 = vmatprep.subr.bf16.mxu1 %v2087_v61 }
  0x3d   : > { %1917 = vmatpush3.bf16.msra.mxu0 %v2086_v62  ;;  %v1694_v62 = vld [vmem:[%s2634_s2] ss:$0 sm:$0xff] }
  0x3e   : > { %1918 = vmatprep.subr.bf16.mxu0 %v2088_v0 }
  0x3f   : > { %1839 = vmatpush3.bf16.msra.mxu1 %v2087_v61 }
  0x40   : > { %1840 = vmatprep.subr.bf16.mxu1 %v2089_v63 }
  0x41   : > { %1919 = vmatpush3.bf16.msra.mxu0 %v2088_v0 }
  0x42   : > { %1920 = vmatprep.subr.bf16.mxu0 %v2090_v4 }
  0x43   : > { %1841 = vmatpush3.bf16.msra.mxu1 %v2089_v63 }
  0x44   : > { %1842 = vmatprep.subr.bf16.mxu1 %v2091_v2 }
  0x45   : > { %1921 = vmatpush3.bf16.msra.mxu0 %v2090_v4 }
  0x46   : > { %1922 = vmatprep.subr.bf16.mxu0 %v2092_v11 }
  0x47   : > { %1843 = vmatpush3.bf16.msra.mxu1 %v2091_v2 }
  0x48   : > { %1848 = vmatprep.subr.bf16.mxu1 %v2094_v12 }
  0x49   : > { %1923 = vmatpush3.bf16.msra.mxu0 %v2092_v11 }
  0x4a   : > { %1845 = vmatmul.mubr.bf16.vlgmr.msra.gmra.mrb[0].mxu1 %v1612_v34  ;;  %1928 = vmatprep.subr.bf16.mxu0 %v2095_v14 }
  0x4b   : > { %1849 = vmatpush3.bf16.msra.mxu1 %v2094_v12  ;;  %1864 = vmatprep.mubr.bf16.mxu1 %v1625_v8 }
  0x4c   : > { %1850 = vmatprep.subr.bf16.mxu1 %v2097_v10  ;;  %1925 = vmatmul.mubr.bf16.vlgmr.msra.gmra.mrb[0].mxu0 %v1657_v16 }
  0x4d   : > { %1929 = vmatpush3.bf16.msra.mxu0 %v2095_v14  ;;  %1944 = vmatprep.mubr.bf16.mxu0 %v1612_v34 }
  0x4e   : > { %1930 = vmatprep.subr.bf16.mxu0 %v2098_v18 }
  0x4f   : > { %1851 = vmatpush3.bf16.msra.mxu1 %v2097_v10 }
  0x50   : > { %1852 = vmatprep.subr.bf16.mxu1 %v2099_v17 }
  0x51   : > { %1931 = vmatpush3.bf16.msra.mxu0 %v2098_v18 }
  0x52   : > { %1932 = vmatprep.subr.bf16.mxu0 %v2100_v20 }
  0x53   : > { %1853 = vmatpush3.bf16.msra.mxu1 %v2099_v17 }
  0x54   : > { %1854 = vmatprep.subr.bf16.mxu1 %v2101_v19 }
  0x55   : > { %1933 = vmatpush3.bf16.msra.mxu0 %v2100_v20 }
  0x56   : > { %1934 = vmatprep.subr.bf16.mxu0 %v2102_v23 }
  0x57   : > { %1855 = vmatpush3.bf16.msra.mxu1 %v2101_v19 }
  0x58   : > { %1856 = vmatprep.subr.bf16.mxu1 %v2103_v22 }
  0x59   : > { %1935 = vmatpush3.bf16.msra.mxu0 %v2102_v23 }
  0x5a   : > { %1936 = vmatprep.subr.bf16.mxu0 %v2104_v25 }
  0x5b   : > { %1857 = vmatpush3.bf16.msra.mxu1 %v2103_v22 }
  0x5c   : > { %1858 = vmatprep.subr.bf16.mxu1 %v2105_v24 }
  0x5d   : > { %1937 = vmatpush3.bf16.msra.mxu0 %v2104_v25 }
  0x5e   : > { %1938 = vmatprep.subr.bf16.mxu0 %v2106_v29 }
  0x5f   : > { %1859 = vmatpush3.bf16.msra.mxu1 %v2105_v24 }
  0x60   : > { %1860 = vmatprep.subr.bf16.mxu1 %v2107_v28 }
  0x61   : > { %1939 = vmatpush3.bf16.msra.mxu0 %v2106_v29 }
  0x62   : > { %1940 = vmatprep.subr.bf16.mxu0 %v2108_v35 }
  0x63   : > { %1861 = vmatpush3.bf16.msra.mxu1 %v2107_v28 }
  0x64   : > { %1862 = vmatprep.subr.bf16.mxu1 %v2109_v32 }
  0x65   : > { %1941 = vmatpush3.bf16.msra.mxu0 %v2108_v35 }
  0x66   : > { %1942 = vmatprep.subr.bf16.mxu0 %v2110_v36 }
  0x67   : > { %1863 = vmatpush3.bf16.msra.mxu1 %v2109_v32 }
  0x68   : > { %1868 = vmatprep.subr.bf16.mxu1 %v2111_v15 }
  0x69   : > { %1943 = vmatpush3.bf16.msra.mxu0 %v2110_v36 }
  0x6a   : > { %1865 = vmatmul.mubr.bf16.vlgmr.msra.gmra.mrb[0].mxu1 %v1626_v38  ;;  %1948 = vmatprep.subr.bf16.mxu0 %v2112_v41 }
  0x6b   : > { %1869 = vmatpush3.bf16.msra.mxu1 %v2111_v15  ;;  %1884 = vmatprep.mubr.bf16.mxu1 %v1635_v37  ;;  %v2120_v37 = vld [vmem:[%s2633_s1 + $0xe0] sm:$0xff]  }
  0x6c   : > { %1870 = vmatprep.subr.bf16.mxu1 %v2114_v40  ;;  %1945 = vmatmul.mubr.bf16.vlgmr.msra.gmra.mrb[0].mxu0 %v1666_v26  ;;  %v2122_v26 = vld [vmem:[%s2633_s1 + $0xe8] sm:$0xff]  }
  0x6d   : > { %1949 = vmatpush3.bf16.msra.mxu0 %v2112_v41  ;;  %1964 = vmatprep.mubr.bf16.mxu0 %v2376_v21  ;;  %v2121_v21 = vld [vmem:[%s2633_s1 + $0x1e0] sm:$0xff]  }
  0x6e   : > { %1950 = vmatprep.subr.bf16.mxu0 %v2115_v43 }
  0x6f   : > { %1871 = vmatpush3.bf16.msra.mxu1 %v2114_v40 }
  0x70   : > { %1872 = vmatprep.subr.bf16.mxu1 %v2116_v42 }
  0x71   : > { %1951 = vmatpush3.bf16.msra.mxu0 %v2115_v43 }
  0x72   : > { %1952 = vmatprep.subr.bf16.mxu0 %v2117_v30 }
  0x73   : > { %1873 = vmatpush3.bf16.msra.mxu1 %v2116_v42 }
  0x74   : > { %1874 = vmatprep.subr.bf16.mxu1 %v2118_v13 }
  0x75   : > { %1953 = vmatpush3.bf16.msra.mxu0 %v2117_v30 }
  0x76   : > { %1954 = vmatprep.subr.bf16.mxu0 %v2119_v57 }
  0x77   : > { %1875 = vmatpush3.bf16.msra.mxu1 %v2118_v13 }
  0x78   : > { %1876 = vmatprep.subr.bf16.mxu1 %v2120_v37 }
  0x79   : > { %1955 = vmatpush3.bf16.msra.mxu0 %v2119_v57 }
  0x7a   : > { %1956 = vmatprep.subr.bf16.mxu0 %v2121_v21 }
  0x7b   : > { %1877 = vmatpush3.bf16.msra.mxu1 %v2120_v37 }
  0x7c   : > { %1878 = vmatprep.subr.bf16.mxu1 %v2122_v26 }
  0x7d   : > { %1957 = vmatpush3.bf16.msra.mxu0 %v2121_v21 }
  0x7e   : > { %1958 = vmatprep.subr.bf16.mxu0 %v2123_v44 }
  0x7f   : > { %1879 = vmatpush3.bf16.msra.mxu1 %v2122_v26 }
  0x80   : > { %1880 = vmatprep.subr.bf16.mxu1 %v2124_v31 }
  0x81   : > { %1959 = vmatpush3.bf16.msra.mxu0 %v2123_v44 }
  0x82   : > { %1960 = vmatprep.subr.bf16.mxu0 %v2125_v46 }
  0x83   : > { %1881 = vmatpush3.bf16.msra.mxu1 %v2124_v31 }
  0x84   : > { %1882 = vmatprep.subr.bf16.mxu1 %v2126_v45 }
  0x85   : > { %1961 = vmatpush3.bf16.msra.mxu0 %v2125_v46 }
  0x86   : > { %1962 = vmatprep.subr.bf16.mxu0 %v2127_v48 }
  0x87   : > { %1883 = vmatpush3.bf16.msra.mxu1 %v2126_v45 }
  0x89   : > { %1963 = vmatpush3.bf16.msra.mxu0 %v2127_v48 }
  0x8a   : > { %1885 = vmatmul.mubr.bf16.vlgmr.msra.gmra.mrb[0].mxu1 %v1636_v27  ;;  %1968 = vmatprep.subr.bf16.mxu0 %v2130_v49  ;;  %v2135_v27 = vld [vmem:[%s2633_s1 + $0x228] sm:$0xff]  }
  0x8c   : > { %1965 = vmatmul.mubr.bf16.vlgmr.msra.gmra.mrb[0].mxu0 %v2408_v47  ;;  %v2136_v47 = vld [vmem:[%s2633_s1 + $0x230] sm:$0xff]  }
  0x8d   : > { %1969 = vmatpush3.bf16.msra.mxu0 %v2130_v49  ;;  %1984 = vmatprep.mubr.bf16.mxu0 %v1626_v38 }
  0x8e   : > { %1970 = vmatprep.subr.bf16.mxu0 %v2131_v39 }
  0x91   : > { %1971 = vmatpush3.bf16.msra.mxu0 %v2131_v39 }
  0x92   : > { %1972 = vmatprep.subr.bf16.mxu0 %v2132_v50 }
  0x95   : > { %1973 = vmatpush3.bf16.msra.mxu0 %v2132_v50 }
  0x96   : > { %1974 = vmatprep.subr.bf16.mxu0 %v2133_v33 }
  0x99   : > { %1975 = vmatpush3.bf16.msra.mxu0 %v2133_v33 }
  0x9a   : > { %1976 = vmatprep.subr.bf16.mxu0 %v2134_v52 }
  0x9d   : > { %1977 = vmatpush3.bf16.msra.mxu0 %v2134_v52 }
  0x9e   : > { %1978 = vmatprep.subr.bf16.mxu0 %v2135_v27 }
  0xa1   : > { %1979 = vmatpush3.bf16.msra.mxu0 %v2135_v27 }
  0xa2   : > { %1980 = vmatprep.subr.bf16.mxu0 %v2136_v47 }
  0xa5   : > { %1981 = vmatpush3.bf16.msra.mxu0 %v2136_v47 }
  0xa6   : > { %1982 = vmatprep.subr.bf16.mxu0 %v2137_v51 }
  0xa9   : > { %1983 = vmatpush3.bf16.msra.mxu0 %v2137_v51 }
  0xac   : > { %1985 = vmatmul.mubr.bf16.vlgmr.msra.gmra.mrb[0].mxu0 %v1685_v60 }
 0x15d   : > { %v1886_v53 = vpop.f32.mrb[0].mxu1 }
 0x15e   : > { %v796_v54 = vpop.f32.mrb[1].mxu1 }
 0x15f   : > { %v1887_v55 = vpop.f32.mrb[2].mxu1 }
 0x160   : > { %v799_v59 = vpop.f32.mrb[3].mxu1 }
 0x17f   : > { %v1986_v61 = vpop.f32.mrb[0].mxu0 }
 0x180   : > { %v1988_v63 = vadd.f32 %v1986_v61, %v1886_v53  ;;  %v1439_v0 = vpop.f32.mrb[1].mxu0 }
 0x181   : > { %v1989_v2 = vadd.f32 %v1439_v0, %v796_v54  ;;  %v1987_v56 = vpop.f32.mrb[2].mxu0 }
 0x182   : > { %v1467_v58 = vadd.f32 %v1988_v63, %v1694_v62  ;;  %v1990_v60 = vadd.f32 %v1987_v56, %v1887_v55  ;;  %v1442_v3 = vpop.f32.mrb[3].mxu0 }
 0x183   : > { %v1465_v4 = vadd.f32 %v1989_v2, %v1694_v62  ;;  %v1991_v5 = vadd.f32 %v1442_v3, %v799_v59 }
 0x184   : > { %v1477_v12 = vmul.f32 %v1474_v1, %v1467_v58  ;;  %v1468_v6 = vadd.f32 %v1990_v60, %v1694_v62  ;;  %vm1472_vm6 = vcmp.ge.f32.partialorder %v1467_v58, 0.0 }
 0x185   : > { %v1475_v7 = vmul.f32 %v1474_v1, %v1465_v4  ;;  %v1466_v11 = vadd.f32 %v1991_v5, %v1694_v62  ;;  %vm1470_vm7 = vcmp.ge.f32.partialorder %v1465_v4, 0.0 }
 0x186   : > { %vm1473_vm8 = vcmp.ge.f32.partialorder %v1468_v6, 0.0  ;;  %v1478_v34 = vmul.f32 %v1474_v1, %v1468_v6  ;;  %v1481_v9 = vsel %vm1472_vm6, %v1467_v58, %v1477_v12 }
 0x187   : > { %vm1471_vm9 = vcmp.ge.f32.partialorder %v1466_v11, 0.0  ;;  %v1476_v8 = vmul.f32 %v1474_v1, %v1466_v11  ;;  %v1479_v14 = vsel %vm1470_vm7, %v1465_v4, %v1475_v7 }
 0x188   : > { %v1482_v10 = vsel %vm1473_vm8, %v1468_v6, %v1478_v34 }
 0x189   : > { %v1715_v16 = vpack.c.bf16 %v1482_v10, %v1481_v9  ;;  %v1480_v17 = vsel %vm1471_vm9, %v1466_v11, %v1476_v8 }
 0x18a   : > { %v1710_v18 = vpack.c.bf16 %v1480_v17, %v1479_v14 }
 0x18b   : > { %1717 = vst [vmem:[%s220_s14 + $0x8] sm:$0xff] %v1715_v16  }
 0x18c   : > { %1711 = vst [vmem:[%s220_s14] sm:$0xff] %v1710_v18  }
 0x18d PF: > { %s15_s21 = sadd.s32 1, %s2176_s21   ;;  %s2641_s17 = smov %s2168_s19 }
 0x18e   : > { %p12_p7 = scmp.ge.s32.totalorder %s15_s21, 6   ;;  %s2642_s18 = smov %s2172_s20 }
 0x18f   : > { %s2643_s19 = smov %s2646_s3  ;;  %s2644_s20 = smov %s2650_s22 }
 0x190   :  { %14 = sbr.rel (!%p12_p7) target bundleno = 3 (0x3), region = 67 }

// kernel: didn_forward.36
= control target key start
LH: loop header
LB: loop body
LE: loop exit
PB: predicated region body
PF: predicated region fallthrough
CT: control target
= control target key end

     0   :  { %s2316_s20 = smov 0   ;;  %s2318_s21 = smov 0   ;;  %s2752_s0 = inlined_call_operand.vmem [shape: bf16[2,10,10,128], index: 0, kind: input, shape index: {}]   ;;  %s2753_s1 = inlined_call_operand.vmem [shape: bf16[1152,128], index: 1, kind: input, shape index: {}]   ;;  %s2754_s2 = inlined_call_operand.vmem [shape: f32[1,128], index: 2, kind: input, shape index: {}]   ;;  %s2755_s3 = inlined_call_operand.<no memory space> [shape: f32[1,1], index: 3, kind: input, shape index: {}]   ;;  %s2756_s4 = inlined_call_operand.vmem [shape: bf16[2,64,128], index: 4, kind: input, shape index: {}]   ;;  %s2757_s5 = inlined_call_operand.vmem [shape: bf16[2,64,128], index: 5, kind: output, shape index: {}]  }
   0x1   :  { %10 = sst [smem:[#allocation2]] %s2755_s3  ;;  %s2320_s22 = smov 0  }
   0x2   :  { %s2322_s23 = smov 0   ;;  %s2324_s24 = smov 0  }
   0x3 LB: > { %s25_s3 = sadd.s32 1, %s2273_s22  ;;  %s28_s25 = sadd.s32 1, %s2277_s23  ;;  %s2281_s24 = sphi %s2324_s24, %s16_s24   ;;  %s2277_s23 = sphi %s2322_s23, %s2765_s23   ;;  %s2273_s22 = sphi %s2320_s22, %s2764_s22   ;;  %s2269_s21 = sphi %s2318_s21, %s2763_s21   ;;  %s2265_s20 = sphi %s2316_s20, %s2762_s20  }
   0x4   : > { %p26_p0 = scmp.ge.s32.totalorder %s25_s3, 2  ;;  %p1686_p1 = scmp.ge.s32.totalorder %s2281_s24, 1 }
   0x5   : > { %p219_p2 = scmp.lt.s32.totalorder %s2281_s24, 5 }
   0x6   : > { %s2767_s3 = smov (%p26_p0, %s25_s3), 0  ;;  %s2769_s25 = smov (!%p26_p0, %s28_s25), %s2277_s23 }
   0x7   : > { %p220_p3 = pnand %p1686_p1, %p219_p2  ;;  %p30_p4 = scmp.ge.s32.totalorder %s2769_s25, 2 }
   0x8   : > { %v2166_v0 = vld [vmem:[%s2753_s1 + $0x40] sm:$0xff] (!%p220_p3)   ;;  %p260_p5 = scmp.lt.s32.totalorder (!%p220_p3), %s2269_s21, 1  ;;  %v2168_v2 = vld [vmem:[%s2753_s1 + $0x48] sm:$0xff] (!%p220_p3)   ;;  %v2170_v4 = vld [vmem:[%s2753_s1 + $0x50] sm:$0xff] (!%p220_p3)   ;;  %s1798_s27 = sshll.u32 (!%p220_p3), %s2265_s20, 5  ;;  %vm611_vm3 = vcmask (!%p220_p3), 1042432  }
   0x9   : > { %s2771_s25 = smov (%p30_p4, %s2769_s25), 0  ;;  %223 = sbr.rel (%p220_p3) target bundleno = 399 (0x18f), region = 40 }
   0xa   : > { %v2167_v1 = vld [vmem:[%s2753_s1 + $0x100] sm:$0xff] (!%p220_p3)   ;;  %1913 = vmatprep.subr.bf16.mxu1 (!%p220_p3), %v2166_v0  ;;  %v2169_v3 = vld [vmem:[%s2753_s1 + $0x108] sm:$0xff] (!%p220_p3)   ;;  %v2171_v5 = vld [vmem:[%s2753_s1 + $0x110] sm:$0xff] (!%p220_p3)   ;;  %vm318_vm0 = vsmask.f32 (!%p220_p3), 3328  ;;  %vm612_vm4 = vcmask (!%p220_p3), 1046532  }
   0xb   : > { %1993 = vmatprep.subr.bf16.mxu0 (!%p220_p3), %v2167_v1  ;;  %1914 = vmatpush3.bf16.msra.mxu1 (!%p220_p3), %v2166_v0  ;;  %v2172_v6 = vld [vmem:[%s2753_s1 + $0x58] sm:$0xff] (!%p220_p3)   ;;  %v2174_v8 = vld [vmem:[%s2753_s1 + $0x60] sm:$0xff] (!%p220_p3)   ;;  %v2176_v10 = vld [vmem:[%s2753_s1 + $0x68] sm:$0xff] (!%p220_p3)   ;;  %vm319_vm1 = vsmask.f32 (!%p220_p3), 7440  ;;  %s1688_s18 = sshll.u32 (!%p220_p3), %s2265_s20, 2 }
   0xc   : > { %1994 = vmatpush3.bf16.msra.mxu0 (!%p220_p3), %v2167_v1  ;;  %1915 = vmatprep.subr.bf16.mxu1 (!%p220_p3), %v2168_v2  ;;  %v2173_v7 = vld [vmem:[%s2753_s1 + $0x118] sm:$0xff] (!%p220_p3)   ;;  %v2175_v9 = vld [vmem:[%s2753_s1 + $0x120] sm:$0xff] (!%p220_p3)   ;;  %v2177_v14 = vld [vmem:[%s2753_s1 + $0x128] sm:$0xff] (!%p220_p3)   ;;  %p268_p6 = scmp.lt.s32.totalorder (!%p220_p3), %s1688_s18, 7 }
   0xd   : > { %1995 = vmatprep.subr.bf16.mxu0 (!%p220_p3), %v2169_v3  ;;  %v2178_v22 = vld [vmem:[%s2753_s1 + $0x70] sm:$0xff] (!%p220_p3)   ;;  %v2180_v38 = vld [vmem:[%s2753_s1 + $0x78] sm:$0xff] (!%p220_p3)   ;;  %vm2438_vm2 = vmor (!%p220_p3), %vm318_vm0, %vm319_vm1 }
   0xe   : > { %v2179_v23 = vld [vmem:[%s2753_s1 + $0x130] sm:$0xff] (!%p220_p3)   ;;  %v2181_v48 = vld [vmem:[%s2753_s1 + $0x138] sm:$0xff] (!%p220_p3)   ;;  %v2182_v0 = vld [vmem:[%s2753_s1] sm:$0xff] (!%p220_p3)  }
   0xf   : > { %1916 = vmatpush3.bf16.msra.mxu1 (!%p220_p3), %v2168_v2  ;;  %vm2496_vm5 = vmor (!%p220_p3), %vm611_vm3, %vm612_vm4 }
  0x10   : > { %s2773_s21 = smov (!%p260_p5, %s2269_s21), 1  ;;  %1996 = vmatpush3.bf16.msra.mxu0 %v2169_v3  ;;  %1917 = vmatprep.subr.bf16.mxu1 %v2170_v4  ;;  %s2775_s18 = smov (!%p268_p6, %s1688_s18), 7 }
  0x11   : > { %s2125_s13 = smul.u32 80, %s2773_s21  ;;  %1997 = vmatprep.subr.bf16.mxu0 %v2171_v5  ;;  %s1689_s19 = sshll.u32 %s2773_s21, 3 }
  0x13   : > { %s264_s26 = scalar_lea.vmem %s2752_s0, %s2125_s13  ;;  %1918 = vmatpush3.bf16.msra.mxu1 %v2170_v4 }
  0x14   : > { %1998 = vmatpush3.bf16.msra.mxu0 %v2171_v5  ;;  %1919 = vmatprep.subr.bf16.mxu1 %v2172_v6  ;;  %s2385_s7 = scalar_lea.vmem %s264_s26, %s1798_s27  ;;  %v2183_v5 = vld [vmem:[%s2753_s1 + $0x140] sm:$0xff]   ;;  %s2721_s26 = sadd.s32 %s1689_s19, %s2775_s18 }
  0x15   : > { %1999 = vmatprep.subr.bf16.mxu0 %v2173_v7  ;;  %v2391_v11 = vld [vmem:[%s2385_s7] sm:$0xf]  ;;  %v2394_v12 = vld [vmem:[%s2385_s7 + $0x4] sm:$0x1]  ;;  %v2397_v13 = vld [vmem:[%s2385_s7 + $0x8] sm:$0xf] }
  0x16   : > { %v2403_v15 = vld [vmem:[%s2385_s7 + $0xc] sm:$0x1]  ;;  %v322_v16 = vshrl.u32 %v2391_v11, 16  ;;  %v325_v17 = vshll.u32 %v2391_v11, 16  ;;  %v331_v18 = vshll.u32 %v2394_v12, 16  ;;  %v336_v19 = vshrl.u32 %v2397_v13, 16 }
  0x17   : > { %1920 = vmatpush3.bf16.msra.mxu1 %v2172_v6  ;;  %v339_v20 = vshll.u32 %v2397_v13, 16  ;;  %v345_v21 = vshll.u32 %v2403_v15, 16  ;;  %v2418_v30 = vld [vmem:[%s2385_s7 + $0x10] sm:$0xf]  ;;  %v2421_v31 = vld [vmem:[%s2385_s7 + $0x14] sm:$0x1] }
  0x18   : > { %2000 = vmatpush3.bf16.msra.mxu0 %v2173_v7  ;;  %1921 = vmatprep.subr.bf16.mxu1 %v2174_v8  ;;  %v324_v24 = vrot.slane %v322_v16, 4  ;;  %v327_v25 = vrot.slane %v325_v17, 5  ;;  %v333_v26 = vrot.slane %v331_v18, 5  ;;  %v338_v27 = vrot.slane %v336_v19, 4  ;;  %v2424_v33 = vld [vmem:[%s2385_s7 + $0x18] sm:$0xf] }
  0x19   : > { %2001 = vmatprep.subr.bf16.mxu0 %v2175_v9  ;;  %v341_v28 = vrot.slane %v339_v20, 5  ;;  %v347_v29 = vrot.slane %v345_v21, 5  ;;  %v2427_v34 = vld [vmem:[%s2385_s7 + $0x1c] sm:$0x1]  ;;  %v350_v35 = vshrl.u32 %v2418_v30, 16  ;;  %v353_v36 = vshll.u32 %v2418_v30, 16 }
  0x1a   : > { %v328_v32 = vor.u32 %v327_v25, %v324_v24  ;;  %v1731_v37 = vcombine.low %v2397_v13, %v2418_v30  ;;  %v359_v41 = vshll.u32 %v2421_v31, 16  ;;  %v364_v42 = vshrl.u32 %v2424_v33, 16  ;;  %v2450_v52 = vld [vmem:[%s2385_s7 + $0x20] sm:$0xf]  ;;  %v2455_v56 = vld [vmem:[%s2385_s7 + $0x24] sm:$0x1] }
  0x1b   : > { %1922 = vmatpush3.bf16.msra.mxu1 %v2174_v8  ;;  %v342_v40 = vor.u32 %v341_v28, %v338_v27  ;;  %v367_v43 = vshll.u32 %v2424_v33, 16  ;;  %v352_v45 = vrot.slane %v350_v35, 4  ;;  %v355_v46 = vrot.slane %v353_v36, 5  ;;  %v2458_v57 = vld [vmem:[%s2385_s7 + $0x28] sm:$0xf]  ;;  %v2213_v35 = vld [vmem:[%s2753_s1 + $0x1b0] sm:$0xff]  }
  0x1c   : > { %2002 = vmatpush3.bf16.msra.mxu0 %v2175_v9  ;;  %1923 = vmatprep.subr.bf16.mxu1 %v2176_v10  ;;  %v329_v44 = vrot.slane %v328_v32, 4  ;;  %v373_v47 = vshll.u32 %v2427_v34, 16  ;;  %v366_v50 = vrot.slane %v364_v42, 4  ;;  %v361_v55 = vrot.slane %v359_v41, 5  ;;  %v2463_v61 = vld [vmem:[%s2385_s7 + $0x2c] sm:$0x1] }
  0x1d   : > { %2003 = vmatprep.subr.bf16.mxu0 %v2177_v14  ;;  %v343_v49 = vrot.slane %v342_v40, 4  ;;  %v369_v51 = vrot.slane %v367_v43, 5  ;;  %v356_v54 = vor.u32 %v355_v46, %v352_v45  ;;  %v879_v62 = vshrl.u32 %v2450_v52, 16  ;;  %v2186_v41 = vld [vmem:[%s2753_s1 + $0x10] sm:$0xff]   ;;  %v2185_v43 = vld [vmem:[%s2753_s1 + $0x148] sm:$0xff]   ;;  %s1532_s27 = sld [smem:[#allocation2]] }
  0x1e   : > { %v334_v53 = vsel %vm2438_vm2, %v329_v44, %v333_v26  ;;  %v375_v60 = vrot.slane %v373_v47, 5  ;;  %v882_v2 = vshll.u32 %v2450_v52, 16  ;;  %v888_v3 = vshll.u32 %v2455_v56, 16  ;;  %s1690_s28 = sshll.u32 %s2721_s26, 2 }
  0x1f   : > { %1924 = vmatpush3.bf16.msra.mxu1 %v2176_v10  ;;  %v348_v58 = vsel %vm2438_vm2, %v343_v49, %v347_v29  ;;  %v370_v59 = vor.u32 %v369_v51, %v366_v50  ;;  %v357_v1 = vrot.slane %v356_v54, 4  ;;  %v881_v6 = vrot.slane %v879_v62, 4  ;;  %v2188_v49 = vld [vmem:[%s2753_s1 + $0x18] sm:$0xff]   ;;  %v2187_v51 = vld [vmem:[%s2753_s1 + $0x150] sm:$0xff]   ;;  %v2191_v62 = vld [vmem:[%s2753_s1 + $0x160] sm:$0xff]   ;;  %s273_s6 = scalar_lea.vmem %s2756_s4, %s1690_s28  ;;  %s283_s9 = scalar_lea.vmem %s2757_s5, %s1690_s28 }
  0x20   : > { %2004 = vmatpush3.bf16.msra.mxu0 %v2177_v14  ;;  %1925 = vmatprep.subr.bf16.mxu1 %v2178_v22  ;;  %v1697_v63 = vcombine.low %v334_v53, %v348_v58  ;;  %v1263_v7 = vshrl.u32 %v2458_v57, 16  ;;  %v884_v9 = vrot.slane %v882_v2, 5  ;;  %v1266_v10 = vshll.u32 %v2458_v57, 16  ;;  %v2184_v14 = vld [vmem:[%s2753_s1 + $0x8] sm:$0xff]   ;;  %v2196_v2 = vld [vmem:[%s2753_s1 + $0x38] sm:$0xff]  }
  0x21   : > { %2005 = vmatprep.subr.bf16.mxu0 %v2179_v23  ;;  %v371_v4 = vrot.slane %v370_v59, 4  ;;  %v362_v8 = vsel %vm2438_vm2, %v357_v1, %v361_v55  ;;  %v1707_v16 = vcombine.low %v2391_v11, %v2397_v13  ;;  %v1272_v20 = vshll.u32 %v2463_v61, 16  ;;  %v2190_v55 = vld [vmem:[%s2753_s1 + $0x20] sm:$0xff]   ;;  %v2189_v59 = vld [vmem:[%s2753_s1 + $0x158] sm:$0xff]  }
  0x22   : > { %1929 = vmatprep.mubr.bf16.mxu1 %v1697_v63  ;;  %v1741_v18 = vcombine.low %v348_v58, %v362_v8  ;;  %v1265_v19 = vrot.slane %v1263_v7, 4  ;;  %v1268_v24 = vrot.slane %v1266_v10, 5  ;;  %v620_v25 = vrot.slane %v2403_v15, 5  ;;  %v2194_v63 = vld [vmem:[%s2753_s1 + $0x30] sm:$0xff]   ;;  %v2202_v10 = vld [vmem:[%s2753_s1 + $0x88] sm:$0xff]  }
  0x23   : > { %1926 = vmatpush3.bf16.msra.mxu1 %v2178_v22  ;;  %v376_v17 = vsel %vm2438_vm2, %v371_v4, %v375_v60  ;;  %v885_v22 = vor.u32 %v884_v9, %v881_v6  ;;  %v1762_v26 = vcombine.low %v2450_v52, %v2458_v57  ;;  %v1732_v27 = vcombine.low %v2424_v33, %v2450_v52  ;;  %v2195_v4 = vld [vmem:[%s2753_s1 + $0x170] sm:$0xff]  }
  0x24   : > { %2006 = vmatpush3.bf16.msra.mxu0 %v2179_v23  ;;  %1927 = vmatprep.subr.bf16.mxu1 %v2180_v38  ;;  %v2486_v21 = vcombine.low %v362_v8, %v376_v17  ;;  %v890_v23 = vrot.slane %v888_v3, 5  ;;  %v1269_v29 = vor.u32 %v1268_v24, %v1265_v19  ;;  %v1274_v32 = vrot.slane %v1272_v20, 5  ;;  %v2206_v19 = vld [vmem:[%s2753_s1 + $0x98] sm:$0xff]   ;;  %v2205_v20 = vld [vmem:[%s2753_s1 + $0x190] sm:$0xff]   ;;  %v2210_v24 = vld [vmem:[%s2753_s1 + $0xa8] sm:$0xff]  }
  0x25   : > { %2007 = vmatprep.subr.bf16.mxu0 %v2181_v48  ;;  %2009 = vmatprep.mubr.bf16.mxu0 %v1741_v18  ;;  %v886_v28 = vrot.slane %v885_v22, 4  ;;  %v624_v15 = vrot.slane %v2421_v31, 5  ;;  %v1718_v36 = vrot.slane %v2397_v13, 9  ;;  %v1719_v44 = vrot.slane %v2418_v30, 9  ;;  %v2203_v18 = vld [vmem:[%s2753_s1 + $0x188] sm:$0xff]   ;;  %v2208_v22 = vld [vmem:[%s2753_s1 + $0xa0] sm:$0xff]  }
  0x26   : > { %v1270_v40 = vrot.slane %v1269_v29, 4  ;;  %v1017_v46 = vrot.slane %v2455_v56, 5  ;;  %v1751_v50 = vrot.slane %v2450_v52, 9  ;;  %v1780_v53 = vrot.slane %v2458_v57, 9  ;;  %v2211_v29 = vld [vmem:[%s2753_s1 + $0x1a8] sm:$0xff]   ;;  %v2223_v13 = vld [vmem:[%s2753_s1 + $0xd8] sm:$0xff]  }
  0x27   : > { %1928 = vmatpush3.bf16.msra.mxu1 %v2180_v38  ;;  %v891_v38 = vsel %vm2438_vm2, %v886_v28, %v890_v23  ;;  %v2512_v31 = vsel %vm2496_vm5, %v1718_v36, %v620_v25  ;;  %v1399_v54 = vrot.slane %v2463_v61, 5  ;;  %v2192_v61 = vld [vmem:[%s2753_s1 + $0x28] sm:$0xff]   ;;  %v616_v1 = vrot.slane %v2394_v12, 5  ;;  %v2199_v12 = vld [vmem:[%s2753_s1 + $0x80] sm:$0xff]   ;;  %v2207_v23 = vld [vmem:[%s2753_s1 + $0x198] sm:$0xff]  }
  0x28   : > { %2008 = vmatpush3.bf16.msra.mxu0 %v2181_v48  ;;  %1933 = vmatprep.subr.bf16.mxu1 %v2182_v0  ;;  %v1742_v42 = vcombine.low %v376_v17, %v891_v38  ;;  %v1275_v45 = vsel %vm2438_vm2, %v1270_v40, %v1274_v32  ;;  %v2522_v48 = vsel %vm2496_vm5, %v1719_v44, %v624_v15  ;;  %v1717_v3 = vrot.slane %v2391_v11, 9  ;;  %v2197_v11 = vld [vmem:[%s2753_s1 + $0x178] sm:$0xff]   ;;  %v2204_v17 = vld [vmem:[%s2753_s1 + $0x90] sm:$0xff]   ;;  %v2209_v25 = vld [vmem:[%s2753_s1 + $0x1a0] sm:$0xff]  }
  0x29   : > { %2013 = vmatprep.subr.bf16.mxu0 %v2183_v5  ;;  %v2518_v47 = vcombine.low %v891_v38, %v1275_v45  ;;  %v1752_v39 = vcombine.low %v2512_v31, %v2522_v48  ;;  %v2540_v56 = vsel %vm2496_vm5, %v1751_v50, %v1017_v46  ;;  %v2544_v58 = vsel %vm2496_vm5, %v1780_v53, %v1399_v54  ;;  %v2212_v28 = vld [vmem:[%s2753_s1 + $0xb0] sm:$0xff]   ;;  %v2214_v32 = vld [vmem:[%s2753_s1 + $0xb8] sm:$0xff]   ;;  %v2216_v15 = vld [vmem:[%s2753_s1 + $0xc0] sm:$0xff]  }
  0x2a   : > { %1930 = vmatmul.mubr.bf16.vlgmr.msra.gmra.mrb[0].mxu1 %v2486_v21  ;;  %v1781_v60 = vcombine.low %v2540_v56, %v2544_v58  ;;  %v1720_v6 = vrot.slane %v2424_v33, 9  ;;  %v617_v7 = vsel %vm2496_vm5, %v1717_v3, %v616_v1  ;;  %v2215_v36 = vld [vmem:[%s2753_s1 + $0x1b8] sm:$0xff]   ;;  %v2219_v40 = vld [vmem:[%s2753_s1 + $0xc8] sm:$0xff]   ;;  %v2230_v46 = vld [vmem:[%s2753_s1 + $0x1f0] sm:$0xff]  }
  0x2b   : > { %1934 = vmatpush3.bf16.msra.mxu1 %v2182_v0  ;;  %1949 = vmatprep.mubr.bf16.mxu1 %v1707_v16  ;;  %v2193_v0 = vld [vmem:[%s2753_s1 + $0x168] sm:$0xff]   ;;  %v1721_v8 = vcombine.low %v617_v7, %v2512_v31  ;;  %v2224_v57 = vld [vmem:[%s2753_s1 + $0x1d8] sm:$0xff]   ;;  %v2229_v31 = vld [vmem:[%s2753_s1 + $0xf0] sm:$0xff]  }
  0x2c   : > { %1935 = vmatprep.subr.bf16.mxu1 %v2184_v14  ;;  %2010 = vmatmul.mubr.bf16.vlgmr.msra.gmra.mrb[0].mxu0 %v1742_v42  ;;  %v2221_v42 = vld [vmem:[%s2753_s1 + $0xd0] sm:$0xff]   ;;  %v2228_v44 = vld [vmem:[%s2753_s1 + $0x1e8] sm:$0xff]   ;;  %v2231_v45 = vld [vmem:[%s2753_s1 + $0xf8] sm:$0xff]  }
  0x2d   : > { %2014 = vmatpush3.bf16.msra.mxu0 %v2183_v5  ;;  %2029 = vmatprep.mubr.bf16.mxu0 %v1752_v39  ;;  %v628_v5 = vrot.slane %v2427_v34, 5  ;;  %v1708_v34 = vcombine.low %v2418_v30, %v2424_v33  ;;  %v2222_v30 = vld [vmem:[%s2753_s1 + $0x1d0] sm:$0xff]   ;;  %v2236_v39 = vld [vmem:[%s2753_s1 + $0x208] sm:$0xff]   ;;  %v2238_v33 = vld [vmem:[%s2753_s1 + $0x218] sm:$0xff]  }
  0x2e   : > { %2015 = vmatprep.subr.bf16.mxu0 %v2185_v43  ;;  %v2237_v50 = vld [vmem:[%s2753_s1 + $0x210] sm:$0xff]   ;;  %v2239_v52 = vld [vmem:[%s2753_s1 + $0x220] sm:$0xff]  }
  0x2f   : > { %1936 = vmatpush3.bf16.msra.mxu1 %v2184_v14  ;;  %v629_v9 = vsel %vm2496_vm5, %v1720_v6, %v628_v5  ;;  %v2200_v14 = vld [vmem:[%s2753_s1 + $0x180] sm:$0xff]  }
  0x30   : > { %1937 = vmatprep.subr.bf16.mxu1 %v2186_v41  ;;  %v1753_v16 = vcombine.low %v629_v9, %v2540_v56  ;;  %v1722_v38 = vcombine.low %v2522_v48, %v629_v9  ;;  %v2232_v48 = vld [vmem:[%s2753_s1 + $0x1f8] sm:$0xff]   ;;  %v1790_v58 = vld [vmem:[%s2754_s2] ss:$0 sm:$0xff] }
  0x31   : > { %2016 = vmatpush3.bf16.msra.mxu0 %v2185_v43  ;;  %v2220_v43 = vld [vmem:[%s2753_s1 + $0x1c8] sm:$0xff]   ;;  %v1804_v1 = vld [vmem:[%s273_s6] sm:$0xff]  }
  0x32   : > { %2017 = vmatprep.subr.bf16.mxu0 %v2187_v51 }
  0x33   : > { %1938 = vmatpush3.bf16.msra.mxu1 %v2186_v41  ;;  %v2217_v41 = vld [vmem:[%s2753_s1 + $0x1c0] sm:$0xff]  }
  0x34   : > { %1939 = vmatprep.subr.bf16.mxu1 %v2188_v49 }
  0x35   : > { %2018 = vmatpush3.bf16.msra.mxu0 %v2187_v51  ;;  %v2242_v51 = vld [vmem:[%s2753_s1 + $0x238] sm:$0xff]  }
  0x36   : > { %2019 = vmatprep.subr.bf16.mxu0 %v2189_v59 }
  0x37   : > { %1940 = vmatpush3.bf16.msra.mxu1 %v2188_v49  ;;  %v2235_v49 = vld [vmem:[%s2753_s1 + $0x200] sm:$0xff]  }
  0x38   : > { %1941 = vmatprep.subr.bf16.mxu1 %v2190_v55 }
  0x39   : > { %2020 = vmatpush3.bf16.msra.mxu0 %v2189_v59 }
  0x3a   : > { %2021 = vmatprep.subr.bf16.mxu0 %v2191_v62 }
  0x3b   : > { %1942 = vmatpush3.bf16.msra.mxu1 %v2190_v55 }
  0x3c   : > { %1943 = vmatprep.subr.bf16.mxu1 %v2192_v61 }
  0x3d   : > { %2022 = vmatpush3.bf16.msra.mxu0 %v2191_v62 }
  0x3e   : > { %2023 = vmatprep.subr.bf16.mxu0 %v2193_v0 }
  0x3f   : > { %1944 = vmatpush3.bf16.msra.mxu1 %v2192_v61  ;;  %v1821_v61 = vld [vmem:[%s273_s6 + $0x8] sm:$0xff]  }
  0x40   : > { %1945 = vmatprep.subr.bf16.mxu1 %v2194_v63 }
  0x41   : > { %2024 = vmatpush3.bf16.msra.mxu0 %v2193_v0 }
  0x42   : > { %2025 = vmatprep.subr.bf16.mxu0 %v2195_v4 }
  0x43   : > { %1946 = vmatpush3.bf16.msra.mxu1 %v2194_v63  ;;  %v1537_v63 = vstv %s1532_s27 }
  0x44   : > { %1947 = vmatprep.subr.bf16.mxu1 %v2196_v2 }
  0x45   : > { %2026 = vmatpush3.bf16.msra.mxu0 %v2195_v4 }
  0x46   : > { %2027 = vmatprep.subr.bf16.mxu0 %v2197_v11 }
  0x47   : > { %1948 = vmatpush3.bf16.msra.mxu1 %v2196_v2 }
  0x48   : > { %1953 = vmatprep.subr.bf16.mxu1 %v2199_v12 }
  0x49   : > { %2028 = vmatpush3.bf16.msra.mxu0 %v2197_v11 }
  0x4a   : > { %1950 = vmatmul.mubr.bf16.vlgmr.msra.gmra.mrb[0].mxu1 %v1708_v34  ;;  %2033 = vmatprep.subr.bf16.mxu0 %v2200_v14 }
  0x4b   : > { %1954 = vmatpush3.bf16.msra.mxu1 %v2199_v12  ;;  %1969 = vmatprep.mubr.bf16.mxu1 %v1721_v8  ;;  %v1809_v12 = vunpack.c.l.bf16 %v1821_v61 }
  0x4c   : > { %1955 = vmatprep.subr.bf16.mxu1 %v2202_v10  ;;  %2030 = vmatmul.mubr.bf16.vlgmr.msra.gmra.mrb[0].mxu0 %v1753_v16 }
  0x4d   : > { %2034 = vmatpush3.bf16.msra.mxu0 %v2200_v14  ;;  %2049 = vmatprep.mubr.bf16.mxu0 %v1708_v34  ;;  %v1805_v34 = vunpack.c.l.bf16 %v1804_v1 }
  0x4e   : > { %2035 = vmatprep.subr.bf16.mxu0 %v2203_v18 }
  0x4f   : > { %1956 = vmatpush3.bf16.msra.mxu1 %v2202_v10  ;;  %v1810_v10 = vunpack.c.h.bf16 %v1821_v61 }
  0x50   : > { %1957 = vmatprep.subr.bf16.mxu1 %v2204_v17 }
  0x51   : > { %2036 = vmatpush3.bf16.msra.mxu0 %v2203_v18  ;;  %v1806_v18 = vunpack.c.h.bf16 %v1804_v1 }
  0x52   : > { %2037 = vmatprep.subr.bf16.mxu0 %v2205_v20 }
  0x53   : > { %1958 = vmatpush3.bf16.msra.mxu1 %v2204_v17 }
  0x54   : > { %1959 = vmatprep.subr.bf16.mxu1 %v2206_v19 }
  0x55   : > { %2038 = vmatpush3.bf16.msra.mxu0 %v2205_v20 }
  0x56   : > { %2039 = vmatprep.subr.bf16.mxu0 %v2207_v23 }
  0x57   : > { %1960 = vmatpush3.bf16.msra.mxu1 %v2206_v19 }
  0x58   : > { %1961 = vmatprep.subr.bf16.mxu1 %v2208_v22 }
  0x59   : > { %2040 = vmatpush3.bf16.msra.mxu0 %v2207_v23 }
  0x5a   : > { %2041 = vmatprep.subr.bf16.mxu0 %v2209_v25 }
  0x5b   : > { %1962 = vmatpush3.bf16.msra.mxu1 %v2208_v22 }
  0x5c   : > { %1963 = vmatprep.subr.bf16.mxu1 %v2210_v24 }
  0x5d   : > { %2042 = vmatpush3.bf16.msra.mxu0 %v2209_v25 }
  0x5e   : > { %2043 = vmatprep.subr.bf16.mxu0 %v2211_v29 }
  0x5f   : > { %1964 = vmatpush3.bf16.msra.mxu1 %v2210_v24 }
  0x60   : > { %1965 = vmatprep.subr.bf16.mxu1 %v2212_v28 }
  0x61   : > { %2044 = vmatpush3.bf16.msra.mxu0 %v2211_v29 }
  0x62   : > { %2045 = vmatprep.subr.bf16.mxu0 %v2213_v35 }
  0x63   : > { %1966 = vmatpush3.bf16.msra.mxu1 %v2212_v28 }
  0x64   : > { %1967 = vmatprep.subr.bf16.mxu1 %v2214_v32 }
  0x65   : > { %2046 = vmatpush3.bf16.msra.mxu0 %v2213_v35 }
  0x66   : > { %2047 = vmatprep.subr.bf16.mxu0 %v2215_v36 }
  0x67   : > { %1968 = vmatpush3.bf16.msra.mxu1 %v2214_v32 }
  0x68   : > { %1973 = vmatprep.subr.bf16.mxu1 %v2216_v15 }
  0x69   : > { %2048 = vmatpush3.bf16.msra.mxu0 %v2215_v36 }
  0x6a   : > { %1970 = vmatmul.mubr.bf16.vlgmr.msra.gmra.mrb[0].mxu1 %v1722_v38  ;;  %2053 = vmatprep.subr.bf16.mxu0 %v2217_v41 }
  0x6b   : > { %1974 = vmatpush3.bf16.msra.mxu1 %v2216_v15  ;;  %1989 = vmatprep.mubr.bf16.mxu1 %v1731_v37  ;;  %v2225_v37 = vld [vmem:[%s2753_s1 + $0xe0] sm:$0xff]  }
  0x6c   : > { %1975 = vmatprep.subr.bf16.mxu1 %v2219_v40  ;;  %2050 = vmatmul.mubr.bf16.vlgmr.msra.gmra.mrb[0].mxu0 %v1762_v26  ;;  %v2227_v26 = vld [vmem:[%s2753_s1 + $0xe8] sm:$0xff]  }
  0x6d   : > { %2054 = vmatpush3.bf16.msra.mxu0 %v2217_v41  ;;  %2069 = vmatprep.mubr.bf16.mxu0 %v2486_v21  ;;  %v2226_v21 = vld [vmem:[%s2753_s1 + $0x1e0] sm:$0xff]  }
  0x6e   : > { %2055 = vmatprep.subr.bf16.mxu0 %v2220_v43 }
  0x6f   : > { %1976 = vmatpush3.bf16.msra.mxu1 %v2219_v40 }
  0x70   : > { %1977 = vmatprep.subr.bf16.mxu1 %v2221_v42 }
  0x71   : > { %2056 = vmatpush3.bf16.msra.mxu0 %v2220_v43 }
  0x72   : > { %2057 = vmatprep.subr.bf16.mxu0 %v2222_v30 }
  0x73   : > { %1978 = vmatpush3.bf16.msra.mxu1 %v2221_v42 }
  0x74   : > { %1979 = vmatprep.subr.bf16.mxu1 %v2223_v13 }
  0x75   : > { %2058 = vmatpush3.bf16.msra.mxu0 %v2222_v30 }
  0x76   : > { %2059 = vmatprep.subr.bf16.mxu0 %v2224_v57 }
  0x77   : > { %1980 = vmatpush3.bf16.msra.mxu1 %v2223_v13 }
  0x78   : > { %1981 = vmatprep.subr.bf16.mxu1 %v2225_v37 }
  0x79   : > { %2060 = vmatpush3.bf16.msra.mxu0 %v2224_v57 }
  0x7a   : > { %2061 = vmatprep.subr.bf16.mxu0 %v2226_v21 }
  0x7b   : > { %1982 = vmatpush3.bf16.msra.mxu1 %v2225_v37 }
  0x7c   : > { %1983 = vmatprep.subr.bf16.mxu1 %v2227_v26 }
  0x7d   : > { %2062 = vmatpush3.bf16.msra.mxu0 %v2226_v21 }
  0x7e   : > { %2063 = vmatprep.subr.bf16.mxu0 %v2228_v44 }
  0x7f   : > { %1984 = vmatpush3.bf16.msra.mxu1 %v2227_v26 }
  0x80   : > { %1985 = vmatprep.subr.bf16.mxu1 %v2229_v31 }
  0x81   : > { %2064 = vmatpush3.bf16.msra.mxu0 %v2228_v44 }
  0x82   : > { %2065 = vmatprep.subr.bf16.mxu0 %v2230_v46 }
  0x83   : > { %1986 = vmatpush3.bf16.msra.mxu1 %v2229_v31 }
  0x84   : > { %1987 = vmatprep.subr.bf16.mxu1 %v2231_v45 }
  0x85   : > { %2066 = vmatpush3.bf16.msra.mxu0 %v2230_v46 }
  0x86   : > { %2067 = vmatprep.subr.bf16.mxu0 %v2232_v48 }
  0x87   : > { %1988 = vmatpush3.bf16.msra.mxu1 %v2231_v45 }
  0x89   : > { %2068 = vmatpush3.bf16.msra.mxu0 %v2232_v48 }
  0x8a   : > { %1990 = vmatmul.mubr.bf16.vlgmr.msra.gmra.mrb[0].mxu1 %v1732_v27  ;;  %2073 = vmatprep.subr.bf16.mxu0 %v2235_v49  ;;  %v2240_v27 = vld [vmem:[%s2753_s1 + $0x228] sm:$0xff]  }
  0x8c   : > { %2070 = vmatmul.mubr.bf16.vlgmr.msra.gmra.mrb[0].mxu0 %v2518_v47  ;;  %v2241_v47 = vld [vmem:[%s2753_s1 + $0x230] sm:$0xff]  }
  0x8d   : > { %2074 = vmatpush3.bf16.msra.mxu0 %v2235_v49  ;;  %2089 = vmatprep.mubr.bf16.mxu0 %v1722_v38 }
  0x8e   : > { %2075 = vmatprep.subr.bf16.mxu0 %v2236_v39 }
  0x91   : > { %2076 = vmatpush3.bf16.msra.mxu0 %v2236_v39 }
  0x92   : > { %2077 = vmatprep.subr.bf16.mxu0 %v2237_v50 }
  0x95   : > { %2078 = vmatpush3.bf16.msra.mxu0 %v2237_v50 }
  0x96   : > { %2079 = vmatprep.subr.bf16.mxu0 %v2238_v33 }
  0x99   : > { %2080 = vmatpush3.bf16.msra.mxu0 %v2238_v33 }
  0x9a   : > { %2081 = vmatprep.subr.bf16.mxu0 %v2239_v52 }
  0x9d   : > { %2082 = vmatpush3.bf16.msra.mxu0 %v2239_v52 }
  0x9e   : > { %2083 = vmatprep.subr.bf16.mxu0 %v2240_v27 }
  0xa1   : > { %2084 = vmatpush3.bf16.msra.mxu0 %v2240_v27 }
  0xa2   : > { %2085 = vmatprep.subr.bf16.mxu0 %v2241_v47 }
  0xa5   : > { %2086 = vmatpush3.bf16.msra.mxu0 %v2241_v47 }
  0xa6   : > { %2087 = vmatprep.subr.bf16.mxu0 %v2242_v51 }
  0xa9   : > { %2088 = vmatpush3.bf16.msra.mxu0 %v2242_v51 }
  0xac   : > { %2090 = vmatmul.mubr.bf16.vlgmr.msra.gmra.mrb[0].mxu0 %v1781_v60 }
 0x15d   : > { %v1991_v53 = vpop.f32.mrb[0].mxu1 }
 0x15e   : > { %v859_v54 = vpop.f32.mrb[1].mxu1 }
 0x15f   : > { %v1992_v55 = vpop.f32.mrb[2].mxu1 }
 0x160   : > { %v862_v59 = vpop.f32.mrb[3].mxu1 }
 0x17f   : > { %v2091_v56 = vpop.f32.mrb[0].mxu0 }
 0x180   : > { %v2093_v60 = vadd.f32 %v2091_v56, %v1991_v53  ;;  %v1502_v62 = vpop.f32.mrb[1].mxu0 }
 0x181   : > { %v2094_v0 = vadd.f32 %v1502_v62, %v859_v54  ;;  %v2092_v2 = vpop.f32.mrb[2].mxu0 }
 0x182   : > { %v1530_v3 = vadd.f32 %v2093_v60, %v1790_v58  ;;  %v2095_v4 = vadd.f32 %v2092_v2, %v1992_v55  ;;  %v1505_v5 = vpop.f32.mrb[3].mxu0 }
 0x183   : > { %v1528_v6 = vadd.f32 %v2094_v0, %v1790_v58  ;;  %v2096_v7 = vadd.f32 %v1505_v5, %v862_v59 }
 0x184   : > { %vm1535_vm6 = vcmp.ge.f32.partialorder %v1530_v3, 0.0  ;;  %v1540_v11 = vmul.f32 %v1537_v63, %v1530_v3  ;;  %v1531_v8 = vadd.f32 %v2095_v4, %v1790_v58 }
 0x185   : > { %vm1533_vm7 = vcmp.ge.f32.partialorder %v1528_v6, 0.0  ;;  %v1538_v9 = vmul.f32 %v1537_v63, %v1528_v6  ;;  %v1529_v14 = vadd.f32 %v2096_v7, %v1790_v58 }
 0x186   : > { %v1544_v16 = vsel %vm1535_vm6, %v1530_v3, %v1540_v11  ;;  %vm1536_vm8 = vcmp.ge.f32.partialorder %v1531_v8, 0.0  ;;  %v1541_v17 = vmul.f32 %v1537_v63, %v1531_v8 }
 0x187   : > { %v1542_v19 = vsel %vm1533_vm7, %v1528_v6, %v1538_v9  ;;  %vm1534_vm9 = vcmp.ge.f32.partialorder %v1529_v14, 0.0  ;;  %v1539_v20 = vmul.f32 %v1537_v63, %v1529_v14  ;;  %v1556_v23 = vadd.f32 %v1809_v12, %v1544_v16 }
 0x188   : > { %v1545_v22 = vsel %vm1536_vm8, %v1531_v8, %v1541_v17  ;;  %v1554_v28 = vadd.f32 %v1805_v34, %v1542_v19 }
 0x189   : > { %v1557_v24 = vadd.f32 %v1810_v10, %v1545_v22  ;;  %v1543_v25 = vsel %vm1534_vm9, %v1529_v14, %v1539_v20 }
 0x18a   : > { %v1555_v29 = vadd.f32 %v1806_v18, %v1543_v25 }
 0x18b   : > { %v1819_v32 = vpack.c.bf16 %v1557_v24, %v1556_v23 }
 0x18c   : > { %v1814_v35 = vpack.c.bf16 %v1555_v29, %v1554_v28 }
 0x18d   : > { %1822 = vst [vmem:[%s283_s9 + $0x8] sm:$0xff] %v1819_v32  }
 0x18e   : > { %1815 = vst [vmem:[%s283_s9] sm:$0xff] %v1814_v35  }
 0x18f PF: > { %s16_s24 = sadd.s32 1, %s2281_s24   ;;  %s2762_s20 = smov %s2273_s22 }
 0x190   : > { %p13_p7 = scmp.ge.s32.totalorder %s16_s24, 6   ;;  %s2763_s21 = smov %s2277_s23 }
 0x191   : > { %s2764_s22 = smov %s2767_s3  ;;  %s2765_s23 = smov %s2771_s25 }
 0x192   :  { %15 = sbr.rel (!%p13_p7) target bundleno = 3 (0x3), region = 74 }

// kernel: didn_forward.37
= control target key start
LH: loop header
LB: loop body
LE: loop exit
PB: predicated region body
PF: predicated region fallthrough
CT: control target
= control target key end

     0   :  { %s2016_s17 = smov 0   ;;  %s2018_s18 = smov 0   ;;  %s2472_s0 = inlined_call_operand.vmem [shape: bf16[2,5,5,512], index: 0, kind: input, shape index: {}]   ;;  %s2473_s1 = inlined_call_operand.vmem [shape: bf16[1152,128], index: 1, kind: input, shape index: {}]   ;;  %s2474_s2 = inlined_call_operand.vmem [shape: f32[1,128], index: 2, kind: input, shape index: {}]   ;;  %s2475_s3 = inlined_call_operand.<no memory space> [shape: f32[1,1], index: 3, kind: input, shape index: {}]   ;;  %s2476_s4 = inlined_call_operand.vmem [shape: bf16[2,16,128], index: 4, kind: output, shape index: {}]  }
   0x1   :  { %9 = sst [smem:[#allocation2]] %s2475_s3  ;;  %s2020_s19 = smov 0  }
   0x2   :  { %s2022_s20 = smov 0   ;;  %s2024_s21 = smov 0  }
   0x3 LB: > { %s24_s3 = sadd.s32 1, %s1975_s19  ;;  %s27_s22 = sadd.s32 1, %s1979_s20  ;;  %s1983_s21 = sphi %s2024_s21, %s15_s21   ;;  %s1979_s20 = sphi %s2022_s20, %s2482_s20   ;;  %s1975_s19 = sphi %s2020_s19, %s2481_s19   ;;  %s1971_s18 = sphi %s2018_s18, %s2480_s18   ;;  %s1967_s17 = sphi %s2016_s17, %s2479_s17  }
   0x4   : > { %p25_p0 = scmp.ge.s32.totalorder %s24_s3, 2  ;;  %p1481_p1 = scmp.ge.s32.totalorder %s1983_s21, 1 }
   0x5   : > { %p177_p2 = scmp.lt.s32.totalorder %s1983_s21, 5 }
   0x6   : > { %s2484_s3 = smov (%p25_p0, %s24_s3), 0  ;;  %s2486_s22 = smov (!%p25_p0, %s27_s22), %s1979_s20 }
   0x7   : > { %p178_p3 = pnand %p1481_p1, %p177_p2  ;;  %p29_p4 = scmp.ge.s32.totalorder %s2486_s22, 2 }
   0x8   : > { %v1870_v0 = vld [vmem:[%s2473_s1 + $0x40] sm:$0xff] (!%p178_p3)   ;;  %v1985_v1 = vmov (!%p178_p3), 0.0   ;;  %v1872_v3 = vld [vmem:[%s2473_s1 + $0x48] sm:$0xff] (!%p178_p3)   ;;  %vm1986_vm0 = vmmov (!%p178_p3), 0   ;;  %p206_p5 = scmp.lt.s32.totalorder (!%p178_p3), %s1971_s18, 1  ;;  %v1874_v5 = vld [vmem:[%s2473_s1 + $0x50] sm:$0xff] (!%p178_p3)   ;;  %v250_v9 = vlaneseq (!%p178_p3) }
   0x9   : > { %s2488_s22 = smov (%p29_p4, %s2486_s22), 0  ;;  %181 = sbr.rel (%p178_p3) target bundleno = 392 (0x188), region = 36 }
   0xa   : > { %1646 = vmatprep.subr.bf16.mxu0 (!%p178_p3), %v1985_v1  ;;  %1666 = vmatprep.subr.bf16.mxu1 (!%p178_p3), %v1985_v1  ;;  %v1871_v2 = vld [vmem:[%s2473_s1] sm:$0xff] (!%p178_p3)   ;;  %v1873_v4 = vld [vmem:[%s2473_s1 + $0x8] sm:$0xff] (!%p178_p3)   ;;  %v1875_v6 = vld [vmem:[%s2473_s1 + $0x10] sm:$0xff] (!%p178_p3)   ;;  %s1564_s23 = sshll.u32 (!%p178_p3), %s1967_s17, 5  ;;  %v1987_v13 = vmov (!%p178_p3), 1983009808  }
   0xb   : > { %1647 = vmatpush3.bf16.msra.mxu0 (!%p178_p3), %v1870_v0  ;;  %1662 = vmatprep.mubr.msk.bf16.mxu0 (!%p178_p3), %vm1986_vm0, %v1985_v1  ;;  %v1876_v7 = vld [vmem:[%s2473_s1 + $0x58] sm:$0xff] (!%p178_p3)   ;;  %v1878_v10 = vld [vmem:[%s2473_s1 + $0x60] sm:$0xff] (!%p178_p3)   ;;  %v1880_v12 = vld [vmem:[%s2473_s1 + $0x68] sm:$0xff] (!%p178_p3)   ;;  %v248_v14 = vunpack.c.l.s4 (!%p178_p3), %v1987_v13  ;;  %v251_v15 = vshrl.u32 (!%p178_p3), %v250_v9, 7  ;;  %vm475_vm1 = vsmask.f32 (!%p178_p3), 1280 }
   0xc   : > { %1667 = vmatpush3.bf16.msra.mxu1 (!%p178_p3), %v1871_v2  ;;  %1648 = vmatprep.subr.bf16.mxu0 (!%p178_p3), %v1985_v1  ;;  %v1877_v8 = vld [vmem:[%s2473_s1 + $0x18] sm:$0xff] (!%p178_p3)   ;;  %v1879_v11 = vld [vmem:[%s2473_s1 + $0x20] sm:$0xff] (!%p178_p3)   ;;  %v1881_v16 = vld [vmem:[%s2473_s1 + $0x28] sm:$0xff] (!%p178_p3)   ;;  %vm476_vm2 = vsmask.f32 (!%p178_p3), 3336  ;;  %p213_p6 = scmp.lt.s32.totalorder (!%p178_p3), %s1967_s17, 1 }
   0xd   : > { %1668 = vmatprep.subr.bf16.mxu1 (!%p178_p3), %v1985_v1  ;;  %1682 = vmatprep.mubr.msk.bf16.mxu1 (!%p178_p3), %vm1986_vm0, %v1985_v1  ;;  %v249_v18 = vunpack.c.0.s8 (!%p178_p3), %v248_v14  ;;  %v1882_v21 = vld [vmem:[%s2473_s1 + $0x70] sm:$0xff] (!%p178_p3)   ;;  %v1884_v27 = vld [vmem:[%s2473_s1 + $0x78] sm:$0xff] (!%p178_p3)   ;;  %v1887_v33 = vld [vmem:[%s2473_s1 + $0x80] sm:$0xff] (!%p178_p3)   ;;  %vm478_vm4 = vsmask.f32 (!%p178_p3), 5392 }
   0xe   : > { %v1883_v22 = vld [vmem:[%s2473_s1 + $0x30] sm:$0xff] (!%p178_p3)   ;;  %v1885_v29 = vld [vmem:[%s2473_s1 + $0x38] sm:$0xff] (!%p178_p3)   ;;  %v1888_v34 = vld [vmem:[%s2473_s1 + $0xc0] sm:$0xff] (!%p178_p3)   ;;  %vm480_vm6 = vsmask.f32 (!%p178_p3), 7448 }
   0xf   : > { %1649 = vmatpush3.bf16.msra.mxu0 (!%p178_p3), %v1872_v3  ;;  %v2117_v20 = vsub.s32 (!%p178_p3), %v249_v18, %v251_v15  ;;  %v1889_v35 = vld [vmem:[%s2473_s1 + $0x88] sm:$0xff] (!%p178_p3)   ;;  %v1891_v39 = vld [vmem:[%s2473_s1 + $0x90] sm:$0xff] (!%p178_p3)   ;;  %v1893_v45 = vld [vmem:[%s2473_s1 + $0x98] sm:$0xff] (!%p178_p3)  }
  0x10   : > { %s2490_s18 = smov (!%p206_p5, %s1971_s18), 1  ;;  %1669 = vmatpush3.bf16.msra.mxu1 %v1873_v4  ;;  %1650 = vmatprep.subr.bf16.mxu0 %v1985_v1  ;;  %v1890_v36 = vld [vmem:[%s2473_s1 + $0xc8] sm:$0xff]   ;;  %v1892_v40 = vld [vmem:[%s2473_s1 + $0xd0] sm:$0xff]   ;;  %v1894_v50 = vld [vmem:[%s2473_s1 + $0xd8] sm:$0xff]   ;;  %s2492_s17 = smov (!%p213_p6, %s1967_s17), 1 }
  0x11   : > { %1670 = vmatprep.subr.bf16.mxu1 %v1985_v1  ;;  %s1826_s9 = smul.u32 80, %s2490_s18  ;;  %vm477_vm3 = vmor %vm475_vm1, %vm476_vm2  ;;  %v1895_v53 = vld [vmem:[%s2473_s1 + $0xa0] sm:$0xff]   ;;  %v1897_v57 = vld [vmem:[%s2473_s1 + $0xa8] sm:$0xff]   ;;  %s1483_s10 = sshll.u32 %s2490_s18, 1 }
  0x12   : > { %v1896_v56 = vld [vmem:[%s2473_s1 + $0xe0] sm:$0xff]   ;;  %vm479_vm5 = vmor %vm477_vm3, %vm478_vm4  ;;  %v1898_v58 = vld [vmem:[%s2473_s1 + $0xe8] sm:$0xff]   ;;  %s216_s13 = sadd.s32 %s1483_s10, %s2492_s17 }
  0x13   : > { %1651 = vmatpush3.bf16.msra.mxu0 %v1874_v5  ;;  %s210_s16 = scalar_lea.vmem %s2472_s0, %s1826_s9  ;;  %vm2201_vm7 = vmor %vm479_vm5, %vm480_vm6  ;;  %v1899_v0 = vld [vmem:[%s2473_s1 + $0xb0] sm:$0xff]   ;;  %v1905_v14 = vld [vmem:[%s2473_s1 + $0x140] sm:$0xff]   ;;  %s1388_s9 = sld [smem:[#allocation2]] }
  0x14   : > { %1671 = vmatpush3.bf16.msra.mxu1 %v1875_v6  ;;  %1652 = vmatprep.subr.bf16.mxu0 %v1985_v1  ;;  %s2103_s28 = scalar_lea.vmem %s210_s16, %s1564_s23  ;;  %v1900_v2 = vld [vmem:[%s2473_s1 + $0xf0] sm:$0xff]   ;;  %v1907_v18 = vld [vmem:[%s2473_s1 + $0x148] sm:$0xff]   ;;  %s1484_s14 = sshll.u32 %s216_s13, 2 }
  0x15   : > { %1672 = vmatprep.subr.bf16.mxu1 %v1985_v1  ;;  %v224_v17 = vld [vmem:[%s2103_s28] sm:$0x77]  ;;  %v2115_v19 = vld [vmem:[%s2103_s28 + $0x10] sm:$0x77]  ;;  %v225_v5 = vld [vmem:[%s2103_s28 + $0x8] sm:$0x77]  ;;  %s218_s23 = scalar_lea.vmem %s2476_s4, %s1484_s14 }
  0x16   : > { %v253_v23 = vrot.slane %v224_v17, %v2117_v20  ;;  %v2129_v24 = vrot.slane %v2115_v19, %v2117_v20  ;;  %v376_v28 = vcombine.low %v224_v17, %v2115_v19  ;;  %v227_v6 = vld [vmem:[%s2103_s28 + $0x18] sm:$0x77]  ;;  %v2241_v15 = vrot.slane %v225_v5, %v2117_v20  ;;  %v1906_v17 = vld [vmem:[%s2473_s1 + $0x108] sm:$0xff]  }
  0x17   : > { %1653 = vmatpush3.bf16.msra.mxu0 %v1876_v7  ;;  %v642_v9 = vcombine.low %v225_v5, %v227_v6  ;;  %v1916_v5 = vld [vmem:[%s2473_s1 + $0x130] sm:$0xff]  }
  0x18   : > { %1673 = vmatpush3.bf16.msra.mxu1 %v1877_v8  ;;  %1654 = vmatprep.subr.bf16.mxu0 %v1985_v1  ;;  %v261_v25 = vrot.slane %v253_v23, 2  ;;  %v262_v26 = vrot.slane %v2129_v24, 2  ;;  %v383_v32 = vrot.slane %v376_v28, %v2117_v20  ;;  %v483_v37 = vshrl.u32 %v253_v23, 16  ;;  %v1901_v8 = vld [vmem:[%s2473_s1 + $0xb8] sm:$0xff]  }
  0x19   : > { %1674 = vmatprep.subr.bf16.mxu1 %v1985_v1  ;;  %v486_v38 = vshll.u32 %v253_v23, 16  ;;  %v497_v41 = vshrl.u32 %v2129_v24, 16  ;;  %v500_v42 = vshll.u32 %v2129_v24, 16  ;;  %v473_v46 = vcombine.high %v253_v23, %v253_v23  ;;  %v1908_v23 = vld [vmem:[%s2473_s1 + $0x110] sm:$0xff]  }
  0x1a   : > { %v279_v30 = vcombine.low %v261_v25, %v262_v26  ;;  %v485_v43 = vrot.slane %v483_v37, 6  ;;  %v474_v47 = vcombine.high %v2129_v24, %v2129_v24  ;;  %v649_v13 = vrot.slane %v642_v9, %v2117_v20  ;;  %v1911_v37 = vld [vmem:[%s2473_s1 + $0x158] sm:$0xff]  }
  0x1b   : > { %1655 = vmatpush3.bf16.msra.mxu0 %v1878_v10  ;;  %v488_v44 = vrot.slane %v486_v38, 7  ;;  %v499_v48 = vrot.slane %v497_v41, 6  ;;  %v502_v49 = vrot.slane %v500_v42, 7  ;;  %v492_v51 = vshll.u32 %v473_v46, 16  ;;  %v1902_v10 = vld [vmem:[%s2473_s1 + $0xf8] sm:$0xff]  }
  0x1c   : > { %1675 = vmatpush3.bf16.msra.mxu1 %v1879_v11  ;;  %1656 = vmatprep.subr.bf16.mxu0 %v1985_v1  ;;  %v286_v31 = vrot.slane %v279_v30, %v2117_v20  ;;  %v506_v55 = vshll.u32 %v474_v47, 16  ;;  %v876_v25 = vshll.u32 %v2241_v15, 16  ;;  %v870_v41 = vcombine.high %v2241_v15, %v2241_v15 }
  0x1d   : > { %1676 = vmatprep.subr.bf16.mxu1 %v1985_v1  ;;  %v489_v52 = vor.u32 %v488_v44, %v485_v43  ;;  %v503_v54 = vor.u32 %v502_v49, %v499_v48  ;;  %v494_v60 = vrot.slane %v492_v51, 7  ;;  %v1912_v48 = vld [vmem:[%s2473_s1 + $0x120] sm:$0xff]  }
  0x1e   : > { %v508_v62 = vrot.slane %v506_v55, 7  ;;  %v878_v38 = vrot.slane %v876_v25, 7  ;;  %v882_v49 = vshll.u32 %v870_v41, 16  ;;  %v1913_v51 = vld [vmem:[%s2473_s1 + $0x160] sm:$0xff]  }
  0x1f   : > { %1657 = vmatpush3.bf16.msra.mxu0 %v1880_v12  ;;  %v490_v59 = vrot.slane %v489_v52, 2  ;;  %v504_v61 = vrot.slane %v503_v54, 2  ;;  %v1903_v12 = vld [vmem:[%s2473_s1 + $0x100] sm:$0xff]  }
  0x20   : > { %1677 = vmatpush3.bf16.msra.mxu1 %v1881_v16  ;;  %1658 = vmatprep.subr.bf16.mxu0 %v1985_v1  ;;  %v2245_v16 = vrot.slane %v227_v6, %v2117_v20  ;;  %v1917_v6 = vld [vmem:[%s2473_s1 + $0x170] sm:$0xff]   ;;  %v1928_v25 = vld [vmem:[%s2473_s1 + $0x1a0] sm:$0xff]  }
  0x21   : > { %1678 = vmatprep.subr.bf16.mxu1 %v1985_v1  ;;  %v495_v3 = vsel %vm2201_vm7, %v490_v59, %v494_v60  ;;  %v2216_v4 = vsel %vm2201_vm7, %v504_v61, %v508_v62  ;;  %v1915_v59 = vld [vmem:[%s2473_s1 + $0x168] sm:$0xff]   ;;  %v884_v61 = vrot.slane %v882_v49, 7 }
  0x22   : > { %v526_v7 = vcombine.low %v495_v3, %v2216_v4  ;;  %v887_v30 = vshrl.u32 %v2245_v16, 16  ;;  %v871_v44 = vcombine.high %v2245_v16, %v2245_v16  ;;  %v754_v3 = vrot.slane %v2241_v15, 2 }
  0x23   : > { %1659 = vmatpush3.bf16.msra.mxu0 %v1882_v21  ;;  %v873_v21 = vshrl.u32 %v2241_v15, 16  ;;  %v1921_v15 = vld [vmem:[%s2473_s1 + $0x1c0] sm:$0xff]  }
  0x24   : > { %1679 = vmatpush3.bf16.msra.mxu1 %v1883_v22  ;;  %1660 = vmatprep.subr.bf16.mxu0 %v1985_v1  ;;  %v533_v11 = vrot.slane %v526_v7, %v2117_v20  ;;  %v228_v22 = vld [vmem:[%s2103_s28 + $0x20] sm:$0x77]  ;;  %v889_v42 = vrot.slane %v887_v30, 6  ;;  %v896_v54 = vshll.u32 %v871_v44, 16  ;;  %v1932_v30 = vld [vmem:[%s2473_s1 + $0x1b0] sm:$0xff]  }
  0x25   : > { %1680 = vmatprep.subr.bf16.mxu1 %v1985_v1  ;;  %v1135_v28 = vrot.slane %v228_v22, %v2117_v20 }
  0x27   : > { %1661 = vmatpush3.bf16.msra.mxu0 %v1884_v27  ;;  %v1031_v27 = vcombine.low %v2115_v19, %v228_v22  ;;  %v1910_v19 = vld [vmem:[%s2473_s1 + $0x118] sm:$0xff]  }
  0x28   : > { %1681 = vmatpush3.bf16.msra.mxu1 %v1885_v29  ;;  %1686 = vmatprep.subr.bf16.mxu0 %v1985_v1  ;;  %v1909_v29 = vld [vmem:[%s2473_s1 + $0x150] sm:$0xff]   ;;  %v1926_v22 = vld [vmem:[%s2473_s1 + $0x198] sm:$0xff]  }
  0x29   : > { %1706 = vmatprep.subr.bf16.mxu1 %v1985_v1 }
  0x2a   : > { %1663 = vmatmul.mubr.bf16.vlgmr.msra.gmra.mrb[0].mxu0 %v286_v31  ;;  %v890_v31 = vshll.u32 %v2245_v16, 16 }
  0x2b   : > { %1683 = vmatmul.mubr.bf16.vlgmr.msra.gmra.mrb[0].mxu1 %v383_v32  ;;  %1687 = vmatpush3.bf16.msra.mxu0 %v1887_v33  ;;  %v2274_v32 = vrot.slane %v1031_v27, %v2117_v20  ;;  %v1136_v33 = vrot.slane %v1135_v28, 2  ;;  %v1929_v27 = vld [vmem:[%s2473_s1 + $0x1e0] sm:$0xff]  }
  0x2c   : > { %1707 = vmatpush3.bf16.msra.mxu1 %v1888_v34  ;;  %1688 = vmatprep.subr.bf16.mxu0 %v1985_v1  ;;  %v875_v34 = vrot.slane %v873_v21, 6  ;;  %v1925_v21 = vld [vmem:[%s2473_s1 + $0x1d0] sm:$0xff]  }
  0x2d   : > { %1708 = vmatprep.subr.bf16.mxu1 %v1985_v1  ;;  %1702 = vmatprep.mubr.msk.bf16.mxu0 %vm1986_vm0, %v1985_v1 }
  0x2e   : > { %1722 = vmatprep.mubr.msk.bf16.mxu1 %vm1986_vm0, %v1985_v1  ;;  %v879_v52 = vor.u32 %v878_v38, %v875_v34  ;;  %v1937_v34 = vld [vmem:[%s2473_s1 + $0x200] sm:$0xff]   ;;  %v1943_v38 = vld [vmem:[%s2473_s1 + $0x230] sm:$0xff]  }
  0x2f   : > { %1689 = vmatpush3.bf16.msra.mxu0 %v1889_v35  ;;  %v1251_v35 = vcombine.high %v1135_v28, %v1135_v28 }
  0x30   : > { %1709 = vmatpush3.bf16.msra.mxu1 %v1890_v36  ;;  %1690 = vmatprep.subr.bf16.mxu0 %v1985_v1  ;;  %v1253_v36 = vshrl.u32 %v1135_v28, 16  ;;  %v880_v60 = vrot.slane %v879_v52, 2 }
  0x31   : > { %1710 = vmatprep.subr.bf16.mxu1 %v1985_v1 }
  0x32   : > { %v1255_v43 = vrot.slane %v1253_v36, 6  ;;  %v885_v7 = vsel %vm2201_vm7, %v880_v60, %v884_v61  ;;  %v1939_v36 = vld [vmem:[%s2473_s1 + $0x210] sm:$0xff]  }
  0x33   : > { %1691 = vmatpush3.bf16.msra.mxu0 %v1891_v39  ;;  %v2285_v39 = vcombine.low %v262_v26, %v1136_v33  ;;  %v1262_v26 = vshll.u32 %v1251_v35, 16  ;;  %v1934_v33 = vld [vmem:[%s2473_s1 + $0x1b8] sm:$0xff]   ;;  %v1938_v35 = vld [vmem:[%s2473_s1 + $0x208] sm:$0xff]  }
  0x34   : > { %1711 = vmatpush3.bf16.msra.mxu1 %v1892_v40  ;;  %1692 = vmatprep.subr.bf16.mxu0 %v1985_v1  ;;  %v1256_v40 = vshll.u32 %v1135_v28, 16  ;;  %v1930_v28 = vld [vmem:[%s2473_s1 + $0x1a8] sm:$0xff]  }
  0x35   : > { %1712 = vmatprep.subr.bf16.mxu1 %v1985_v1  ;;  %v1160_v46 = vrot.slane %v2285_v39, %v2117_v20  ;;  %v1944_v39 = vld [vmem:[%s2473_s1 + $0x238] sm:$0xff]  }
  0x36   : > { %v1258_v24 = vrot.slane %v1256_v40, 7 }
  0x37   : > { %1693 = vmatpush3.bf16.msra.mxu0 %v1893_v45  ;;  %v892_v45 = vrot.slane %v890_v31, 7  ;;  %v1933_v31 = vld [vmem:[%s2473_s1 + $0x1f0] sm:$0xff]  }
  0x38   : > { %1713 = vmatpush3.bf16.msra.mxu1 %v1894_v50  ;;  %1694 = vmatprep.subr.bf16.mxu0 %v1985_v1  ;;  %v1259_v47 = vor.u32 %v1258_v24, %v1255_v43  ;;  %v1264_v50 = vrot.slane %v1262_v26, 7 }
  0x39   : > { %1714 = vmatprep.subr.bf16.mxu1 %v1985_v1 }
  0x3a   : > { %v1260_v55 = vrot.slane %v1259_v47, 2 }
  0x3b   : > { %1695 = vmatpush3.bf16.msra.mxu0 %v1895_v53  ;;  %v893_v53 = vor.u32 %v892_v45, %v889_v42 }
  0x3c   : > { %1715 = vmatpush3.bf16.msra.mxu1 %v1896_v56  ;;  %1696 = vmatprep.subr.bf16.mxu0 %v1985_v1  ;;  %v1265_v56 = vsel %vm2201_vm7, %v1260_v55, %v1264_v50 }
  0x3d   : > { %1716 = vmatprep.subr.bf16.mxu1 %v1985_v1  ;;  %v894_v62 = vrot.slane %v893_v53, 2 }
  0x3f   : > { %1697 = vmatpush3.bf16.msra.mxu0 %v1897_v57  ;;  %v1914_v57 = vld [vmem:[%s2473_s1 + $0x128] sm:$0xff]  }
  0x40   : > { %1717 = vmatpush3.bf16.msra.mxu1 %v1898_v58  ;;  %1698 = vmatprep.subr.bf16.mxu0 %v1985_v1  ;;  %v1282_v58 = vcombine.low %v2216_v4, %v1265_v56  ;;  %v755_v4 = vrot.slane %v2245_v16, 2  ;;  %v1922_v16 = vld [vmem:[%s2473_s1 + $0x188] sm:$0xff]  }
  0x41   : > { %1718 = vmatprep.subr.bf16.mxu1 %v1985_v1 }
  0x42   : > { %v772_v9 = vcombine.low %v754_v3, %v755_v4 }
  0x43   : > { %1699 = vmatpush3.bf16.msra.mxu0 %v1899_v0  ;;  %v898_v0 = vrot.slane %v896_v54, 7 }
  0x44   : > { %1719 = vmatpush3.bf16.msra.mxu1 %v1900_v2  ;;  %1700 = vmatprep.subr.bf16.mxu0 %v1985_v1  ;;  %v2315_v2 = vrot.slane %v1282_v58, %v2117_v20  ;;  %v779_v63 = vrot.slane %v772_v9, %v2117_v20 }
  0x45   : > { %1720 = vmatprep.subr.bf16.mxu1 %v1985_v1 }
  0x47   : > { %1701 = vmatpush3.bf16.msra.mxu0 %v1901_v8  ;;  %v899_v8 = vsel %vm2201_vm7, %v894_v62, %v898_v0 }
  0x48   : > { %1721 = vmatpush3.bf16.msra.mxu1 %v1902_v10  ;;  %1726 = vmatprep.subr.bf16.mxu0 %v1985_v1  ;;  %v1918_v10 = vld [vmem:[%s2473_s1 + $0x138] sm:$0xff]  }
  0x49   : > { %1746 = vmatprep.subr.bf16.mxu1 %v1985_v1 }
  0x4a   : > { %1703 = vmatmul.mubr.bf16.vlgmr.msra.gmra.mrb[4].mxu0 %v533_v11  ;;  %v916_v11 = vcombine.low %v885_v7, %v899_v8 }
  0x4b   : > { %1727 = vmatpush3.bf16.msra.mxu0 %v1903_v12  ;;  %1723 = vmatmul.mubr.bf16.vlgmr.msra.gmra.mrb[4].mxu1 %v649_v13  ;;  %v1919_v12 = vld [vmem:[%s2473_s1 + $0x178] sm:$0xff]   ;;  %v1920_v13 = vld [vmem:[%s2473_s1 + $0x180] sm:$0xff]  }
  0x4c   : > { %1747 = vmatpush3.bf16.msra.mxu1 %v1905_v14  ;;  %1728 = vmatprep.subr.bf16.mxu0 %v1985_v1  ;;  %v923_v14 = vrot.slane %v916_v11, %v2117_v20  ;;  %v1940_v20 = vld [vmem:[%s2473_s1 + $0x218] sm:$0xff]  }
  0x4d   : > { %1748 = vmatprep.subr.bf16.mxu1 %v1985_v1  ;;  %1742 = vmatprep.mubr.msk.bf16.mxu0 %vm1986_vm0, %v1985_v1 }
  0x4e   : > { %1762 = vmatprep.mubr.msk.bf16.mxu1 %vm1986_vm0, %v1985_v1 }
  0x4f   : > { %1729 = vmatpush3.bf16.msra.mxu0 %v1906_v17  ;;  %v1923_v17 = vld [vmem:[%s2473_s1 + $0x1c8] sm:$0xff]  }
  0x50   : > { %1749 = vmatpush3.bf16.msra.mxu1 %v1907_v18  ;;  %1730 = vmatprep.subr.bf16.mxu0 %v1985_v1  ;;  %v1924_v18 = vld [vmem:[%s2473_s1 + $0x190] sm:$0xff]  }
  0x51   : > { %1750 = vmatprep.subr.bf16.mxu1 %v1985_v1 }
  0x53   : > { %1731 = vmatpush3.bf16.msra.mxu0 %v1908_v23  ;;  %v1927_v23 = vld [vmem:[%s2473_s1 + $0x1d8] sm:$0xff]  }
  0x54   : > { %1751 = vmatpush3.bf16.msra.mxu1 %v1909_v29  ;;  %1732 = vmatprep.subr.bf16.mxu0 %v1985_v1  ;;  %v1931_v29 = vld [vmem:[%s2473_s1 + $0x1e8] sm:$0xff]  }
  0x55   : > { %1752 = vmatprep.subr.bf16.mxu1 %v1985_v1 }
  0x57   : > { %1733 = vmatpush3.bf16.msra.mxu0 %v1910_v19  ;;  %v1935_v19 = vld [vmem:[%s2473_s1 + $0x1f8] sm:$0xff]  }
  0x58   : > { %1753 = vmatpush3.bf16.msra.mxu1 %v1911_v37  ;;  %1734 = vmatprep.subr.bf16.mxu0 %v1985_v1  ;;  %v1942_v37 = vld [vmem:[%s2473_s1 + $0x228] sm:$0xff]  }
  0x59   : > { %1754 = vmatprep.subr.bf16.mxu1 %v1985_v1 }
  0x5b   : > { %1735 = vmatpush3.bf16.msra.mxu0 %v1912_v48 }
  0x5c   : > { %1755 = vmatpush3.bf16.msra.mxu1 %v1913_v51  ;;  %1736 = vmatprep.subr.bf16.mxu0 %v1985_v1 }
  0x5d   : > { %1756 = vmatprep.subr.bf16.mxu1 %v1985_v1 }
  0x5f   : > { %1737 = vmatpush3.bf16.msra.mxu0 %v1914_v57 }
  0x60   : > { %1757 = vmatpush3.bf16.msra.mxu1 %v1915_v59  ;;  %1738 = vmatprep.subr.bf16.mxu0 %v1985_v1 }
  0x61   : > { %1758 = vmatprep.subr.bf16.mxu1 %v1985_v1 }
  0x63   : > { %1739 = vmatpush3.bf16.msra.mxu0 %v1916_v5 }
  0x64   : > { %1759 = vmatpush3.bf16.msra.mxu1 %v1917_v6  ;;  %1740 = vmatprep.subr.bf16.mxu0 %v1985_v1 }
  0x65   : > { %1760 = vmatprep.subr.bf16.mxu1 %v1985_v1 }
  0x67   : > { %1741 = vmatpush3.bf16.msra.mxu0 %v1918_v10 }
  0x68   : > { %1761 = vmatpush3.bf16.msra.mxu1 %v1919_v12  ;;  %1766 = vmatprep.subr.bf16.mxu0 %v1985_v1 }
  0x69   : > { %1786 = vmatprep.subr.bf16.mxu1 %v1985_v1 }
  0x6a   : > { %1743 = vmatmul.mubr.bf16.vlgmr.msra.gmra.mrb[8].mxu0 %v779_v63 }
  0x6b   : > { %1767 = vmatpush3.bf16.msra.mxu0 %v1920_v13  ;;  %1763 = vmatmul.mubr.bf16.vlgmr.msra.gmra.mrb[8].mxu1 %v923_v14  ;;  %v1560_v14 = vld [vmem:[%s2474_s2] ss:$0 sm:$0xff] }
  0x6c   : > { %1787 = vmatpush3.bf16.msra.mxu1 %v1921_v15  ;;  %1768 = vmatprep.subr.bf16.mxu0 %v1985_v1 }
  0x6d   : > { %1788 = vmatprep.subr.bf16.mxu1 %v1985_v1  ;;  %1782 = vmatprep.mubr.msk.bf16.mxu0 %vm1986_vm0, %v1985_v1 }
  0x6e   : > { %1802 = vmatprep.mubr.msk.bf16.mxu1 %vm1986_vm0, %v1985_v1 }
  0x6f   : > { %1769 = vmatpush3.bf16.msra.mxu0 %v1922_v16 }
  0x70   : > { %1789 = vmatpush3.bf16.msra.mxu1 %v1923_v17  ;;  %1770 = vmatprep.subr.bf16.mxu0 %v1985_v1  ;;  %v1390_v17 = vstv %s1388_s9 }
  0x71   : > { %1790 = vmatprep.subr.bf16.mxu1 %v1985_v1 }
  0x73   : > { %1771 = vmatpush3.bf16.msra.mxu0 %v1924_v18 }
  0x74   : > { %1791 = vmatpush3.bf16.msra.mxu1 %v1925_v21  ;;  %1772 = vmatprep.subr.bf16.mxu0 %v1985_v1 }
  0x75   : > { %1792 = vmatprep.subr.bf16.mxu1 %v1985_v1 }
  0x77   : > { %1773 = vmatpush3.bf16.msra.mxu0 %v1926_v22 }
  0x78   : > { %1793 = vmatpush3.bf16.msra.mxu1 %v1927_v23  ;;  %1774 = vmatprep.subr.bf16.mxu0 %v1985_v1 }
  0x79   : > { %1794 = vmatprep.subr.bf16.mxu1 %v1985_v1 }
  0x7b   : > { %1775 = vmatpush3.bf16.msra.mxu0 %v1928_v25 }
  0x7c   : > { %1795 = vmatpush3.bf16.msra.mxu1 %v1929_v27  ;;  %1776 = vmatprep.subr.bf16.mxu0 %v1985_v1 }
  0x7d   : > { %1796 = vmatprep.subr.bf16.mxu1 %v1985_v1 }
  0x7f   : > { %1777 = vmatpush3.bf16.msra.mxu0 %v1930_v28 }
  0x80   : > { %1797 = vmatpush3.bf16.msra.mxu1 %v1931_v29  ;;  %1778 = vmatprep.subr.bf16.mxu0 %v1985_v1 }
  0x81   : > { %1798 = vmatprep.subr.bf16.mxu1 %v1985_v1 }
  0x83   : > { %1779 = vmatpush3.bf16.msra.mxu0 %v1932_v30 }
  0x84   : > { %1799 = vmatpush3.bf16.msra.mxu1 %v1933_v31  ;;  %1780 = vmatprep.subr.bf16.mxu0 %v1985_v1 }
  0x85   : > { %1800 = vmatprep.subr.bf16.mxu1 %v1985_v1 }
  0x87   : > { %1781 = vmatpush3.bf16.msra.mxu0 %v1934_v33 }
  0x88   : > { %1801 = vmatpush3.bf16.msra.mxu1 %v1935_v19  ;;  %1806 = vmatprep.subr.bf16.mxu0 %v1985_v1 }
  0x8a   : > { %1783 = vmatmul.mubr.bf16.vlgmr.msra.gmra.mrb[12].mxu0 %v2274_v32  ;;  %v1941_v32 = vld [vmem:[%s2473_s1 + $0x220] sm:$0xff]  }
  0x8b   : > { %1807 = vmatpush3.bf16.msra.mxu0 %v1937_v34  ;;  %1803 = vmatmul.mubr.bf16.vlgmr.msra.gmra.mrb[12].mxu1 %v1160_v46 }
  0x8c   : > { %1808 = vmatprep.subr.bf16.mxu0 %v1985_v1  ;;  %1822 = vmatprep.mubr.msk.bf16.mxu0 %vm1986_vm0, %v1985_v1 }
  0x8f   : > { %1809 = vmatpush3.bf16.msra.mxu0 %v1938_v35 }
  0x90   : > { %1810 = vmatprep.subr.bf16.mxu0 %v1985_v1 }
  0x93   : > { %1811 = vmatpush3.bf16.msra.mxu0 %v1939_v36 }
  0x94   : > { %1812 = vmatprep.subr.bf16.mxu0 %v1985_v1 }
  0x97   : > { %1813 = vmatpush3.bf16.msra.mxu0 %v1940_v20 }
  0x98   : > { %1814 = vmatprep.subr.bf16.mxu0 %v1985_v1 }
  0x9b   : > { %1815 = vmatpush3.bf16.msra.mxu0 %v1941_v32 }
  0x9c   : > { %1816 = vmatprep.subr.bf16.mxu0 %v1985_v1 }
  0x9f   : > { %1817 = vmatpush3.bf16.msra.mxu0 %v1942_v37 }
  0xa0   : > { %1818 = vmatprep.subr.bf16.mxu0 %v1985_v1 }
  0xa3   : > { %1819 = vmatpush3.bf16.msra.mxu0 %v1943_v38 }
  0xa4   : > { %1820 = vmatprep.subr.bf16.mxu0 %v1985_v1 }
  0xa7   : > { %1821 = vmatpush3.bf16.msra.mxu0 %v1944_v39 }
  0xaa   : > { %1823 = vmatmul.mubr.bf16.vlgmr.msra.gmra.mrb[16].mxu0 %v2315_v2 }
  0xfd   : > { %v370_v40 = vpop.f32.mrb[0].mxu0 }
  0xfe   : > { %v1664_v41 = vpop.f32.mrb[1].mxu0  ;;  %v467_v42 = vpop.f32.mrb[0].mxu1 }
  0xff   : > { %v468_v43 = vadd.f32 %v467_v42, %v370_v40  ;;  %v373_v44 = vpop.f32.mrb[2].mxu0  ;;  %v1684_v45 = vpop.f32.mrb[1].mxu1 }
 0x100   : > { %v1665_v46 = vpop.f32.mrb[3].mxu0  ;;  %v470_v24 = vpop.f32.mrb[2].mxu1 }
 0x101   : > { %v1685_v26 = vpop.f32.mrb[3].mxu1 }
 0x11d   : > { %v617_v47 = vpop.f32.mrb[4].mxu0 }
 0x11e   : > { %v623_v48 = vadd.f32 %v617_v47, %v468_v43  ;;  %v1704_v49 = vpop.f32.mrb[5].mxu0  ;;  %v733_v50 = vpop.f32.mrb[4].mxu1 }
 0x11f   : > { %v620_v51 = vpop.f32.mrb[6].mxu0  ;;  %v1724_v52 = vpop.f32.mrb[5].mxu1 }
 0x120   : > { %v739_v53 = vadd.f32 %v733_v50, %v623_v48  ;;  %v1705_v1 = vpop.f32.mrb[7].mxu0  ;;  %v736_v54 = vpop.f32.mrb[6].mxu1 }
 0x121   : > { %v1725_v55 = vpop.f32.mrb[7].mxu1 }
 0x13d   : > { %v863_v56 = vpop.f32.mrb[8].mxu0 }
 0x13e   : > { %v869_v57 = vadd.f32 %v863_v56, %v739_v53  ;;  %v1744_v58 = vpop.f32.mrb[9].mxu0  ;;  %v1007_v59 = vpop.f32.mrb[8].mxu1 }
 0x13f   : > { %v866_v60 = vpop.f32.mrb[10].mxu0  ;;  %v1764_v61 = vpop.f32.mrb[9].mxu1 }
 0x140   : > { %v1013_v62 = vadd.f32 %v1007_v59, %v869_v57  ;;  %v1745_v0 = vpop.f32.mrb[11].mxu0  ;;  %v1010_v2 = vpop.f32.mrb[10].mxu1 }
 0x141   : > { %v1765_v3 = vpop.f32.mrb[11].mxu1 }
 0x15d   : > { %v1122_v4 = vpop.f32.mrb[12].mxu0 }
 0x15e   : > { %v1128_v5 = vadd.f32 %v1122_v4, %v1013_v62  ;;  %v1784_v6 = vpop.f32.mrb[13].mxu0  ;;  %v1244_v7 = vpop.f32.mrb[12].mxu1 }
 0x15f   : > { %v1125_v8 = vpop.f32.mrb[14].mxu0  ;;  %v1804_v9 = vpop.f32.mrb[13].mxu1 }
 0x160   : > { %v1250_v10 = vadd.f32 %v1244_v7, %v1128_v5  ;;  %v1785_v11 = vpop.f32.mrb[15].mxu0  ;;  %v1247_v12 = vpop.f32.mrb[14].mxu1 }
 0x161   : > { %v1805_v63 = vpop.f32.mrb[15].mxu1 }
 0x17d   : > { %v1373_v13 = vpop.f32.mrb[16].mxu0 }
 0x17e   : > { %v1379_v15 = vadd.f32 %v1373_v13, %v1250_v10  ;;  %v1824_v16 = vpop.f32.mrb[17].mxu0 }
 0x17f   : > { %v1376_v18 = vpop.f32.mrb[18].mxu0 }
 0x180   : > { %v1387_v21 = vadd.f32 %v1560_v14, %v1379_v15  ;;  %v1825_v22 = vpop.f32.mrb[19].mxu0 }
 0x182   : > { %vm1389_vm8 = vcmp.ge.f32.partialorder %v1387_v21, 0.0  ;;  %v1391_v23 = vmul.f32 %v1390_v17, %v1387_v21 }
 0x184   : > { %v1392_v25 = vsel %vm1389_vm8, %v1387_v21, %v1391_v23 }
 0x185   : > { %v1393_v27 = vpack.c.bf16 %v1392_v25, %v1392_v25 }
 0x187   : > { %1394 = vst [vmem:[%s218_s23] sm:$0xf] %v1393_v27 }
 0x188 PF: > { %s15_s21 = sadd.s32 1, %s1983_s21   ;;  %s2479_s17 = smov %s1975_s19 }
 0x189   : > { %p12_p7 = scmp.ge.s32.totalorder %s15_s21, 6   ;;  %s2480_s18 = smov %s1979_s20 }
 0x18a   : > { %s2481_s19 = smov %s2484_s3  ;;  %s2482_s20 = smov %s2488_s22 }
 0x18b   :  { %14 = sbr.rel (!%p12_p7) target bundleno = 3 (0x3), region = 67 }

// kernel: didn_forward.38
= control target key start
LH: loop header
LB: loop body
LE: loop exit
PB: predicated region body
PF: predicated region fallthrough
CT: control target
= control target key end

     0   :  { %s2097_s20 = smov 0   ;;  %s2099_s21 = smov 0   ;;  %s2598_s0 = inlined_call_operand.vmem [shape: bf16[2,6,6,128], index: 0, kind: input, shape index: {}]   ;;  %s2599_s1 = inlined_call_operand.vmem [shape: bf16[1152,128], index: 1, kind: input, shape index: {}]   ;;  %s2600_s2 = inlined_call_operand.vmem [shape: f32[1,128], index: 2, kind: input, shape index: {}]   ;;  %s2601_s3 = inlined_call_operand.<no memory space> [shape: f32[1,1], index: 3, kind: input, shape index: {}]   ;;  %s2602_s4 = inlined_call_operand.vmem [shape: bf16[2,16,128], index: 4, kind: input, shape index: {}]   ;;  %s2603_s5 = inlined_call_operand.vmem [shape: bf16[2,16,128], index: 5, kind: output, shape index: {}]  }
   0x1   :  { %10 = sst [smem:[#allocation2]] %s2601_s3  ;;  %s2101_s22 = smov 0  }
   0x2   :  { %s2103_s23 = smov 0   ;;  %s2105_s24 = smov 0  }
   0x3 LB: > { %s25_s3 = sadd.s32 1, %s2051_s22  ;;  %s28_s25 = sadd.s32 1, %s2055_s23  ;;  %s2059_s24 = sphi %s2105_s24, %s16_s24   ;;  %s2055_s23 = sphi %s2103_s23, %s2615_s23   ;;  %s2051_s22 = sphi %s2101_s22, %s2614_s22   ;;  %s2047_s21 = sphi %s2099_s21, %s2613_s21   ;;  %s2043_s20 = sphi %s2097_s20, %s2612_s20  }
   0x4   : > { %p26_p0 = scmp.ge.s32.totalorder %s25_s3, 2  ;;  %p1553_p1 = scmp.ge.s32.totalorder %s2059_s24, 1 }
   0x5   : > { %p217_p2 = scmp.lt.s32.totalorder %s2059_s24, 5 }
   0x6   : > { %s2617_s3 = smov (%p26_p0, %s25_s3), 0  ;;  %s2619_s25 = smov (!%p26_p0, %s28_s25), %s2055_s23 }
   0x7   : > { %p218_p3 = pnand %p1553_p1, %p217_p2  ;;  %p30_p4 = scmp.ge.s32.totalorder %s2619_s25, 2 }
   0x8   : > { %v1946_v0 = vld [vmem:[%s2599_s1 + $0x40] sm:$0xff] (!%p218_p3)   ;;  %v2061_v1 = vmov (!%p218_p3), 0.0   ;;  %v1948_v3 = vld [vmem:[%s2599_s1 + $0x48] sm:$0xff] (!%p218_p3)   ;;  %vm2062_vm0 = vmmov (!%p218_p3), 0   ;;  %p256_p5 = scmp.lt.s32.totalorder (!%p218_p3), %s2047_s21, 1  ;;  %v1950_v5 = vld [vmem:[%s2599_s1 + $0x50] sm:$0xff] (!%p218_p3)   ;;  %v306_v10 = vlaneseq (!%p218_p3) }
   0x9   : > { %s2621_s25 = smov (%p30_p4, %s2619_s25), 0  ;;  %221 = sbr.rel (%p218_p3) target bundleno = 394 (0x18a), region = 40 }
   0xa   : > { %1722 = vmatprep.subr.bf16.mxu0 (!%p218_p3), %v2061_v1  ;;  %1742 = vmatprep.subr.bf16.mxu1 (!%p218_p3), %v2061_v1  ;;  %v1947_v2 = vld [vmem:[%s2599_s1] sm:$0xff] (!%p218_p3)   ;;  %v1949_v4 = vld [vmem:[%s2599_s1 + $0x8] sm:$0xff] (!%p218_p3)   ;;  %v1951_v6 = vld [vmem:[%s2599_s1 + $0x10] sm:$0xff] (!%p218_p3)   ;;  %s1640_s27 = sshll.u32 (!%p218_p3), %s2043_s20, 3  ;;  %v2063_v13 = vmov (!%p218_p3), 1983009808  }
   0xb   : > { %1723 = vmatpush3.bf16.msra.mxu0 (!%p218_p3), %v1946_v0  ;;  %1738 = vmatprep.mubr.msk.bf16.mxu0 (!%p218_p3), %vm2062_vm0, %v2061_v1  ;;  %v1952_v7 = vld [vmem:[%s2599_s1 + $0x58] sm:$0xff] (!%p218_p3)   ;;  %v1954_v9 = vld [vmem:[%s2599_s1 + $0x60] sm:$0xff] (!%p218_p3)   ;;  %v1956_v12 = vld [vmem:[%s2599_s1 + $0x68] sm:$0xff] (!%p218_p3)   ;;  %v304_v14 = vunpack.c.l.s4 (!%p218_p3), %v2063_v13  ;;  %v307_v15 = vshrl.u32 (!%p218_p3), %v306_v10, 7  ;;  %vm319_vm1 = vsmask.f32 (!%p218_p3), 1280 }
   0xc   : > { %1743 = vmatpush3.bf16.msra.mxu1 (!%p218_p3), %v1947_v2  ;;  %1724 = vmatprep.subr.bf16.mxu0 (!%p218_p3), %v2061_v1  ;;  %v1953_v8 = vld [vmem:[%s2599_s1 + $0x18] sm:$0xff] (!%p218_p3)   ;;  %v1955_v11 = vld [vmem:[%s2599_s1 + $0x20] sm:$0xff] (!%p218_p3)   ;;  %v1957_v16 = vld [vmem:[%s2599_s1 + $0x28] sm:$0xff] (!%p218_p3)   ;;  %vm320_vm2 = vsmask.f32 (!%p218_p3), 3336  ;;  %vm564_vm8 = vcmask (!%p218_p3), 1040384  }
   0xd   : > { %1744 = vmatprep.subr.bf16.mxu1 (!%p218_p3), %v2061_v1  ;;  %1758 = vmatprep.mubr.msk.bf16.mxu1 (!%p218_p3), %vm2062_vm0, %v2061_v1  ;;  %v1958_v18 = vld [vmem:[%s2599_s1 + $0x70] sm:$0xff] (!%p218_p3)   ;;  %v305_v20 = vunpack.c.0.s8 (!%p218_p3), %v304_v14  ;;  %vm322_vm3 = vsmask.f32 (!%p218_p3), 5392  ;;  %vm2222_vm4 = vmor (!%p218_p3), %vm319_vm1, %vm320_vm2  ;;  %vm324_vm5 = vsmask.f32 (!%p218_p3), 7448  ;;  %v1960_v29 = vld [vmem:[%s2599_s1 + $0x78] sm:$0xff] (!%p218_p3)  }
   0xe   : > { %v1959_v21 = vld [vmem:[%s2599_s1 + $0x30] sm:$0xff] (!%p218_p3)   ;;  %v1961_v34 = vld [vmem:[%s2599_s1 + $0x38] sm:$0xff] (!%p218_p3)   ;;  %vm2255_vm6 = vmor (!%p218_p3), %vm2222_vm4, %vm322_vm3  ;;  %vm565_vm9 = vcmask (!%p218_p3), 1042434   ;;  %vm567_vm11 = vcmask (!%p218_p3), 1044484   ;;  %vm569_vm13 = vcmask (!%p218_p3), 1046534   ;;  %p263_p6 = scmp.lt.s32.totalorder (!%p218_p3), %s2043_s20, 1 }
   0xf   : > { %1725 = vmatpush3.bf16.msra.mxu0 (!%p218_p3), %v1948_v3  ;;  %v2204_v22 = vsub.s32 (!%p218_p3), %v305_v20, %v307_v15  ;;  %v1964_v52 = vld [vmem:[%s2599_s1 + $0xc0] sm:$0xff] (!%p218_p3)   ;;  %vm2270_vm7 = vmor (!%p218_p3), %vm2255_vm6, %vm324_vm5  ;;  %v1966_v0 = vld [vmem:[%s2599_s1 + $0xc8] sm:$0xff] (!%p218_p3)   ;;  %s1439_s28 = sld [smem:[#allocation2]] (!%p218_p3) }
  0x10   : > { %s2623_s21 = smov (!%p256_p5, %s2047_s21), 1  ;;  %1745 = vmatpush3.bf16.msra.mxu1 %v1949_v4  ;;  %1726 = vmatprep.subr.bf16.mxu0 %v2061_v1  ;;  %v1963_v4 = vld [vmem:[%s2599_s1 + $0x80] sm:$0xff]   ;;  %v1970_v10 = vld [vmem:[%s2599_s1 + $0xd8] sm:$0xff]   ;;  %vm566_vm10 = vmor %vm564_vm8, %vm565_vm9  ;;  %s2625_s20 = smov (!%p263_p6, %s2043_s20), 1 }
  0x11   : > { %1746 = vmatprep.subr.bf16.mxu1 %v2061_v1  ;;  %s1902_s13 = smul.u32 24, %s2623_s21  ;;  %v1969_v13 = vld [vmem:[%s2599_s1 + $0x98] sm:$0xff]   ;;  %v1974_v14 = vld [vmem:[%s2599_s1 + $0xe8] sm:$0xff]   ;;  %v1971_v15 = vld [vmem:[%s2599_s1 + $0xa0] sm:$0xff]  }
  0x12   : > { %vm568_vm12 = vmor %vm566_vm10, %vm567_vm11 }
  0x13   : > { %1727 = vmatpush3.bf16.msra.mxu0 %v1950_v5  ;;  %s260_s26 = scalar_lea.vmem %s2598_s0, %s1902_s13  ;;  %vm2344_vm14 = vmor %vm568_vm12, %vm569_vm13 }
  0x14   : > { %1747 = vmatpush3.bf16.msra.mxu1 %v1951_v6  ;;  %1728 = vmatprep.subr.bf16.mxu0 %v2061_v1  ;;  %s2184_s7 = scalar_lea.vmem %s260_s26, %s1640_s27  ;;  %s1555_s26 = sshll.u32 %s2623_s21, 1 }
  0x15   : > { %1748 = vmatprep.subr.bf16.mxu1 %v2061_v1  ;;  %v281_v17 = vld [vmem:[%s2184_s7] sm:$0x7]  ;;  %v2199_v19 = vld [vmem:[%s2184_s7 + $0x4] sm:$0x7]  ;;  %v2208_v23 = vld [vmem:[%s2184_s7 + $0x8] sm:$0x7]  ;;  %s266_s27 = sadd.s32 %s1555_s26, %s2625_s20 }
  0x16   : > { %v2212_v24 = vrot.slane %v281_v17, %v2204_v22  ;;  %v2216_v25 = vrot.slane %v2199_v19, %v2204_v22  ;;  %v2220_v26 = vrot.slane %v2208_v23, %v2204_v22  ;;  %v467_v28 = vcombine.low %v281_v17, %v2199_v19  ;;  %v1976_v17 = vld [vmem:[%s2599_s1 + $0xf0] sm:$0xff]   ;;  %v284_v39 = vld [vmem:[%s2184_s7 + $0xc] sm:$0x7]  ;;  %s1556_s29 = sshll.u32 %s266_s27, 2 }
  0x17   : > { %1729 = vmatpush3.bf16.msra.mxu0 %v1952_v7  ;;  %v1968_v7 = vld [vmem:[%s2599_s1 + $0xd0] sm:$0xff]   ;;  %s268_s7 = scalar_lea.vmem %s2602_s4, %s1556_s29  ;;  %s276_s10 = scalar_lea.vmem %s2603_s5, %s1556_s29 }
  0x18   : > { %1749 = vmatpush3.bf16.msra.mxu1 %v1953_v8  ;;  %1730 = vmatprep.subr.bf16.mxu0 %v2061_v1  ;;  %v2232_v30 = vcombine.high %v2212_v24, %v2212_v24  ;;  %v2236_v31 = vcombine.high %v2216_v25, %v2216_v25  ;;  %v327_v32 = vshrl.u32 %v2212_v24, 16  ;;  %v330_v33 = vshll.u32 %v2212_v24, 16 }
  0x19   : > { %1750 = vmatprep.subr.bf16.mxu1 %v2061_v1  ;;  %v341_v35 = vshrl.u32 %v2216_v25, 16  ;;  %v344_v36 = vshll.u32 %v2216_v25, 16  ;;  %v2248_v37 = vcombine.high %v2220_v26, %v2220_v26  ;;  %v817_v38 = vshrl.u32 %v2220_v26, 16 }
  0x1a   : > { %v329_v40 = vrot.slane %v327_v32, 6  ;;  %v332_v41 = vrot.slane %v330_v33, 7  ;;  %v336_v42 = vshll.u32 %v2232_v30, 16  ;;  %v350_v43 = vshll.u32 %v2236_v31, 16  ;;  %v1981_v32 = vld [vmem:[%s2599_s1 + $0x140] sm:$0xff]  }
  0x1b   : > { %1731 = vmatpush3.bf16.msra.mxu0 %v1954_v9  ;;  %v343_v44 = vrot.slane %v341_v35, 6  ;;  %v346_v45 = vrot.slane %v344_v36, 7  ;;  %v819_v46 = vrot.slane %v817_v38, 6  ;;  %v820_v47 = vshll.u32 %v2220_v26, 16  ;;  %v1965_v9 = vld [vmem:[%s2599_s1 + $0x88] sm:$0xff]   ;;  %v1979_v38 = vld [vmem:[%s2599_s1 + $0x100] sm:$0xff]  }
  0x1c   : > { %1751 = vmatpush3.bf16.msra.mxu1 %v1955_v11  ;;  %1732 = vmatprep.subr.bf16.mxu0 %v2061_v1  ;;  %v333_v48 = vor.u32 %v332_v41, %v329_v40  ;;  %v338_v49 = vrot.slane %v336_v42, 7  ;;  %v826_v50 = vshll.u32 %v2248_v37, 16  ;;  %v474_v51 = vrot.slane %v467_v28, %v2204_v22  ;;  %v1967_v11 = vld [vmem:[%s2599_s1 + $0x90] sm:$0xff]   ;;  %v1983_v35 = vld [vmem:[%s2599_s1 + $0x148] sm:$0xff]   ;;  %v2004_v28 = vld [vmem:[%s2599_s1 + $0x1a0] sm:$0xff]  }
  0x1d   : > { %1752 = vmatprep.subr.bf16.mxu1 %v2061_v1  ;;  %v347_v54 = vor.u32 %v346_v45, %v343_v44  ;;  %v352_v55 = vrot.slane %v350_v43, 7  ;;  %v822_v56 = vrot.slane %v820_v47, 7  ;;  %v573_v20 = vrot.slane %v2232_v30, 7  ;;  %v1982_v42 = vld [vmem:[%s2599_s1 + $0x108] sm:$0xff]   ;;  %v1985_v43 = vld [vmem:[%s2599_s1 + $0x150] sm:$0xff]  }
  0x1e   : > { %v334_v57 = vrot.slane %v333_v48, 2  ;;  %v828_v60 = vrot.slane %v826_v50, 7  ;;  %v577_v27 = vrot.slane %v2236_v31, 7  ;;  %v1079_v40 = vcombine.low %v2208_v23, %v284_v39 }
  0x1f   : > { %1733 = vmatpush3.bf16.msra.mxu0 %v1956_v12  ;;  %v348_v58 = vrot.slane %v347_v54, 2  ;;  %v823_v59 = vor.u32 %v822_v56, %v819_v46  ;;  %v1972_v12 = vld [vmem:[%s2599_s1 + $0xe0] sm:$0xff]   ;;  %v1183_v41 = vrot.slane %v284_v39, %v2204_v22  ;;  %v1603_v44 = vrot.slane %v2220_v26, 9 }
  0x20   : > { %1753 = vmatpush3.bf16.msra.mxu1 %v1957_v16  ;;  %1734 = vmatprep.subr.bf16.mxu0 %v2061_v1  ;;  %v339_v61 = vsel %vm2270_vm7, %v334_v57, %v338_v49  ;;  %v1973_v16 = vld [vmem:[%s2599_s1 + $0xa8] sm:$0xff]   ;;  %v2397_v45 = vrot.slane %v1079_v40, %v2204_v22  ;;  %v946_v48 = vrot.slane %v2248_v37, 7  ;;  %v1984_v37 = vld [vmem:[%s2599_s1 + $0x110] sm:$0xff]  }
  0x21   : > { %1754 = vmatprep.subr.bf16.mxu1 %v2061_v1  ;;  %v353_v62 = vsel %vm2270_vm7, %v348_v58, %v352_v55  ;;  %v824_v63 = vrot.slane %v823_v59, 2  ;;  %v1186_v46 = vshrl.u32 %v1183_v41, 16  ;;  %v1189_v47 = vshll.u32 %v1183_v41, 16 }
  0x22   : > { %v370_v2 = vcombine.low %v339_v61, %v353_v62  ;;  %v1628_v49 = vrot.slane %v1183_v41, 9  ;;  %v947_v57 = vsel %vm2344_vm14, %v1603_v44, %v946_v48  ;;  %v1989_v61 = vld [vmem:[%s2599_s1 + $0x160] sm:$0xff]  }
  0x23   : > { %1735 = vmatpush3.bf16.msra.mxu0 %v1958_v18  ;;  %v2288_v3 = vsel %vm2270_vm7, %v824_v63, %v828_v60  ;;  %v1577_v18 = vrot.slane %v2212_v24, 9  ;;  %v1978_v24 = vld [vmem:[%s2599_s1 + $0xf8] sm:$0xff]   ;;  %v1188_v50 = vrot.slane %v1186_v46, 6  ;;  %v1191_v26 = vrot.slane %v1189_v47, 7 }
  0x24   : > { %1755 = vmatpush3.bf16.msra.mxu1 %v1959_v21  ;;  %1736 = vmatprep.subr.bf16.mxu0 %v2061_v1  ;;  %v377_v5 = vrot.slane %v370_v2, %v2204_v22  ;;  %v846_v6 = vcombine.low %v353_v62, %v2288_v3  ;;  %v1578_v21 = vrot.slane %v2216_v25, 9  ;;  %v1975_v25 = vld [vmem:[%s2599_s1 + $0xb0] sm:$0xff]  }
  0x25   : > { %1756 = vmatprep.subr.bf16.mxu1 %v2061_v1  ;;  %v574_v30 = vsel %vm2344_vm14, %v1577_v18, %v573_v20  ;;  %v1192_v55 = vor.u32 %v1191_v26, %v1188_v50  ;;  %v2003_v18 = vld [vmem:[%s2599_s1 + $0x1d8] sm:$0xff]   ;;  %v2005_v20 = vld [vmem:[%s2599_s1 + $0x1e0] sm:$0xff]  }
  0x26   : > { %v2300_v8 = vrot.slane %v846_v6, %v2204_v22  ;;  %v2361_v31 = vsel %vm2344_vm14, %v1578_v21, %v577_v27  ;;  %v1990_v6 = vld [vmem:[%s2599_s1 + $0x128] sm:$0xff]   ;;  %v2002_v21 = vld [vmem:[%s2599_s1 + $0x198] sm:$0xff]  }
  0x27   : > { %1737 = vmatpush3.bf16.msra.mxu0 %v1960_v29  ;;  %v710_v29 = vcombine.low %v2199_v19, %v2208_v23  ;;  %v595_v33 = vcombine.low %v574_v30, %v2361_v31  ;;  %v1184_v23 = vcombine.high %v1183_v41, %v1183_v41  ;;  %v1193_v59 = vrot.slane %v1192_v55, 2  ;;  %v2007_v27 = vld [vmem:[%s2599_s1 + $0x1e8] sm:$0xff]   ;;  %v2008_v30 = vld [vmem:[%s2599_s1 + $0x1b0] sm:$0xff]  }
  0x28   : > { %1757 = vmatpush3.bf16.msra.mxu1 %v1961_v34  ;;  %1762 = vmatprep.subr.bf16.mxu0 %v2061_v1  ;;  %v1977_v34 = vld [vmem:[%s2599_s1 + $0xb8] sm:$0xff]  }
  0x29   : > { %1782 = vmatprep.subr.bf16.mxu1 %v2061_v1  ;;  %v717_v19 = vrot.slane %v710_v29, %v2204_v22  ;;  %v602_v36 = vrot.slane %v595_v33, %v2204_v22  ;;  %v1315_v54 = vrot.slane %v1184_v23, 7  ;;  %v2009_v29 = vld [vmem:[%s2599_s1 + $0x1f0] sm:$0xff]   ;;  %v2016_v33 = vld [vmem:[%s2599_s1 + $0x218] sm:$0xff]  }
  0x2a   : > { %1739 = vmatmul.mubr.bf16.vlgmr.msra.gmra.mrb[0].mxu0 %v377_v5  ;;  %v1988_v5 = vld [vmem:[%s2599_s1 + $0x120] sm:$0xff]  }
  0x2b   : > { %1759 = vmatmul.mubr.bf16.vlgmr.msra.gmra.mrb[0].mxu1 %v474_v51  ;;  %1763 = vmatpush3.bf16.msra.mxu0 %v1963_v4  ;;  %v1195_v51 = vshll.u32 %v1184_v23, 16  ;;  %v1316_v58 = vsel %vm2344_vm14, %v1628_v49, %v1315_v54  ;;  %v1991_v4 = vld [vmem:[%s2599_s1 + $0x168] sm:$0xff]  }
  0x2c   : > { %1783 = vmatpush3.bf16.msra.mxu1 %v1964_v52  ;;  %1798 = vmatprep.mubr.msk.bf16.mxu1 %vm2062_vm0, %v2061_v1  ;;  %v1987_v52 = vld [vmem:[%s2599_s1 + $0x158] sm:$0xff]   ;;  %v1333_v60 = vcombine.low %v947_v57, %v1316_v58 }
  0x2d   : > { %1784 = vmatprep.subr.bf16.mxu1 %v2061_v1  ;;  %1778 = vmatprep.mubr.msk.bf16.mxu0 %vm2062_vm0, %v2061_v1  ;;  %v1197_v56 = vrot.slane %v1195_v51, 7 }
  0x2e   : > { %1764 = vmatprep.subr.bf16.mxu0 %v2061_v1  ;;  %v2422_v63 = vrot.slane %v1333_v60, %v2204_v22 }
  0x2f   : > { %1765 = vmatpush3.bf16.msra.mxu0 %v1965_v9  ;;  %v1198_v62 = vsel %vm2270_vm7, %v1193_v59, %v1197_v56  ;;  %v1995_v9 = vld [vmem:[%s2599_s1 + $0x178] sm:$0xff]  }
  0x30   : > { %1785 = vmatpush3.bf16.msra.mxu1 %v1966_v0  ;;  %1766 = vmatprep.subr.bf16.mxu0 %v2061_v1  ;;  %v1986_v0 = vld [vmem:[%s2599_s1 + $0x118] sm:$0xff]   ;;  %v2428_v2 = vcombine.low %v2288_v3, %v1198_v62  ;;  %v1993_v3 = vld [vmem:[%s2599_s1 + $0x170] sm:$0xff]  }
  0x31   : > { %1786 = vmatprep.subr.bf16.mxu1 %v2061_v1 }
  0x32   : > { %v1222_v53 = vrot.slane %v2428_v2, %v2204_v22 }
  0x33   : > { %1767 = vmatpush3.bf16.msra.mxu0 %v1967_v11 }
  0x34   : > { %1787 = vmatpush3.bf16.msra.mxu1 %v1968_v7  ;;  %1768 = vmatprep.subr.bf16.mxu0 %v2061_v1  ;;  %v964_v7 = vcombine.low %v2361_v31, %v947_v57  ;;  %v2010_v31 = vld [vmem:[%s2599_s1 + $0x1b8] sm:$0xff]  }
  0x35   : > { %1788 = vmatprep.subr.bf16.mxu1 %v2061_v1 }
  0x36   : > { %v971_v11 = vrot.slane %v964_v7, %v2204_v22  ;;  %v2015_v22 = vld [vmem:[%s2599_s1 + $0x210] sm:$0xff]  }
  0x37   : > { %1769 = vmatpush3.bf16.msra.mxu0 %v1969_v13  ;;  %v1994_v13 = vld [vmem:[%s2599_s1 + $0x138] sm:$0xff]  }
  0x38   : > { %1789 = vmatpush3.bf16.msra.mxu1 %v1970_v10  ;;  %1770 = vmatprep.subr.bf16.mxu0 %v2061_v1  ;;  %v1992_v10 = vld [vmem:[%s2599_s1 + $0x130] sm:$0xff]  }
  0x39   : > { %1790 = vmatprep.subr.bf16.mxu1 %v2061_v1 }
  0x3b   : > { %1771 = vmatpush3.bf16.msra.mxu0 %v1971_v15  ;;  %v1996_v15 = vld [vmem:[%s2599_s1 + $0x180] sm:$0xff]  }
  0x3c   : > { %1791 = vmatpush3.bf16.msra.mxu1 %v1972_v12  ;;  %1772 = vmatprep.subr.bf16.mxu0 %v2061_v1  ;;  %v1997_v12 = vld [vmem:[%s2599_s1 + $0x1c0] sm:$0xff]  }
  0x3d   : > { %1792 = vmatprep.subr.bf16.mxu1 %v2061_v1 }
  0x3f   : > { %1773 = vmatpush3.bf16.msra.mxu0 %v1973_v16  ;;  %v2001_v16 = vld [vmem:[%s2599_s1 + $0x1d0] sm:$0xff]  }
  0x40   : > { %1793 = vmatpush3.bf16.msra.mxu1 %v1974_v14  ;;  %1774 = vmatprep.subr.bf16.mxu0 %v2061_v1  ;;  %v1999_v14 = vld [vmem:[%s2599_s1 + $0x1c8] sm:$0xff]  }
  0x41   : > { %1794 = vmatprep.subr.bf16.mxu1 %v2061_v1 }
  0x43   : > { %1775 = vmatpush3.bf16.msra.mxu0 %v1975_v25  ;;  %v2011_v25 = vld [vmem:[%s2599_s1 + $0x1f8] sm:$0xff]  }
  0x44   : > { %1795 = vmatpush3.bf16.msra.mxu1 %v1976_v17  ;;  %1776 = vmatprep.subr.bf16.mxu0 %v2061_v1  ;;  %v1998_v17 = vld [vmem:[%s2599_s1 + $0x188] sm:$0xff]  }
  0x45   : > { %1796 = vmatprep.subr.bf16.mxu1 %v2061_v1 }
  0x47   : > { %1777 = vmatpush3.bf16.msra.mxu0 %v1977_v34  ;;  %v2017_v34 = vld [vmem:[%s2599_s1 + $0x220] sm:$0xff]  }
  0x48   : > { %1797 = vmatpush3.bf16.msra.mxu1 %v1978_v24  ;;  %1802 = vmatprep.subr.bf16.mxu0 %v2061_v1  ;;  %v2006_v24 = vld [vmem:[%s2599_s1 + $0x1a8] sm:$0xff]  }
  0x49   : > { %1822 = vmatprep.subr.bf16.mxu1 %v2061_v1 }
  0x4a   : > { %1779 = vmatmul.mubr.bf16.vlgmr.msra.gmra.mrb[4].mxu0 %v602_v36  ;;  %v2019_v36 = vld [vmem:[%s2599_s1 + $0x230] sm:$0xff]  }
  0x4b   : > { %1799 = vmatmul.mubr.bf16.vlgmr.msra.gmra.mrb[4].mxu1 %v717_v19  ;;  %1803 = vmatpush3.bf16.msra.mxu0 %v1979_v38  ;;  %v2013_v19 = vld [vmem:[%s2599_s1 + $0x200] sm:$0xff]   ;;  %v2020_v38 = vld [vmem:[%s2599_s1 + $0x238] sm:$0xff]  }
  0x4c   : > { %1823 = vmatpush3.bf16.msra.mxu1 %v1981_v32  ;;  %1838 = vmatprep.mubr.msk.bf16.mxu1 %vm2062_vm0, %v2061_v1  ;;  %v2014_v32 = vld [vmem:[%s2599_s1 + $0x208] sm:$0xff]  }
  0x4d   : > { %1824 = vmatprep.subr.bf16.mxu1 %v2061_v1  ;;  %1818 = vmatprep.mubr.msk.bf16.mxu0 %vm2062_vm0, %v2061_v1 }
  0x4e   : > { %1804 = vmatprep.subr.bf16.mxu0 %v2061_v1 }
  0x4f   : > { %1805 = vmatpush3.bf16.msra.mxu0 %v1982_v42 }
  0x50   : > { %1825 = vmatpush3.bf16.msra.mxu1 %v1983_v35  ;;  %1806 = vmatprep.subr.bf16.mxu0 %v2061_v1  ;;  %v2018_v35 = vld [vmem:[%s2599_s1 + $0x228] sm:$0xff]  }
  0x51   : > { %1826 = vmatprep.subr.bf16.mxu1 %v2061_v1 }
  0x53   : > { %1807 = vmatpush3.bf16.msra.mxu0 %v1984_v37 }
  0x54   : > { %1827 = vmatpush3.bf16.msra.mxu1 %v1985_v43  ;;  %1808 = vmatprep.subr.bf16.mxu0 %v2061_v1 }
  0x55   : > { %1828 = vmatprep.subr.bf16.mxu1 %v2061_v1 }
  0x57   : > { %1809 = vmatpush3.bf16.msra.mxu0 %v1986_v0 }
  0x58   : > { %1829 = vmatpush3.bf16.msra.mxu1 %v1987_v52  ;;  %1810 = vmatprep.subr.bf16.mxu0 %v2061_v1 }
  0x59   : > { %1830 = vmatprep.subr.bf16.mxu1 %v2061_v1 }
  0x5b   : > { %1811 = vmatpush3.bf16.msra.mxu0 %v1988_v5 }
  0x5c   : > { %1831 = vmatpush3.bf16.msra.mxu1 %v1989_v61  ;;  %1812 = vmatprep.subr.bf16.mxu0 %v2061_v1 }
  0x5d   : > { %1832 = vmatprep.subr.bf16.mxu1 %v2061_v1 }
  0x5f   : > { %1813 = vmatpush3.bf16.msra.mxu0 %v1990_v6 }
  0x60   : > { %1833 = vmatpush3.bf16.msra.mxu1 %v1991_v4  ;;  %1814 = vmatprep.subr.bf16.mxu0 %v2061_v1 }
  0x61   : > { %1834 = vmatprep.subr.bf16.mxu1 %v2061_v1 }
  0x63   : > { %1815 = vmatpush3.bf16.msra.mxu0 %v1992_v10 }
  0x64   : > { %1835 = vmatpush3.bf16.msra.mxu1 %v1993_v3  ;;  %1816 = vmatprep.subr.bf16.mxu0 %v2061_v1 }
  0x65   : > { %1836 = vmatprep.subr.bf16.mxu1 %v2061_v1 }
  0x67   : > { %1817 = vmatpush3.bf16.msra.mxu0 %v1994_v13  ;;  %v1637_v13 = vld [vmem:[%s2600_s2] ss:$0 sm:$0xff] }
  0x68   : > { %1837 = vmatpush3.bf16.msra.mxu1 %v1995_v9  ;;  %1842 = vmatprep.subr.bf16.mxu0 %v2061_v1 }
  0x69   : > { %1862 = vmatprep.subr.bf16.mxu1 %v2061_v1 }
  0x6a   : > { %1819 = vmatmul.mubr.bf16.vlgmr.msra.gmra.mrb[8].mxu0 %v2300_v8  ;;  %v2000_v8 = vld [vmem:[%s2599_s1 + $0x190] sm:$0xff]  }
  0x6b   : > { %1839 = vmatmul.mubr.bf16.vlgmr.msra.gmra.mrb[8].mxu1 %v971_v11  ;;  %1843 = vmatpush3.bf16.msra.mxu0 %v1996_v15  ;;  %v1444_v15 = vld [vmem:[%s268_s7] sm:$0xf] }
  0x6c   : > { %1863 = vmatpush3.bf16.msra.mxu1 %v1997_v12  ;;  %1878 = vmatprep.mubr.msk.bf16.mxu1 %vm2062_vm0, %v2061_v1 }
  0x6d   : > { %1864 = vmatprep.subr.bf16.mxu1 %v2061_v1  ;;  %1858 = vmatprep.mubr.msk.bf16.mxu0 %vm2062_vm0, %v2061_v1 }
  0x6e   : > { %1844 = vmatprep.subr.bf16.mxu0 %v2061_v1 }
  0x6f   : > { %1845 = vmatpush3.bf16.msra.mxu0 %v1998_v17  ;;  %v1441_v17 = vstv %s1439_s28 }
  0x70   : > { %1865 = vmatpush3.bf16.msra.mxu1 %v1999_v14  ;;  %1846 = vmatprep.subr.bf16.mxu0 %v2061_v1 }
  0x71   : > { %1866 = vmatprep.subr.bf16.mxu1 %v2061_v1 }
  0x73   : > { %1847 = vmatpush3.bf16.msra.mxu0 %v2000_v8 }
  0x74   : > { %1867 = vmatpush3.bf16.msra.mxu1 %v2001_v16  ;;  %1848 = vmatprep.subr.bf16.mxu0 %v2061_v1 }
  0x75   : > { %1868 = vmatprep.subr.bf16.mxu1 %v2061_v1 }
  0x77   : > { %1849 = vmatpush3.bf16.msra.mxu0 %v2002_v21  ;;  %v1445_v21 = vunpack.c.l.bf16 %v1444_v15 }
  0x78   : > { %1869 = vmatpush3.bf16.msra.mxu1 %v2003_v18  ;;  %1850 = vmatprep.subr.bf16.mxu0 %v2061_v1 }
  0x79   : > { %1870 = vmatprep.subr.bf16.mxu1 %v2061_v1 }
  0x7b   : > { %1851 = vmatpush3.bf16.msra.mxu0 %v2004_v28 }
  0x7c   : > { %1871 = vmatpush3.bf16.msra.mxu1 %v2005_v20  ;;  %1852 = vmatprep.subr.bf16.mxu0 %v2061_v1 }
  0x7d   : > { %1872 = vmatprep.subr.bf16.mxu1 %v2061_v1 }
  0x7f   : > { %1853 = vmatpush3.bf16.msra.mxu0 %v2006_v24 }
  0x80   : > { %1873 = vmatpush3.bf16.msra.mxu1 %v2007_v27  ;;  %1854 = vmatprep.subr.bf16.mxu0 %v2061_v1 }
  0x81   : > { %1874 = vmatprep.subr.bf16.mxu1 %v2061_v1 }
  0x83   : > { %1855 = vmatpush3.bf16.msra.mxu0 %v2008_v30 }
  0x84   : > { %1875 = vmatpush3.bf16.msra.mxu1 %v2009_v29  ;;  %1856 = vmatprep.subr.bf16.mxu0 %v2061_v1 }
  0x85   : > { %1876 = vmatprep.subr.bf16.mxu1 %v2061_v1 }
  0x87   : > { %1857 = vmatpush3.bf16.msra.mxu0 %v2010_v31 }
  0x88   : > { %1877 = vmatpush3.bf16.msra.mxu1 %v2011_v25  ;;  %1882 = vmatprep.subr.bf16.mxu0 %v2061_v1 }
  0x8a   : > { %1859 = vmatmul.mubr.bf16.vlgmr.msra.gmra.mrb[12].mxu0 %v2397_v45 }
  0x8b   : > { %1879 = vmatmul.mubr.bf16.vlgmr.msra.gmra.mrb[12].mxu1 %v1222_v53  ;;  %1883 = vmatpush3.bf16.msra.mxu0 %v2013_v19 }
  0x8c   : > { %1898 = vmatprep.mubr.msk.bf16.mxu0 %vm2062_vm0, %v2061_v1  ;;  %1884 = vmatprep.subr.bf16.mxu0 %v2061_v1 }
  0x8f   : > { %1885 = vmatpush3.bf16.msra.mxu0 %v2014_v32 }
  0x90   : > { %1886 = vmatprep.subr.bf16.mxu0 %v2061_v1 }
  0x93   : > { %1887 = vmatpush3.bf16.msra.mxu0 %v2015_v22 }
  0x94   : > { %1888 = vmatprep.subr.bf16.mxu0 %v2061_v1 }
  0x97   : > { %1889 = vmatpush3.bf16.msra.mxu0 %v2016_v33 }
  0x98   : > { %1890 = vmatprep.subr.bf16.mxu0 %v2061_v1 }
  0x9b   : > { %1891 = vmatpush3.bf16.msra.mxu0 %v2017_v34 }
  0x9c   : > { %1892 = vmatprep.subr.bf16.mxu0 %v2061_v1 }
  0x9f   : > { %1893 = vmatpush3.bf16.msra.mxu0 %v2018_v35 }
  0xa0   : > { %1894 = vmatprep.subr.bf16.mxu0 %v2061_v1 }
  0xa3   : > { %1895 = vmatpush3.bf16.msra.mxu0 %v2019_v36 }
  0xa4   : > { %1896 = vmatprep.subr.bf16.mxu0 %v2061_v1 }
  0xa7   : > { %1897 = vmatpush3.bf16.msra.mxu0 %v2020_v38 }
  0xaa   : > { %1899 = vmatmul.mubr.bf16.vlgmr.msra.gmra.mrb[16].mxu0 %v2422_v63 }
  0xfd   : > { %v461_v43 = vpop.f32.mrb[0].mxu0 }
  0xfe   : > { %v558_v39 = vpop.f32.mrb[0].mxu1  ;;  %v1740_v44 = vpop.f32.mrb[1].mxu0 }
  0xff   : > { %v1760_v40 = vpop.f32.mrb[1].mxu1  ;;  %v559_v45 = vadd.f32 %v558_v39, %v461_v43  ;;  %v464_v23 = vpop.f32.mrb[2].mxu0 }
 0x100   : > { %v561_v41 = vpop.f32.mrb[2].mxu1  ;;  %v1741_v46 = vpop.f32.mrb[3].mxu0 }
 0x101   : > { %v1761_v42 = vpop.f32.mrb[3].mxu1 }
 0x11d   : > { %v686_v26 = vpop.f32.mrb[4].mxu0 }
 0x11e   : > { %v801_v47 = vpop.f32.mrb[4].mxu1  ;;  %v692_v51 = vadd.f32 %v686_v26, %v559_v45  ;;  %v1780_v52 = vpop.f32.mrb[5].mxu0 }
 0x11f   : > { %v1800_v48 = vpop.f32.mrb[5].mxu1  ;;  %v689_v1 = vpop.f32.mrb[6].mxu0 }
 0x120   : > { %v804_v49 = vpop.f32.mrb[6].mxu1  ;;  %v807_v54 = vadd.f32 %v801_v47, %v692_v51  ;;  %v1781_v55 = vpop.f32.mrb[7].mxu0 }
 0x121   : > { %v1801_v50 = vpop.f32.mrb[7].mxu1 }
 0x13d   : > { %v937_v59 = vpop.f32.mrb[8].mxu0 }
 0x13e   : > { %v1055_v56 = vpop.f32.mrb[8].mxu1  ;;  %v943_v60 = vadd.f32 %v937_v59, %v807_v54  ;;  %v1820_v61 = vpop.f32.mrb[9].mxu0 }
 0x13f   : > { %v1840_v37 = vpop.f32.mrb[9].mxu1  ;;  %v940_v62 = vpop.f32.mrb[10].mxu0 }
 0x140   : > { %v1058_v57 = vpop.f32.mrb[10].mxu1  ;;  %v1061_v63 = vadd.f32 %v1055_v56, %v943_v60  ;;  %v1821_v0 = vpop.f32.mrb[11].mxu0 }
 0x141   : > { %v1841_v58 = vpop.f32.mrb[11].mxu1 }
 0x15d   : > { %v1170_v3 = vpop.f32.mrb[12].mxu0 }
 0x15e   : > { %v1306_v2 = vpop.f32.mrb[12].mxu1  ;;  %v1176_v6 = vadd.f32 %v1170_v3, %v1061_v63  ;;  %v1860_v7 = vpop.f32.mrb[13].mxu0 }
 0x15f   : > { %v1880_v4 = vpop.f32.mrb[13].mxu1  ;;  %v1173_v9 = vpop.f32.mrb[14].mxu0 }
 0x160   : > { %v1309_v53 = vpop.f32.mrb[14].mxu1  ;;  %v1312_v10 = vadd.f32 %v1306_v2, %v1176_v6  ;;  %v1861_v11 = vpop.f32.mrb[15].mxu0 }
 0x161   : > { %v1881_v5 = vpop.f32.mrb[15].mxu1 }
 0x17d   : > { %v1424_v12 = vpop.f32.mrb[16].mxu0 }
 0x17e   : > { %v1430_v14 = vadd.f32 %v1424_v12, %v1312_v10  ;;  %v1900_v16 = vpop.f32.mrb[17].mxu0 }
 0x17f   : > { %v1427_v18 = vpop.f32.mrb[18].mxu0 }
 0x180   : > { %v1438_v8 = vadd.f32 %v1637_v13, %v1430_v14  ;;  %v1901_v20 = vpop.f32.mrb[19].mxu0 }
 0x182   : > { %vm1440_vm15 = vcmp.ge.f32.partialorder %v1438_v8, 0.0  ;;  %v1442_v27 = vmul.f32 %v1441_v17, %v1438_v8 }
 0x184   : > { %v1443_v28 = vsel %vm1440_vm15, %v1438_v8, %v1442_v27 }
 0x185   : > { %v1446_v29 = vadd.f32 %v1445_v21, %v1443_v28 }
 0x187   : > { %v1447_v24 = vpack.c.bf16 %v1446_v29, %v1446_v29 }
 0x189   : > { %1448 = vst [vmem:[%s276_s10] sm:$0xf] %v1447_v24 }
 0x18a PF: > { %s16_s24 = sadd.s32 1, %s2059_s24   ;;  %s2612_s20 = smov %s2051_s22 }
 0x18b   : > { %p13_p7 = scmp.ge.s32.totalorder %s16_s24, 6   ;;  %s2613_s21 = smov %s2055_s23 }
 0x18c   : > { %s2614_s22 = smov %s2617_s3  ;;  %s2615_s23 = smov %s2621_s25 }
 0x18d   :  { %15 = sbr.rel (!%p13_p7) target bundleno = 3 (0x3), region = 74 }

// kernel: didn_forward.40
= control target key start
LH: loop header
LB: loop body
LE: loop exit
PB: predicated region body
PF: predicated region fallthrough
CT: control target
= control target key end

     0   :  { %s2072_s20 = smov 0   ;;  %s2074_s21 = smov 0   ;;  %s2531_s0 = inlined_call_operand.vmem [shape: bf16[2,4,4,128], index: 0, kind: input, shape index: {}]   ;;  %s2532_s1 = inlined_call_operand.vmem [shape: bf16[1152,128], index: 1, kind: input, shape index: {}]   ;;  %s2533_s2 = inlined_call_operand.vmem [shape: f32[1,128], index: 2, kind: input, shape index: {}]   ;;  %s2534_s3 = inlined_call_operand.<no memory space> [shape: f32[1,1], index: 3, kind: input, shape index: {}]   ;;  %s2535_s4 = inlined_call_operand.vmem [shape: bf16[2,4,128], index: 4, kind: input, shape index: {}]   ;;  %s2536_s5 = inlined_call_operand.vmem [shape: bf16[2,4,128], index: 5, kind: output, shape index: {}]  }
   0x1   :  { %10 = sst [smem:[#allocation2]] %s2534_s3  ;;  %s2076_s22 = smov 0  }
   0x2 LB: > { %s28_s3 = sadd.s32 1, %s2030_s21  ;;  %p1564_p0 = scmp.ge.s32.totalorder %s2034_s22, 1  ;;  %s2034_s22 = sphi %s2076_s22, %s16_s22   ;;  %s2030_s21 = sphi %s2074_s21, %s2540_s21   ;;  %s2026_s20 = sphi %s2072_s20, %s2539_s20  }
   0x3   : > { %p30_p1 = scmp.ge.s32.totalorder %s28_s3, 2  ;;  %p216_p2 = scmp.lt.s32.totalorder %s2034_s22, 3 }
   0x5   : > { %s2542_s3 = smov (%p30_p1, %s28_s3), 0  ;;  %p217_p3 = pnand %p1564_p0, %p216_p2 }
   0x6   : > { %v1940_v0 = vld [vmem:[%s2532_s1 + $0x40] sm:$0xff] (!%p217_p3)   ;;  %v2036_v1 = vmov (!%p217_p3), 0.0   ;;  %v1942_v3 = vld [vmem:[%s2532_s1 + $0x48] sm:$0xff] (!%p217_p3)   ;;  %vm2037_vm0 = vmmov (!%p217_p3), 0   ;;  %p253_p4 = scmp.lt.s32.totalorder (!%p217_p3), %s2026_s20, 1  ;;  %v1944_v5 = vld [vmem:[%s2532_s1 + $0x50] sm:$0xff] (!%p217_p3)   ;;  %v301_v9 = vlaneseq (!%p217_p3) }
   0x7   : > { %220 = sbr.rel (%p217_p3) target bundleno = 391 (0x187), region = 40  ;;  %1733 = vmatprep.subr.bf16.mxu0 (!%p217_p3), %v2036_v1  ;;  %1753 = vmatprep.subr.bf16.mxu1 (!%p217_p3), %v2036_v1  ;;  %v1941_v2 = vld [vmem:[%s2532_s1] sm:$0xff] (!%p217_p3)   ;;  %v1943_v4 = vld [vmem:[%s2532_s1 + $0x8] sm:$0xff] (!%p217_p3)   ;;  %v1945_v6 = vld [vmem:[%s2532_s1 + $0x10] sm:$0xff] (!%p217_p3)   ;;  %vm314_vm1 = vsmask.f32 (!%p217_p3), 256 }
   0x8   : > { %1734 = vmatpush3.bf16.msra.mxu0 (!%p217_p3), %v1940_v0  ;;  %1749 = vmatprep.mubr.msk.bf16.mxu0 (!%p217_p3), %vm2037_vm0, %v2036_v1  ;;  %v1946_v7 = vld [vmem:[%s2532_s1 + $0x58] sm:$0xff] (!%p217_p3)   ;;  %v1948_v10 = vld [vmem:[%s2532_s1 + $0x60] sm:$0xff] (!%p217_p3)   ;;  %v1950_v12 = vld [vmem:[%s2532_s1 + $0x68] sm:$0xff] (!%p217_p3)   ;;  %v302_v13 = vshrl.u32 (!%p217_p3), %v301_v9, 7  ;;  %vm315_vm2 = vsmask.f32 (!%p217_p3), 1284 }
   0x9   : > { %1754 = vmatpush3.bf16.msra.mxu1 (!%p217_p3), %v1941_v2  ;;  %1735 = vmatprep.subr.bf16.mxu0 (!%p217_p3), %v2036_v1  ;;  %v1947_v8 = vld [vmem:[%s2532_s1 + $0x18] sm:$0xff] (!%p217_p3)   ;;  %v1949_v11 = vld [vmem:[%s2532_s1 + $0x20] sm:$0xff] (!%p217_p3)   ;;  %v1951_v14 = vld [vmem:[%s2532_s1 + $0x28] sm:$0xff] (!%p217_p3)   ;;  %v2038_v15 = vmov (!%p217_p3), 1966171168   ;;  %s1462_s15 = sld [smem:[#allocation2]] (!%p217_p3) }
   0xa   : > { %1755 = vmatprep.subr.bf16.mxu1 (!%p217_p3), %v2036_v1  ;;  %1769 = vmatprep.mubr.msk.bf16.mxu1 (!%p217_p3), %vm2037_vm0, %v2036_v1  ;;  %v299_v16 = vunpack.c.l.s4 (!%p217_p3), %v2038_v15  ;;  %vm316_vm3 = vmor (!%p217_p3), %vm314_vm1, %vm315_vm2  ;;  %vm317_vm4 = vsmask.f32 (!%p217_p3), 2312  ;;  %vm319_vm5 = vsmask.f32 (!%p217_p3), 3340  ;;  %vm321_vm6 = vsmask.f32 (!%p217_p3), 4368 }
   0xb   : > { %vm318_vm7 = vmor (!%p217_p3), %vm316_vm3, %vm317_vm4  ;;  %vm323_vm8 = vsmask.f32 (!%p217_p3), 5396  ;;  %v1952_v20 = vld [vmem:[%s2532_s1 + $0x70] sm:$0xff] (!%p217_p3)   ;;  %vm325_vm11 = vsmask.f32 (!%p217_p3), 6424  ;;  %v1954_v29 = vld [vmem:[%s2532_s1 + $0x78] sm:$0xff] (!%p217_p3)  }
   0xc   : > { %1736 = vmatpush3.bf16.msra.mxu0 (!%p217_p3), %v1942_v3  ;;  %v300_v19 = vunpack.c.0.s8 (!%p217_p3), %v299_v16  ;;  %vm320_vm9 = vmor (!%p217_p3), %vm318_vm7, %vm319_vm5  ;;  %v1953_v22 = vld [vmem:[%s2532_s1 + $0x30] sm:$0xff] (!%p217_p3)   ;;  %vm327_vm14 = vsmask.f32 (!%p217_p3), 7452  ;;  %v1955_v30 = vld [vmem:[%s2532_s1 + $0x38] sm:$0xff] (!%p217_p3)  }
   0xd   : > { %1756 = vmatpush3.bf16.msra.mxu1 (!%p217_p3), %v1943_v4  ;;  %1737 = vmatprep.subr.bf16.mxu0 (!%p217_p3), %v2036_v1  ;;  %vm322_vm10 = vmor (!%p217_p3), %vm320_vm9, %vm321_vm6  ;;  %v1957_v48 = vld [vmem:[%s2532_s1 + $0xc0] sm:$0xff] (!%p217_p3)   ;;  %v1959_v55 = vld [vmem:[%s2532_s1 + $0xc8] sm:$0xff] (!%p217_p3)  }
   0xe   : > { %1757 = vmatprep.subr.bf16.mxu1 %v2036_v1  ;;  %s2544_s20 = smov (!%p253_p4, %s2026_s20), 1  ;;  %v2165_v23 = vsub.s32 %v300_v19, %v302_v13  ;;  %vm324_vm12 = vmor %vm322_vm10, %vm323_vm8  ;;  %v1956_v52 = vld [vmem:[%s2532_s1 + $0x80] sm:$0xff]   ;;  %v1958_v57 = vld [vmem:[%s2532_s1 + $0x88] sm:$0xff]  }
   0xf   : > { %s1651_s14 = sshll.u32 %s2544_s20, 3  ;;  %vm326_vm13 = vmor %vm324_vm12, %vm325_vm11  ;;  %v1961_v58 = vld [vmem:[%s2532_s1 + $0xd0] sm:$0xff]   ;;  %v1963_v60 = vld [vmem:[%s2532_s1 + $0xd8] sm:$0xff]   ;;  %s1567_s16 = sshll.u32 %s2544_s20, 1 }
  0x10   : > { %1738 = vmatpush3.bf16.msra.mxu0 %v1944_v5  ;;  %s2147_s26 = scalar_lea.vmem %s2531_s0, %s1651_s14  ;;  %vm2197_vm15 = vmor %vm326_vm13, %vm327_vm14  ;;  %v1960_v59 = vld [vmem:[%s2532_s1 + $0x90] sm:$0xff]   ;;  %v1962_v61 = vld [vmem:[%s2532_s1 + $0x98] sm:$0xff]   ;;  %s264_s19 = scalar_lea.vmem %s2535_s4, %s1567_s16 }
  0x11   : > { %1758 = vmatpush3.bf16.msra.mxu1 %v1945_v6  ;;  %1739 = vmatprep.subr.bf16.mxu0 %v2036_v1  ;;  %v276_v17 = vld [vmem:[%s2147_s26] sm:$0x3]  ;;  %v2155_v18 = vld [vmem:[%s2147_s26 + $0x2] sm:$0x3]  ;;  %v2169_v24 = vld [vmem:[%s2147_s26 + $0x4] sm:$0x3]  ;;  %s271_s27 = scalar_lea.vmem %s2536_s5, %s1567_s16 }
  0x12   : > { %1759 = vmatprep.subr.bf16.mxu1 %v2036_v1  ;;  %v467_v21 = vcombine.low %v276_v17, %v2155_v18  ;;  %v2173_v25 = vrot.slane %v276_v17, %v2165_v23  ;;  %v2177_v26 = vrot.slane %v2155_v18, %v2165_v23  ;;  %v2181_v27 = vrot.slane %v2169_v24, %v2165_v23  ;;  %v1965_v62 = vld [vmem:[%s2532_s1 + $0xe0] sm:$0xff]   ;;  %v1967_v0 = vld [vmem:[%s2532_s1 + $0xe8] sm:$0xff]   ;;  %v1969_v4 = vld [vmem:[%s2532_s1 + $0xf0] sm:$0xff]  }
  0x13   : > { %v1964_v63 = vld [vmem:[%s2532_s1 + $0xa0] sm:$0xff]   ;;  %v1966_v2 = vld [vmem:[%s2532_s1 + $0xa8] sm:$0xff]   ;;  %v709_v3 = vcombine.low %v2155_v18, %v2169_v24  ;;  %v1968_v6 = vld [vmem:[%s2532_s1 + $0xb0] sm:$0xff]  }
  0x14   : > { %1740 = vmatpush3.bf16.msra.mxu0 %v1946_v7  ;;  %v474_v28 = vrot.slane %v467_v21, %v2165_v23  ;;  %v305_v31 = vcombine.high %v2173_v25, %v2173_v25  ;;  %v313_v32 = vcombine.high %v2177_v26, %v2177_v26  ;;  %v330_v33 = vshrl.u32 %v2173_v25, 16  ;;  %v1975_v15 = vld [vmem:[%s2532_s1 + $0x148] sm:$0xff]   ;;  %v279_v17 = vld [vmem:[%s2147_s26 + $0x6] sm:$0x3]  ;;  %v1977_v18 = vld [vmem:[%s2532_s1 + $0x150] sm:$0xff]  }
  0x15   : > { %1760 = vmatpush3.bf16.msra.mxu1 %v1947_v8  ;;  %1741 = vmatprep.subr.bf16.mxu0 %v2036_v1  ;;  %v339_v34 = vshrl.u32 %v2177_v26, 16  ;;  %v821_v36 = vcombine.high %v2181_v27, %v2181_v27  ;;  %v823_v37 = vshrl.u32 %v2181_v27, 16  ;;  %v1613_v40 = vcombine.high %v2177_v26, %v2181_v27  ;;  %v1971_v8 = vld [vmem:[%s2532_s1 + $0xf8] sm:$0xff]   ;;  %v1974_v16 = vld [vmem:[%s2532_s1 + $0x108] sm:$0xff]  }
  0x16   : > { %1761 = vmatprep.subr.bf16.mxu1 %v2036_v1  ;;  %v335_v38 = vshll.u32 %v305_v31, 16  ;;  %v344_v39 = vshll.u32 %v313_v32, 16  ;;  %v481_v44 = vrot.slane %v474_v28, %v2165_v23  ;;  %v1587_v5 = vcombine.high %v2173_v25, %v2177_v26  ;;  %v1976_v28 = vld [vmem:[%s2532_s1 + $0x110] sm:$0xff]  }
  0x17   : > { %v828_v41 = vshll.u32 %v821_v36, 16  ;;  %v2213_v45 = vrot.slane %v1613_v40, %v2165_v23  ;;  %v716_v7 = vrot.slane %v709_v3, %v2165_v23  ;;  %v1090_v19 = vcombine.low %v2169_v24, %v279_v17  ;;  %v1979_v24 = vld [vmem:[%s2532_s1 + $0x158] sm:$0xff]   ;;  %v1981_v36 = vld [vmem:[%s2532_s1 + $0x160] sm:$0xff]   ;;  %v1982_v40 = vld [vmem:[%s2532_s1 + $0x128] sm:$0xff]  }
  0x18   : > { %1742 = vmatpush3.bf16.msra.mxu0 %v1948_v10  ;;  %v337_v42 = vsel %vm2197_vm15, %v330_v33, %v335_v38  ;;  %v346_v43 = vsel %vm2197_vm15, %v339_v34, %v344_v39  ;;  %v594_v9 = vrot.slane %v1587_v5, %v2165_v23  ;;  %v1970_v10 = vld [vmem:[%s2532_s1 + $0xb8] sm:$0xff]   ;;  %v1983_v39 = vld [vmem:[%s2532_s1 + $0x168] sm:$0xff]  }
  0x19   : > { %1762 = vmatpush3.bf16.msra.mxu1 %v1949_v11  ;;  %1743 = vmatprep.subr.bf16.mxu0 %v2036_v1  ;;  %v363_v46 = vcombine.low %v337_v42, %v346_v43  ;;  %v2217_v47 = vsel %vm2197_vm15, %v823_v37, %v828_v41  ;;  %v982_v50 = vrot.slane %v2213_v45, %v2165_v23  ;;  %v1978_v33 = vld [vmem:[%s2532_s1 + $0x118] sm:$0xff]   ;;  %v1980_v37 = vld [vmem:[%s2532_s1 + $0x120] sm:$0xff]   ;;  %v1985_v41 = vld [vmem:[%s2532_s1 + $0x170] sm:$0xff]  }
  0x1a   : > { %1763 = vmatprep.subr.bf16.mxu1 %v2036_v1  ;;  %v847_v49 = vcombine.low %v346_v43, %v2217_v47  ;;  %v723_v11 = vrot.slane %v716_v7, %v2165_v23  ;;  %v601_v13 = vrot.slane %v594_v9, %v2165_v23  ;;  %v2333_v21 = vrot.slane %v1090_v19, %v2165_v23  ;;  %v1984_v42 = vld [vmem:[%s2532_s1 + $0x130] sm:$0xff]   ;;  %v1987_v43 = vld [vmem:[%s2532_s1 + $0x178] sm:$0xff]   ;;  %v1990_v45 = vld [vmem:[%s2532_s1 + $0x188] sm:$0xff]  }
  0x1b   : > { %v370_v51 = vrot.slane %v363_v46, %v2165_v23  ;;  %v1989_v46 = vld [vmem:[%s2532_s1 + $0x1c0] sm:$0xff]   ;;  %v2009_v3 = vld [vmem:[%s2532_s1 + $0x228] sm:$0xff]   ;;  %v2011_v5 = vld [vmem:[%s2532_s1 + $0x238] sm:$0xff]  }
  0x1c   : > { %1744 = vmatpush3.bf16.msra.mxu0 %v1950_v12  ;;  %v2232_v53 = vrot.slane %v847_v49, %v2165_v23  ;;  %v1973_v12 = vld [vmem:[%s2532_s1 + $0x140] sm:$0xff]   ;;  %v1993_v49 = vld [vmem:[%s2532_s1 + $0x1d0] sm:$0xff]  }
  0x1d   : > { %1764 = vmatpush3.bf16.msra.mxu1 %v1951_v14  ;;  %1745 = vmatprep.subr.bf16.mxu0 %v2036_v1  ;;  %v377_v54 = vrot.slane %v370_v51, %v2165_v23  ;;  %v1972_v14 = vld [vmem:[%s2532_s1 + $0x100] sm:$0xff]   ;;  %v1995_v51 = vld [vmem:[%s2532_s1 + $0x1d8] sm:$0xff]  }
  0x1e   : > { %1765 = vmatprep.subr.bf16.mxu1 %v2036_v1  ;;  %v861_v56 = vrot.slane %v2232_v53, %v2165_v23  ;;  %v1997_v53 = vld [vmem:[%s2532_s1 + $0x1e0] sm:$0xff]  }
  0x20   : > { %1746 = vmatpush3.bf16.msra.mxu0 %v1952_v20  ;;  %v1201_v20 = vrot.slane %v279_v17, %v2165_v23 }
  0x21   : > { %1766 = vmatpush3.bf16.msra.mxu1 %v1953_v22  ;;  %1747 = vmatprep.subr.bf16.mxu0 %v2036_v1 }
  0x22   : > { %1767 = vmatprep.subr.bf16.mxu1 %v2036_v1  ;;  %v1202_v22 = vcombine.high %v1201_v20, %v1201_v20  ;;  %v1204_v25 = vshrl.u32 %v1201_v20, 16  ;;  %v1639_v26 = vcombine.high %v2181_v27, %v1201_v20 }
  0x24   : > { %1748 = vmatpush3.bf16.msra.mxu0 %v1954_v29  ;;  %v1104_v29 = vrot.slane %v2333_v21, %v2165_v23  ;;  %v2346_v31 = vrot.slane %v1639_v26, %v2165_v23 }
  0x25   : > { %1768 = vmatpush3.bf16.msra.mxu1 %v1955_v30  ;;  %1773 = vmatprep.subr.bf16.mxu0 %v2036_v1  ;;  %v1209_v30 = vshll.u32 %v1202_v22, 16 }
  0x26   : > { %1793 = vmatprep.subr.bf16.mxu1 %v2036_v1  ;;  %v1363_v32 = vrot.slane %v2346_v31, %v2165_v23 }
  0x27   : > { %1750 = vmatmul.mubr.bf16.vlgmr.msra.gmra.mrb[0].mxu0 %v377_v54  ;;  %v1211_v27 = vsel %vm2197_vm15, %v1204_v25, %v1209_v30  ;;  %v1996_v54 = vld [vmem:[%s2532_s1 + $0x1a0] sm:$0xff]  }
  0x28   : > { %1770 = vmatmul.mubr.bf16.vlgmr.msra.gmra.mrb[0].mxu1 %v481_v44  ;;  %1774 = vmatpush3.bf16.msra.mxu0 %v1956_v52  ;;  %v1228_v34 = vcombine.low %v2217_v47, %v1211_v27  ;;  %v1986_v44 = vld [vmem:[%s2532_s1 + $0x138] sm:$0xff]   ;;  %v1988_v47 = vld [vmem:[%s2532_s1 + $0x180] sm:$0xff]  }
  0x29   : > { %1794 = vmatpush3.bf16.msra.mxu1 %v1957_v48  ;;  %1809 = vmatprep.mubr.msk.bf16.mxu1 %vm2037_vm0, %v2036_v1  ;;  %v1991_v48 = vld [vmem:[%s2532_s1 + $0x1c8] sm:$0xff]   ;;  %v1994_v52 = vld [vmem:[%s2532_s1 + $0x198] sm:$0xff]  }
  0x2a   : > { %1795 = vmatprep.subr.bf16.mxu1 %v2036_v1  ;;  %1789 = vmatprep.mubr.msk.bf16.mxu0 %vm2037_vm0, %v2036_v1  ;;  %v2363_v35 = vrot.slane %v1228_v34, %v2165_v23 }
  0x2b   : > { %1775 = vmatprep.subr.bf16.mxu0 %v2036_v1 }
  0x2c   : > { %1776 = vmatpush3.bf16.msra.mxu0 %v1958_v57  ;;  %v1242_v38 = vrot.slane %v2363_v35, %v2165_v23  ;;  %v2001_v57 = vld [vmem:[%s2532_s1 + $0x1f0] sm:$0xff]  }
  0x2d   : > { %1796 = vmatpush3.bf16.msra.mxu1 %v1959_v55  ;;  %1777 = vmatprep.subr.bf16.mxu0 %v2036_v1  ;;  %v1999_v55 = vld [vmem:[%s2532_s1 + $0x1e8] sm:$0xff]  }
  0x2e   : > { %1797 = vmatprep.subr.bf16.mxu1 %v2036_v1 }
  0x30   : > { %1778 = vmatpush3.bf16.msra.mxu0 %v1960_v59  ;;  %v2003_v59 = vld [vmem:[%s2532_s1 + $0x1f8] sm:$0xff]  }
  0x31   : > { %1798 = vmatpush3.bf16.msra.mxu1 %v1961_v58  ;;  %1779 = vmatprep.subr.bf16.mxu0 %v2036_v1  ;;  %v2000_v58 = vld [vmem:[%s2532_s1 + $0x1b0] sm:$0xff]  }
  0x32   : > { %1799 = vmatprep.subr.bf16.mxu1 %v2036_v1 }
  0x34   : > { %1780 = vmatpush3.bf16.msra.mxu0 %v1962_v61  ;;  %v2004_v61 = vld [vmem:[%s2532_s1 + $0x200] sm:$0xff]  }
  0x35   : > { %1800 = vmatpush3.bf16.msra.mxu1 %v1963_v60  ;;  %1781 = vmatprep.subr.bf16.mxu0 %v2036_v1  ;;  %v2002_v60 = vld [vmem:[%s2532_s1 + $0x1b8] sm:$0xff]  }
  0x36   : > { %1801 = vmatprep.subr.bf16.mxu1 %v2036_v1 }
  0x38   : > { %1782 = vmatpush3.bf16.msra.mxu0 %v1964_v63  ;;  %v2006_v63 = vld [vmem:[%s2532_s1 + $0x210] sm:$0xff]  }
  0x39   : > { %1802 = vmatpush3.bf16.msra.mxu1 %v1965_v62  ;;  %1783 = vmatprep.subr.bf16.mxu0 %v2036_v1  ;;  %v2005_v62 = vld [vmem:[%s2532_s1 + $0x208] sm:$0xff]  }
  0x3a   : > { %1803 = vmatprep.subr.bf16.mxu1 %v2036_v1 }
  0x3c   : > { %1784 = vmatpush3.bf16.msra.mxu0 %v1966_v2  ;;  %v2008_v2 = vld [vmem:[%s2532_s1 + $0x220] sm:$0xff]  }
  0x3d   : > { %1804 = vmatpush3.bf16.msra.mxu1 %v1967_v0  ;;  %1785 = vmatprep.subr.bf16.mxu0 %v2036_v1  ;;  %v2007_v0 = vld [vmem:[%s2532_s1 + $0x218] sm:$0xff]  }
  0x3e   : > { %1805 = vmatprep.subr.bf16.mxu1 %v2036_v1 }
  0x40   : > { %1786 = vmatpush3.bf16.msra.mxu0 %v1968_v6 }
  0x41   : > { %1806 = vmatpush3.bf16.msra.mxu1 %v1969_v4  ;;  %1787 = vmatprep.subr.bf16.mxu0 %v2036_v1  ;;  %v2010_v4 = vld [vmem:[%s2532_s1 + $0x230] sm:$0xff]  }
  0x42   : > { %1807 = vmatprep.subr.bf16.mxu1 %v2036_v1 }
  0x44   : > { %1788 = vmatpush3.bf16.msra.mxu0 %v1970_v10 }
  0x45   : > { %1808 = vmatpush3.bf16.msra.mxu1 %v1971_v8  ;;  %1813 = vmatprep.subr.bf16.mxu0 %v2036_v1 }
  0x46   : > { %1833 = vmatprep.subr.bf16.mxu1 %v2036_v1 }
  0x47   : > { %1790 = vmatmul.mubr.bf16.vlgmr.msra.gmra.mrb[4].mxu0 %v601_v13 }
  0x48   : > { %1810 = vmatmul.mubr.bf16.vlgmr.msra.gmra.mrb[4].mxu1 %v723_v11  ;;  %1814 = vmatpush3.bf16.msra.mxu0 %v1972_v14 }
  0x49   : > { %1834 = vmatpush3.bf16.msra.mxu1 %v1973_v12  ;;  %1849 = vmatprep.mubr.msk.bf16.mxu1 %vm2037_vm0, %v2036_v1 }
  0x4a   : > { %1835 = vmatprep.subr.bf16.mxu1 %v2036_v1  ;;  %1829 = vmatprep.mubr.msk.bf16.mxu0 %vm2037_vm0, %v2036_v1 }
  0x4b   : > { %1815 = vmatprep.subr.bf16.mxu0 %v2036_v1 }
  0x4c   : > { %1816 = vmatpush3.bf16.msra.mxu0 %v1974_v16 }
  0x4d   : > { %1836 = vmatpush3.bf16.msra.mxu1 %v1975_v15  ;;  %1817 = vmatprep.subr.bf16.mxu0 %v2036_v1 }
  0x4e   : > { %1837 = vmatprep.subr.bf16.mxu1 %v2036_v1 }
  0x50   : > { %1818 = vmatpush3.bf16.msra.mxu0 %v1976_v28 }
  0x51   : > { %1838 = vmatpush3.bf16.msra.mxu1 %v1977_v18  ;;  %1819 = vmatprep.subr.bf16.mxu0 %v2036_v1 }
  0x52   : > { %1839 = vmatprep.subr.bf16.mxu1 %v2036_v1 }
  0x54   : > { %1820 = vmatpush3.bf16.msra.mxu0 %v1978_v33 }
  0x55   : > { %1840 = vmatpush3.bf16.msra.mxu1 %v1979_v24  ;;  %1821 = vmatprep.subr.bf16.mxu0 %v2036_v1 }
  0x56   : > { %1841 = vmatprep.subr.bf16.mxu1 %v2036_v1 }
  0x58   : > { %1822 = vmatpush3.bf16.msra.mxu0 %v1980_v37 }
  0x59   : > { %1842 = vmatpush3.bf16.msra.mxu1 %v1981_v36  ;;  %1823 = vmatprep.subr.bf16.mxu0 %v2036_v1 }
  0x5a   : > { %1843 = vmatprep.subr.bf16.mxu1 %v2036_v1 }
  0x5c   : > { %1824 = vmatpush3.bf16.msra.mxu0 %v1982_v40 }
  0x5d   : > { %1844 = vmatpush3.bf16.msra.mxu1 %v1983_v39  ;;  %1825 = vmatprep.subr.bf16.mxu0 %v2036_v1 }
  0x5e   : > { %1845 = vmatprep.subr.bf16.mxu1 %v2036_v1 }
  0x60   : > { %1826 = vmatpush3.bf16.msra.mxu0 %v1984_v42 }
  0x61   : > { %1846 = vmatpush3.bf16.msra.mxu1 %v1985_v41  ;;  %1827 = vmatprep.subr.bf16.mxu0 %v2036_v1 }
  0x62   : > { %1847 = vmatprep.subr.bf16.mxu1 %v2036_v1 }
  0x64   : > { %1828 = vmatpush3.bf16.msra.mxu0 %v1986_v44 }
  0x65   : > { %1848 = vmatpush3.bf16.msra.mxu1 %v1987_v43  ;;  %1853 = vmatprep.subr.bf16.mxu0 %v2036_v1 }
  0x66   : > { %1873 = vmatprep.subr.bf16.mxu1 %v2036_v1 }
  0x67   : > { %1830 = vmatmul.mubr.bf16.vlgmr.msra.gmra.mrb[8].mxu0 %v861_v56  ;;  %v1998_v56 = vld [vmem:[%s2532_s1 + $0x1a8] sm:$0xff]  }
  0x68   : > { %1850 = vmatmul.mubr.bf16.vlgmr.msra.gmra.mrb[8].mxu1 %v982_v50  ;;  %1854 = vmatpush3.bf16.msra.mxu0 %v1988_v47  ;;  %v1992_v50 = vld [vmem:[%s2532_s1 + $0x190] sm:$0xff]  }
  0x69   : > { %1874 = vmatpush3.bf16.msra.mxu1 %v1989_v46  ;;  %1889 = vmatprep.mubr.msk.bf16.mxu1 %vm2037_vm0, %v2036_v1  ;;  %v1648_v46 = vld [vmem:[%s2533_s2] ss:$0 sm:$0xff] }
  0x6a   : > { %1875 = vmatprep.subr.bf16.mxu1 %v2036_v1  ;;  %1869 = vmatprep.mubr.msk.bf16.mxu0 %vm2037_vm0, %v2036_v1 }
  0x6b   : > { %1855 = vmatprep.subr.bf16.mxu0 %v2036_v1 }
  0x6c   : > { %1856 = vmatpush3.bf16.msra.mxu0 %v1990_v45 }
  0x6d   : > { %1876 = vmatpush3.bf16.msra.mxu1 %v1991_v48  ;;  %1857 = vmatprep.subr.bf16.mxu0 %v2036_v1  ;;  %v1467_v48 = vld [vmem:[%s264_s19] sm:$0x3] }
  0x6e   : > { %1877 = vmatprep.subr.bf16.mxu1 %v2036_v1 }
  0x70   : > { %1858 = vmatpush3.bf16.msra.mxu0 %v1992_v50 }
  0x71   : > { %1878 = vmatpush3.bf16.msra.mxu1 %v1993_v49  ;;  %1859 = vmatprep.subr.bf16.mxu0 %v2036_v1  ;;  %v1464_v49 = vstv %s1462_s15 }
  0x72   : > { %1879 = vmatprep.subr.bf16.mxu1 %v2036_v1 }
  0x74   : > { %1860 = vmatpush3.bf16.msra.mxu0 %v1994_v52 }
  0x75   : > { %1880 = vmatpush3.bf16.msra.mxu1 %v1995_v51  ;;  %1861 = vmatprep.subr.bf16.mxu0 %v2036_v1 }
  0x76   : > { %1881 = vmatprep.subr.bf16.mxu1 %v2036_v1 }
  0x78   : > { %1862 = vmatpush3.bf16.msra.mxu0 %v1996_v54 }
  0x79   : > { %1882 = vmatpush3.bf16.msra.mxu1 %v1997_v53  ;;  %1863 = vmatprep.subr.bf16.mxu0 %v2036_v1  ;;  %v1468_v53 = vunpack.c.l.bf16 %v1467_v48 }
  0x7a   : > { %1883 = vmatprep.subr.bf16.mxu1 %v2036_v1 }
  0x7c   : > { %1864 = vmatpush3.bf16.msra.mxu0 %v1998_v56 }
  0x7d   : > { %1884 = vmatpush3.bf16.msra.mxu1 %v1999_v55  ;;  %1865 = vmatprep.subr.bf16.mxu0 %v2036_v1 }
  0x7e   : > { %1885 = vmatprep.subr.bf16.mxu1 %v2036_v1 }
  0x80   : > { %1866 = vmatpush3.bf16.msra.mxu0 %v2000_v58 }
  0x81   : > { %1886 = vmatpush3.bf16.msra.mxu1 %v2001_v57  ;;  %1867 = vmatprep.subr.bf16.mxu0 %v2036_v1 }
  0x82   : > { %1887 = vmatprep.subr.bf16.mxu1 %v2036_v1 }
  0x84   : > { %1868 = vmatpush3.bf16.msra.mxu0 %v2002_v60 }
  0x85   : > { %1888 = vmatpush3.bf16.msra.mxu1 %v2003_v59  ;;  %1893 = vmatprep.subr.bf16.mxu0 %v2036_v1 }
  0x87   : > { %1870 = vmatmul.mubr.bf16.vlgmr.msra.gmra.mrb[12].mxu0 %v1104_v29 }
  0x88   : > { %1890 = vmatmul.mubr.bf16.vlgmr.msra.gmra.mrb[12].mxu1 %v1242_v38  ;;  %1894 = vmatpush3.bf16.msra.mxu0 %v2004_v61 }
  0x89   : > { %1909 = vmatprep.mubr.msk.bf16.mxu0 %vm2037_vm0, %v2036_v1  ;;  %1895 = vmatprep.subr.bf16.mxu0 %v2036_v1 }
  0x8c   : > { %1896 = vmatpush3.bf16.msra.mxu0 %v2005_v62 }
  0x8d   : > { %1897 = vmatprep.subr.bf16.mxu0 %v2036_v1 }
  0x90   : > { %1898 = vmatpush3.bf16.msra.mxu0 %v2006_v63 }
  0x91   : > { %1899 = vmatprep.subr.bf16.mxu0 %v2036_v1 }
  0x94   : > { %1900 = vmatpush3.bf16.msra.mxu0 %v2007_v0 }
  0x95   : > { %1901 = vmatprep.subr.bf16.mxu0 %v2036_v1 }
  0x98   : > { %1902 = vmatpush3.bf16.msra.mxu0 %v2008_v2 }
  0x99   : > { %1903 = vmatprep.subr.bf16.mxu0 %v2036_v1 }
  0x9c   : > { %1904 = vmatpush3.bf16.msra.mxu0 %v2009_v3 }
  0x9d   : > { %1905 = vmatprep.subr.bf16.mxu0 %v2036_v1 }
  0xa0   : > { %1906 = vmatpush3.bf16.msra.mxu0 %v2010_v4 }
  0xa1   : > { %1907 = vmatprep.subr.bf16.mxu0 %v2036_v1 }
  0xa4   : > { %1908 = vmatpush3.bf16.msra.mxu0 %v2011_v5 }
  0xa7   : > { %1910 = vmatmul.mubr.bf16.vlgmr.msra.gmra.mrb[16].mxu0 %v1363_v32 }
  0xfa   : > { %v461_v9 = vpop.f32.mrb[0].mxu0 }
  0xfb   : > { %v565_v6 = vpop.f32.mrb[0].mxu1  ;;  %v1751_v11 = vpop.f32.mrb[1].mxu0 }
  0xfc   : > { %v1771_v7 = vpop.f32.mrb[1].mxu1  ;;  %v566_v12 = vadd.f32 %v565_v6, %v461_v9  ;;  %v464_v13 = vpop.f32.mrb[2].mxu0 }
  0xfd   : > { %v568_v8 = vpop.f32.mrb[2].mxu1  ;;  %v1752_v14 = vpop.f32.mrb[3].mxu0 }
  0xfe   : > { %v1772_v10 = vpop.f32.mrb[3].mxu1 }
 0x11a   : > { %v685_v18 = vpop.f32.mrb[4].mxu0 }
 0x11b   : > { %v807_v15 = vpop.f32.mrb[4].mxu1  ;;  %v691_v1 = vadd.f32 %v685_v18, %v566_v12  ;;  %v1791_v20 = vpop.f32.mrb[5].mxu0 }
 0x11c   : > { %v1811_v16 = vpop.f32.mrb[5].mxu1  ;;  %v688_v21 = vpop.f32.mrb[6].mxu0 }
 0x11d   : > { %v810_v17 = vpop.f32.mrb[6].mxu1  ;;  %v813_v22 = vadd.f32 %v807_v15, %v691_v1  ;;  %v1792_v23 = vpop.f32.mrb[7].mxu0 }
 0x11e   : > { %v1812_v19 = vpop.f32.mrb[7].mxu1 }
 0x13a   : > { %v945_v24 = vpop.f32.mrb[8].mxu0 }
 0x13b   : > { %v1066_v25 = vpop.f32.mrb[8].mxu1  ;;  %v951_v30 = vadd.f32 %v945_v24, %v813_v22  ;;  %v1831_v31 = vpop.f32.mrb[9].mxu0 }
 0x13c   : > { %v1851_v26 = vpop.f32.mrb[9].mxu1  ;;  %v948_v27 = vpop.f32.mrb[10].mxu0 }
 0x13d   : > { %v1069_v28 = vpop.f32.mrb[10].mxu1  ;;  %v1072_v32 = vadd.f32 %v1066_v25, %v951_v30  ;;  %v1832_v33 = vpop.f32.mrb[11].mxu0 }
 0x13e   : > { %v1852_v29 = vpop.f32.mrb[11].mxu1 }
 0x15a   : > { %v1188_v37 = vpop.f32.mrb[12].mxu0 }
 0x15b   : > { %v1326_v34 = vpop.f32.mrb[12].mxu1  ;;  %v1194_v39 = vadd.f32 %v1188_v37, %v1072_v32  ;;  %v1871_v40 = vpop.f32.mrb[13].mxu0 }
 0x15c   : > { %v1891_v36 = vpop.f32.mrb[13].mxu1  ;;  %v1191_v41 = vpop.f32.mrb[14].mxu0 }
 0x15d   : > { %v1329_v35 = vpop.f32.mrb[14].mxu1  ;;  %v1332_v42 = vadd.f32 %v1326_v34, %v1194_v39  ;;  %v1872_v43 = vpop.f32.mrb[15].mxu0 }
 0x15e   : > { %v1892_v38 = vpop.f32.mrb[15].mxu1 }
 0x17a   : > { %v1447_v44 = vpop.f32.mrb[16].mxu0 }
 0x17b   : > { %v1453_v47 = vadd.f32 %v1447_v44, %v1332_v42  ;;  %v1911_v45 = vpop.f32.mrb[17].mxu0 }
 0x17c   : > { %v1450_v50 = vpop.f32.mrb[18].mxu0 }
 0x17d   : > { %v1461_v51 = vadd.f32 %v1648_v46, %v1453_v47  ;;  %v1912_v52 = vpop.f32.mrb[19].mxu0 }
 0x17f   : > { %vm1463_vm0 = vcmp.ge.f32.partialorder %v1461_v51, 0.0  ;;  %v1465_v54 = vmul.f32 %v1464_v49, %v1461_v51 }
 0x181   : > { %v1466_v55 = vsel %vm1463_vm0, %v1461_v51, %v1465_v54 }
 0x182   : > { %v1469_v56 = vadd.f32 %v1468_v53, %v1466_v55 }
 0x184   : > { %v1470_v57 = vpack.c.bf16 %v1469_v56, %v1469_v56 }
 0x186   : > { %1471 = vst [vmem:[%s271_s27] sm:$0x3] %v1470_v57 }
 0x187 PF: > { %s16_s22 = sadd.s32 1, %s2034_s22   ;;  %s2539_s20 = smov %s2030_s21 }
 0x188   : > { %p13_p5 = scmp.ge.s32.totalorder %s16_s22, 4   ;;  %s2540_s21 = smov %s2542_s3 }
 0x18a   :  { %15 = sbr.rel (!%p13_p5) target bundleno = 2 (0x2), region = 74 }

// kernel: didn_forward.39
= control target key start
LH: loop header
LB: loop body
LE: loop exit
PB: predicated region body
PF: predicated region fallthrough
CT: control target
= control target key end

     0   :  { %s1981_s17 = smov 0   ;;  %s1983_s18 = smov 0   ;;  %s2421_s0 = inlined_call_operand.vmem [shape: bf16[2,3,3,512], index: 0, kind: input, shape index: {}]   ;;  %s2422_s1 = inlined_call_operand.vmem [shape: bf16[1152,128], index: 1, kind: input, shape index: {}]   ;;  %s2423_s2 = inlined_call_operand.vmem [shape: f32[1,128], index: 2, kind: input, shape index: {}]   ;;  %s2424_s3 = inlined_call_operand.<no memory space> [shape: f32[1,1], index: 3, kind: input, shape index: {}]   ;;  %s2425_s4 = inlined_call_operand.vmem [shape: bf16[2,4,128], index: 4, kind: output, shape index: {}]  }
   0x1   :  { %9 = sst [smem:[#allocation2]] %s2424_s3  ;;  %s1985_s19 = smov 0  }
   0x2 LB: > { %s27_s3 = sadd.s32 1, %s1944_s18  ;;  %p1482_p0 = scmp.ge.s32.totalorder %s1948_s19, 1  ;;  %s1948_s19 = sphi %s1985_s19, %s15_s19   ;;  %s1944_s18 = sphi %s1983_s18, %s2429_s18   ;;  %s1940_s17 = sphi %s1981_s17, %s2428_s17  }
   0x3   : > { %p29_p1 = scmp.ge.s32.totalorder %s27_s3, 2  ;;  %p177_p2 = scmp.lt.s32.totalorder %s1948_s19, 3 }
   0x5   : > { %s2431_s3 = smov (%p29_p1, %s27_s3), 0  ;;  %p178_p3 = pnand %p1482_p0, %p177_p2 }
   0x6   : > { %v1852_v0 = vld [vmem:[%s2422_s1 + $0x40] sm:$0xff] (!%p178_p3)   ;;  %v1950_v1 = vmov (!%p178_p3), 0.0   ;;  %v1854_v3 = vld [vmem:[%s2422_s1 + $0x48] sm:$0xff] (!%p178_p3)   ;;  %vm1951_vm0 = vmmov (!%p178_p3), 0   ;;  %p205_p4 = scmp.lt.s32.totalorder (!%p178_p3), %s1940_s17, 1  ;;  %v1856_v5 = vld [vmem:[%s2422_s1 + $0x50] sm:$0xff] (!%p178_p3)   ;;  %v246_v9 = vlaneseq (!%p178_p3) }
   0x7   : > { %181 = sbr.rel (%p178_p3) target bundleno = 389 (0x185), region = 36  ;;  %1644 = vmatprep.subr.bf16.mxu0 (!%p178_p3), %v1950_v1  ;;  %1664 = vmatprep.subr.bf16.mxu1 (!%p178_p3), %v1950_v1  ;;  %v1853_v2 = vld [vmem:[%s2422_s1] sm:$0xff] (!%p178_p3)   ;;  %v1855_v4 = vld [vmem:[%s2422_s1 + $0x8] sm:$0xff] (!%p178_p3)   ;;  %v1857_v6 = vld [vmem:[%s2422_s1 + $0x10] sm:$0xff] (!%p178_p3)   ;;  %v1952_v13 = vmov (!%p178_p3), 1966171168  }
   0x8   : > { %1645 = vmatpush3.bf16.msra.mxu0 (!%p178_p3), %v1852_v0  ;;  %1660 = vmatprep.mubr.msk.bf16.mxu0 (!%p178_p3), %vm1951_vm0, %v1950_v1  ;;  %v1858_v7 = vld [vmem:[%s2422_s1 + $0x58] sm:$0xff] (!%p178_p3)   ;;  %v1860_v10 = vld [vmem:[%s2422_s1 + $0x60] sm:$0xff] (!%p178_p3)   ;;  %v1862_v12 = vld [vmem:[%s2422_s1 + $0x68] sm:$0xff] (!%p178_p3)   ;;  %v244_v14 = vunpack.c.l.s4 (!%p178_p3), %v1952_v13  ;;  %v247_v15 = vshrl.u32 (!%p178_p3), %v246_v9, 7  ;;  %vm485_vm1 = vsmask.f32 (!%p178_p3), 256 }
   0x9   : > { %1665 = vmatpush3.bf16.msra.mxu1 (!%p178_p3), %v1853_v2  ;;  %1646 = vmatprep.subr.bf16.mxu0 (!%p178_p3), %v1950_v1  ;;  %v1859_v8 = vld [vmem:[%s2422_s1 + $0x18] sm:$0xff] (!%p178_p3)   ;;  %v1861_v11 = vld [vmem:[%s2422_s1 + $0x20] sm:$0xff] (!%p178_p3)   ;;  %v1863_v16 = vld [vmem:[%s2422_s1 + $0x28] sm:$0xff] (!%p178_p3)   ;;  %vm486_vm2 = vsmask.f32 (!%p178_p3), 1284  ;;  %s1398_s6 = sld [smem:[#allocation2]] (!%p178_p3) }
   0xa   : > { %1666 = vmatprep.subr.bf16.mxu1 (!%p178_p3), %v1950_v1  ;;  %1680 = vmatprep.mubr.msk.bf16.mxu1 (!%p178_p3), %vm1951_vm0, %v1950_v1  ;;  %v245_v18 = vunpack.c.0.s8 (!%p178_p3), %v244_v14  ;;  %v1864_v21 = vld [vmem:[%s2422_s1 + $0x70] sm:$0xff] (!%p178_p3)   ;;  %v1866_v26 = vld [vmem:[%s2422_s1 + $0x78] sm:$0xff] (!%p178_p3)   ;;  %v1869_v34 = vld [vmem:[%s2422_s1 + $0x80] sm:$0xff] (!%p178_p3)   ;;  %vm488_vm3 = vsmask.f32 (!%p178_p3), 2312 }
   0xb   : > { %v1865_v23 = vld [vmem:[%s2422_s1 + $0x30] sm:$0xff] (!%p178_p3)   ;;  %v1867_v30 = vld [vmem:[%s2422_s1 + $0x38] sm:$0xff] (!%p178_p3)   ;;  %v1870_v36 = vld [vmem:[%s2422_s1 + $0xc0] sm:$0xff] (!%p178_p3)   ;;  %vm490_vm4 = vsmask.f32 (!%p178_p3), 3340 }
   0xc   : > { %1647 = vmatpush3.bf16.msra.mxu0 (!%p178_p3), %v1854_v3  ;;  %v2067_v20 = vsub.s32 (!%p178_p3), %v245_v18, %v247_v15  ;;  %v1871_v37 = vld [vmem:[%s2422_s1 + $0x88] sm:$0xff] (!%p178_p3)   ;;  %vm487_vm5 = vmor (!%p178_p3), %vm485_vm1, %vm486_vm2  ;;  %vm492_vm7 = vsmask.f32 (!%p178_p3), 4368  ;;  %v1873_v41 = vld [vmem:[%s2422_s1 + $0x90] sm:$0xff] (!%p178_p3)   ;;  %vm494_vm10 = vsmask.f32 (!%p178_p3), 5396 }
   0xd   : > { %1667 = vmatpush3.bf16.msra.mxu1 (!%p178_p3), %v1855_v4  ;;  %1648 = vmatprep.subr.bf16.mxu0 (!%p178_p3), %v1950_v1  ;;  %v1872_v38 = vld [vmem:[%s2422_s1 + $0xc8] sm:$0xff] (!%p178_p3)   ;;  %vm489_vm6 = vmor (!%p178_p3), %vm487_vm5, %vm488_vm3  ;;  %v1874_v42 = vld [vmem:[%s2422_s1 + $0xd0] sm:$0xff] (!%p178_p3)   ;;  %vm496_vm12 = vsmask.f32 (!%p178_p3), 6424  ;;  %vm498_vm14 = vsmask.f32 (!%p178_p3), 7452 }
   0xe   : > { %1668 = vmatprep.subr.bf16.mxu1 %v1950_v1  ;;  %s2433_s17 = smov (!%p205_p4, %s1940_s17), 1  ;;  %vm491_vm8 = vmor %vm489_vm6, %vm490_vm4  ;;  %v1875_v46 = vld [vmem:[%s2422_s1 + $0x98] sm:$0xff]   ;;  %v1877_v50 = vld [vmem:[%s2422_s1 + $0xa0] sm:$0xff]  }
   0xf   : > { %s1824_s10 = smul.u32 24, %s2433_s17  ;;  %vm493_vm9 = vmor %vm491_vm8, %vm492_vm7  ;;  %v1876_v48 = vld [vmem:[%s2422_s1 + $0xd8] sm:$0xff]   ;;  %v1878_v51 = vld [vmem:[%s2422_s1 + $0xe0] sm:$0xff]   ;;  %s1484_s8 = sshll.u32 %s2433_s17, 1 }
  0x10   : > { %1649 = vmatpush3.bf16.msra.mxu0 %v1856_v5  ;;  %vm495_vm11 = vmor %vm493_vm9, %vm494_vm10  ;;  %v1879_v57 = vld [vmem:[%s2422_s1 + $0xa8] sm:$0xff]   ;;  %v1881_v0 = vld [vmem:[%s2422_s1 + $0xb0] sm:$0xff]   ;;  %s216_s11 = scalar_lea.vmem %s2425_s4, %s1484_s8 }
  0x11   : > { %1669 = vmatpush3.bf16.msra.mxu1 %v1857_v6  ;;  %1650 = vmatprep.subr.bf16.mxu0 %v1950_v1  ;;  %s2053_s20 = scalar_lea.vmem %s2421_s0, %s1824_s10  ;;  %vm497_vm13 = vmor %vm495_vm11, %vm496_vm12  ;;  %v1880_v62 = vld [vmem:[%s2422_s1 + $0xe8] sm:$0xff]   ;;  %v1882_v3 = vld [vmem:[%s2422_s1 + $0xf0] sm:$0xff]  }
  0x12   : > { %1670 = vmatprep.subr.bf16.mxu1 %v1950_v1  ;;  %v222_v17 = vld [vmem:[%s2053_s20] sm:$0xff]  ;;  %v2065_v19 = vld [vmem:[%s2053_s20 + $0x8] sm:$0xff]  ;;  %vm2156_vm15 = vmor %vm497_vm13, %vm498_vm14 }
  0x13   : > { %v379_v22 = vcombine.low %v222_v17, %v2065_v19  ;;  %v2078_v24 = vrot.slane %v222_v17, %v2067_v20  ;;  %v2082_v25 = vrot.slane %v2065_v19, %v2067_v20  ;;  %v1883_v5 = vld [vmem:[%s2422_s1 + $0xb8] sm:$0xff]   ;;  %v1885_v9 = vld [vmem:[%s2422_s1 + $0x100] sm:$0xff]   ;;  %v1888_v13 = vld [vmem:[%s2422_s1 + $0x148] sm:$0xff]  }
  0x14   : > { %1651 = vmatpush3.bf16.msra.mxu0 %v1858_v7  ;;  %v1884_v7 = vld [vmem:[%s2422_s1 + $0xf8] sm:$0xff]   ;;  %v224_v14 = vld [vmem:[%s2053_s20 + $0x10] sm:$0xff]  ;;  %v1909_v56 = vld [vmem:[%s2422_s1 + $0x1a0] sm:$0xff]  }
  0x15   : > { %1671 = vmatpush3.bf16.msra.mxu1 %v1859_v8  ;;  %1652 = vmatprep.subr.bf16.mxu0 %v1950_v1  ;;  %v257_v27 = vrot.slane %v2078_v24, 1  ;;  %v258_v28 = vrot.slane %v2082_v25, 1  ;;  %v386_v29 = vrot.slane %v379_v22, %v2067_v20  ;;  %v762_v39 = vrot.slane %v2078_v24, 3  ;;  %v1889_v17 = vld [vmem:[%s2422_s1 + $0x110] sm:$0xff]  }
  0x16   : > { %1672 = vmatprep.subr.bf16.mxu1 %v1950_v1  ;;  %v763_v40 = vrot.slane %v2082_v25, 3  ;;  %v483_v44 = vcombine.high %v2078_v24, %v2078_v24  ;;  %v484_v47 = vcombine.high %v2082_v25, %v2082_v25  ;;  %v501_v52 = vshrl.u32 %v2078_v24, 16  ;;  %v1890_v18 = vld [vmem:[%s2422_s1 + $0x150] sm:$0xff]  }
  0x17   : > { %v275_v31 = vcombine.low %v257_v27, %v258_v28  ;;  %v393_v33 = vrot.slane %v386_v29, %v2067_v20  ;;  %v510_v54 = vshrl.u32 %v2082_v25, 16  ;;  %v639_v60 = vrot.slane %v2078_v24, 2  ;;  %v1891_v29 = vld [vmem:[%s2422_s1 + $0x118] sm:$0xff]  }
  0x18   : > { %1653 = vmatpush3.bf16.msra.mxu0 %v1860_v10  ;;  %v780_v43 = vcombine.low %v762_v39, %v763_v40  ;;  %v506_v53 = vshll.u32 %v483_v44, 16  ;;  %v515_v55 = vshll.u32 %v484_v47, 16  ;;  %v640_v61 = vrot.slane %v2082_v25, 2  ;;  %v1896_v40 = vld [vmem:[%s2422_s1 + $0x168] sm:$0xff]   ;;  %v1899_v44 = vld [vmem:[%s2422_s1 + $0x138] sm:$0xff]   ;;  %v1901_v47 = vld [vmem:[%s2422_s1 + $0x180] sm:$0xff]  }
  0x19   : > { %1673 = vmatpush3.bf16.msra.mxu1 %v1861_v11  ;;  %1654 = vmatprep.subr.bf16.mxu0 %v1950_v1  ;;  %v282_v32 = vrot.slane %v275_v31, %v2067_v20  ;;  %v1886_v11 = vld [vmem:[%s2422_s1 + $0x140] sm:$0xff]   ;;  %v1025_v15 = vcombine.low %v2065_v19, %v224_v14 }
  0x1a   : > { %1674 = vmatprep.subr.bf16.mxu1 %v1950_v1  ;;  %v787_v45 = vrot.slane %v780_v43, %v2067_v20  ;;  %v2166_v58 = vsel %vm2156_vm15, %v501_v52, %v506_v53  ;;  %v2170_v59 = vsel %vm2156_vm15, %v510_v54, %v515_v55  ;;  %v657_v2 = vcombine.low %v639_v60, %v640_v61  ;;  %v1898_v43 = vld [vmem:[%s2422_s1 + $0x170] sm:$0xff]   ;;  %v1904_v52 = vld [vmem:[%s2422_s1 + $0x1c8] sm:$0xff]   ;;  %v1907_v54 = vld [vmem:[%s2422_s1 + $0x198] sm:$0xff]  }
  0x1b   : > { %v289_v35 = vrot.slane %v282_v32, %v2067_v20  ;;  %v534_v63 = vcombine.low %v2166_v58, %v2170_v59  ;;  %v886_v39 = vrot.slane %v2170_v59, 2  ;;  %v1906_v53 = vld [vmem:[%s2422_s1 + $0x1d0] sm:$0xff]   ;;  %v1908_v55 = vld [vmem:[%s2422_s1 + $0x1d8] sm:$0xff]  }
  0x1c   : > { %1655 = vmatpush3.bf16.msra.mxu0 %v1862_v12  ;;  %v2144_v49 = vrot.slane %v787_v45, %v2067_v20  ;;  %v664_v6 = vrot.slane %v657_v2, %v2067_v20  ;;  %v1887_v12 = vld [vmem:[%s2422_s1 + $0x108] sm:$0xff]   ;;  %v1913_v60 = vld [vmem:[%s2422_s1 + $0x1b0] sm:$0xff]  }
  0x1d   : > { %1675 = vmatpush3.bf16.msra.mxu1 %v1863_v16  ;;  %1656 = vmatprep.subr.bf16.mxu0 %v1950_v1  ;;  %v541_v4 = vrot.slane %v534_v63, %v2067_v20  ;;  %v1136_v16 = vrot.slane %v224_v14, %v2067_v20  ;;  %v1914_v61 = vld [vmem:[%s2422_s1 + $0x1f0] sm:$0xff]   ;;  %v1916_v63 = vld [vmem:[%s2422_s1 + $0x1f8] sm:$0xff]   ;;  %v1919_v2 = vld [vmem:[%s2422_s1 + $0x208] sm:$0xff]  }
  0x1e   : > { %1676 = vmatprep.subr.bf16.mxu1 %v1950_v1  ;;  %v671_v10 = vrot.slane %v664_v6, %v2067_v20  ;;  %v1923_v6 = vld [vmem:[%s2422_s1 + $0x228] sm:$0xff]  }
  0x1f   : > { %v548_v8 = vrot.slane %v541_v4, %v2067_v20  ;;  %v1137_v22 = vrot.slane %v1136_v16, 1  ;;  %v1261_v19 = vshrl.u32 %v1136_v16, 16  ;;  %v1921_v4 = vld [vmem:[%s2422_s1 + $0x218] sm:$0xff]  }
  0x20   : > { %1657 = vmatpush3.bf16.msra.mxu0 %v1864_v21  ;;  %v2232_v21 = vrot.slane %v1025_v15, %v2067_v20 }
  0x21   : > { %1677 = vmatpush3.bf16.msra.mxu1 %v1865_v23  ;;  %1658 = vmatprep.subr.bf16.mxu0 %v1950_v1  ;;  %v1259_v23 = vcombine.high %v1136_v16, %v1136_v16 }
  0x22   : > { %1678 = vmatprep.subr.bf16.mxu1 %v1950_v1  ;;  %v1039_v24 = vrot.slane %v2232_v21, %v2067_v20 }
  0x23   : > { %v1266_v27 = vshll.u32 %v1259_v23, 16 }
  0x24   : > { %1659 = vmatpush3.bf16.msra.mxu0 %v1866_v26  ;;  %v1154_v26 = vcombine.low %v258_v28, %v1137_v22 }
  0x25   : > { %1679 = vmatpush3.bf16.msra.mxu1 %v1867_v30  ;;  %1684 = vmatprep.subr.bf16.mxu0 %v1950_v1  ;;  %v1892_v30 = vld [vmem:[%s2422_s1 + $0x158] sm:$0xff]   ;;  %v1268_v32 = vsel %vm2156_vm15, %v1261_v19, %v1266_v27 }
  0x26   : > { %1704 = vmatprep.subr.bf16.mxu1 %v1950_v1  ;;  %v1161_v31 = vrot.slane %v1154_v26, %v2067_v20  ;;  %v1285_v25 = vcombine.low %v2170_v59, %v1268_v32  ;;  %v1912_v59 = vld [vmem:[%s2422_s1 + $0x1e8] sm:$0xff]  }
  0x27   : > { %1661 = vmatmul.mubr.bf16.vlgmr.msra.gmra.mrb[0].mxu0 %v289_v35  ;;  %v1894_v35 = vld [vmem:[%s2422_s1 + $0x160] sm:$0xff]  }
  0x28   : > { %1681 = vmatmul.mubr.bf16.vlgmr.msra.gmra.mrb[0].mxu1 %v393_v33  ;;  %1685 = vmatpush3.bf16.msra.mxu0 %v1869_v34  ;;  %v2252_v28 = vrot.slane %v1161_v31, %v2067_v20  ;;  %v1893_v33 = vld [vmem:[%s2422_s1 + $0x120] sm:$0xff]   ;;  %v2258_v34 = vrot.slane %v1285_v25, %v2067_v20 }
  0x29   : > { %1705 = vmatpush3.bf16.msra.mxu1 %v1870_v36  ;;  %1686 = vmatprep.subr.bf16.mxu0 %v1950_v1 }
  0x2a   : > { %1706 = vmatprep.subr.bf16.mxu1 %v1950_v1  ;;  %1700 = vmatprep.mubr.msk.bf16.mxu0 %vm1951_vm0, %v1950_v1  ;;  %v1299_v36 = vrot.slane %v2258_v34, %v2067_v20 }
  0x2b   : > { %1720 = vmatprep.mubr.msk.bf16.mxu1 %vm1951_vm0, %v1950_v1 }
  0x2c   : > { %1687 = vmatpush3.bf16.msra.mxu0 %v1871_v37  ;;  %v1895_v37 = vld [vmem:[%s2422_s1 + $0x128] sm:$0xff]  }
  0x2d   : > { %1707 = vmatpush3.bf16.msra.mxu1 %v1872_v38  ;;  %1688 = vmatprep.subr.bf16.mxu0 %v1950_v1  ;;  %v885_v38 = vrot.slane %v2166_v58, 2  ;;  %v1911_v58 = vld [vmem:[%s2422_s1 + $0x1a8] sm:$0xff]  }
  0x2e   : > { %1708 = vmatprep.subr.bf16.mxu1 %v1950_v1 }
  0x30   : > { %1689 = vmatpush3.bf16.msra.mxu0 %v1873_v41  ;;  %v1897_v41 = vld [vmem:[%s2422_s1 + $0x130] sm:$0xff]  }
  0x31   : > { %1709 = vmatpush3.bf16.msra.mxu1 %v1874_v42  ;;  %1690 = vmatprep.subr.bf16.mxu0 %v1950_v1  ;;  %v903_v42 = vcombine.low %v885_v38, %v886_v39 }
  0x32   : > { %1710 = vmatprep.subr.bf16.mxu1 %v1950_v1 }
  0x33   : > { %v910_v45 = vrot.slane %v903_v42, %v2067_v20 }
  0x34   : > { %1691 = vmatpush3.bf16.msra.mxu0 %v1875_v46  ;;  %v1900_v46 = vld [vmem:[%s2422_s1 + $0x178] sm:$0xff]  }
  0x35   : > { %1711 = vmatpush3.bf16.msra.mxu1 %v1876_v48  ;;  %1692 = vmatprep.subr.bf16.mxu0 %v1950_v1  ;;  %v917_v48 = vrot.slane %v910_v45, %v2067_v20 }
  0x36   : > { %1712 = vmatprep.subr.bf16.mxu1 %v1950_v1 }
  0x38   : > { %1693 = vmatpush3.bf16.msra.mxu0 %v1877_v50  ;;  %v1902_v50 = vld [vmem:[%s2422_s1 + $0x1c0] sm:$0xff]  }
  0x39   : > { %1713 = vmatpush3.bf16.msra.mxu1 %v1878_v51  ;;  %1694 = vmatprep.subr.bf16.mxu0 %v1950_v1  ;;  %v1903_v51 = vld [vmem:[%s2422_s1 + $0x188] sm:$0xff]  }
  0x3a   : > { %1714 = vmatprep.subr.bf16.mxu1 %v1950_v1 }
  0x3c   : > { %1695 = vmatpush3.bf16.msra.mxu0 %v1879_v57  ;;  %v1910_v57 = vld [vmem:[%s2422_s1 + $0x1e0] sm:$0xff]  }
  0x3d   : > { %1715 = vmatpush3.bf16.msra.mxu1 %v1880_v62  ;;  %1696 = vmatprep.subr.bf16.mxu0 %v1950_v1  ;;  %v1915_v62 = vld [vmem:[%s2422_s1 + $0x1b8] sm:$0xff]  }
  0x3e   : > { %1716 = vmatprep.subr.bf16.mxu1 %v1950_v1 }
  0x40   : > { %1697 = vmatpush3.bf16.msra.mxu0 %v1881_v0  ;;  %v1918_v0 = vld [vmem:[%s2422_s1 + $0x200] sm:$0xff]  }
  0x41   : > { %1717 = vmatpush3.bf16.msra.mxu1 %v1882_v3  ;;  %1698 = vmatprep.subr.bf16.mxu0 %v1950_v1  ;;  %v1920_v3 = vld [vmem:[%s2422_s1 + $0x210] sm:$0xff]  }
  0x42   : > { %1718 = vmatprep.subr.bf16.mxu1 %v1950_v1 }
  0x44   : > { %1699 = vmatpush3.bf16.msra.mxu0 %v1883_v5  ;;  %v1922_v5 = vld [vmem:[%s2422_s1 + $0x220] sm:$0xff]  }
  0x45   : > { %1719 = vmatpush3.bf16.msra.mxu1 %v1884_v7  ;;  %1724 = vmatprep.subr.bf16.mxu0 %v1950_v1  ;;  %v1924_v7 = vld [vmem:[%s2422_s1 + $0x230] sm:$0xff]  }
  0x46   : > { %1744 = vmatprep.subr.bf16.mxu1 %v1950_v1 }
  0x47   : > { %1701 = vmatmul.mubr.bf16.vlgmr.msra.gmra.mrb[4].mxu0 %v548_v8  ;;  %v1925_v8 = vld [vmem:[%s2422_s1 + $0x238] sm:$0xff]  }
  0x48   : > { %1725 = vmatpush3.bf16.msra.mxu0 %v1885_v9  ;;  %1721 = vmatmul.mubr.bf16.vlgmr.msra.gmra.mrb[4].mxu1 %v671_v10 }
  0x49   : > { %1745 = vmatpush3.bf16.msra.mxu1 %v1886_v11  ;;  %1726 = vmatprep.subr.bf16.mxu0 %v1950_v1 }
  0x4a   : > { %1746 = vmatprep.subr.bf16.mxu1 %v1950_v1  ;;  %1740 = vmatprep.mubr.msk.bf16.mxu0 %vm1951_vm0, %v1950_v1 }
  0x4b   : > { %1760 = vmatprep.mubr.msk.bf16.mxu1 %vm1951_vm0, %v1950_v1 }
  0x4c   : > { %1727 = vmatpush3.bf16.msra.mxu0 %v1887_v12 }
  0x4d   : > { %1747 = vmatpush3.bf16.msra.mxu1 %v1888_v13  ;;  %1728 = vmatprep.subr.bf16.mxu0 %v1950_v1 }
  0x4e   : > { %1748 = vmatprep.subr.bf16.mxu1 %v1950_v1 }
  0x50   : > { %1729 = vmatpush3.bf16.msra.mxu0 %v1889_v17 }
  0x51   : > { %1749 = vmatpush3.bf16.msra.mxu1 %v1890_v18  ;;  %1730 = vmatprep.subr.bf16.mxu0 %v1950_v1 }
  0x52   : > { %1750 = vmatprep.subr.bf16.mxu1 %v1950_v1 }
  0x54   : > { %1731 = vmatpush3.bf16.msra.mxu0 %v1891_v29 }
  0x55   : > { %1751 = vmatpush3.bf16.msra.mxu1 %v1892_v30  ;;  %1732 = vmatprep.subr.bf16.mxu0 %v1950_v1 }
  0x56   : > { %1752 = vmatprep.subr.bf16.mxu1 %v1950_v1 }
  0x58   : > { %1733 = vmatpush3.bf16.msra.mxu0 %v1893_v33 }
  0x59   : > { %1753 = vmatpush3.bf16.msra.mxu1 %v1894_v35  ;;  %1734 = vmatprep.subr.bf16.mxu0 %v1950_v1 }
  0x5a   : > { %1754 = vmatprep.subr.bf16.mxu1 %v1950_v1 }
  0x5c   : > { %1735 = vmatpush3.bf16.msra.mxu0 %v1895_v37 }
  0x5d   : > { %1755 = vmatpush3.bf16.msra.mxu1 %v1896_v40  ;;  %1736 = vmatprep.subr.bf16.mxu0 %v1950_v1 }
  0x5e   : > { %1756 = vmatprep.subr.bf16.mxu1 %v1950_v1 }
  0x60   : > { %1737 = vmatpush3.bf16.msra.mxu0 %v1897_v41 }
  0x61   : > { %1757 = vmatpush3.bf16.msra.mxu1 %v1898_v43  ;;  %1738 = vmatprep.subr.bf16.mxu0 %v1950_v1 }
  0x62   : > { %1758 = vmatprep.subr.bf16.mxu1 %v1950_v1 }
  0x64   : > { %1739 = vmatpush3.bf16.msra.mxu0 %v1899_v44 }
  0x65   : > { %1759 = vmatpush3.bf16.msra.mxu1 %v1900_v46  ;;  %1764 = vmatprep.subr.bf16.mxu0 %v1950_v1 }
  0x66   : > { %1784 = vmatprep.subr.bf16.mxu1 %v1950_v1 }
  0x67   : > { %1741 = vmatmul.mubr.bf16.vlgmr.msra.gmra.mrb[8].mxu0 %v2144_v49  ;;  %v1905_v49 = vld [vmem:[%s2422_s1 + $0x190] sm:$0xff]  }
  0x68   : > { %1765 = vmatpush3.bf16.msra.mxu0 %v1901_v47  ;;  %1761 = vmatmul.mubr.bf16.vlgmr.msra.gmra.mrb[8].mxu1 %v917_v48  ;;  %v1560_v48 = vld [vmem:[%s2423_s2] ss:$0 sm:$0xff] }
  0x69   : > { %1785 = vmatpush3.bf16.msra.mxu1 %v1902_v50  ;;  %1766 = vmatprep.subr.bf16.mxu0 %v1950_v1 }
  0x6a   : > { %1786 = vmatprep.subr.bf16.mxu1 %v1950_v1  ;;  %1780 = vmatprep.mubr.msk.bf16.mxu0 %vm1951_vm0, %v1950_v1 }
  0x6b   : > { %1800 = vmatprep.mubr.msk.bf16.mxu1 %vm1951_vm0, %v1950_v1 }
  0x6c   : > { %1767 = vmatpush3.bf16.msra.mxu0 %v1903_v51 }
  0x6d   : > { %1787 = vmatpush3.bf16.msra.mxu1 %v1904_v52  ;;  %1768 = vmatprep.subr.bf16.mxu0 %v1950_v1  ;;  %v1400_v52 = vstv %s1398_s6 }
  0x6e   : > { %1788 = vmatprep.subr.bf16.mxu1 %v1950_v1 }
  0x70   : > { %1769 = vmatpush3.bf16.msra.mxu0 %v1905_v49 }
  0x71   : > { %1789 = vmatpush3.bf16.msra.mxu1 %v1906_v53  ;;  %1770 = vmatprep.subr.bf16.mxu0 %v1950_v1 }
  0x72   : > { %1790 = vmatprep.subr.bf16.mxu1 %v1950_v1 }
  0x74   : > { %1771 = vmatpush3.bf16.msra.mxu0 %v1907_v54 }
  0x75   : > { %1791 = vmatpush3.bf16.msra.mxu1 %v1908_v55  ;;  %1772 = vmatprep.subr.bf16.mxu0 %v1950_v1 }
  0x76   : > { %1792 = vmatprep.subr.bf16.mxu1 %v1950_v1 }
  0x78   : > { %1773 = vmatpush3.bf16.msra.mxu0 %v1909_v56 }
  0x79   : > { %1793 = vmatpush3.bf16.msra.mxu1 %v1910_v57  ;;  %1774 = vmatprep.subr.bf16.mxu0 %v1950_v1 }
  0x7a   : > { %1794 = vmatprep.subr.bf16.mxu1 %v1950_v1 }
  0x7c   : > { %1775 = vmatpush3.bf16.msra.mxu0 %v1911_v58 }
  0x7d   : > { %1795 = vmatpush3.bf16.msra.mxu1 %v1912_v59  ;;  %1776 = vmatprep.subr.bf16.mxu0 %v1950_v1 }
  0x7e   : > { %1796 = vmatprep.subr.bf16.mxu1 %v1950_v1 }
  0x80   : > { %1777 = vmatpush3.bf16.msra.mxu0 %v1913_v60 }
  0x81   : > { %1797 = vmatpush3.bf16.msra.mxu1 %v1914_v61  ;;  %1778 = vmatprep.subr.bf16.mxu0 %v1950_v1 }
  0x82   : > { %1798 = vmatprep.subr.bf16.mxu1 %v1950_v1 }
  0x84   : > { %1779 = vmatpush3.bf16.msra.mxu0 %v1915_v62 }
  0x85   : > { %1799 = vmatpush3.bf16.msra.mxu1 %v1916_v63  ;;  %1804 = vmatprep.subr.bf16.mxu0 %v1950_v1 }
  0x87   : > { %1781 = vmatmul.mubr.bf16.vlgmr.msra.gmra.mrb[12].mxu0 %v1039_v24 }
  0x88   : > { %1805 = vmatpush3.bf16.msra.mxu0 %v1918_v0  ;;  %1801 = vmatmul.mubr.bf16.vlgmr.msra.gmra.mrb[12].mxu1 %v2252_v28 }
  0x89   : > { %1806 = vmatprep.subr.bf16.mxu0 %v1950_v1  ;;  %1820 = vmatprep.mubr.msk.bf16.mxu0 %vm1951_vm0, %v1950_v1 }
  0x8c   : > { %1807 = vmatpush3.bf16.msra.mxu0 %v1919_v2 }
  0x8d   : > { %1808 = vmatprep.subr.bf16.mxu0 %v1950_v1 }
  0x90   : > { %1809 = vmatpush3.bf16.msra.mxu0 %v1920_v3 }
  0x91   : > { %1810 = vmatprep.subr.bf16.mxu0 %v1950_v1 }
  0x94   : > { %1811 = vmatpush3.bf16.msra.mxu0 %v1921_v4 }
  0x95   : > { %1812 = vmatprep.subr.bf16.mxu0 %v1950_v1 }
  0x98   : > { %1813 = vmatpush3.bf16.msra.mxu0 %v1922_v5 }
  0x99   : > { %1814 = vmatprep.subr.bf16.mxu0 %v1950_v1 }
  0x9c   : > { %1815 = vmatpush3.bf16.msra.mxu0 %v1923_v6 }
  0x9d   : > { %1816 = vmatprep.subr.bf16.mxu0 %v1950_v1 }
  0xa0   : > { %1817 = vmatpush3.bf16.msra.mxu0 %v1924_v7 }
  0xa1   : > { %1818 = vmatprep.subr.bf16.mxu0 %v1950_v1 }
  0xa4   : > { %1819 = vmatpush3.bf16.msra.mxu0 %v1925_v8 }
  0xa7   : > { %1821 = vmatmul.mubr.bf16.vlgmr.msra.gmra.mrb[16].mxu0 %v1299_v36 }
  0xfa   : > { %v373_v9 = vpop.f32.mrb[0].mxu0 }
  0xfb   : > { %v1662_v10 = vpop.f32.mrb[1].mxu0  ;;  %v477_v11 = vpop.f32.mrb[0].mxu1 }
  0xfc   : > { %v478_v12 = vadd.f32 %v477_v11, %v373_v9  ;;  %v376_v13 = vpop.f32.mrb[2].mxu0  ;;  %v1682_v14 = vpop.f32.mrb[1].mxu1 }
  0xfd   : > { %v1663_v15 = vpop.f32.mrb[3].mxu0  ;;  %v480_v16 = vpop.f32.mrb[2].mxu1 }
  0xfe   : > { %v1683_v17 = vpop.f32.mrb[3].mxu1 }
 0x11a   : > { %v632_v18 = vpop.f32.mrb[4].mxu0 }
 0x11b   : > { %v638_v21 = vadd.f32 %v632_v18, %v478_v12  ;;  %v1702_v22 = vpop.f32.mrb[5].mxu0  ;;  %v755_v23 = vpop.f32.mrb[4].mxu1 }
 0x11c   : > { %v635_v19 = vpop.f32.mrb[6].mxu0  ;;  %v1722_v1 = vpop.f32.mrb[5].mxu1 }
 0x11d   : > { %v761_v24 = vadd.f32 %v755_v23, %v638_v21  ;;  %v1703_v26 = vpop.f32.mrb[7].mxu0  ;;  %v758_v27 = vpop.f32.mrb[6].mxu1 }
 0x11e   : > { %v1723_v20 = vpop.f32.mrb[7].mxu1 }
 0x13a   : > { %v878_v29 = vpop.f32.mrb[8].mxu0 }
 0x13b   : > { %v884_v30 = vadd.f32 %v878_v29, %v761_v24  ;;  %v1742_v31 = vpop.f32.mrb[9].mxu0  ;;  %v1001_v32 = vpop.f32.mrb[8].mxu1 }
 0x13c   : > { %v881_v25 = vpop.f32.mrb[10].mxu0  ;;  %v1762_v28 = vpop.f32.mrb[9].mxu1 }
 0x13d   : > { %v1007_v33 = vadd.f32 %v1001_v32, %v884_v30  ;;  %v1743_v34 = vpop.f32.mrb[11].mxu0  ;;  %v1004_v35 = vpop.f32.mrb[10].mxu1 }
 0x13e   : > { %v1763_v36 = vpop.f32.mrb[11].mxu1 }
 0x15a   : > { %v1123_v37 = vpop.f32.mrb[12].mxu0 }
 0x15b   : > { %v1129_v38 = vadd.f32 %v1123_v37, %v1007_v33  ;;  %v1782_v39 = vpop.f32.mrb[13].mxu0  ;;  %v1252_v40 = vpop.f32.mrb[12].mxu1 }
 0x15c   : > { %v1126_v41 = vpop.f32.mrb[14].mxu0  ;;  %v1802_v42 = vpop.f32.mrb[13].mxu1 }
 0x15d   : > { %v1258_v43 = vadd.f32 %v1252_v40, %v1129_v38  ;;  %v1783_v44 = vpop.f32.mrb[15].mxu0  ;;  %v1255_v45 = vpop.f32.mrb[14].mxu1 }
 0x15e   : > { %v1803_v46 = vpop.f32.mrb[15].mxu1 }
 0x17a   : > { %v1383_v47 = vpop.f32.mrb[16].mxu0 }
 0x17b   : > { %v1389_v50 = vadd.f32 %v1383_v47, %v1258_v43  ;;  %v1822_v51 = vpop.f32.mrb[17].mxu0 }
 0x17c   : > { %v1386_v49 = vpop.f32.mrb[18].mxu0 }
 0x17d   : > { %v1397_v53 = vadd.f32 %v1560_v48, %v1389_v50  ;;  %v1823_v54 = vpop.f32.mrb[19].mxu0 }
 0x17f   : > { %vm1399_vm0 = vcmp.ge.f32.partialorder %v1397_v53, 0.0  ;;  %v1401_v55 = vmul.f32 %v1400_v52, %v1397_v53 }
 0x181   : > { %v1402_v56 = vsel %vm1399_vm0, %v1397_v53, %v1401_v55 }
 0x182   : > { %v1403_v57 = vpack.c.bf16 %v1402_v56, %v1402_v56 }
 0x184   : > { %1404 = vst [vmem:[%s216_s11] sm:$0x3] %v1403_v57 }
 0x185 PF: > { %s15_s19 = sadd.s32 1, %s1948_s19   ;;  %s2428_s17 = smov %s1944_s18 }
 0x186   : > { %p12_p5 = scmp.ge.s32.totalorder %s15_s19, 4   ;;  %s2429_s18 = smov %s2431_s3 }
 0x188   :  { %14 = sbr.rel (!%p12_p5) target bundleno = 2 (0x2), region = 67 }

// kernel: didn_forward.41
= control target key start
LH: loop header
LB: loop body
LE: loop exit
PB: predicated region body
PF: predicated region fallthrough
CT: control target
= control target key end

     0   :  { %v181_v0 = vmov 0.0   ;;  %vm182_vm0 = vmmov 0   ;;  %s236_s1 = inlined_call_operand.vmem [shape: bf16[128,128], index: 1, kind: input, shape index: {}]   ;;  %s237_s0 = inlined_call_operand.vmem [shape: bf16[8,128], index: 0, kind: input, shape index: {}]   ;;  %s238_s2 = inlined_call_operand.vmem [shape: f32[1,128], index: 2, kind: input, shape index: {}]   ;;  %s239_s3 = inlined_call_operand.vmem [shape: bf16[8,128], index: 3, kind: output, shape index: {}]  }
   0x1   :  { %151 = vmatprep.subr.bf16.mxu0 %v181_v0  ;;  %v173_v1 = vld [vmem:[%s236_s1] sm:$0xff]   ;;  %167 = vmatprep.mubr.msk.bf16.mxu0 %vm182_vm0, %v181_v0  ;;  %v174_v2 = vld [vmem:[%s236_s1 + $0x8] sm:$0xff]   ;;  %v175_v3 = vld [vmem:[%s236_s1 + $0x10] sm:$0xff]  }
   0x2   :  { %152 = vmatpush3.bf16.msra.mxu0 %v173_v1  ;;  %v176_v4 = vld [vmem:[%s236_s1 + $0x18] sm:$0xff]   ;;  %v177_v5 = vld [vmem:[%s236_s1 + $0x20] sm:$0xff]   ;;  %v178_v6 = vld [vmem:[%s236_s1 + $0x28] sm:$0xff]  }
   0x3   :  { %153 = vmatprep.subr.bf16.mxu0 %v181_v0  ;;  %v179_v7 = vld [vmem:[%s236_s1 + $0x30] sm:$0xff]   ;;  %v180_v8 = vld [vmem:[%s236_s1 + $0x38] sm:$0xff]   ;;  %v15_v9 = vld [vmem:[%s237_s0] sm:$0xf] }
   0x4   :  { %v133_v10 = vld [vmem:[%s238_s2] ss:$0 sm:$0xff] }
   0x6   :  { %154 = vmatpush3.bf16.msra.mxu0 %v174_v2 }
   0x7   :  { %155 = vmatprep.subr.bf16.mxu0 %v181_v0 }
   0xa   :  { %156 = vmatpush3.bf16.msra.mxu0 %v175_v3 }
   0xb   :  { %157 = vmatprep.subr.bf16.mxu0 %v181_v0 }
   0xe   :  { %158 = vmatpush3.bf16.msra.mxu0 %v176_v4 }
   0xf   :  { %159 = vmatprep.subr.bf16.mxu0 %v181_v0 }
  0x12   :  { %160 = vmatpush3.bf16.msra.mxu0 %v177_v5 }
  0x13   :  { %161 = vmatprep.subr.bf16.mxu0 %v181_v0 }
  0x16   :  { %162 = vmatpush3.bf16.msra.mxu0 %v178_v6 }
  0x17   :  { %163 = vmatprep.subr.bf16.mxu0 %v181_v0 }
  0x1a   :  { %164 = vmatpush3.bf16.msra.mxu0 %v179_v7 }
  0x1b   :  { %165 = vmatprep.subr.bf16.mxu0 %v181_v0 }
  0x1e   :  { %166 = vmatpush3.bf16.msra.mxu0 %v180_v8 }
  0x21   :  { %168 = vmatmul.mubr.bf16.vlgmr.msra.gmra.mrb[0].mxu0 %v15_v9 }
  0xf4   :  { %v121_v11 = vpop.f32.mrb[0].mxu0 }
  0xf5   :  { %v122_v12 = vadd.f32 %v133_v10, %v121_v11  ;;  %v169_v13 = vpop.f32.mrb[1].mxu0 }
  0xf6   :  { %v124_v14 = vpop.f32.mrb[2].mxu0 }
  0xf7   :  { %v127_v15 = vpack.c.bf16 %v122_v12, %v122_v12  ;;  %v170_v16 = vpop.f32.mrb[3].mxu0 }
  0xf9   :  { %128 = vst [vmem:[%s239_s3] sm:$0xf] %v127_v15 }

// kernel: didn_forward.44
= control target key start
LH: loop header
LB: loop body
LE: loop exit
PB: predicated region body
PF: predicated region fallthrough
CT: control target
= control target key end

     0   :  { %s429_s12 = smov 0   ;;  %s473_s0 = inlined_call_operand.vmem [shape: bf16[32,128], index: 0, kind: input, shape index: {}]   ;;  %s474_s1 = inlined_call_operand.vmem [shape: bf16[128,128], index: 1, kind: input, shape index: {}]   ;;  %s475_s2 = inlined_call_operand.vmem [shape: f32[1,128], index: 2, kind: input, shape index: {}]   ;;  %s476_s3 = inlined_call_operand.vmem [shape: bf16[32,128], index: 3, kind: output, shape index: {}]  }
   0x1 LB: > { %s334_s13 = sadd.s32 4294967295, %s405_s12   ;;  %p338_p0 = scmp.ge.s32.totalorder %s405_s12, 1  ;;  %s405_s12 = sphi %s429_s12, %s13_s12  }
   0x2   : > { %p136_p1 = scmp.lt.s32.totalorder %s405_s12, 5 }
   0x4   : > { %p137_p2 = pnand %p338_p0, %p136_p1 }
   0x5   : > { %v391_v0 = vld [vmem:[%s474_s1] sm:$0xff] (!%p137_p2)   ;;  %v407_v1 = vmov (!%p137_p2), 0.0   ;;  %v392_v2 = vld [vmem:[%s474_s1 + $0x8] sm:$0xff] (!%p137_p2)   ;;  %vm408_vm0 = vmmov (!%p137_p2), 0   ;;  %v393_v3 = vld [vmem:[%s474_s1 + $0x10] sm:$0xff] (!%p137_p2)   ;;  %p158_p3 = scmp.lt.s32.totalorder (!%p137_p2), %s334_s13, 3 }
   0x6   : > { %140 = sbr.rel (%p137_p2) target bundleno = 255 (0xff), region = 32  ;;  %361 = vmatprep.subr.bf16.mxu0 (!%p137_p2), %v407_v1  ;;  %377 = vmatprep.mubr.msk.bf16.mxu0 (!%p137_p2), %vm408_vm0, %v407_v1  ;;  %v394_v4 = vld [vmem:[%s474_s1 + $0x18] sm:$0xff] (!%p137_p2)   ;;  %v395_v5 = vld [vmem:[%s474_s1 + $0x20] sm:$0xff] (!%p137_p2)   ;;  %v396_v6 = vld [vmem:[%s474_s1 + $0x28] sm:$0xff] (!%p137_p2)  }
   0x7   : > { %362 = vmatpush3.bf16.msra.mxu0 (!%p137_p2), %v391_v0  ;;  %v397_v7 = vld [vmem:[%s474_s1 + $0x30] sm:$0xff] (!%p137_p2)   ;;  %v398_v8 = vld [vmem:[%s474_s1 + $0x38] sm:$0xff] (!%p137_p2)   ;;  %v341_v10 = vld [vmem:[%s475_s2] ss:$0 sm:$0xff] (!%p137_p2) }
   0x8   : > { %363 = vmatprep.subr.bf16.mxu0 (!%p137_p2), %v407_v1 }
   0xb   : > { %364 = vmatpush3.bf16.msra.mxu0 (!%p137_p2), %v392_v2 }
   0xc   : > { %365 = vmatprep.subr.bf16.mxu0 (!%p137_p2), %v407_v1 }
   0xd   : > { %s478_s13 = smov (!%p158_p3, %s334_s13), 3 }
   0xe   : > { %s339_s28 = sshll.u32 %s478_s13, 2 }
   0xf   : > { %366 = vmatpush3.bf16.msra.mxu0 %v393_v3  ;;  %s161_s6 = scalar_lea.vmem %s473_s0, %s339_s28  ;;  %s165_s11 = scalar_lea.vmem %s476_s3, %s339_s28 }
  0x10   : > { %367 = vmatprep.subr.bf16.mxu0 %v407_v1  ;;  %v167_v9 = vld [vmem:[%s161_s6] sm:$0xf] }
  0x13   : > { %368 = vmatpush3.bf16.msra.mxu0 %v394_v4 }
  0x14   : > { %369 = vmatprep.subr.bf16.mxu0 %v407_v1 }
  0x17   : > { %370 = vmatpush3.bf16.msra.mxu0 %v395_v5 }
  0x18   : > { %371 = vmatprep.subr.bf16.mxu0 %v407_v1 }
  0x1b   : > { %372 = vmatpush3.bf16.msra.mxu0 %v396_v6 }
  0x1c   : > { %373 = vmatprep.subr.bf16.mxu0 %v407_v1 }
  0x1f   : > { %374 = vmatpush3.bf16.msra.mxu0 %v397_v7 }
  0x20   : > { %375 = vmatprep.subr.bf16.mxu0 %v407_v1 }
  0x23   : > { %376 = vmatpush3.bf16.msra.mxu0 %v398_v8 }
  0x26   : > { %378 = vmatmul.mubr.bf16.vlgmr.msra.gmra.mrb[0].mxu0 %v167_v9 }
  0xf9   : > { %v273_v11 = vpop.f32.mrb[0].mxu0 }
  0xfa   : > { %v274_v12 = vadd.f32 %v341_v10, %v273_v11  ;;  %v379_v13 = vpop.f32.mrb[1].mxu0 }
  0xfb   : > { %v276_v14 = vpop.f32.mrb[2].mxu0 }
  0xfc   : > { %v279_v15 = vpack.c.bf16 %v274_v12, %v274_v12  ;;  %v380_v16 = vpop.f32.mrb[3].mxu0 }
  0xfe   : > { %280 = vst [vmem:[%s165_s11] sm:$0xf] %v279_v15 }
  0xff PF: > { %s13_s12 = sadd.s32 1, %s405_s12  }
 0x100   : > { %p10_p4 = scmp.ge.s32.totalorder %s13_s12, 6  }
 0x102   :  { %12 = sbr.rel (!%p10_p4) target bundleno = 1 (0x1), region = 62 }

// kernel: didn_forward.42
= control target key start
LH: loop header
LB: loop body
LE: loop exit
PB: predicated region body
PF: predicated region fallthrough
CT: control target
= control target key end

     0   :  { %s601_s18 = smov 0   ;;  %s659_s0 = inlined_call_operand.vmem [shape: bf16[32,32], index: 0, kind: input, shape index: {}]   ;;  %s660_s1 = inlined_call_operand.vmem [shape: bf16[32,128], index: 1, kind: input, shape index: {}]   ;;  %s661_s2 = inlined_call_operand.vmem [shape: bf16[32,128], index: 2, kind: input, shape index: {}]   ;;  %s662_s3 = inlined_call_operand.vmem [shape: bf16[128,128], index: 3, kind: input, shape index: {}]   ;;  %s663_s4 = inlined_call_operand.vmem [shape: f32[1,128], index: 4, kind: input, shape index: {}]   ;;  %s664_s5 = inlined_call_operand.vmem [shape: bf16[32,128], index: 5, kind: output, shape index: {}]  }
   0x1 LB: > { %s479_s19 = sadd.s32 4294967295, %s567_s18   ;;  %p483_p0 = scmp.ge.s32.totalorder %s567_s18, 1  ;;  %s567_s18 = sphi %s601_s18, %s15_s18  }
   0x2   : > { %p195_p1 = scmp.lt.s32.totalorder %s567_s18, 5 }
   0x4   : > { %p196_p2 = pnand %p483_p0, %p195_p1 }
   0x5   : > { %v551_v0 = vld [vmem:[%s662_s3] sm:$0xff] (!%p196_p2)   ;;  %v569_v1 = vmov (!%p196_p2), 0.0   ;;  %v552_v2 = vld [vmem:[%s662_s3 + $0x8] sm:$0xff] (!%p196_p2)   ;;  %vm570_vm0 = vmmov (!%p196_p2), 0   ;;  %p225_p3 = scmp.lt.s32.totalorder (!%p196_p2), %s479_s19, 3  ;;  %v553_v3 = vld [vmem:[%s662_s3 + $0x10] sm:$0xff] (!%p196_p2)  }
   0x6   : > { %199 = sbr.rel (%p196_p2) target bundleno = 257 (0x101), region = 40  ;;  %513 = vmatprep.subr.bf16.mxu0 (!%p196_p2), %v569_v1  ;;  %533 = vmatprep.subr.bf16.mxu1 (!%p196_p2), %v569_v1  ;;  %v557_v4 = vld [vmem:[%s661_s2] sm:$0xff] (!%p196_p2)   ;;  %v559_v5 = vld [vmem:[%s661_s2 + $0x8] sm:$0xff] (!%p196_p2)   ;;  %v554_v6 = vld [vmem:[%s662_s3 + $0x18] sm:$0xff] (!%p196_p2)   ;;  %vm360_vm1 = vcmask (!%p196_p2), 261120  }
   0x7   : > { %514 = vmatpush3.bf16.msra.mxu0 (!%p196_p2), %v551_v0  ;;  %537 = vmatprep.mubr.msk.bf16.mxu1 (!%p196_p2), %vm570_vm0, %v569_v1  ;;  %v555_v8 = vld [vmem:[%s662_s3 + $0x20] sm:$0xff] (!%p196_p2)   ;;  %v556_v9 = vld [vmem:[%s662_s3 + $0x28] sm:$0xff] (!%p196_p2)   ;;  %v558_v10 = vld [vmem:[%s662_s3 + $0x30] sm:$0xff] (!%p196_p2)  }
   0x8   : > { %515 = vmatprep.subr.bf16.mxu0 (!%p196_p2), %v569_v1  ;;  %529 = vmatprep.mubr.msk.bf16.mxu0 (!%p196_p2), %vm570_vm0, %v569_v1  ;;  %v560_v11 = vld [vmem:[%s662_s3 + $0x38] sm:$0xff] (!%p196_p2)   ;;  %v498_v18 = vld [vmem:[%s663_s4] ss:$0 sm:$0xff] (!%p196_p2) }
   0x9   : > { %534 = vmatpush3.bf16.msra.mxu1 (!%p196_p2), %v557_v4 }
   0xa   : > { %535 = vmatprep.subr.bf16.mxu1 (!%p196_p2), %v569_v1 }
   0xb   : > { %516 = vmatpush3.bf16.msra.mxu0 (!%p196_p2), %v552_v2 }
   0xc   : > { %517 = vmatprep.subr.bf16.mxu0 (!%p196_p2), %v569_v1 }
   0xd   : > { %s666_s19 = smov (!%p225_p3, %s479_s19), 3  ;;  %536 = vmatpush3.bf16.msra.mxu1 %v559_v5 }
   0xe   : > { %s621_s28 = sshll.u32 %s666_s19, 2 }
   0xf   : > { %s228_s8 = scalar_lea.vmem %s659_s0, %s621_s28  ;;  %518 = vmatpush3.bf16.msra.mxu0 %v553_v3  ;;  %s232_s22 = scalar_lea.vmem %s660_s1, %s621_s28 }
  0x10   : > { %519 = vmatprep.subr.bf16.mxu0 %v569_v1  ;;  %v238_v7 = vld [vmem:[%s228_s8] sm:$0xf]  ;;  %s236_s27 = scalar_lea.vmem %s664_s5, %s621_s28 }
  0x11   : > { %538 = vmatmul.mubr.msk.bf16.vlgmr.msra.gmra.mrb[0].mxu1 %vm360_vm1, %v238_v7  ;;  %v243_v12 = vld [vmem:[%s232_s22] sm:$0xf] }
  0x13   : > { %520 = vmatpush3.bf16.msra.mxu0 %v554_v6 }
  0x14   : > { %521 = vmatprep.subr.bf16.mxu0 %v569_v1 }
  0x17   : > { %522 = vmatpush3.bf16.msra.mxu0 %v555_v8 }
  0x18   : > { %523 = vmatprep.subr.bf16.mxu0 %v569_v1 }
  0x1b   : > { %524 = vmatpush3.bf16.msra.mxu0 %v556_v9 }
  0x1c   : > { %525 = vmatprep.subr.bf16.mxu0 %v569_v1 }
  0x1f   : > { %526 = vmatpush3.bf16.msra.mxu0 %v558_v10 }
  0x20   : > { %527 = vmatprep.subr.bf16.mxu0 %v569_v1 }
  0x23   : > { %528 = vmatpush3.bf16.msra.mxu0 %v560_v11 }
  0x26   : > { %530 = vmatmul.mubr.bf16.vlgmr.msra.gmra.mrb[0].mxu0 %v243_v12 }
  0xe4   : > { %v398_v13 = vpop.f32.mrb[0].mxu1 }
  0xe5   : > { %v539_v14 = vpop.f32.mrb[1].mxu1 }
  0xe6   : > { %v401_v15 = vpop.f32.mrb[2].mxu1 }
  0xe7   : > { %v540_v16 = vpop.f32.mrb[3].mxu1 }
  0xf9   : > { %v342_v17 = vpop.f32.mrb[0].mxu0 }
  0xfa   : > { %v399_v19 = vadd.f32 %v398_v13, %v342_v17  ;;  %v531_v20 = vpop.f32.mrb[1].mxu0 }
  0xfb   : > { %v345_v21 = vpop.f32.mrb[2].mxu0 }
  0xfc   : > { %v411_v22 = vadd.f32 %v498_v18, %v399_v19  ;;  %v532_v23 = vpop.f32.mrb[3].mxu0 }
  0xfe   : > { %v412_v24 = vpack.c.bf16 %v411_v22, %v411_v22 }
 0x100   : > { %413 = vst [vmem:[%s236_s27] sm:$0xf] %v412_v24 }
 0x101 PF: > { %s15_s18 = sadd.s32 1, %s567_s18  }
 0x102   : > { %p12_p4 = scmp.ge.s32.totalorder %s15_s18, 6  }
 0x104   :  { %14 = sbr.rel (!%p12_p4) target bundleno = 1 (0x1), region = 73 }

// kernel: didn_forward.63
= control target key start
LH: loop header
LB: loop body
LE: loop exit
PB: predicated region body
PF: predicated region fallthrough
CT: control target
= control target key end

     0   :  { %s841_s23 = smov 0   ;;  %s917_s0 = inlined_call_operand.vmem [shape: bf16[128,128], index: 0, kind: input, shape index: {}]   ;;  %s918_s1 = inlined_call_operand.vmem [shape: bf16[128,128], index: 1, kind: input, shape index: {}]   ;;  %s919_s2 = inlined_call_operand.vmem [shape: bf16[128,128], index: 2, kind: input, shape index: {}]   ;;  %s920_s3 = inlined_call_operand.vmem [shape: bf16[128,128], index: 3, kind: input, shape index: {}]   ;;  %s921_s4 = inlined_call_operand.vmem [shape: f32[1,128], index: 4, kind: input, shape index: {}]   ;;  %s922_s5 = inlined_call_operand.<no memory space> [shape: f32[1,1], index: 5, kind: input, shape index: {}]   ;;  %s923_s6 = inlined_call_operand.vmem [shape: bf16[128,128], index: 6, kind: output, shape index: {}]  }
   0x1   :  { %11 = sst [smem:[#allocation2]] %s922_s5 }
   0x2 LB: > { %s650_s24 = sadd.s32 4294967295, %s801_s23   ;;  %p654_p0 = scmp.ge.s32.totalorder %s801_s23, 1  ;;  %s801_s23 = sphi %s841_s23, %s17_s23  }
   0x3   : > { %p225_p1 = scmp.lt.s32.totalorder %s801_s23, 5 }
   0x5   : > { %p226_p2 = pnand %p654_p0, %p225_p1 }
   0x6   : > { %v775_v0 = vld [vmem:[%s920_s3] sm:$0xff] (!%p226_p2)   ;;  %s655_s5 = sshll.u32 (!%p226_p2), %s650_s24, 2  ;;  %v777_v2 = vld [vmem:[%s920_s3 + $0x8] sm:$0xff] (!%p226_p2)   ;;  %v779_v4 = vld [vmem:[%s920_s3 + $0x10] sm:$0xff] (!%p226_p2)   ;;  %s548_s16 = sld [smem:[#allocation2]] (!%p226_p2) }
   0x7   : > { %229 = sbr.rel (%p226_p2) target bundleno = 265 (0x109), region = 44  ;;  %v776_v1 = vld [vmem:[%s919_s2] sm:$0xff] (!%p226_p2)   ;;  %723 = vmatprep.subr.bf16.mxu1 (!%p226_p2), %v775_v0  ;;  %p261_p3 = scmp.lt.s32.totalorder (!%p226_p2), %s655_s5, 15  ;;  %v778_v3 = vld [vmem:[%s919_s2 + $0x8] sm:$0xff] (!%p226_p2)   ;;  %v780_v5 = vld [vmem:[%s919_s2 + $0x10] sm:$0xff] (!%p226_p2)  }
   0x8   : > { %743 = vmatprep.subr.bf16.mxu0 (!%p226_p2), %v776_v1  ;;  %724 = vmatpush3.bf16.msra.mxu1 (!%p226_p2), %v775_v0  ;;  %v781_v6 = vld [vmem:[%s920_s3 + $0x18] sm:$0xff] (!%p226_p2)   ;;  %v783_v8 = vld [vmem:[%s920_s3 + $0x20] sm:$0xff] (!%p226_p2)   ;;  %v785_v10 = vld [vmem:[%s920_s3 + $0x28] sm:$0xff] (!%p226_p2)  }
   0x9   : > { %744 = vmatpush3.bf16.msra.mxu0 (!%p226_p2), %v776_v1  ;;  %725 = vmatprep.subr.bf16.mxu1 (!%p226_p2), %v777_v2  ;;  %v782_v7 = vld [vmem:[%s919_s2 + $0x18] sm:$0xff] (!%p226_p2)   ;;  %v784_v9 = vld [vmem:[%s919_s2 + $0x20] sm:$0xff] (!%p226_p2)   ;;  %v786_v11 = vld [vmem:[%s919_s2 + $0x28] sm:$0xff] (!%p226_p2)  }
   0xa   : > { %745 = vmatprep.subr.bf16.mxu0 (!%p226_p2), %v778_v3  ;;  %v787_v14 = vld [vmem:[%s920_s3 + $0x30] sm:$0xff] (!%p226_p2)   ;;  %v789_v16 = vld [vmem:[%s920_s3 + $0x38] sm:$0xff] (!%p226_p2)   ;;  %v681_v22 = vld [vmem:[%s921_s4] ss:$0 sm:$0xff] (!%p226_p2) }
   0xb   : > { %v788_v15 = vld [vmem:[%s919_s2 + $0x30] sm:$0xff] (!%p226_p2)   ;;  %v790_v17 = vld [vmem:[%s919_s2 + $0x38] sm:$0xff] (!%p226_p2)  }
   0xc   : > { %726 = vmatpush3.bf16.msra.mxu1 (!%p226_p2), %v777_v2  ;;  %v553_v27 = vstv (!%p226_p2), %s548_s16 }
   0xd   : > { %746 = vmatpush3.bf16.msra.mxu0 (!%p226_p2), %v778_v3  ;;  %727 = vmatprep.subr.bf16.mxu1 (!%p226_p2), %v779_v4 }
   0xe   : > { %s925_s5 = smov (!%p261_p3, %s655_s5), 15  ;;  %747 = vmatprep.subr.bf16.mxu0 %v780_v5 }
   0xf   : > { %s873_s17 = sshll.u32 %s925_s5, 2 }
  0x10   : > { %728 = vmatpush3.bf16.msra.mxu1 %v779_v4  ;;  %s270_s25 = scalar_lea.vmem %s918_s1, %s873_s17  ;;  %s264_s29 = scalar_lea.vmem %s917_s0, %s873_s17 }
  0x11   : > { %748 = vmatpush3.bf16.msra.mxu0 %v780_v5  ;;  %729 = vmatprep.subr.bf16.mxu1 %v781_v6  ;;  %v791_v12 = vld [vmem:[%s270_s25] sm:$0xff]   ;;  %v793_v18 = vld [vmem:[%s270_s25 + $0x8] sm:$0xff]   ;;  %s276_s22 = scalar_lea.vmem %s923_s6, %s873_s17 }
  0x12   : > { %749 = vmatprep.subr.bf16.mxu0 %v782_v7  ;;  %v792_v13 = vld [vmem:[%s264_s29] sm:$0xff]   ;;  %739 = vmatprep.mubr.bf16.mxu1 %v791_v12  ;;  %v794_v19 = vld [vmem:[%s264_s29 + $0x8] sm:$0xff]  }
  0x13   : > { %759 = vmatprep.mubr.bf16.mxu0 %v792_v13 }
  0x14   : > { %730 = vmatpush3.bf16.msra.mxu1 %v781_v6 }
  0x15   : > { %750 = vmatpush3.bf16.msra.mxu0 %v782_v7  ;;  %731 = vmatprep.subr.bf16.mxu1 %v783_v8 }
  0x16   : > { %751 = vmatprep.subr.bf16.mxu0 %v784_v9 }
  0x18   : > { %732 = vmatpush3.bf16.msra.mxu1 %v783_v8 }
  0x19   : > { %752 = vmatpush3.bf16.msra.mxu0 %v784_v9  ;;  %733 = vmatprep.subr.bf16.mxu1 %v785_v10 }
  0x1a   : > { %753 = vmatprep.subr.bf16.mxu0 %v786_v11 }
  0x1c   : > { %734 = vmatpush3.bf16.msra.mxu1 %v785_v10 }
  0x1d   : > { %754 = vmatpush3.bf16.msra.mxu0 %v786_v11  ;;  %735 = vmatprep.subr.bf16.mxu1 %v787_v14 }
  0x1e   : > { %755 = vmatprep.subr.bf16.mxu0 %v788_v15 }
  0x20   : > { %736 = vmatpush3.bf16.msra.mxu1 %v787_v14 }
  0x21   : > { %756 = vmatpush3.bf16.msra.mxu0 %v788_v15  ;;  %737 = vmatprep.subr.bf16.mxu1 %v789_v16 }
  0x22   : > { %757 = vmatprep.subr.bf16.mxu0 %v790_v17 }
  0x24   : > { %738 = vmatpush3.bf16.msra.mxu1 %v789_v16 }
  0x25   : > { %758 = vmatpush3.bf16.msra.mxu0 %v790_v17 }
  0x27   : > { %740 = vmatmul.mubr.bf16.vlgmr.msra.gmra.mrb[0].mxu1 %v793_v18 }
  0x28   : > { %760 = vmatmul.mubr.bf16.vlgmr.msra.gmra.mrb[0].mxu0 %v794_v19 }
  0xfa   : > { %v741_v20 = vpop.f32.mrb[0].mxu1 }
  0xfb   : > { %v761_v21 = vpop.f32.mrb[0].mxu0  ;;  %v413_v23 = vpop.f32.mrb[1].mxu1 }
  0xfc   : > { %v531_v24 = vadd.f32 %v761_v21, %v741_v20  ;;  %v522_v25 = vpop.f32.mrb[1].mxu0  ;;  %v742_v26 = vpop.f32.mrb[2].mxu1 }
  0xfd   : > { %v523_v28 = vadd.f32 %v522_v25, %v413_v23  ;;  %v762_v29 = vpop.f32.mrb[2].mxu0  ;;  %v416_v30 = vpop.f32.mrb[3].mxu1 }
  0xfe   : > { %v546_v31 = vadd.f32 %v681_v22, %v531_v24  ;;  %v534_v32 = vadd.f32 %v762_v29, %v742_v26  ;;  %v525_v33 = vpop.f32.mrb[3].mxu0 }
  0xff   : > { %v544_v34 = vadd.f32 %v681_v22, %v523_v28  ;;  %v526_v35 = vadd.f32 %v525_v33, %v416_v30 }
 0x100   : > { %v556_v36 = vmul.f32 %v553_v27, %v546_v31  ;;  %v547_v37 = vadd.f32 %v681_v22, %v534_v32  ;;  %vm551_vm0 = vcmp.ge.f32.partialorder %v546_v31, 0.0 }
 0x101   : > { %v554_v38 = vmul.f32 %v553_v27, %v544_v34  ;;  %v545_v39 = vadd.f32 %v681_v22, %v526_v35  ;;  %vm549_vm1 = vcmp.ge.f32.partialorder %v544_v34, 0.0 }
 0x102   : > { %vm552_vm2 = vcmp.ge.f32.partialorder %v547_v37, 0.0  ;;  %v557_v40 = vmul.f32 %v553_v27, %v547_v37  ;;  %v560_v42 = vsel %vm551_vm0, %v546_v31, %v556_v36 }
 0x103   : > { %vm550_vm3 = vcmp.ge.f32.partialorder %v545_v39, 0.0  ;;  %v555_v41 = vmul.f32 %v553_v27, %v545_v39  ;;  %v558_v44 = vsel %vm549_vm1, %v544_v34, %v554_v38 }
 0x104   : > { %v561_v43 = vsel %vm552_vm2, %v547_v37, %v557_v40 }
 0x105   : > { %v700_v45 = vpack.c.bf16 %v561_v43, %v560_v42  ;;  %v559_v46 = vsel %vm550_vm3, %v545_v39, %v555_v41 }
 0x106   : > { %v695_v47 = vpack.c.bf16 %v559_v46, %v558_v44 }
 0x107   : > { %702 = vst [vmem:[%s276_s22 + $0x8] sm:$0xff] %v700_v45  }
 0x108   : > { %696 = vst [vmem:[%s276_s22] sm:$0xff] %v695_v47  }
 0x109 PF: > { %s17_s23 = sadd.s32 1, %s801_s23  }
 0x10a   : > { %p14_p4 = scmp.ge.s32.totalorder %s17_s23, 6  }
 0x10c   :  { %16 = sbr.rel (!%p14_p4) target bundleno = 2 (0x2), region = 77 }

// kernel: didn_forward.45
= control target key start
LH: loop header
LB: loop body
LE: loop exit
PB: predicated region body
PF: predicated region fallthrough
CT: control target
= control target key end

     0   :  { %s707_s18 = smov 0   ;;  %s762_s0 = inlined_call_operand.vmem [shape: bf16[128,16], index: 0, kind: input, shape index: {}]   ;;  %s763_s1 = inlined_call_operand.vmem [shape: bf16[128,128], index: 1, kind: input, shape index: {}]   ;;  %s764_s2 = inlined_call_operand.vmem [shape: bf16[16,128], index: 2, kind: input, shape index: {}]   ;;  %s765_s3 = inlined_call_operand.vmem [shape: bf16[128,128], index: 3, kind: input, shape index: {}]   ;;  %s766_s4 = inlined_call_operand.vmem [shape: f32[1,128], index: 4, kind: input, shape index: {}]   ;;  %s767_s5 = inlined_call_operand.vmem [shape: bf16[128,128], index: 5, kind: output, shape index: {}]  }
   0x1 LB: > { %s557_s19 = sadd.s32 4294967295, %s675_s18   ;;  %p561_p0 = scmp.ge.s32.totalorder %s675_s18, 1  ;;  %s675_s18 = sphi %s707_s18, %s15_s18  }
   0x2   : > { %p199_p1 = scmp.lt.s32.totalorder %s675_s18, 5 }
   0x4   : > { %p200_p2 = pnand %p561_p0, %p199_p1 }
   0x5   : > { %v656_v0 = vld [vmem:[%s765_s3] sm:$0xff] (!%p200_p2)   ;;  %s562_s22 = sshll.u32 (!%p200_p2), %s557_s19, 2  ;;  %v657_v1 = vld [vmem:[%s765_s3 + $0x8] sm:$0xff] (!%p200_p2)   ;;  %v658_v2 = vld [vmem:[%s765_s3 + $0x10] sm:$0xff] (!%p200_p2)   ;;  %vm402_vm0 = vcmask (!%p200_p2), 130048  }
   0x6   : > { %203 = sbr.rel (%p200_p2) target bundleno = 260 (0x104), region = 40  ;;  %p233_p3 = scmp.lt.s32.totalorder (!%p200_p2), %s562_s22, 15  ;;  %618 = vmatprep.subr.bf16.mxu1 (!%p200_p2), %v656_v0  ;;  %v663_v3 = vld [vmem:[%s764_s2] sm:$0xff] (!%p200_p2)   ;;  %v659_v4 = vld [vmem:[%s765_s3 + $0x18] sm:$0xff] (!%p200_p2)   ;;  %v661_v9 = vld [vmem:[%s765_s3 + $0x28] sm:$0xff] (!%p200_p2)  }
   0x7   : > { %619 = vmatpush3.bf16.msra.mxu1 (!%p200_p2), %v656_v0  ;;  %638 = vmatprep.subr.bf16.mxu0 (!%p200_p2), %v663_v3  ;;  %v660_v8 = vld [vmem:[%s765_s3 + $0x20] sm:$0xff] (!%p200_p2)   ;;  %v662_v10 = vld [vmem:[%s765_s3 + $0x30] sm:$0xff] (!%p200_p2)   ;;  %v664_v11 = vld [vmem:[%s765_s3 + $0x38] sm:$0xff] (!%p200_p2)  }
   0x8   : > { %620 = vmatprep.subr.bf16.mxu1 (!%p200_p2), %v657_v1  ;;  %639 = vmatpush3.bf16.msra.mxu0 (!%p200_p2), %v663_v3  ;;  %v583_v20 = vld [vmem:[%s766_s4] ss:$0 sm:$0xff] (!%p200_p2) }
   0xb   : > { %621 = vmatpush3.bf16.msra.mxu1 (!%p200_p2), %v657_v1 }
   0xc   : > { %622 = vmatprep.subr.bf16.mxu1 (!%p200_p2), %v658_v2 }
   0xd   : > { %s769_s22 = smov (!%p233_p3, %s562_s22), 15 }
   0xe   : > { %s724_s27 = sshll.u32 %s769_s22, 2 }
   0xf   : > { %s236_s30 = scalar_lea.vmem %s762_s0, %s724_s27  ;;  %s242_s12 = scalar_lea.vmem %s763_s1, %s724_s27  ;;  %623 = vmatpush3.bf16.msra.mxu1 %v658_v2 }
  0x10   : > { %v665_v5 = vld [vmem:[%s236_s30] sm:$0xff]   ;;  %v666_v6 = vld [vmem:[%s236_s30 + $0x8] sm:$0xff]   ;;  %624 = vmatprep.subr.bf16.mxu1 %v659_v4  ;;  %s248_s26 = scalar_lea.vmem %s767_s5, %s724_s27 }
  0x11   : > { %640 = vmatprep.mubr.msk.bf16.mxu0 %vm402_vm0, %v665_v5  ;;  %v667_v7 = vld [vmem:[%s242_s12] sm:$0xff]   ;;  %v668_v12 = vld [vmem:[%s242_s12 + $0x8] sm:$0xff]  }
  0x12   : > { %641 = vmatmul.mubr.msk.bf16.vlgmr.msra.gmra.mrb[0].mxu0 %vm402_vm0, %v666_v6  ;;  %634 = vmatprep.mubr.bf16.mxu1 %v667_v7 }
  0x13   : > { %625 = vmatpush3.bf16.msra.mxu1 %v659_v4 }
  0x14   : > { %626 = vmatprep.subr.bf16.mxu1 %v660_v8 }
  0x17   : > { %627 = vmatpush3.bf16.msra.mxu1 %v660_v8 }
  0x18   : > { %628 = vmatprep.subr.bf16.mxu1 %v661_v9 }
  0x1b   : > { %629 = vmatpush3.bf16.msra.mxu1 %v661_v9 }
  0x1c   : > { %630 = vmatprep.subr.bf16.mxu1 %v662_v10 }
  0x1f   : > { %631 = vmatpush3.bf16.msra.mxu1 %v662_v10 }
  0x20   : > { %632 = vmatprep.subr.bf16.mxu1 %v664_v11 }
  0x23   : > { %633 = vmatpush3.bf16.msra.mxu1 %v664_v11 }
  0x26   : > { %635 = vmatmul.mubr.bf16.vlgmr.msra.gmra.mrb[0].mxu1 %v668_v12 }
  0xe5   : > { %v642_v13 = vpop.f32.mrb[0].mxu0 }
  0xe6   : > { %v443_v14 = vpop.f32.mrb[1].mxu0 }
  0xe7   : > { %v643_v15 = vpop.f32.mrb[2].mxu0 }
  0xe8   : > { %v446_v16 = vpop.f32.mrb[3].mxu0 }
  0xf9   : > { %v636_v17 = vpop.f32.mrb[0].mxu1 }
  0xfa   : > { %v452_v18 = vadd.f32 %v642_v13, %v636_v17  ;;  %v371_v19 = vpop.f32.mrb[1].mxu1 }
  0xfb   : > { %v444_v21 = vadd.f32 %v443_v14, %v371_v19  ;;  %v637_v22 = vpop.f32.mrb[2].mxu1 }
  0xfc   : > { %v455_v23 = vadd.f32 %v643_v15, %v637_v22  ;;  %v374_v24 = vpop.f32.mrb[3].mxu1  ;;  %v467_v26 = vadd.f32 %v583_v20, %v452_v18 }
  0xfd   : > { %v447_v25 = vadd.f32 %v446_v16, %v374_v24  ;;  %v465_v28 = vadd.f32 %v583_v20, %v444_v21 }
  0xfe   : > { %v468_v27 = vadd.f32 %v583_v20, %v455_v23 }
  0xff   : > { %v466_v29 = vadd.f32 %v583_v20, %v447_v25 }
 0x100   : > { %v602_v30 = vpack.c.bf16 %v468_v27, %v467_v26 }
 0x101   : > { %v597_v31 = vpack.c.bf16 %v466_v29, %v465_v28 }
 0x102   : > { %604 = vst [vmem:[%s248_s26 + $0x8] sm:$0xff] %v602_v30  }
 0x103   : > { %598 = vst [vmem:[%s248_s26] sm:$0xff] %v597_v31  }
 0x104 PF: > { %s15_s18 = sadd.s32 1, %s675_s18  }
 0x105   : > { %p12_p4 = scmp.ge.s32.totalorder %s15_s18, 6  }
 0x107   :  { %14 = sbr.rel (!%p12_p4) target bundleno = 1 (0x1), region = 73 }

// kernel: didn_forward.48
= control target key start
LH: loop header
LB: loop body
LE: loop exit
PB: predicated region body
PF: predicated region fallthrough
CT: control target
= control target key end

     0   :  { %s2266_s15 = smov 0   ;;  %s2268_s16 = smov 0   ;;  %s2695_s0 = inlined_call_operand.vmem [shape: bf16[2,10,10,128], index: 0, kind: input, shape index: {}]   ;;  %s2696_s1 = inlined_call_operand.vmem [shape: bf16[1152,128], index: 1, kind: input, shape index: {}]   ;;  %s2697_s2 = inlined_call_operand.vmem [shape: f32[1,128], index: 2, kind: input, shape index: {}]   ;;  %s2698_s3 = inlined_call_operand.vmem [shape: bf16[2,64,128], index: 3, kind: input, shape index: {}]   ;;  %s2699_s4 = inlined_call_operand.vmem [shape: bf16[2,64,128], index: 4, kind: output, shape index: {}]  }
   0x1   :  { %s2270_s17 = smov 0   ;;  %s2272_s18 = smov 0  }
   0x2   :  { %s2274_s19 = smov 0  }
   0x3 LB: > { %s23_s20 = sadd.s32 1, %s2231_s17  ;;  %s26_s21 = sadd.s32 1, %s2235_s18  ;;  %s2239_s19 = sphi %s2274_s19, %s14_s19   ;;  %s2235_s18 = sphi %s2272_s18, %s2707_s18   ;;  %s2231_s17 = sphi %s2270_s17, %s2706_s17   ;;  %s2227_s16 = sphi %s2268_s16, %s2705_s16   ;;  %s2223_s15 = sphi %s2266_s15, %s2704_s15  }
   0x4   : > { %p24_p0 = scmp.ge.s32.totalorder %s23_s20, 2  ;;  %p1644_p1 = scmp.ge.s32.totalorder %s2239_s19, 1 }
   0x5   : > { %p193_p2 = scmp.lt.s32.totalorder %s2239_s19, 5 }
   0x6   : > { %s2709_s20 = smov (%p24_p0, %s23_s20), 0  ;;  %s2711_s21 = smov (!%p24_p0, %s26_s21), %s2235_s18 }
   0x7   : > { %p194_p3 = pnand %p1644_p1, %p193_p2  ;;  %p28_p4 = scmp.ge.s32.totalorder %s2711_s21, 2 }
   0x8   : > { %v2124_v0 = vld [vmem:[%s2696_s1 + $0x40] sm:$0xff] (!%p194_p3)   ;;  %p232_p5 = scmp.lt.s32.totalorder (!%p194_p3), %s2227_s16, 1  ;;  %v2126_v2 = vld [vmem:[%s2696_s1 + $0x48] sm:$0xff] (!%p194_p3)   ;;  %v2128_v4 = vld [vmem:[%s2696_s1 + $0x50] sm:$0xff] (!%p194_p3)   ;;  %s1756_s23 = sshll.u32 (!%p194_p3), %s2223_s15, 5  ;;  %vm583_vm3 = vcmask (!%p194_p3), 1042432  }
   0x9   : > { %s2713_s21 = smov (%p28_p4, %s2711_s21), 0  ;;  %197 = sbr.rel (%p194_p3) target bundleno = 396 (0x18c), region = 36 }
   0xa   : > { %v2125_v1 = vld [vmem:[%s2696_s1 + $0x100] sm:$0xff] (!%p194_p3)   ;;  %1871 = vmatprep.subr.bf16.mxu1 (!%p194_p3), %v2124_v0  ;;  %v2127_v3 = vld [vmem:[%s2696_s1 + $0x108] sm:$0xff] (!%p194_p3)   ;;  %v2129_v5 = vld [vmem:[%s2696_s1 + $0x110] sm:$0xff] (!%p194_p3)   ;;  %vm290_vm0 = vsmask.f32 (!%p194_p3), 3328  ;;  %vm584_vm4 = vcmask (!%p194_p3), 1046532  }
   0xb   : > { %1951 = vmatprep.subr.bf16.mxu0 (!%p194_p3), %v2125_v1  ;;  %1872 = vmatpush3.bf16.msra.mxu1 (!%p194_p3), %v2124_v0  ;;  %v2130_v6 = vld [vmem:[%s2696_s1 + $0x58] sm:$0xff] (!%p194_p3)   ;;  %v2132_v8 = vld [vmem:[%s2696_s1 + $0x60] sm:$0xff] (!%p194_p3)   ;;  %v2134_v10 = vld [vmem:[%s2696_s1 + $0x68] sm:$0xff] (!%p194_p3)   ;;  %vm291_vm1 = vsmask.f32 (!%p194_p3), 7440  ;;  %s1646_s13 = sshll.u32 (!%p194_p3), %s2223_s15, 2 }
   0xc   : > { %1952 = vmatpush3.bf16.msra.mxu0 (!%p194_p3), %v2125_v1  ;;  %1873 = vmatprep.subr.bf16.mxu1 (!%p194_p3), %v2126_v2  ;;  %v2131_v7 = vld [vmem:[%s2696_s1 + $0x118] sm:$0xff] (!%p194_p3)   ;;  %v2133_v9 = vld [vmem:[%s2696_s1 + $0x120] sm:$0xff] (!%p194_p3)   ;;  %v2135_v14 = vld [vmem:[%s2696_s1 + $0x128] sm:$0xff] (!%p194_p3)   ;;  %p240_p6 = scmp.lt.s32.totalorder (!%p194_p3), %s1646_s13, 7 }
   0xd   : > { %1953 = vmatprep.subr.bf16.mxu0 (!%p194_p3), %v2127_v3  ;;  %v2136_v22 = vld [vmem:[%s2696_s1 + $0x70] sm:$0xff] (!%p194_p3)   ;;  %v2138_v38 = vld [vmem:[%s2696_s1 + $0x78] sm:$0xff] (!%p194_p3)   ;;  %vm2388_vm2 = vmor (!%p194_p3), %vm290_vm0, %vm291_vm1 }
   0xe   : > { %v2137_v23 = vld [vmem:[%s2696_s1 + $0x130] sm:$0xff] (!%p194_p3)   ;;  %v2139_v48 = vld [vmem:[%s2696_s1 + $0x138] sm:$0xff] (!%p194_p3)   ;;  %v2140_v0 = vld [vmem:[%s2696_s1] sm:$0xff] (!%p194_p3)  }
   0xf   : > { %1874 = vmatpush3.bf16.msra.mxu1 (!%p194_p3), %v2126_v2  ;;  %vm2446_vm5 = vmor (!%p194_p3), %vm583_vm3, %vm584_vm4 }
  0x10   : > { %s2715_s16 = smov (!%p232_p5, %s2227_s16), 1  ;;  %1954 = vmatpush3.bf16.msra.mxu0 %v2127_v3  ;;  %1875 = vmatprep.subr.bf16.mxu1 %v2128_v4  ;;  %s2717_s13 = smov (!%p240_p6, %s1646_s13), 7 }
  0x11   : > { %s2083_s8 = smul.u32 80, %s2715_s16  ;;  %1955 = vmatprep.subr.bf16.mxu0 %v2129_v5  ;;  %s1647_s14 = sshll.u32 %s2715_s16, 3 }
  0x13   : > { %s236_s22 = scalar_lea.vmem %s2695_s0, %s2083_s8  ;;  %1876 = vmatpush3.bf16.msra.mxu1 %v2128_v4 }
  0x14   : > { %1956 = vmatpush3.bf16.msra.mxu0 %v2129_v5  ;;  %1877 = vmatprep.subr.bf16.mxu1 %v2130_v6  ;;  %s2335_s28 = scalar_lea.vmem %s236_s22, %s1756_s23  ;;  %v2141_v5 = vld [vmem:[%s2696_s1 + $0x140] sm:$0xff]   ;;  %s243_s22 = sadd.s32 %s1647_s14, %s2717_s13 }
  0x15   : > { %1957 = vmatprep.subr.bf16.mxu0 %v2131_v7  ;;  %v2341_v11 = vld [vmem:[%s2335_s28] sm:$0xf]  ;;  %v2344_v12 = vld [vmem:[%s2335_s28 + $0x4] sm:$0x1]  ;;  %v2347_v13 = vld [vmem:[%s2335_s28 + $0x8] sm:$0xf] }
  0x16   : > { %v2353_v15 = vld [vmem:[%s2335_s28 + $0xc] sm:$0x1]  ;;  %v294_v16 = vshrl.u32 %v2341_v11, 16  ;;  %v297_v17 = vshll.u32 %v2341_v11, 16  ;;  %v303_v18 = vshll.u32 %v2344_v12, 16  ;;  %v308_v19 = vshrl.u32 %v2347_v13, 16 }
  0x17   : > { %1878 = vmatpush3.bf16.msra.mxu1 %v2130_v6  ;;  %v311_v20 = vshll.u32 %v2347_v13, 16  ;;  %v317_v21 = vshll.u32 %v2353_v15, 16  ;;  %v2368_v30 = vld [vmem:[%s2335_s28 + $0x10] sm:$0xf]  ;;  %v2371_v31 = vld [vmem:[%s2335_s28 + $0x14] sm:$0x1] }
  0x18   : > { %1958 = vmatpush3.bf16.msra.mxu0 %v2131_v7  ;;  %1879 = vmatprep.subr.bf16.mxu1 %v2132_v8  ;;  %v296_v24 = vrot.slane %v294_v16, 4  ;;  %v299_v25 = vrot.slane %v297_v17, 5  ;;  %v305_v26 = vrot.slane %v303_v18, 5  ;;  %v310_v27 = vrot.slane %v308_v19, 4  ;;  %v2374_v33 = vld [vmem:[%s2335_s28 + $0x18] sm:$0xf] }
  0x19   : > { %1959 = vmatprep.subr.bf16.mxu0 %v2133_v9  ;;  %v313_v28 = vrot.slane %v311_v20, 5  ;;  %v319_v29 = vrot.slane %v317_v21, 5  ;;  %v2377_v34 = vld [vmem:[%s2335_s28 + $0x1c] sm:$0x1]  ;;  %v322_v35 = vshrl.u32 %v2368_v30, 16  ;;  %v325_v36 = vshll.u32 %v2368_v30, 16 }
  0x1a   : > { %v300_v32 = vor.u32 %v299_v25, %v296_v24  ;;  %v1689_v37 = vcombine.low %v2347_v13, %v2368_v30  ;;  %v331_v41 = vshll.u32 %v2371_v31, 16  ;;  %v336_v42 = vshrl.u32 %v2374_v33, 16  ;;  %v2400_v52 = vld [vmem:[%s2335_s28 + $0x20] sm:$0xf]  ;;  %v2405_v56 = vld [vmem:[%s2335_s28 + $0x24] sm:$0x1] }
  0x1b   : > { %1880 = vmatpush3.bf16.msra.mxu1 %v2132_v8  ;;  %v314_v40 = vor.u32 %v313_v28, %v310_v27  ;;  %v339_v43 = vshll.u32 %v2374_v33, 16  ;;  %v324_v45 = vrot.slane %v322_v35, 4  ;;  %v327_v46 = vrot.slane %v325_v36, 5  ;;  %v2408_v57 = vld [vmem:[%s2335_s28 + $0x28] sm:$0xf]  ;;  %v2171_v35 = vld [vmem:[%s2696_s1 + $0x1b0] sm:$0xff]  }
  0x1c   : > { %1960 = vmatpush3.bf16.msra.mxu0 %v2133_v9  ;;  %1881 = vmatprep.subr.bf16.mxu1 %v2134_v10  ;;  %v301_v44 = vrot.slane %v300_v32, 4  ;;  %v345_v47 = vshll.u32 %v2377_v34, 16  ;;  %v338_v50 = vrot.slane %v336_v42, 4  ;;  %v333_v55 = vrot.slane %v331_v41, 5  ;;  %v2413_v61 = vld [vmem:[%s2335_s28 + $0x2c] sm:$0x1] }
  0x1d   : > { %1961 = vmatprep.subr.bf16.mxu0 %v2135_v14  ;;  %v315_v49 = vrot.slane %v314_v40, 4  ;;  %v341_v51 = vrot.slane %v339_v43, 5  ;;  %v328_v54 = vor.u32 %v327_v46, %v324_v45  ;;  %v851_v62 = vshrl.u32 %v2400_v52, 16  ;;  %v2144_v41 = vld [vmem:[%s2696_s1 + $0x10] sm:$0xff]   ;;  %v2143_v43 = vld [vmem:[%s2696_s1 + $0x148] sm:$0xff]   ;;  %s1648_s23 = sshll.u32 %s243_s22, 2 }
  0x1e   : > { %v306_v53 = vsel %vm2388_vm2, %v301_v44, %v305_v26  ;;  %v347_v60 = vrot.slane %v345_v47, 5  ;;  %v854_v2 = vshll.u32 %v2400_v52, 16  ;;  %v860_v3 = vshll.u32 %v2405_v56, 16  ;;  %s245_s26 = scalar_lea.vmem %s2698_s3, %s1648_s23  ;;  %s255_s29 = scalar_lea.vmem %s2699_s4, %s1648_s23 }
  0x1f   : > { %1882 = vmatpush3.bf16.msra.mxu1 %v2134_v10  ;;  %v320_v58 = vsel %vm2388_vm2, %v315_v49, %v319_v29  ;;  %v342_v59 = vor.u32 %v341_v51, %v338_v50  ;;  %v329_v1 = vrot.slane %v328_v54, 4  ;;  %v853_v6 = vrot.slane %v851_v62, 4  ;;  %v2146_v49 = vld [vmem:[%s2696_s1 + $0x18] sm:$0xff]   ;;  %v2145_v51 = vld [vmem:[%s2696_s1 + $0x150] sm:$0xff]   ;;  %v2149_v62 = vld [vmem:[%s2696_s1 + $0x160] sm:$0xff]  }
  0x20   : > { %1962 = vmatpush3.bf16.msra.mxu0 %v2135_v14  ;;  %1883 = vmatprep.subr.bf16.mxu1 %v2136_v22  ;;  %v1655_v63 = vcombine.low %v306_v53, %v320_v58  ;;  %v1235_v7 = vshrl.u32 %v2408_v57, 16  ;;  %v856_v9 = vrot.slane %v854_v2, 5  ;;  %v1238_v10 = vshll.u32 %v2408_v57, 16  ;;  %v2142_v14 = vld [vmem:[%s2696_s1 + $0x8] sm:$0xff]   ;;  %v2154_v2 = vld [vmem:[%s2696_s1 + $0x38] sm:$0xff]  }
  0x21   : > { %1963 = vmatprep.subr.bf16.mxu0 %v2137_v23  ;;  %v343_v4 = vrot.slane %v342_v59, 4  ;;  %v334_v8 = vsel %vm2388_vm2, %v329_v1, %v333_v55  ;;  %v1665_v16 = vcombine.low %v2341_v11, %v2347_v13  ;;  %v1244_v20 = vshll.u32 %v2413_v61, 16  ;;  %v2148_v55 = vld [vmem:[%s2696_s1 + $0x20] sm:$0xff]   ;;  %v2147_v59 = vld [vmem:[%s2696_s1 + $0x158] sm:$0xff]  }
  0x22   : > { %1887 = vmatprep.mubr.bf16.mxu1 %v1655_v63  ;;  %v1699_v18 = vcombine.low %v320_v58, %v334_v8  ;;  %v1237_v19 = vrot.slane %v1235_v7, 4  ;;  %v1240_v24 = vrot.slane %v1238_v10, 5  ;;  %v592_v25 = vrot.slane %v2353_v15, 5  ;;  %v2152_v63 = vld [vmem:[%s2696_s1 + $0x30] sm:$0xff]   ;;  %v2160_v10 = vld [vmem:[%s2696_s1 + $0x88] sm:$0xff]  }
  0x23   : > { %1884 = vmatpush3.bf16.msra.mxu1 %v2136_v22  ;;  %v348_v17 = vsel %vm2388_vm2, %v343_v4, %v347_v60  ;;  %v857_v22 = vor.u32 %v856_v9, %v853_v6  ;;  %v1720_v26 = vcombine.low %v2400_v52, %v2408_v57  ;;  %v1690_v27 = vcombine.low %v2374_v33, %v2400_v52  ;;  %v2153_v4 = vld [vmem:[%s2696_s1 + $0x170] sm:$0xff]  }
  0x24   : > { %1964 = vmatpush3.bf16.msra.mxu0 %v2137_v23  ;;  %1885 = vmatprep.subr.bf16.mxu1 %v2138_v38  ;;  %v2436_v21 = vcombine.low %v334_v8, %v348_v17  ;;  %v862_v23 = vrot.slane %v860_v3, 5  ;;  %v1241_v29 = vor.u32 %v1240_v24, %v1237_v19  ;;  %v1246_v32 = vrot.slane %v1244_v20, 5  ;;  %v2164_v19 = vld [vmem:[%s2696_s1 + $0x98] sm:$0xff]   ;;  %v2163_v20 = vld [vmem:[%s2696_s1 + $0x190] sm:$0xff]   ;;  %v2168_v24 = vld [vmem:[%s2696_s1 + $0xa8] sm:$0xff]  }
  0x25   : > { %1965 = vmatprep.subr.bf16.mxu0 %v2139_v48  ;;  %1967 = vmatprep.mubr.bf16.mxu0 %v1699_v18  ;;  %v858_v28 = vrot.slane %v857_v22, 4  ;;  %v596_v15 = vrot.slane %v2371_v31, 5  ;;  %v1676_v36 = vrot.slane %v2347_v13, 9  ;;  %v1677_v44 = vrot.slane %v2368_v30, 9  ;;  %v2161_v18 = vld [vmem:[%s2696_s1 + $0x188] sm:$0xff]   ;;  %v2166_v22 = vld [vmem:[%s2696_s1 + $0xa0] sm:$0xff]  }
  0x26   : > { %v1242_v40 = vrot.slane %v1241_v29, 4  ;;  %v989_v46 = vrot.slane %v2405_v56, 5  ;;  %v1709_v50 = vrot.slane %v2400_v52, 9  ;;  %v1738_v53 = vrot.slane %v2408_v57, 9  ;;  %v2169_v29 = vld [vmem:[%s2696_s1 + $0x1a8] sm:$0xff]   ;;  %v2181_v13 = vld [vmem:[%s2696_s1 + $0xd8] sm:$0xff]  }
  0x27   : > { %1886 = vmatpush3.bf16.msra.mxu1 %v2138_v38  ;;  %v863_v38 = vsel %vm2388_vm2, %v858_v28, %v862_v23  ;;  %v2462_v31 = vsel %vm2446_vm5, %v1676_v36, %v592_v25  ;;  %v1371_v54 = vrot.slane %v2413_v61, 5  ;;  %v2150_v61 = vld [vmem:[%s2696_s1 + $0x28] sm:$0xff]   ;;  %v588_v1 = vrot.slane %v2344_v12, 5  ;;  %v2157_v12 = vld [vmem:[%s2696_s1 + $0x80] sm:$0xff]   ;;  %v2165_v23 = vld [vmem:[%s2696_s1 + $0x198] sm:$0xff]  }
  0x28   : > { %1966 = vmatpush3.bf16.msra.mxu0 %v2139_v48  ;;  %1891 = vmatprep.subr.bf16.mxu1 %v2140_v0  ;;  %v1700_v42 = vcombine.low %v348_v17, %v863_v38  ;;  %v1247_v45 = vsel %vm2388_vm2, %v1242_v40, %v1246_v32  ;;  %v2472_v48 = vsel %vm2446_vm5, %v1677_v44, %v596_v15  ;;  %v1675_v3 = vrot.slane %v2341_v11, 9  ;;  %v2155_v11 = vld [vmem:[%s2696_s1 + $0x178] sm:$0xff]   ;;  %v2162_v17 = vld [vmem:[%s2696_s1 + $0x90] sm:$0xff]   ;;  %v2167_v25 = vld [vmem:[%s2696_s1 + $0x1a0] sm:$0xff]  }
  0x29   : > { %1971 = vmatprep.subr.bf16.mxu0 %v2141_v5  ;;  %v2468_v47 = vcombine.low %v863_v38, %v1247_v45  ;;  %v1710_v39 = vcombine.low %v2462_v31, %v2472_v48  ;;  %v2490_v56 = vsel %vm2446_vm5, %v1709_v50, %v989_v46  ;;  %v2494_v58 = vsel %vm2446_vm5, %v1738_v53, %v1371_v54  ;;  %v2170_v28 = vld [vmem:[%s2696_s1 + $0xb0] sm:$0xff]   ;;  %v2172_v32 = vld [vmem:[%s2696_s1 + $0xb8] sm:$0xff]   ;;  %v2174_v15 = vld [vmem:[%s2696_s1 + $0xc0] sm:$0xff]  }
  0x2a   : > { %1888 = vmatmul.mubr.bf16.vlgmr.msra.gmra.mrb[0].mxu1 %v2436_v21  ;;  %v1739_v60 = vcombine.low %v2490_v56, %v2494_v58  ;;  %v1678_v6 = vrot.slane %v2374_v33, 9  ;;  %v589_v7 = vsel %vm2446_vm5, %v1675_v3, %v588_v1  ;;  %v2173_v36 = vld [vmem:[%s2696_s1 + $0x1b8] sm:$0xff]   ;;  %v2177_v40 = vld [vmem:[%s2696_s1 + $0xc8] sm:$0xff]   ;;  %v2188_v46 = vld [vmem:[%s2696_s1 + $0x1f0] sm:$0xff]  }
  0x2b   : > { %1892 = vmatpush3.bf16.msra.mxu1 %v2140_v0  ;;  %1907 = vmatprep.mubr.bf16.mxu1 %v1665_v16  ;;  %v2151_v0 = vld [vmem:[%s2696_s1 + $0x168] sm:$0xff]   ;;  %v1679_v8 = vcombine.low %v589_v7, %v2462_v31  ;;  %v2182_v57 = vld [vmem:[%s2696_s1 + $0x1d8] sm:$0xff]   ;;  %v2187_v31 = vld [vmem:[%s2696_s1 + $0xf0] sm:$0xff]  }
  0x2c   : > { %1893 = vmatprep.subr.bf16.mxu1 %v2142_v14  ;;  %1968 = vmatmul.mubr.bf16.vlgmr.msra.gmra.mrb[0].mxu0 %v1700_v42  ;;  %v2179_v42 = vld [vmem:[%s2696_s1 + $0xd0] sm:$0xff]   ;;  %v2186_v44 = vld [vmem:[%s2696_s1 + $0x1e8] sm:$0xff]   ;;  %v2189_v45 = vld [vmem:[%s2696_s1 + $0xf8] sm:$0xff]  }
  0x2d   : > { %1972 = vmatpush3.bf16.msra.mxu0 %v2141_v5  ;;  %1987 = vmatprep.mubr.bf16.mxu0 %v1710_v39  ;;  %v600_v5 = vrot.slane %v2377_v34, 5  ;;  %v1666_v34 = vcombine.low %v2368_v30, %v2374_v33  ;;  %v2180_v30 = vld [vmem:[%s2696_s1 + $0x1d0] sm:$0xff]   ;;  %v2194_v39 = vld [vmem:[%s2696_s1 + $0x208] sm:$0xff]   ;;  %v2196_v33 = vld [vmem:[%s2696_s1 + $0x218] sm:$0xff]  }
  0x2e   : > { %1973 = vmatprep.subr.bf16.mxu0 %v2143_v43  ;;  %v2195_v50 = vld [vmem:[%s2696_s1 + $0x210] sm:$0xff]   ;;  %v2197_v52 = vld [vmem:[%s2696_s1 + $0x220] sm:$0xff]   ;;  %v1779_v58 = vld [vmem:[%s245_s26 + $0x8] sm:$0xff]  }
  0x2f   : > { %1894 = vmatpush3.bf16.msra.mxu1 %v2142_v14  ;;  %v601_v9 = vsel %vm2446_vm5, %v1678_v6, %v600_v5  ;;  %v2158_v14 = vld [vmem:[%s2696_s1 + $0x180] sm:$0xff]   ;;  %v1767_v3 = vunpack.c.l.bf16 %v1779_v58  ;;  %v1768_v5 = vunpack.c.h.bf16 %v1779_v58 }
  0x30   : > { %1895 = vmatprep.subr.bf16.mxu1 %v2144_v41  ;;  %v1711_v16 = vcombine.low %v601_v9, %v2490_v56  ;;  %v1680_v38 = vcombine.low %v2472_v48, %v601_v9  ;;  %v2190_v48 = vld [vmem:[%s2696_s1 + $0x1f8] sm:$0xff]   ;;  %v1748_v56 = vld [vmem:[%s2697_s2] ss:$0 sm:$0xff] }
  0x31   : > { %1974 = vmatpush3.bf16.msra.mxu0 %v2143_v43  ;;  %v2178_v43 = vld [vmem:[%s2696_s1 + $0x1c8] sm:$0xff]  }
  0x32   : > { %1975 = vmatprep.subr.bf16.mxu0 %v2145_v51 }
  0x33   : > { %1896 = vmatpush3.bf16.msra.mxu1 %v2144_v41  ;;  %v2175_v41 = vld [vmem:[%s2696_s1 + $0x1c0] sm:$0xff]  }
  0x34   : > { %1897 = vmatprep.subr.bf16.mxu1 %v2146_v49 }
  0x35   : > { %1976 = vmatpush3.bf16.msra.mxu0 %v2145_v51  ;;  %v2200_v51 = vld [vmem:[%s2696_s1 + $0x238] sm:$0xff]  }
  0x36   : > { %1977 = vmatprep.subr.bf16.mxu0 %v2147_v59 }
  0x37   : > { %1898 = vmatpush3.bf16.msra.mxu1 %v2146_v49  ;;  %v2193_v49 = vld [vmem:[%s2696_s1 + $0x200] sm:$0xff]  }
  0x38   : > { %1899 = vmatprep.subr.bf16.mxu1 %v2148_v55 }
  0x39   : > { %1978 = vmatpush3.bf16.msra.mxu0 %v2147_v59 }
  0x3a   : > { %1979 = vmatprep.subr.bf16.mxu0 %v2149_v62 }
  0x3b   : > { %1900 = vmatpush3.bf16.msra.mxu1 %v2148_v55 }
  0x3c   : > { %1901 = vmatprep.subr.bf16.mxu1 %v2150_v61 }
  0x3d   : > { %1980 = vmatpush3.bf16.msra.mxu0 %v2149_v62 }
  0x3e   : > { %1981 = vmatprep.subr.bf16.mxu0 %v2151_v0 }
  0x3f   : > { %1902 = vmatpush3.bf16.msra.mxu1 %v2150_v61 }
  0x40   : > { %1903 = vmatprep.subr.bf16.mxu1 %v2152_v63 }
  0x41   : > { %1982 = vmatpush3.bf16.msra.mxu0 %v2151_v0 }
  0x42   : > { %1983 = vmatprep.subr.bf16.mxu0 %v2153_v4 }
  0x43   : > { %1904 = vmatpush3.bf16.msra.mxu1 %v2152_v63  ;;  %v1762_v63 = vld [vmem:[%s245_s26] sm:$0xff]  }
  0x44   : > { %1905 = vmatprep.subr.bf16.mxu1 %v2154_v2  ;;  %v1763_v7 = vunpack.c.l.bf16 %v1762_v63 }
  0x45   : > { %1984 = vmatpush3.bf16.msra.mxu0 %v2153_v4 }
  0x46   : > { %1985 = vmatprep.subr.bf16.mxu0 %v2155_v11 }
  0x47   : > { %1906 = vmatpush3.bf16.msra.mxu1 %v2154_v2 }
  0x48   : > { %1911 = vmatprep.subr.bf16.mxu1 %v2157_v12 }
  0x49   : > { %1986 = vmatpush3.bf16.msra.mxu0 %v2155_v11 }
  0x4a   : > { %1908 = vmatmul.mubr.bf16.vlgmr.msra.gmra.mrb[0].mxu1 %v1666_v34  ;;  %1991 = vmatprep.subr.bf16.mxu0 %v2158_v14 }
  0x4b   : > { %1912 = vmatpush3.bf16.msra.mxu1 %v2157_v12  ;;  %1927 = vmatprep.mubr.bf16.mxu1 %v1679_v8 }
  0x4c   : > { %1913 = vmatprep.subr.bf16.mxu1 %v2160_v10  ;;  %1988 = vmatmul.mubr.bf16.vlgmr.msra.gmra.mrb[0].mxu0 %v1711_v16 }
  0x4d   : > { %1992 = vmatpush3.bf16.msra.mxu0 %v2158_v14  ;;  %2007 = vmatprep.mubr.bf16.mxu0 %v1666_v34  ;;  %v1764_v34 = vunpack.c.h.bf16 %v1762_v63 }
  0x4e   : > { %1993 = vmatprep.subr.bf16.mxu0 %v2161_v18 }
  0x4f   : > { %1914 = vmatpush3.bf16.msra.mxu1 %v2160_v10 }
  0x50   : > { %1915 = vmatprep.subr.bf16.mxu1 %v2162_v17 }
  0x51   : > { %1994 = vmatpush3.bf16.msra.mxu0 %v2161_v18 }
  0x52   : > { %1995 = vmatprep.subr.bf16.mxu0 %v2163_v20 }
  0x53   : > { %1916 = vmatpush3.bf16.msra.mxu1 %v2162_v17 }
  0x54   : > { %1917 = vmatprep.subr.bf16.mxu1 %v2164_v19 }
  0x55   : > { %1996 = vmatpush3.bf16.msra.mxu0 %v2163_v20 }
  0x56   : > { %1997 = vmatprep.subr.bf16.mxu0 %v2165_v23 }
  0x57   : > { %1918 = vmatpush3.bf16.msra.mxu1 %v2164_v19 }
  0x58   : > { %1919 = vmatprep.subr.bf16.mxu1 %v2166_v22 }
  0x59   : > { %1998 = vmatpush3.bf16.msra.mxu0 %v2165_v23 }
  0x5a   : > { %1999 = vmatprep.subr.bf16.mxu0 %v2167_v25 }
  0x5b   : > { %1920 = vmatpush3.bf16.msra.mxu1 %v2166_v22 }
  0x5c   : > { %1921 = vmatprep.subr.bf16.mxu1 %v2168_v24 }
  0x5d   : > { %2000 = vmatpush3.bf16.msra.mxu0 %v2167_v25 }
  0x5e   : > { %2001 = vmatprep.subr.bf16.mxu0 %v2169_v29 }
  0x5f   : > { %1922 = vmatpush3.bf16.msra.mxu1 %v2168_v24 }
  0x60   : > { %1923 = vmatprep.subr.bf16.mxu1 %v2170_v28 }
  0x61   : > { %2002 = vmatpush3.bf16.msra.mxu0 %v2169_v29 }
  0x62   : > { %2003 = vmatprep.subr.bf16.mxu0 %v2171_v35 }
  0x63   : > { %1924 = vmatpush3.bf16.msra.mxu1 %v2170_v28 }
  0x64   : > { %1925 = vmatprep.subr.bf16.mxu1 %v2172_v32 }
  0x65   : > { %2004 = vmatpush3.bf16.msra.mxu0 %v2171_v35 }
  0x66   : > { %2005 = vmatprep.subr.bf16.mxu0 %v2173_v36 }
  0x67   : > { %1926 = vmatpush3.bf16.msra.mxu1 %v2172_v32 }
  0x68   : > { %1931 = vmatprep.subr.bf16.mxu1 %v2174_v15 }
  0x69   : > { %2006 = vmatpush3.bf16.msra.mxu0 %v2173_v36 }
  0x6a   : > { %1928 = vmatmul.mubr.bf16.vlgmr.msra.gmra.mrb[0].mxu1 %v1680_v38  ;;  %2011 = vmatprep.subr.bf16.mxu0 %v2175_v41 }
  0x6b   : > { %1932 = vmatpush3.bf16.msra.mxu1 %v2174_v15  ;;  %1947 = vmatprep.mubr.bf16.mxu1 %v1689_v37  ;;  %v2183_v37 = vld [vmem:[%s2696_s1 + $0xe0] sm:$0xff]  }
  0x6c   : > { %1933 = vmatprep.subr.bf16.mxu1 %v2177_v40  ;;  %2008 = vmatmul.mubr.bf16.vlgmr.msra.gmra.mrb[0].mxu0 %v1720_v26  ;;  %v2185_v26 = vld [vmem:[%s2696_s1 + $0xe8] sm:$0xff]  }
  0x6d   : > { %2012 = vmatpush3.bf16.msra.mxu0 %v2175_v41  ;;  %2027 = vmatprep.mubr.bf16.mxu0 %v2436_v21  ;;  %v2184_v21 = vld [vmem:[%s2696_s1 + $0x1e0] sm:$0xff]  }
  0x6e   : > { %2013 = vmatprep.subr.bf16.mxu0 %v2178_v43 }
  0x6f   : > { %1934 = vmatpush3.bf16.msra.mxu1 %v2177_v40 }
  0x70   : > { %1935 = vmatprep.subr.bf16.mxu1 %v2179_v42 }
  0x71   : > { %2014 = vmatpush3.bf16.msra.mxu0 %v2178_v43 }
  0x72   : > { %2015 = vmatprep.subr.bf16.mxu0 %v2180_v30 }
  0x73   : > { %1936 = vmatpush3.bf16.msra.mxu1 %v2179_v42 }
  0x74   : > { %1937 = vmatprep.subr.bf16.mxu1 %v2181_v13 }
  0x75   : > { %2016 = vmatpush3.bf16.msra.mxu0 %v2180_v30 }
  0x76   : > { %2017 = vmatprep.subr.bf16.mxu0 %v2182_v57 }
  0x77   : > { %1938 = vmatpush3.bf16.msra.mxu1 %v2181_v13 }
  0x78   : > { %1939 = vmatprep.subr.bf16.mxu1 %v2183_v37 }
  0x79   : > { %2018 = vmatpush3.bf16.msra.mxu0 %v2182_v57 }
  0x7a   : > { %2019 = vmatprep.subr.bf16.mxu0 %v2184_v21 }
  0x7b   : > { %1940 = vmatpush3.bf16.msra.mxu1 %v2183_v37 }
  0x7c   : > { %1941 = vmatprep.subr.bf16.mxu1 %v2185_v26 }
  0x7d   : > { %2020 = vmatpush3.bf16.msra.mxu0 %v2184_v21 }
  0x7e   : > { %2021 = vmatprep.subr.bf16.mxu0 %v2186_v44 }
  0x7f   : > { %1942 = vmatpush3.bf16.msra.mxu1 %v2185_v26 }
  0x80   : > { %1943 = vmatprep.subr.bf16.mxu1 %v2187_v31 }
  0x81   : > { %2022 = vmatpush3.bf16.msra.mxu0 %v2186_v44 }
  0x82   : > { %2023 = vmatprep.subr.bf16.mxu0 %v2188_v46 }
  0x83   : > { %1944 = vmatpush3.bf16.msra.mxu1 %v2187_v31 }
  0x84   : > { %1945 = vmatprep.subr.bf16.mxu1 %v2189_v45 }
  0x85   : > { %2024 = vmatpush3.bf16.msra.mxu0 %v2188_v46 }
  0x86   : > { %2025 = vmatprep.subr.bf16.mxu0 %v2190_v48 }
  0x87   : > { %1946 = vmatpush3.bf16.msra.mxu1 %v2189_v45 }
  0x89   : > { %2026 = vmatpush3.bf16.msra.mxu0 %v2190_v48 }
  0x8a   : > { %1948 = vmatmul.mubr.bf16.vlgmr.msra.gmra.mrb[0].mxu1 %v1690_v27  ;;  %2031 = vmatprep.subr.bf16.mxu0 %v2193_v49  ;;  %v2198_v27 = vld [vmem:[%s2696_s1 + $0x228] sm:$0xff]  }
  0x8c   : > { %2028 = vmatmul.mubr.bf16.vlgmr.msra.gmra.mrb[0].mxu0 %v2468_v47  ;;  %v2199_v47 = vld [vmem:[%s2696_s1 + $0x230] sm:$0xff]  }
  0x8d   : > { %2032 = vmatpush3.bf16.msra.mxu0 %v2193_v49  ;;  %2047 = vmatprep.mubr.bf16.mxu0 %v1680_v38 }
  0x8e   : > { %2033 = vmatprep.subr.bf16.mxu0 %v2194_v39 }
  0x91   : > { %2034 = vmatpush3.bf16.msra.mxu0 %v2194_v39 }
  0x92   : > { %2035 = vmatprep.subr.bf16.mxu0 %v2195_v50 }
  0x95   : > { %2036 = vmatpush3.bf16.msra.mxu0 %v2195_v50 }
  0x96   : > { %2037 = vmatprep.subr.bf16.mxu0 %v2196_v33 }
  0x99   : > { %2038 = vmatpush3.bf16.msra.mxu0 %v2196_v33 }
  0x9a   : > { %2039 = vmatprep.subr.bf16.mxu0 %v2197_v52 }
  0x9d   : > { %2040 = vmatpush3.bf16.msra.mxu0 %v2197_v52 }
  0x9e   : > { %2041 = vmatprep.subr.bf16.mxu0 %v2198_v27 }
  0xa1   : > { %2042 = vmatpush3.bf16.msra.mxu0 %v2198_v27 }
  0xa2   : > { %2043 = vmatprep.subr.bf16.mxu0 %v2199_v47 }
  0xa5   : > { %2044 = vmatpush3.bf16.msra.mxu0 %v2199_v47 }
  0xa6   : > { %2045 = vmatprep.subr.bf16.mxu0 %v2200_v51 }
  0xa9   : > { %2046 = vmatpush3.bf16.msra.mxu0 %v2200_v51 }
  0xac   : > { %2048 = vmatmul.mubr.bf16.vlgmr.msra.gmra.mrb[0].mxu0 %v1739_v60 }
 0x15d   : > { %v1949_v53 = vpop.f32.mrb[0].mxu1 }
 0x15e   : > { %v831_v54 = vpop.f32.mrb[1].mxu1 }
 0x15f   : > { %v1950_v55 = vpop.f32.mrb[2].mxu1 }
 0x160   : > { %v834_v59 = vpop.f32.mrb[3].mxu1 }
 0x17f   : > { %v2049_v61 = vpop.f32.mrb[0].mxu0 }
 0x180   : > { %v2051_v60 = vadd.f32 %v2049_v61, %v1949_v53  ;;  %v1474_v62 = vpop.f32.mrb[1].mxu0 }
 0x181   : > { %v2052_v0 = vadd.f32 %v1474_v62, %v831_v54  ;;  %v2050_v1 = vpop.f32.mrb[2].mxu0 }
 0x182   : > { %v1502_v2 = vadd.f32 %v2051_v60, %v1748_v56  ;;  %v2053_v4 = vadd.f32 %v2050_v1, %v1950_v55  ;;  %v1477_v12 = vpop.f32.mrb[3].mxu0 }
 0x183   : > { %v1500_v6 = vadd.f32 %v2052_v0, %v1748_v56  ;;  %v2054_v11 = vadd.f32 %v1477_v12, %v834_v59 }
 0x184   : > { %v1503_v8 = vadd.f32 %v2053_v4, %v1748_v56  ;;  %v1514_v10 = vadd.f32 %v1767_v3, %v1502_v2 }
 0x185   : > { %v1501_v9 = vadd.f32 %v2054_v11, %v1748_v56  ;;  %v1512_v16 = vadd.f32 %v1763_v7, %v1500_v6 }
 0x186   : > { %v1515_v14 = vadd.f32 %v1768_v5, %v1503_v8 }
 0x187   : > { %v1513_v17 = vadd.f32 %v1764_v34, %v1501_v9 }
 0x188   : > { %v1777_v18 = vpack.c.bf16 %v1515_v14, %v1514_v10 }
 0x189   : > { %v1772_v19 = vpack.c.bf16 %v1513_v17, %v1512_v16 }
 0x18a   : > { %1780 = vst [vmem:[%s255_s29 + $0x8] sm:$0xff] %v1777_v18  }
 0x18b   : > { %1773 = vst [vmem:[%s255_s29] sm:$0xff] %v1772_v19  }
 0x18c PF: > { %s14_s19 = sadd.s32 1, %s2239_s19   ;;  %s2704_s15 = smov %s2231_s17 }
 0x18d   : > { %p11_p7 = scmp.ge.s32.totalorder %s14_s19, 6   ;;  %s2705_s16 = smov %s2235_s18 }
 0x18e   : > { %s2706_s17 = smov %s2709_s20  ;;  %s2707_s18 = smov %s2713_s21 }
 0x18f   :  { %13 = sbr.rel (!%p11_p7) target bundleno = 3 (0x3), region = 70 }

// kernel: didn_forward.65
= control target key start
LH: loop header
LB: loop body
LE: loop exit
PB: predicated region body
PF: predicated region fallthrough
CT: control target
= control target key end

     0   :  { %s3389_s15 = smov 0   ;;  %s3391_s16 = smov 0   ;;  %s4135_s0 = inlined_call_operand.vmem [shape: bf16[2,18,18,128], index: 0, kind: input, shape index: {}]   ;;  %s4136_s1 = inlined_call_operand.vmem [shape: bf16[1152,128], index: 1, kind: input, shape index: {}]   ;;  %s4137_s2 = inlined_call_operand.vmem [shape: f32[1,128], index: 2, kind: input, shape index: {}]   ;;  %s4138_s3 = inlined_call_operand.vmem [shape: f32[2,256,128], index: 3, kind: input, shape index: {}]   ;;  %s4139_s4 = inlined_call_operand.vmem [shape: f32[2,256,128], index: 4, kind: output, shape index: {}]  }
   0x1   :  { %s3393_s17 = smov 0   ;;  %s3395_s18 = smov 0  }
   0x2   :  { %s3397_s19 = smov 0  }
   0x3 LB: > { %s23_s20 = sadd.s32 1, %s3354_s17  ;;  %s26_s21 = sadd.s32 1, %s3358_s18  ;;  %s3362_s19 = sphi %s3397_s19, %s14_s19   ;;  %s3358_s18 = sphi %s3395_s18, %s4147_s18   ;;  %s3354_s17 = sphi %s3393_s17, %s4146_s17   ;;  %s3350_s16 = sphi %s3391_s16, %s4145_s16   ;;  %s3346_s15 = sphi %s3389_s15, %s4144_s15  }
   0x4   : > { %p24_p0 = scmp.ge.s32.totalorder %s23_s20, 2  ;;  %p2498_p1 = scmp.ge.s32.totalorder %s3362_s19, 1 }
   0x5   : > { %p193_p2 = scmp.lt.s32.totalorder %s3362_s19, 5 }
   0x6   : > { %s4149_s20 = smov (%p24_p0, %s23_s20), 0  ;;  %s4151_s21 = smov (!%p24_p0, %s26_s21), %s3358_s18 }
   0x7   : > { %p194_p3 = pnand %p2498_p1, %p193_p2  ;;  %p28_p4 = scmp.ge.s32.totalorder %s4151_s21, 2 }
   0x8   : > { %v3242_v0 = vld [vmem:[%s4136_s1 + $0x40] sm:$0xff] (!%p194_p3)   ;;  %p232_p5 = scmp.lt.s32.totalorder (!%p194_p3), %s3350_s16, 1  ;;  %v3244_v2 = vld [vmem:[%s4136_s1 + $0x48] sm:$0xff] (!%p194_p3)   ;;  %v3246_v4 = vld [vmem:[%s4136_s1 + $0x50] sm:$0xff] (!%p194_p3)   ;;  %s2624_s13 = smul.u32 (!%p194_p3), 96, %s3346_s15  ;;  %vm897_vm3 = vcmask (!%p194_p3), 1042432  }
   0x9   : > { %s4153_s21 = smov (%p28_p4, %s4151_s21), 0  ;;  %197 = sbr.rel (%p194_p3) target bundleno = 404 (0x194), region = 36 }
   0xa   : > { %v3243_v1 = vld [vmem:[%s4136_s1 + $0x100] sm:$0xff] (!%p194_p3)   ;;  %2769 = vmatprep.subr.bf16.mxu1 (!%p194_p3), %v3242_v0  ;;  %v3245_v3 = vld [vmem:[%s4136_s1 + $0x108] sm:$0xff] (!%p194_p3)   ;;  %v3247_v5 = vld [vmem:[%s4136_s1 + $0x110] sm:$0xff] (!%p194_p3)   ;;  %vm308_vm0 = vsmask.f32 (!%p194_p3), 3328  ;;  %vm898_vm4 = vcmask (!%p194_p3), 1046532  }
   0xb   : > { %2897 = vmatprep.subr.bf16.mxu0 (!%p194_p3), %v3243_v1  ;;  %2770 = vmatpush3.bf16.msra.mxu1 (!%p194_p3), %v3242_v0  ;;  %v3248_v6 = vld [vmem:[%s4136_s1 + $0x58] sm:$0xff] (!%p194_p3)   ;;  %v3250_v8 = vld [vmem:[%s4136_s1 + $0x60] sm:$0xff] (!%p194_p3)   ;;  %v3252_v10 = vld [vmem:[%s4136_s1 + $0x68] sm:$0xff] (!%p194_p3)   ;;  %vm309_vm1 = vsmask.f32 (!%p194_p3), 7440  ;;  %s2500_s25 = sshll.u32 (!%p194_p3), %s3346_s15, 4 }
   0xc   : > { %2898 = vmatpush3.bf16.msra.mxu0 (!%p194_p3), %v3243_v1  ;;  %2771 = vmatprep.subr.bf16.mxu1 (!%p194_p3), %v3244_v2  ;;  %v3249_v7 = vld [vmem:[%s4136_s1 + $0x118] sm:$0xff] (!%p194_p3)   ;;  %v3251_v9 = vld [vmem:[%s4136_s1 + $0x120] sm:$0xff] (!%p194_p3)   ;;  %v3253_v11 = vld [vmem:[%s4136_s1 + $0x128] sm:$0xff] (!%p194_p3)   ;;  %p240_p6 = scmp.lt.s32.totalorder (!%p194_p3), %s2500_s25, 31 }
   0xd   : > { %2899 = vmatprep.subr.bf16.mxu0 (!%p194_p3), %v3245_v3  ;;  %v3254_v17 = vld [vmem:[%s4136_s1 + $0x70] sm:$0xff] (!%p194_p3)   ;;  %v3256_v35 = vld [vmem:[%s4136_s1 + $0x78] sm:$0xff] (!%p194_p3)   ;;  %vm3504_vm2 = vmor (!%p194_p3), %vm308_vm0, %vm309_vm1 }
   0xe   : > { %v3255_v30 = vld [vmem:[%s4136_s1 + $0x130] sm:$0xff] (!%p194_p3)   ;;  %v3257_v51 = vld [vmem:[%s4136_s1 + $0x138] sm:$0xff] (!%p194_p3)   ;;  %v3258_v0 = vld [vmem:[%s4136_s1] sm:$0xff] (!%p194_p3)  }
   0xf   : > { %2772 = vmatpush3.bf16.msra.mxu1 (!%p194_p3), %v3244_v2  ;;  %vm3705_vm5 = vmor (!%p194_p3), %vm897_vm3, %vm898_vm4 }
  0x10   : > { %s4155_s16 = smov (!%p232_p5, %s3350_s16), 1  ;;  %2900 = vmatpush3.bf16.msra.mxu0 %v3245_v3  ;;  %2773 = vmatprep.subr.bf16.mxu1 %v3246_v4  ;;  %s4157_s25 = smov (!%p240_p6, %s2500_s25), 31 }
  0x11   : > { %s3201_s8 = smul.u32 216, %s4155_s16  ;;  %2901 = vmatprep.subr.bf16.mxu0 %v3247_v5  ;;  %s2501_s26 = sshll.u32 %s4155_s16, 5 }
  0x12   : > { %s243_s27 = sadd.s32 %s2501_s26, %s4157_s25 }
  0x13   : > { %s236_s23 = scalar_lea.vmem %s4135_s0, %s3201_s8  ;;  %2774 = vmatpush3.bf16.msra.mxu1 %v3246_v4  ;;  %v3259_v4 = vld [vmem:[%s4136_s1 + $0x140] sm:$0xff]   ;;  %s2502_s15 = sshll.u32 %s243_s27, 3 }
  0x14   : > { %2902 = vmatpush3.bf16.msra.mxu0 %v3247_v5  ;;  %2775 = vmatprep.subr.bf16.mxu1 %v3248_v6  ;;  %s3458_s28 = scalar_lea.vmem %s236_s23, %s2624_s13  ;;  %s4053_s16 = scalar_lea.vmem %s4138_s3, %s2502_s15 }
  0x15   : > { %2903 = vmatprep.subr.bf16.mxu0 %v3249_v7  ;;  %v3467_v12 = vld [vmem:[%s3458_s28] sm:$0xf]  ;;  %v3470_v13 = vld [vmem:[%s3458_s28 + $0x4] sm:$0xf]  ;;  %v3473_v14 = vld [vmem:[%s3458_s28 + $0x8] sm:$0x1]  ;;  %s4066_s9 = scalar_lea.vmem %s4139_s4, %s2502_s15 }
  0x16   : > { %v312_v15 = vshrl.u32 %v3467_v12, 16  ;;  %v315_v16 = vshll.u32 %v3467_v12, 16  ;;  %v321_v18 = vshll.u32 %v3470_v13, 16  ;;  %v325_v19 = vshrl.u32 %v3470_v13, 16  ;;  %v3484_v21 = vld [vmem:[%s3458_s28 + $0xc] sm:$0xf] }
  0x17   : > { %2776 = vmatpush3.bf16.msra.mxu1 %v3248_v6  ;;  %v331_v20 = vshll.u32 %v3473_v14, 16  ;;  %v3487_v24 = vld [vmem:[%s3458_s28 + $0x10] sm:$0xf]  ;;  %v3490_v25 = vld [vmem:[%s3458_s28 + $0x14] sm:$0x1]  ;;  %v336_v29 = vshrl.u32 %v3484_v21, 16 }
  0x18   : > { %2904 = vmatpush3.bf16.msra.mxu0 %v3249_v7  ;;  %2777 = vmatprep.subr.bf16.mxu1 %v3250_v8  ;;  %v314_v22 = vrot.slane %v312_v15, 4  ;;  %v317_v23 = vrot.slane %v315_v16, 5  ;;  %v323_v26 = vrot.slane %v321_v18, 5  ;;  %v327_v27 = vrot.slane %v325_v19, 4  ;;  %v3510_v40 = vld [vmem:[%s3458_s28 + $0x18] sm:$0xf] }
  0x19   : > { %2905 = vmatprep.subr.bf16.mxu0 %v3251_v9  ;;  %v333_v28 = vrot.slane %v331_v20, 5  ;;  %v339_v32 = vshll.u32 %v3484_v21, 16  ;;  %v345_v33 = vshll.u32 %v3487_v24, 16  ;;  %v349_v34 = vshrl.u32 %v3487_v24, 16  ;;  %v3513_v41 = vld [vmem:[%s3458_s28 + $0x1c] sm:$0xf] }
  0x1a   : > { %v318_v31 = vor.u32 %v317_v23, %v314_v22  ;;  %v328_v37 = vor.u32 %v327_v27, %v323_v26  ;;  %v338_v38 = vrot.slane %v336_v29, 4  ;;  %v355_v39 = vshll.u32 %v3490_v25, 16  ;;  %v3516_v46 = vld [vmem:[%s3458_s28 + $0x20] sm:$0x1]  ;;  %v3541_v7 = vld [vmem:[%s3458_s28 + $0x24] sm:$0xf] }
  0x1b   : > { %2778 = vmatpush3.bf16.msra.mxu1 %v3250_v8  ;;  %v341_v43 = vrot.slane %v339_v32, 5  ;;  %v347_v44 = vrot.slane %v345_v33, 5  ;;  %v351_v45 = vrot.slane %v349_v34, 4  ;;  %v360_v49 = vshrl.u32 %v3510_v40, 16  ;;  %v3544_v8 = vld [vmem:[%s3458_s28 + $0x28] sm:$0xf] }
  0x1c   : > { %2906 = vmatpush3.bf16.msra.mxu0 %v3251_v9  ;;  %2779 = vmatprep.subr.bf16.mxu1 %v3252_v10  ;;  %v319_v42 = vrot.slane %v318_v31, 4  ;;  %v329_v47 = vrot.slane %v328_v37, 4  ;;  %v357_v48 = vrot.slane %v355_v39, 5  ;;  %v363_v50 = vshll.u32 %v3510_v40, 16  ;;  %v3547_v9 = vld [vmem:[%s3458_s28 + $0x2c] sm:$0x1] }
  0x1d   : > { %2907 = vmatprep.subr.bf16.mxu0 %v3253_v11  ;;  %v342_v53 = vor.u32 %v341_v43, %v338_v38  ;;  %v352_v54 = vor.u32 %v351_v45, %v347_v44  ;;  %v369_v55 = vshll.u32 %v3513_v41, 16  ;;  %v362_v57 = vrot.slane %v360_v49, 4  ;;  %v3557_v23 = vld [vmem:[%s3458_s28 + $0x30] sm:$0xf]  ;;  %v3563_v29 = vld [vmem:[%s3458_s28 + $0x34] sm:$0xf] }
  0x1e   : > { %v324_v52 = vsel %vm3504_vm2, %v319_v42, %v323_v26  ;;  %v334_v56 = vsel %vm3504_vm2, %v329_v47, %v333_v28  ;;  %v365_v58 = vrot.slane %v363_v50, 5  ;;  %v373_v59 = vshrl.u32 %v3513_v41, 16  ;;  %v3261_v37 = vld [vmem:[%s4136_s1 + $0x148] sm:$0xff]   ;;  %v3262_v47 = vld [vmem:[%s4136_s1 + $0x10] sm:$0xff]  }
  0x1f   : > { %2780 = vmatpush3.bf16.msra.mxu1 %v3252_v10  ;;  %v2509_v60 = vcombine.low %v324_v52, %v334_v56  ;;  %v343_v61 = vrot.slane %v342_v53, 4  ;;  %v353_v62 = vrot.slane %v352_v54, 4  ;;  %v371_v63 = vrot.slane %v369_v55, 5  ;;  %v3263_v56 = vld [vmem:[%s4136_s1 + $0x150] sm:$0xff]  }
  0x20   : > { %2908 = vmatpush3.bf16.msra.mxu0 %v3253_v11  ;;  %2781 = vmatprep.subr.bf16.mxu1 %v3254_v17  ;;  %v366_v1 = vor.u32 %v365_v58, %v362_v57  ;;  %v375_v2 = vrot.slane %v373_v59, 4  ;;  %v379_v3 = vshll.u32 %v3516_v46, 16  ;;  %v384_v18 = vshrl.u32 %v3541_v7, 16 }
  0x21   : > { %2909 = vmatprep.subr.bf16.mxu0 %v3255_v30  ;;  %2785 = vmatprep.mubr.bf16.mxu1 %v2509_v60  ;;  %v348_v5 = vsel %vm3504_vm2, %v343_v61, %v347_v44  ;;  %v358_v6 = vsel %vm3504_vm2, %v353_v62, %v357_v48  ;;  %v387_v19 = vshll.u32 %v3541_v7, 16  ;;  %v393_v20 = vshll.u32 %v3544_v8, 16  ;;  %v3589_v60 = vld [vmem:[%s3458_s28 + $0x3c] sm:$0xf]  ;;  %v3592_v61 = vld [vmem:[%s3458_s28 + $0x40] sm:$0xf] }
  0x22   : > { %v2510_v10 = vcombine.low %v348_v5, %v358_v6  ;;  %v367_v11 = vrot.slane %v366_v1, 4  ;;  %v376_v15 = vor.u32 %v375_v2, %v371_v63  ;;  %v381_v16 = vrot.slane %v379_v3, 5  ;;  %v3264_v6 = vld [vmem:[%s4136_s1 + $0x18] sm:$0xff]  }
  0x23   : > { %2782 = vmatpush3.bf16.msra.mxu1 %v3254_v17  ;;  %v3260_v17 = vld [vmem:[%s4136_s1 + $0x8] sm:$0xff]   ;;  %v397_v22 = vshrl.u32 %v3544_v8, 16  ;;  %v403_v28 = vshll.u32 %v3547_v9, 16  ;;  %v386_v31 = vrot.slane %v384_v18, 4  ;;  %v389_v32 = vrot.slane %v387_v19, 5 }
  0x24   : > { %2910 = vmatpush3.bf16.msra.mxu0 %v3255_v30  ;;  %2783 = vmatprep.subr.bf16.mxu1 %v3256_v35  ;;  %v372_v26 = vsel %vm3504_vm2, %v367_v11, %v371_v63  ;;  %v377_v27 = vrot.slane %v376_v15, 4  ;;  %v3566_v30 = vld [vmem:[%s3458_s28 + $0x38] sm:$0x1]  ;;  %v395_v33 = vrot.slane %v393_v20, 5  ;;  %v408_v39 = vshrl.u32 %v3557_v23, 16 }
  0x25   : > { %2911 = vmatprep.subr.bf16.mxu0 %v3257_v51  ;;  %2913 = vmatprep.mubr.bf16.mxu0 %v2510_v10  ;;  %v399_v34 = vrot.slane %v397_v22, 4  ;;  %v405_v38 = vrot.slane %v403_v28, 5  ;;  %v411_v42 = vshll.u32 %v3557_v23, 16  ;;  %v390_v44 = vor.u32 %v389_v32, %v386_v31  ;;  %v3612_v18 = vld [vmem:[%s3458_s28 + $0x48] sm:$0xf]  ;;  %v3265_v28 = vld [vmem:[%s4136_s1 + $0x158] sm:$0xff]  }
  0x26   : > { %v417_v48 = vshll.u32 %v3563_v29, 16  ;;  %v410_v49 = vrot.slane %v408_v39, 4  ;;  %v427_v52 = vshll.u32 %v3566_v30, 16  ;;  %v432_v1 = vshrl.u32 %v3589_v60, 16 }
  0x27   : > { %2784 = vmatpush3.bf16.msra.mxu1 %v3256_v35  ;;  %v382_v35 = vsel %vm3504_vm2, %v377_v27, %v381_v16  ;;  %v400_v45 = vor.u32 %v399_v34, %v395_v33  ;;  %v413_v50 = vrot.slane %v411_v42, 5  ;;  %v391_v53 = vrot.slane %v390_v44, 4  ;;  %v3621_v27 = vld [vmem:[%s3458_s28 + $0x50] sm:$0x1] }
  0x28   : > { %2912 = vmatpush3.bf16.msra.mxu0 %v3257_v51  ;;  %2801 = vmatprep.subr.bf16.mxu1 %v3258_v0  ;;  %v3575_v43 = vcombine.low %v372_v26, %v382_v35  ;;  %v421_v51 = vshrl.u32 %v3563_v29, 16  ;;  %v419_v55 = vrot.slane %v417_v48, 5  ;;  %v429_v59 = vrot.slane %v427_v52, 5  ;;  %v3618_v26 = vld [vmem:[%s3458_s28 + $0x4c] sm:$0xf] }
  0x29   : > { %2929 = vmatprep.subr.bf16.mxu0 %v3259_v4  ;;  %v401_v54 = vrot.slane %v400_v45, 4  ;;  %v414_v57 = vor.u32 %v413_v50, %v410_v49  ;;  %v396_v62 = vsel %vm3504_vm2, %v391_v53, %v395_v33  ;;  %v435_v2 = vshll.u32 %v3589_v60, 16 }
  0x2a   : > { %2786 = vmatmul.mubr.bf16.vlgmr.msra.gmra.mrb[0].mxu1 %v2510_v10  ;;  %v423_v58 = vrot.slane %v421_v51, 4  ;;  %v441_v10 = vshll.u32 %v3592_v61, 16  ;;  %v434_v11 = vrot.slane %v432_v1, 4  ;;  %v445_v16 = vshrl.u32 %v3592_v61, 16 }
  0x2b   : > { %2802 = vmatpush3.bf16.msra.mxu1 %v3258_v0  ;;  %2914 = vmatmul.mubr.bf16.vlgmr.msra.gmra.mrb[0].mxu0 %v3575_v43  ;;  %v406_v63 = vsel %vm3504_vm2, %v401_v54, %v405_v38  ;;  %v3599_v0 = vld [vmem:[%s3458_s28 + $0x44] sm:$0x1]  ;;  %v437_v15 = vrot.slane %v435_v2, 5  ;;  %v456_v34 = vshrl.u32 %v3612_v18, 16  ;;  %v459_v38 = vshll.u32 %v3612_v18, 16 }
  0x2c   : > { %2803 = vmatprep.subr.bf16.mxu1 %v3260_v17  ;;  %2789 = vmatprep.mubr.bf16.mxu1 %v3575_v43  ;;  %v3603_v3 = vcombine.low %v396_v62, %v406_v63  ;;  %v424_v5 = vor.u32 %v423_v58, %v419_v55  ;;  %v443_v22 = vrot.slane %v441_v10, 5  ;;  %v447_v32 = vrot.slane %v445_v16, 4  ;;  %v3650_v62 = vld [vmem:[%s3458_s28 + $0x58] sm:$0xf]  ;;  %v3653_v63 = vld [vmem:[%s3458_s28 + $0x5c] sm:$0x1] }
  0x2d   : > { %2930 = vmatpush3.bf16.msra.mxu0 %v3259_v4  ;;  %v415_v4 = vrot.slane %v414_v57, 4  ;;  %v438_v31 = vor.u32 %v437_v15, %v434_v11  ;;  %v465_v39 = vshll.u32 %v3618_v26, 16  ;;  %v469_v42 = vshrl.u32 %v3618_v26, 16  ;;  %v3646_v57 = vld [vmem:[%s3458_s28 + $0x54] sm:$0xf] }
  0x2e   : > { %2931 = vmatprep.subr.bf16.mxu0 %v3261_v37  ;;  %2917 = vmatprep.mubr.bf16.mxu0 %v3603_v3  ;;  %v425_v20 = vrot.slane %v424_v5, 4  ;;  %v448_v48 = vor.u32 %v447_v32, %v443_v22  ;;  %v458_v49 = vrot.slane %v456_v34, 4  ;;  %v475_v52 = vshll.u32 %v3621_v27, 16 }
  0x2f   : > { %2804 = vmatpush3.bf16.msra.mxu1 %v3260_v17  ;;  %v451_v17 = vshll.u32 %v3599_v0, 16  ;;  %v420_v19 = vsel %vm3504_vm2, %v415_v4, %v419_v55  ;;  %v439_v45 = vrot.slane %v438_v31, 4  ;;  %v467_v50 = vrot.slane %v465_v39, 5  ;;  %v3267_v55 = vld [vmem:[%s4136_s1 + $0x160] sm:$0xff]   ;;  %v3268_v4 = vld [vmem:[%s4136_s1 + $0x28] sm:$0xff]  }
  0x30   : > { %2805 = vmatprep.subr.bf16.mxu1 %v3262_v47  ;;  %v430_v35 = vsel %vm3504_vm2, %v425_v20, %v429_v59  ;;  %v471_v51 = vrot.slane %v469_v42, 4  ;;  %v449_v54 = vrot.slane %v448_v48, 4  ;;  %v477_v59 = vrot.slane %v475_v52, 5  ;;  %v3686_v39 = vld [vmem:[%s3458_s28 + $0x68] sm:$0x1] }
  0x31   : > { %2932 = vmatpush3.bf16.msra.mxu0 %v3261_v37  ;;  %v453_v33 = vrot.slane %v451_v17, 5  ;;  %v3266_v37 = vld [vmem:[%s4136_s1 + $0x20] sm:$0xff]   ;;  %v3636_v44 = vcombine.low %v420_v19, %v430_v35  ;;  %v444_v53 = vsel %vm3504_vm2, %v439_v45, %v443_v22  ;;  %v480_v1 = vshrl.u32 %v3646_v57, 16  ;;  %v3269_v17 = vld [vmem:[%s4136_s1 + $0x168] sm:$0xff]   ;;  %v3270_v35 = vld [vmem:[%s4136_s1 + $0x30] sm:$0xff]  }
  0x32   : > { %2790 = vmatmul.mubr.bf16.gmra.mrb[4].mxu1 %v3603_v3  ;;  %2933 = vmatprep.subr.bf16.mxu0 %v3263_v56  ;;  %v472_v58 = vor.u32 %v471_v51, %v467_v50  ;;  %v483_v5 = vshll.u32 %v3646_v57, 16  ;;  %v493_v10 = vshrl.u32 %v3650_v62, 16  ;;  %v499_v32 = vshll.u32 %v3653_v63, 16  ;;  %v3271_v51 = vld [vmem:[%s4136_s1 + $0x170] sm:$0xff]  }
  0x33   : > { %2806 = vmatpush3.bf16.msra.mxu1 %v3262_v47  ;;  %v461_v47 = vrot.slane %v459_v38, 5  ;;  %2918 = vmatmul.mubr.bf16.gmra.mrb[4].mxu0 %v3636_v44  ;;  %v454_v2 = vsel %vm3504_vm2, %v449_v54, %v453_v33  ;;  %v482_v19 = vrot.slane %v480_v1, 4  ;;  %v3671_v33 = vld [vmem:[%s3458_s28 + $0x60] sm:$0xf]  ;;  %v3683_v38 = vld [vmem:[%s3458_s28 + $0x64] sm:$0xf] }
  0x34   : > { %2807 = vmatprep.subr.bf16.mxu1 %v3264_v6  ;;  %2793 = vmatprep.mubr.bf16.mxu1 %v3636_v44  ;;  %v3664_v11 = vcombine.low %v444_v53, %v454_v2  ;;  %v473_v16 = vrot.slane %v472_v58, 4  ;;  %v485_v20 = vrot.slane %v483_v5, 5  ;;  %v495_v31 = vrot.slane %v493_v10, 4 }
  0x35   : > { %2934 = vmatpush3.bf16.msra.mxu0 %v3263_v56  ;;  %v462_v56 = vor.u32 %v461_v47, %v458_v49  ;;  %v1349_v42 = vshrl.u32 %v3671_v33, 16  ;;  %v1352_v45 = vshll.u32 %v3671_v33, 16  ;;  %v1358_v54 = vshll.u32 %v3683_v38, 16 }
  0x36   : > { %2935 = vmatprep.subr.bf16.mxu0 %v3265_v28  ;;  %2921 = vmatprep.mubr.bf16.mxu0 %v3664_v11  ;;  %v478_v34 = vsel %vm3504_vm2, %v473_v16, %v477_v59  ;;  %v486_v49 = vor.u32 %v485_v20, %v482_v19  ;;  %v1368_v59 = vshll.u32 %v3686_v39, 16  ;;  %v2542_v1 = vrot.slane %v3484_v21, 9 }
  0x37   : > { %2808 = vmatpush3.bf16.msra.mxu1 %v3264_v6  ;;  %v489_v6 = vshll.u32 %v3650_v62, 16  ;;  %v463_v15 = vrot.slane %v462_v56, 4  ;;  %v1351_v52 = vrot.slane %v1349_v42, 4  ;;  %v1354_v53 = vrot.slane %v1352_v45, 5 }
  0x38   : > { %2809 = vmatprep.subr.bf16.mxu1 %v3266_v37  ;;  %v1362_v56 = vshrl.u32 %v3683_v38, 16  ;;  %v487_v58 = vrot.slane %v486_v49, 4  ;;  %v1370_v19 = vrot.slane %v1368_v59, 5  ;;  %v909_v20 = vrot.slane %v3487_v24, 5 }
  0x39   : > { %2936 = vmatpush3.bf16.msra.mxu0 %v3265_v28  ;;  %v491_v22 = vrot.slane %v489_v6, 5  ;;  %v468_v28 = vsel %vm3504_vm2, %v463_v15, %v467_v50  ;;  %v501_v50 = vrot.slane %v499_v32, 5  ;;  %v1355_v2 = vor.u32 %v1354_v53, %v1351_v52 }
  0x3a   : > { %2937 = vmatprep.subr.bf16.mxu0 %v3267_v55  ;;  %2794 = vmatmul.mubr.bf16.gmra.mrb[8].mxu1 %v3664_v11  ;;  %v3690_v48 = vcombine.low %v468_v28, %v478_v34  ;;  %v1364_v5 = vrot.slane %v1362_v56, 4  ;;  %v2525_v6 = vcombine.low %v3467_v12, %v3470_v13  ;;  %v3272_v34 = vld [vmem:[%s4136_s1 + $0x38] sm:$0xff]   ;;  %v910_v42 = vsel %vm3705_vm5, %v2542_v1, %v909_v20 }
  0x3b   : > { %2810 = vmatpush3.bf16.msra.mxu1 %v3266_v37  ;;  %v496_v47 = vor.u32 %v495_v31, %v491_v22  ;;  %v492_v15 = vsel %vm3504_vm2, %v487_v58, %v491_v22  ;;  %v1356_v32 = vrot.slane %v1355_v2, 4  ;;  %v3273_v22 = vld [vmem:[%s4136_s1 + $0x178] sm:$0xff]   ;;  %v916_v45 = vrot.slane %v3513_v41, 5 }
  0x3c   : > { %2811 = vmatprep.subr.bf16.mxu1 %v3268_v4  ;;  %2922 = vmatmul.mubr.bf16.gmra.mrb[8].mxu0 %v3690_v48  ;;  %v2543_v53 = vrot.slane %v3510_v40, 9  ;;  %v2544_v1 = vrot.slane %v3541_v7, 9  ;;  %v3755_v2 = vcombine.low %v3484_v21, %v3487_v24  ;;  %v3278_v21 = vld [vmem:[%s4136_s1 + $0x88] sm:$0xff]   ;;  %v930_v24 = vrot.slane %v3563_v29, 5 }
  0x3d   : > { %2938 = vmatpush3.bf16.msra.mxu0 %v3267_v55  ;;  %v497_v37 = vrot.slane %v496_v47, 4  ;;  %2797 = vmatprep.mubr.bf16.mxu1 %v3690_v48  ;;  %v1360_v55 = vrot.slane %v1358_v54, 5  ;;  %v918_v58 = vrot.slane %v916_v45, 4 }
  0x3e   : > { %2939 = vmatprep.subr.bf16.mxu0 %v3269_v17 }
  0x3f   : > { %2812 = vmatpush3.bf16.msra.mxu1 %v3268_v4  ;;  %v502_v16 = vsel %vm3504_vm2, %v497_v37, %v501_v50  ;;  %v1365_v28 = vor.u32 %v1364_v5, %v1360_v55  ;;  %v912_v4 = vrot.slane %v3490_v25, 5  ;;  %v1361_v49 = vsel %vm3504_vm2, %v1356_v32, %v1360_v55 }
  0x40   : > { %v3714_v31 = vcombine.low %v492_v15, %v502_v16  ;;  %2813 = vmatprep.subr.bf16.mxu1 %v3270_v35  ;;  %v3732_v25 = vcombine.low %v3671_v33, %v3683_v38  ;;  %v919_v50 = vrot.slane %v3516_v46, 5  ;;  %v923_v37 = vrot.slane %v3544_v8, 5  ;;  %v3276_v46 = vld [vmem:[%s4136_s1 + $0x80] sm:$0xff]  }
  0x41   : > { %2940 = vmatpush3.bf16.msra.mxu0 %v3269_v17  ;;  %v911_v17 = vrot.slane %v909_v20, 4  ;;  %v1366_v47 = vrot.slane %v1365_v28, 4  ;;  %v3760_v5 = vcombine.low %v3510_v40, %v3513_v41  ;;  %v937_v15 = vrot.slane %v3592_v61, 5 }
  0x42   : > { %2941 = vmatprep.subr.bf16.mxu0 %v3271_v51  ;;  %2925 = vmatprep.mubr.bf16.mxu0 %v3714_v31  ;;  %v925_v55 = vrot.slane %v923_v37, 4  ;;  %v924_v40 = vsel %vm3705_vm5, %v2544_v1, %v923_v37  ;;  %v2545_v20 = vrot.slane %v3557_v23, 9  ;;  %v932_v28 = vrot.slane %v930_v24, 4  ;;  %v3285_v37 = vld [vmem:[%s4136_s1 + $0x198] sm:$0xff]  }
  0x43   : > { %2798 = vmatmul.mubr.bf16.gmra.mrb[12].mxu1 %v3714_v31  ;;  %v913_v52 = vsel %vm3705_vm5, %v911_v17, %v912_v4  ;;  %v1371_v54 = vsel %vm3504_vm2, %v1366_v47, %v1370_v19  ;;  %v3279_v19 = vld [vmem:[%s4136_s1 + $0x188] sm:$0xff]   ;;  %v3282_v4 = vld [vmem:[%s4136_s1 + $0x90] sm:$0xff]   ;;  %v940_v17 = vrot.slane %v3599_v0, 5  ;;  %v944_v47 = vrot.slane %v3618_v26, 5  ;;  %v3284_v0 = vld [vmem:[%s4136_s1 + $0x98] sm:$0xff]  }
  0x44   : > { %2814 = vmatpush3.bf16.msra.mxu1 %v3270_v35  ;;  %2817 = vmatprep.mubr.bf16.mxu1 %v2525_v6  ;;  %v3740_v56 = vcombine.low %v910_v42, %v913_v52  ;;  %v3743_v59 = vcombine.low %v1361_v49, %v1371_v54  ;;  %v3277_v35 = vld [vmem:[%s4136_s1 + $0x180] sm:$0xff]   ;;  %v917_v6 = vsel %vm3705_vm5, %v2543_v53, %v916_v45  ;;  %v939_v42 = vrot.slane %v937_v15, 4 }
  0x45   : > { %2942 = vmatpush3.bf16.msra.mxu0 %v3271_v51  ;;  %2815 = vmatprep.subr.bf16.mxu1 %v3272_v34  ;;  %v926_v51 = vrot.slane %v3547_v9, 5  ;;  %v920_v9 = vsel %vm3705_vm5, %v918_v58, %v919_v50  ;;  %v3794_v45 = vcombine.low %v3541_v7, %v3544_v8  ;;  %v3802_v49 = vcombine.low %v3557_v23, %v3563_v29 }
  0x46   : > { %2943 = vmatprep.subr.bf16.mxu0 %v3273_v22  ;;  %2926 = vmatmul.mubr.bf16.gmra.mrb[12].mxu0 %v3743_v59  ;;  %v3777_v16 = vcombine.low %v917_v6, %v920_v9  ;;  %v905_v50 = vrot.slane %v3473_v14, 5  ;;  %v931_v7 = vsel %vm3705_vm5, %v2545_v20, %v930_v24  ;;  %v941_v14 = vsel %vm3705_vm5, %v939_v42, %v940_v17  ;;  %v3296_v17 = vld [vmem:[%s4136_s1 + $0xb8] sm:$0xff]  }
  0x47   : > { %2945 = vmatprep.mubr.bf16.mxu0 %v3740_v56  ;;  %v927_v41 = vsel %vm3705_vm5, %v925_v55, %v926_v51  ;;  %v951_v29 = vrot.slane %v3650_v62, 5  ;;  %v2541_v52 = vrot.slane %v3467_v12, 9  ;;  %v2547_v53 = vrot.slane %v3612_v18, 9 }
  0x48   : > { %2816 = vmatpush3.bf16.msra.mxu1 %v3272_v34  ;;  %v3784_v32 = vcombine.low %v924_v40, %v927_v41  ;;  %v933_v34 = vrot.slane %v3566_v30, 5  ;;  %v3283_v30 = vld [vmem:[%s4136_s1 + $0x190] sm:$0xff]   ;;  %v902_v54 = vrot.slane %v3470_v13, 5  ;;  %v946_v12 = vrot.slane %v944_v47, 4 }
  0x49   : > { %2944 = vmatpush3.bf16.msra.mxu0 %v3273_v22  ;;  %2833 = vmatprep.subr.bf16.mxu1 %v3276_v46  ;;  %v2546_v22 = vrot.slane %v3589_v60, 9  ;;  %v2548_v13 = vrot.slane %v3646_v57, 9  ;;  %v953_v6 = vrot.slane %v951_v29, 4  ;;  %v954_v9 = vrot.slane %v3653_v63, 5 }
  0x4a   : > { %2961 = vmatprep.subr.bf16.mxu0 %v3277_v35  ;;  %v934_v8 = vsel %vm3705_vm5, %v932_v28, %v933_v34  ;;  %v903_v51 = vsel %vm3705_vm5, %v2541_v52, %v902_v54  ;;  %v904_v55 = vrot.slane %v902_v54, 4  ;;  %v3848_v24 = vcombine.low %v3612_v18, %v3618_v26  ;;  %v3289_v18 = vld [vmem:[%s4136_s1 + $0x1a0] sm:$0xff]   ;;  %v3308_v52 = vld [vmem:[%s4136_s1 + $0xe8] sm:$0xff]  }
  0x4b   : > { %2818 = vmatmul.mubr.bf16.vlgmr.msra.gmra.mrb[0].mxu1 %v3755_v2  ;;  %v938_v23 = vsel %vm3705_vm5, %v2546_v22, %v937_v15  ;;  %v3823_v58 = vcombine.low %v931_v7, %v934_v8  ;;  %v945_v63 = vsel %vm3705_vm5, %v2547_v53, %v944_v47  ;;  %v1556_v41 = vrot.slane %v3683_v38, 5  ;;  %v3291_v38 = vld [vmem:[%s4136_s1 + $0x1a8] sm:$0xff]   ;;  %v3294_v22 = vld [vmem:[%s4136_s1 + $0xb0] sm:$0xff]   ;;  %v3298_v47 = vld [vmem:[%s4136_s1 + $0xc0] sm:$0xff]  }
  0x4c   : > { %2834 = vmatpush3.bf16.msra.mxu1 %v3276_v46  ;;  %2821 = vmatprep.mubr.bf16.mxu1 %v3760_v5  ;;  %v3288_v46 = vld [vmem:[%s4136_s1 + $0xa0] sm:$0xff]   ;;  %v3833_v1 = vcombine.low %v938_v23, %v941_v14  ;;  %v952_v26 = vsel %vm3705_vm5, %v2548_v13, %v951_v29  ;;  %v955_v15 = vsel %vm3705_vm5, %v953_v6, %v954_v9  ;;  %v2583_v20 = vrot.slane %v3671_v33, 9  ;;  %v3301_v8 = vld [vmem:[%s4136_s1 + $0x1c8] sm:$0xff]   ;;  %v3303_v23 = vld [vmem:[%s4136_s1 + $0x1d0] sm:$0xff]  }
  0x4d   : > { %2835 = vmatprep.subr.bf16.mxu1 %v3278_v21  ;;  %v3874_v28 = vcombine.low %v952_v26, %v955_v15  ;;  %v1558_v34 = vrot.slane %v1556_v41, 4  ;;  %v3882_v42 = vcombine.low %v3646_v57, %v3650_v62  ;;  %v3295_v57 = vld [vmem:[%s4136_s1 + $0x1b0] sm:$0xff]   ;;  %v3299_v7 = vld [vmem:[%s4136_s1 + $0x1c0] sm:$0xff]   ;;  %v3305_v14 = vld [vmem:[%s4136_s1 + $0x1d8] sm:$0xff]  }
  0x4e   : > { %2946 = vmatmul.mubr.bf16.vlgmr.msra.gmra.mrb[0].mxu0 %v3777_v16  ;;  %v1557_v33 = vsel %vm3705_vm5, %v2583_v20, %v1556_v41  ;;  %v3306_v29 = vld [vmem:[%s4136_s1 + $0xe0] sm:$0xff]   ;;  %v3309_v54 = vld [vmem:[%s4136_s1 + $0x1e8] sm:$0xff]   ;;  %v3313_v13 = vld [vmem:[%s4136_s1 + $0x1f0] sm:$0xff]  }
  0x4f   : > { %2962 = vmatpush3.bf16.msra.mxu0 %v3277_v35  ;;  %2949 = vmatprep.mubr.bf16.mxu0 %v3784_v32  ;;  %v947_v35 = vrot.slane %v3621_v27, 5  ;;  %v906_v27 = vsel %vm3705_vm5, %v904_v55, %v905_v50  ;;  %v3300_v50 = vld [vmem:[%s4136_s1 + $0xc8] sm:$0xff]   ;;  %v3307_v53 = vld [vmem:[%s4136_s1 + $0x1e0] sm:$0xff]   ;;  %v3315_v55 = vld [vmem:[%s4136_s1 + $0x1f8] sm:$0xff]  }
  0x50   : > { %2836 = vmatpush3.bf16.msra.mxu1 %v3278_v21  ;;  %2963 = vmatprep.subr.bf16.mxu0 %v3279_v19  ;;  %v3841_v21 = vcombine.low %v3589_v60, %v3592_v61  ;;  %v2549_v40 = vcombine.low %v903_v51, %v906_v27  ;;  %v3290_v61 = vld [vmem:[%s4136_s1 + $0xa8] sm:$0xff]   ;;  %v3316_v6 = vld [vmem:[%s4136_s1 + $0x200] sm:$0xff]   ;;  %v3318_v9 = vld [vmem:[%s4136_s1 + $0x210] sm:$0xff]  }
  0x51   : > { %2837 = vmatprep.subr.bf16.mxu1 %v3282_v4  ;;  %v948_v60 = vsel %vm3705_vm5, %v946_v12, %v947_v35  ;;  %v3959_v12 = vld [vmem:[%s3458_s28 + $0x70] sm:$0xf]  ;;  %v3314_v35 = vld [vmem:[%s4136_s1 + $0xf8] sm:$0xff]   ;;  %v291_v41 = vld [vmem:[%s3458_s28 + $0x74] sm:$0x1] }
  0x52   : > { %v1945_v26 = vshll.u32 %v291_v41, 16 }
  0x53   : > { %2822 = vmatmul.mubr.bf16.gmra.mrb[4].mxu1 %v3794_v45  ;;  %2964 = vmatpush3.bf16.msra.mxu0 %v3279_v19  ;;  %v3867_v19 = vcombine.low %v945_v63, %v948_v60 }
  0x54   : > { %2838 = vmatpush3.bf16.msra.mxu1 %v3282_v4  ;;  %2825 = vmatprep.mubr.bf16.mxu1 %v3802_v49  ;;  %v1559_v4 = vrot.slane %v3686_v39, 5 }
  0x55   : > { %2839 = vmatprep.subr.bf16.mxu1 %v3284_v0  ;;  %2965 = vmatprep.subr.bf16.mxu0 %v3283_v30 }
  0x56   : > { %2950 = vmatmul.mubr.bf16.gmra.mrb[4].mxu0 %v3823_v58  ;;  %v1560_v39 = vsel %vm3705_vm5, %v1558_v34, %v1559_v4  ;;  %v3323_v34 = vld [vmem:[%s4136_s1 + $0x238] sm:$0xff]  }
  0x57   : > { %2966 = vmatpush3.bf16.msra.mxu0 %v3283_v30  ;;  %2953 = vmatprep.mubr.bf16.mxu0 %v3833_v1  ;;  %v3897_v62 = vcombine.low %v1557_v33, %v1560_v39  ;;  %v3297_v30 = vld [vmem:[%s4136_s1 + $0x1b8] sm:$0xff]  }
  0x58   : > { %2840 = vmatpush3.bf16.msra.mxu1 %v3284_v0  ;;  %2967 = vmatprep.subr.bf16.mxu0 %v3285_v37  ;;  %v3302_v0 = vld [vmem:[%s4136_s1 + $0xd0] sm:$0xff]  }
  0x59   : > { %2841 = vmatprep.subr.bf16.mxu1 %v3288_v46 }
  0x5b   : > { %2826 = vmatmul.mubr.bf16.gmra.mrb[8].mxu1 %v3841_v21  ;;  %2968 = vmatpush3.bf16.msra.mxu0 %v3285_v37  ;;  %v3311_v37 = vld [vmem:[%s4136_s1 + $0xf0] sm:$0xff]  }
  0x5c   : > { %2842 = vmatpush3.bf16.msra.mxu1 %v3288_v46  ;;  %2829 = vmatprep.mubr.bf16.mxu1 %v3848_v24  ;;  %v3956_v46 = vld [vmem:[%s3458_s28 + $0x6c] sm:$0xf] }
  0x5d   : > { %2843 = vmatprep.subr.bf16.mxu1 %v3290_v61  ;;  %2969 = vmatprep.subr.bf16.mxu0 %v3289_v18  ;;  %v2593_v51 = vcombine.low %v3956_v46, %v3959_v12  ;;  %v1929_v27 = vshll.u32 %v3956_v46, 16  ;;  %v2611_v36 = vrot.slane %v3956_v46, 9 }
  0x5e   : > { %2954 = vmatmul.mubr.bf16.gmra.mrb[8].mxu0 %v3867_v19 }
  0x5f   : > { %2970 = vmatpush3.bf16.msra.mxu0 %v3289_v18  ;;  %2957 = vmatprep.mubr.bf16.mxu0 %v3874_v28  ;;  %v1931_v63 = vrot.slane %v1929_v27, 5 }
  0x60   : > { %2844 = vmatpush3.bf16.msra.mxu1 %v3290_v61  ;;  %2971 = vmatprep.subr.bf16.mxu0 %v3291_v38  ;;  %v3320_v61 = vld [vmem:[%s4136_s1 + $0x220] sm:$0xff]  }
  0x61   : > { %2845 = vmatprep.subr.bf16.mxu1 %v3294_v22 }
  0x63   : > { %2830 = vmatmul.mubr.bf16.gmra.mrb[12].mxu1 %v3882_v42  ;;  %2972 = vmatpush3.bf16.msra.mxu0 %v3291_v38  ;;  %v1947_v38 = vrot.slane %v1945_v26, 5 }
  0x64   : > { %2846 = vmatpush3.bf16.msra.mxu1 %v3294_v22  ;;  %2849 = vmatprep.mubr.bf16.mxu1 %v2549_v40  ;;  %v1939_v40 = vshrl.u32 %v3959_v12, 16  ;;  %v2136_v22 = vrot.slane %v291_v41, 5  ;;  %v2353_v41 = vld [vmem:[%s4053_s16 + $0x58] sm:$0xff] }
  0x65   : > { %2847 = vmatprep.subr.bf16.mxu1 %v3296_v17  ;;  %2973 = vmatprep.subr.bf16.mxu0 %v3295_v57 }
  0x66   : > { %2958 = vmatmul.mubr.bf16.gmra.mrb[12].mxu0 %v3897_v62 }
  0x67   : > { %2974 = vmatpush3.bf16.msra.mxu0 %v3295_v57  ;;  %2977 = vmatprep.mubr.bf16.mxu0 %v3760_v5 }
  0x68   : > { %2848 = vmatpush3.bf16.msra.mxu1 %v3296_v17  ;;  %2975 = vmatprep.subr.bf16.mxu0 %v3297_v30 }
  0x69   : > { %2865 = vmatprep.subr.bf16.mxu1 %v3298_v47 }
  0x6b   : > { %2850 = vmatmul.mubr.bf16.vlgmr.msra.gmra.mrb[0].mxu1 %v3740_v56  ;;  %2976 = vmatpush3.bf16.msra.mxu0 %v3297_v30  ;;  %v3304_v56 = vld [vmem:[%s4136_s1 + $0xd8] sm:$0xff]  }
  0x6c   : > { %2866 = vmatpush3.bf16.msra.mxu1 %v3298_v47  ;;  %2853 = vmatprep.mubr.bf16.mxu1 %v3777_v16 }
  0x6d   : > { %2867 = vmatprep.subr.bf16.mxu1 %v3300_v50  ;;  %2993 = vmatprep.subr.bf16.mxu0 %v3299_v7 }
  0x6e   : > { %2978 = vmatmul.mubr.bf16.vlgmr.msra.gmra.mrb[0].mxu0 %v3794_v45 }
  0x6f   : > { %2994 = vmatpush3.bf16.msra.mxu0 %v3299_v7  ;;  %2981 = vmatprep.mubr.bf16.mxu0 %v3802_v49 }
  0x70   : > { %2868 = vmatpush3.bf16.msra.mxu1 %v3300_v50  ;;  %2995 = vmatprep.subr.bf16.mxu0 %v3301_v8 }
  0x71   : > { %2869 = vmatprep.subr.bf16.mxu1 %v3302_v0 }
  0x73   : > { %2854 = vmatmul.mubr.bf16.gmra.mrb[4].mxu1 %v3784_v32  ;;  %2996 = vmatpush3.bf16.msra.mxu0 %v3301_v8 }
  0x74   : > { %2870 = vmatpush3.bf16.msra.mxu1 %v3302_v0  ;;  %2857 = vmatprep.mubr.bf16.mxu1 %v3823_v58 }
  0x75   : > { %2871 = vmatprep.subr.bf16.mxu1 %v3304_v56  ;;  %2997 = vmatprep.subr.bf16.mxu0 %v3303_v23 }
  0x76   : > { %2982 = vmatmul.mubr.bf16.gmra.mrb[4].mxu0 %v3841_v21 }
  0x77   : > { %2998 = vmatpush3.bf16.msra.mxu0 %v3303_v23  ;;  %2985 = vmatprep.mubr.bf16.mxu0 %v3848_v24 }
  0x78   : > { %2872 = vmatpush3.bf16.msra.mxu1 %v3304_v56  ;;  %2999 = vmatprep.subr.bf16.mxu0 %v3305_v14 }
  0x79   : > { %2873 = vmatprep.subr.bf16.mxu1 %v3306_v29 }
  0x7b   : > { %2858 = vmatmul.mubr.bf16.gmra.mrb[8].mxu1 %v3833_v1  ;;  %3000 = vmatpush3.bf16.msra.mxu0 %v3305_v14 }
  0x7c   : > { %2874 = vmatpush3.bf16.msra.mxu1 %v3306_v29  ;;  %2861 = vmatprep.mubr.bf16.mxu1 %v3867_v19 }
  0x7d   : > { %2875 = vmatprep.subr.bf16.mxu1 %v3308_v52  ;;  %3001 = vmatprep.subr.bf16.mxu0 %v3307_v53 }
  0x7e   : > { %2986 = vmatmul.mubr.bf16.gmra.mrb[8].mxu0 %v3882_v42 }
  0x7f   : > { %3002 = vmatpush3.bf16.msra.mxu0 %v3307_v53  ;;  %2989 = vmatprep.mubr.bf16.mxu0 %v3732_v25 }
  0x80   : > { %2876 = vmatpush3.bf16.msra.mxu1 %v3308_v52  ;;  %3003 = vmatprep.subr.bf16.mxu0 %v3309_v54 }
  0x81   : > { %2877 = vmatprep.subr.bf16.mxu1 %v3311_v37 }
  0x83   : > { %2862 = vmatmul.mubr.bf16.gmra.mrb[12].mxu1 %v3874_v28  ;;  %3004 = vmatpush3.bf16.msra.mxu0 %v3309_v54 }
  0x84   : > { %2878 = vmatpush3.bf16.msra.mxu1 %v3311_v37  ;;  %2881 = vmatprep.mubr.bf16.mxu1 %v3755_v2  ;;  %v3317_v2 = vld [vmem:[%s4136_s1 + $0x208] sm:$0xff]  }
  0x85   : > { %2879 = vmatprep.subr.bf16.mxu1 %v3314_v35  ;;  %3005 = vmatprep.subr.bf16.mxu0 %v3313_v13 }
  0x86   : > { %2990 = vmatmul.mubr.bf16.gmra.mrb[12].mxu0 %v2593_v51 }
  0x87   : > { %3006 = vmatpush3.bf16.msra.mxu0 %v3313_v13  ;;  %3009 = vmatprep.mubr.bf16.mxu0 %v3575_v43  ;;  %v1926_v43 = vshrl.u32 %v3956_v46, 16 }
  0x88   : > { %2880 = vmatpush3.bf16.msra.mxu1 %v3314_v35  ;;  %3007 = vmatprep.subr.bf16.mxu0 %v3315_v55 }
  0x89   : > { %3057 = vmatprep.subr.bf16.mxu1 %v3316_v6 }
  0x8b   : > { %2882 = vmatmul.mubr.bf16.vlgmr.msra.gmra.mrb[0].mxu1 %v3760_v5  ;;  %3008 = vmatpush3.bf16.msra.mxu0 %v3315_v55  ;;  %v3319_v5 = vld [vmem:[%s4136_s1 + $0x218] sm:$0xff]  }
  0x8c   : > { %3065 = vmatpush3.bf16.msra.mxu1 %v3316_v6  ;;  %2885 = vmatprep.mubr.bf16.mxu1 %v3794_v45  ;;  %v1935_v45 = vshll.u32 %v3959_v12, 16 }
  0x8d   : > { %3058 = vmatprep.subr.bf16.mxu1 %v3317_v2  ;;  %3025 = vmatprep.subr.bf16.mxu0 %v3316_v6 }
  0x8e   : > { %3010 = vmatmul.mubr.bf16.vlgmr.msra.gmra.mrb[0].mxu0 %v3603_v3  ;;  %v1928_v3 = vrot.slane %v1926_v43, 4  ;;  %v1937_v60 = vrot.slane %v1935_v45, 5 }
  0x8f   : > { %3026 = vmatpush3.bf16.msra.mxu0 %v3316_v6  ;;  %3013 = vmatprep.mubr.bf16.mxu0 %v3636_v44  ;;  %v1941_v44 = vrot.slane %v1939_v40, 4  ;;  %v4058_v6 = vld [vmem:[%s4137_s2] ss:$0 sm:$0xff]  ;;  %v2352_v40 = vld [vmem:[%s4053_s16 + $0x50] sm:$0xff] }
  0x90   : > { %3066 = vmatpush3.bf16.msra.mxu1 %v3317_v2  ;;  %3027 = vmatprep.subr.bf16.mxu0 %v3317_v2 }
  0x91   : > { %3059 = vmatprep.subr.bf16.mxu1 %v3318_v9  ;;  %v1942_v18 = vor.u32 %v1941_v44, %v1937_v60 }
  0x93   : > { %2886 = vmatmul.mubr.bf16.gmra.mrb[4].mxu1 %v3802_v49  ;;  %3028 = vmatpush3.bf16.msra.mxu0 %v3317_v2  ;;  %v3321_v49 = vld [vmem:[%s4136_s1 + $0x228] sm:$0xff]   ;;  %v1943_v15 = vrot.slane %v1942_v18, 4 }
  0x94   : > { %3067 = vmatpush3.bf16.msra.mxu1 %v3318_v9  ;;  %2889 = vmatprep.mubr.bf16.mxu1 %v3841_v21  ;;  %v1932_v21 = vor.u32 %v1931_v63, %v1928_v3  ;;  %v2350_v63 = vld [vmem:[%s4053_s16 + $0x40] sm:$0xff] }
  0x95   : > { %3060 = vmatprep.subr.bf16.mxu1 %v3319_v5  ;;  %3029 = vmatprep.subr.bf16.mxu0 %v3318_v9  ;;  %v1948_v20 = vsel %vm3504_vm2, %v1943_v15, %v1947_v38 }
  0x96   : > { %3014 = vmatmul.mubr.bf16.gmra.mrb[4].mxu0 %v3664_v11  ;;  %v1933_v11 = vrot.slane %v1932_v21, 4 }
  0x97   : > { %3030 = vmatpush3.bf16.msra.mxu0 %v3318_v9  ;;  %3017 = vmatprep.mubr.bf16.mxu0 %v3690_v48  ;;  %v3322_v48 = vld [vmem:[%s4136_s1 + $0x230] sm:$0xff]  }
  0x98   : > { %3068 = vmatpush3.bf16.msra.mxu1 %v3319_v5  ;;  %3031 = vmatprep.subr.bf16.mxu0 %v3319_v5 }
  0x99   : > { %3061 = vmatprep.subr.bf16.mxu1 %v3320_v61 }
  0x9b   : > { %2890 = vmatmul.mubr.bf16.gmra.mrb[8].mxu1 %v3848_v24  ;;  %3032 = vmatpush3.bf16.msra.mxu0 %v3319_v5  ;;  %v1938_v24 = vsel %vm3504_vm2, %v1933_v11, %v1937_v60  ;;  %v2351_v11 = vld [vmem:[%s4053_s16 + $0x48] sm:$0xff] }
  0x9c   : > { %3069 = vmatpush3.bf16.msra.mxu1 %v3320_v61  ;;  %2893 = vmatprep.mubr.bf16.mxu1 %v3882_v42  ;;  %v2602_v4 = vcombine.low %v1938_v24, %v1948_v20  ;;  %v2344_v20 = vld [vmem:[%s4053_s16 + $0x10] sm:$0xff] }
  0x9d   : > { %3062 = vmatprep.subr.bf16.mxu1 %v3321_v49  ;;  %3033 = vmatprep.subr.bf16.mxu0 %v3320_v61 }
  0x9e   : > { %3018 = vmatmul.mubr.bf16.gmra.mrb[8].mxu0 %v3714_v31  ;;  %v2133_v31 = vrot.slane %v3959_v12, 5 }
  0x9f   : > { %3034 = vmatpush3.bf16.msra.mxu0 %v3320_v61  ;;  %3021 = vmatprep.mubr.bf16.mxu0 %v3743_v59 }
  0xa0   : > { %3070 = vmatpush3.bf16.msra.mxu1 %v3321_v49  ;;  %3035 = vmatprep.subr.bf16.mxu0 %v3321_v49  ;;  %v2135_v59 = vrot.slane %v2133_v31, 4 }
  0xa1   : > { %3063 = vmatprep.subr.bf16.mxu1 %v3322_v48 }
  0xa3   : > { %2894 = vmatmul.mubr.bf16.gmra.mrb[12].mxu1 %v3732_v25  ;;  %3036 = vmatpush3.bf16.msra.mxu0 %v3321_v49  ;;  %v2134_v25 = vsel %vm3705_vm5, %v2611_v36, %v2133_v31 }
  0xa4   : > { %3071 = vmatpush3.bf16.msra.mxu1 %v3322_v48  ;;  %3049 = vmatprep.mubr.bf16.mxu1 %v3867_v19  ;;  %v2137_v19 = vsel %vm3705_vm5, %v2135_v59, %v2136_v22  ;;  %v2342_v59 = vld [vmem:[%s4053_s16] sm:$0xff] }
  0xa5   : > { %3064 = vmatprep.subr.bf16.mxu1 %v3323_v34  ;;  %3037 = vmatprep.subr.bf16.mxu0 %v3322_v48  ;;  %v2612_v42 = vcombine.low %v2134_v25, %v2137_v19 }
  0xa6   : > { %3022 = vmatmul.mubr.bf16.gmra.mrb[12].mxu0 %v2602_v4 }
  0xa7   : > { %3038 = vmatpush3.bf16.msra.mxu0 %v3322_v48  ;;  %3041 = vmatprep.mubr.bf16.mxu0 %v3777_v16 }
  0xa8   : > { %3072 = vmatpush3.bf16.msra.mxu1 %v3323_v34  ;;  %3039 = vmatprep.subr.bf16.mxu0 %v3323_v34 }
  0xab   : > { %3050 = vmatmul.mubr.bf16.vlgmr.msra.gmra.mrb[16].mxu1 %v3874_v28  ;;  %3040 = vmatpush3.bf16.msra.mxu0 %v3323_v34 }
  0xac   : > { %3053 = vmatprep.mubr.bf16.mxu1 %v3897_v62 }
  0xae   : > { %3042 = vmatmul.mubr.bf16.vlgmr.msra.gmra.mrb[0].mxu0 %v3784_v32 }
  0xaf   : > { %3045 = vmatprep.mubr.bf16.mxu0 %v3823_v58 }
  0xb3   : > { %3054 = vmatmul.mubr.bf16.gmra.mrb[20].mxu1 %v2612_v42 }
  0xb6   : > { %3046 = vmatmul.mubr.bf16.gmra.mrb[4].mxu0 %v3833_v1 }
 0x15e   : > { %v2883_v16 = vpop.f32.mrb[0].mxu1 }
 0x15f   : > { %v4034_v28 = vpop.f32.mrb[1].mxu1 }
 0x160   : > { %v4036_v33 = vpop.f32.mrb[2].mxu1 }
 0x161   : > { %v4038_v39 = vpop.f32.mrb[3].mxu1 }
 0x166   : > { %v4040_v10 = vpop.f32.mrb[4].mxu1 }
 0x167   : > { %v4042_v17 = vpop.f32.mrb[5].mxu1 }
 0x168   : > { %v4044_v57 = vpop.f32.mrb[6].mxu1 }
 0x169   : > { %v4046_v32 = vpop.f32.mrb[7].mxu1 }
 0x16e   : > { %v2891_v58 = vpop.f32.mrb[8].mxu1 }
 0x16f   : > { %v1301_v62 = vpop.f32.mrb[9].mxu1 }
 0x170   : > { %v2892_v1 = vpop.f32.mrb[10].mxu1 }
 0x171   : > { %v1304_v30 = vpop.f32.mrb[11].mxu1  ;;  %v3019_v47 = vpop.f32.mrb[8].mxu0 }
 0x172   : > { %v3081_v50 = vadd.f32 %v3019_v47, %v2891_v58  ;;  %v2083_v7 = vpop.f32.mrb[9].mxu0  ;;  %v2345_v58 = vld [vmem:[%s4053_s16 + $0x18] sm:$0xff] }
 0x173   : > { %v3083_v8 = vadd.f32 %v2083_v7, %v1301_v62  ;;  %v3020_v0 = vpop.f32.mrb[10].mxu0 }
 0x174   : > { %v3085_v56 = vadd.f32 %v3020_v0, %v2892_v1  ;;  %v2086_v23 = vpop.f32.mrb[11].mxu0 }
 0x175   : > { %v3087_v29 = vadd.f32 %v2086_v23, %v1304_v30  ;;  %v2354_v23 = vld [vmem:[%s4053_s16 + $0x60] sm:$0xff] }
 0x176   : > { %v2895_v14 = vpop.f32.mrb[12].mxu1 }
 0x177   : > { %v1317_v52 = vpop.f32.mrb[13].mxu1 }
 0x178   : > { %v2896_v53 = vpop.f32.mrb[14].mxu1 }
 0x179   : > { %v1320_v54 = vpop.f32.mrb[15].mxu1  ;;  %v3023_v37 = vpop.f32.mrb[12].mxu0 }
 0x17a   : > { %v3089_v46 = vadd.f32 %v3023_v37, %v2895_v14  ;;  %v2099_v12 = vpop.f32.mrb[13].mxu0 }
 0x17b   : > { %v3091_v35 = vadd.f32 %v2099_v12, %v1317_v52  ;;  %v3024_v13 = vpop.f32.mrb[14].mxu0 }
 0x17c   : > { %v3093_v51 = vadd.f32 %v3024_v13, %v2896_v53  ;;  %v2102_v55 = vpop.f32.mrb[15].mxu0 }
 0x17d   : > { %v3095_v9 = vadd.f32 %v2102_v55, %v1320_v54  ;;  %v2357_v54 = vld [vmem:[%s4053_s16 + $0x78] sm:$0xff]  ;;  %v2355_v55 = vld [vmem:[%s4053_s16 + $0x68] sm:$0xff] }
 0x17e   : > { %v3051_v2 = vpop.f32.mrb[16].mxu1 }
 0x17f   : > { %v3082_v43 = vadd.f32 %v3081_v50, %v3051_v2  ;;  %v2272_v27 = vpop.f32.mrb[17].mxu1  ;;  %v2343_v50 = vld [vmem:[%s4053_s16 + $0x8] sm:$0xff] }
 0x180   : > { %v3084_v5 = vadd.f32 %v3083_v8, %v2272_v27  ;;  %v3052_v45 = vpop.f32.mrb[18].mxu1 }
 0x181   : > { %v2336_v3 = vadd.f32 %v3082_v43, %v4058_v6  ;;  %v3086_v60 = vadd.f32 %v3085_v56, %v3052_v45  ;;  %v2275_v44 = vpop.f32.mrb[19].mxu1  ;;  %v3043_v21 = vpop.f32.mrb[0].mxu0 }
 0x182   : > { %v2334_v61 = vadd.f32 %v3084_v5, %v4058_v6  ;;  %v3088_v49 = vadd.f32 %v3087_v29, %v2275_v44  ;;  %v3073_v15 = vadd.f32 %v3043_v21, %v2883_v16  ;;  %v2240_v38 = vpop.f32.mrb[1].mxu0 }
 0x183   : > { %v2368_v18 = vadd.f32 %v2352_v40, %v2336_v3  ;;  %v2337_v26 = vadd.f32 %v3086_v60, %v4058_v6  ;;  %v3074_v34 = vadd.f32 %v2240_v38, %v4034_v28  ;;  %v3044_v4 = vpop.f32.mrb[2].mxu0 }
 0x184   : > { %v2366_v48 = vadd.f32 %v2350_v63, %v2334_v61  ;;  %v2335_v24 = vadd.f32 %v3088_v49, %v4058_v6  ;;  %v2328_v36 = vadd.f32 %v3073_v15, %v4058_v6  ;;  %v3075_v22 = vadd.f32 %v3044_v4, %v4036_v33  ;;  %v2243_v25 = vpop.f32.mrb[3].mxu0  ;;  %v2356_v33 = vld [vmem:[%s4053_s16 + $0x70] sm:$0xff]  ;;  %v2346_v63 = vld [vmem:[%s4053_s16 + $0x20] sm:$0xff] }
 0x185   : > { %2384 = vst [vmem:[%s4066_s9 + $0x50] sm:$0xff] %v2368_v18  ;;  %v2369_v31 = vadd.f32 %v2353_v41, %v2337_v26  ;;  %v2326_v16 = vadd.f32 %v3074_v34, %v4058_v6  ;;  %v3076_v28 = vadd.f32 %v2243_v25, %v4038_v39  ;;  %v2349_v41 = vld [vmem:[%s4053_s16 + $0x38] sm:$0xff]  ;;  %v2347_v18 = vld [vmem:[%s4053_s16 + $0x28] sm:$0xff] }
 0x186   : > { %2382 = vst [vmem:[%s4066_s9 + $0x40] sm:$0xff] %v2366_v48  ;;  %v2367_v19 = vadd.f32 %v2351_v11, %v2335_v24  ;;  %v3055_v42 = vpop.f32.mrb[20].mxu1  ;;  %v2360_v30 = vadd.f32 %v2344_v20, %v2328_v36  ;;  %v2329_v47 = vadd.f32 %v3075_v22, %v4058_v6 }
 0x187   : > { %2385 = vst [vmem:[%s4066_s9 + $0x58] sm:$0xff] %v2369_v31  ;;  %v3090_v62 = vadd.f32 %v3089_v46, %v3055_v42  ;;  %v2288_v1 = vpop.f32.mrb[21].mxu1  ;;  %v2358_v0 = vadd.f32 %v2342_v59, %v2326_v16  ;;  %v2327_v56 = vadd.f32 %v3076_v28, %v4058_v6 }
 0x188   : > { %2383 = vst [vmem:[%s4066_s9 + $0x48] sm:$0xff] %v2367_v19  ;;  %v3092_v7 = vadd.f32 %v3091_v35, %v2288_v1  ;;  %v3056_v8 = vpop.f32.mrb[22].mxu1  ;;  %2376 = vst [vmem:[%s4066_s9 + $0x10] sm:$0xff] %v2360_v30  ;;  %v2361_v52 = vadd.f32 %v2345_v58, %v2329_v47 }
 0x189   : > { %v2340_v39 = vadd.f32 %v3090_v62, %v4058_v6  ;;  %v3094_v14 = vadd.f32 %v3093_v51, %v3056_v8  ;;  %v2291_v29 = vpop.f32.mrb[23].mxu1  ;;  %2374 = vst [vmem:[%s4066_s9] sm:$0xff] %v2358_v0  ;;  %v2359_v46 = vadd.f32 %v2343_v50, %v2327_v56  ;;  %v3047_v12 = vpop.f32.mrb[4].mxu0 }
 0x18a   : > { %v2338_v53 = vadd.f32 %v3092_v7, %v4058_v6  ;;  %v3096_v37 = vadd.f32 %v3095_v9, %v2291_v29  ;;  %2377 = vst [vmem:[%s4066_s9 + $0x18] sm:$0xff] %v2361_v52  ;;  %v3077_v51 = vadd.f32 %v3047_v12, %v4040_v10  ;;  %v2256_v2 = vpop.f32.mrb[5].mxu0  ;;  %v2348_v9 = vld [vmem:[%s4053_s16 + $0x30] sm:$0xff] }
 0x18b   : > { %v2372_v35 = vadd.f32 %v2356_v33, %v2340_v39  ;;  %v2341_v13 = vadd.f32 %v3094_v14, %v4058_v6  ;;  %2375 = vst [vmem:[%s4066_s9 + $0x8] sm:$0xff] %v2359_v46  ;;  %v3078_v40 = vadd.f32 %v2256_v2, %v4042_v17  ;;  %v3048_v5 = vpop.f32.mrb[6].mxu0 }
 0x18c   : > { %v2370_v43 = vadd.f32 %v2354_v23, %v2338_v53  ;;  %v2339_v27 = vadd.f32 %v3096_v37, %v4058_v6  ;;  %v2332_v3 = vadd.f32 %v3077_v51, %v4058_v6  ;;  %v3079_v10 = vadd.f32 %v3048_v5, %v4044_v57  ;;  %v2259_v60 = vpop.f32.mrb[7].mxu0 }
 0x18d   : > { %2388 = vst [vmem:[%s4066_s9 + $0x70] sm:$0xff] %v2372_v35  ;;  %v2373_v45 = vadd.f32 %v2357_v54, %v2341_v13  ;;  %v2330_v61 = vadd.f32 %v3078_v40, %v4058_v6  ;;  %v3080_v17 = vadd.f32 %v2259_v60, %v4046_v32 }
 0x18e   : > { %2386 = vst [vmem:[%s4066_s9 + $0x60] sm:$0xff] %v2370_v43  ;;  %v2371_v44 = vadd.f32 %v2355_v55, %v2339_v27  ;;  %v2364_v49 = vadd.f32 %v2348_v9, %v2332_v3  ;;  %v2333_v21 = vadd.f32 %v3079_v10, %v4058_v6 }
 0x18f   : > { %2389 = vst [vmem:[%s4066_s9 + $0x78] sm:$0xff] %v2373_v45  ;;  %v2362_v26 = vadd.f32 %v2346_v63, %v2330_v61  ;;  %v2331_v11 = vadd.f32 %v3080_v17, %v4058_v6 }
 0x190   : > { %2387 = vst [vmem:[%s4066_s9 + $0x68] sm:$0xff] %v2371_v44  ;;  %2380 = vst [vmem:[%s4066_s9 + $0x30] sm:$0xff] %v2364_v49  ;;  %v2365_v57 = vadd.f32 %v2349_v41, %v2333_v21 }
 0x191   : > { %2378 = vst [vmem:[%s4066_s9 + $0x20] sm:$0xff] %v2362_v26  ;;  %v2363_v15 = vadd.f32 %v2347_v18, %v2331_v11 }
 0x192   : > { %2381 = vst [vmem:[%s4066_s9 + $0x38] sm:$0xff] %v2365_v57 }
 0x193   : > { %2379 = vst [vmem:[%s4066_s9 + $0x28] sm:$0xff] %v2363_v15 }
 0x194 PF: > { %s14_s19 = sadd.s32 1, %s3362_s19   ;;  %s4144_s15 = smov %s3354_s17 }
 0x195   : > { %p11_p7 = scmp.ge.s32.totalorder %s14_s19, 6   ;;  %s4145_s16 = smov %s3358_s18 }
 0x196   : > { %s4146_s17 = smov %s4149_s20  ;;  %s4147_s18 = smov %s4153_s21 }
 0x197   :  { %13 = sbr.rel (!%p11_p7) target bundleno = 3 (0x3), region = 70 }

</bundles_post_ra>
